<compile_context>
chip_gen: v6e
topology: v6e:2x2x1
jax: 0.10.0
libtpu: 0.0.40
codegen_flags: <defaults>
</compile_context>

<pallas_src>
import functools

import jax
import jax.numpy as jnp
from jax.experimental import pallas as pl
from jax.experimental.pallas import tpu as pltpu

NEG_SLOPE = 0.01  # F.leaky_relu default negative_slope
NUM_CLASSES = 34
NUM_FTRS = 800 * 64
LANE = 128


def _leaky(y):
    return jnp.where(y > 0, y, NEG_SLOPE * y)


# ---------------------------------------------------------------------------
# Layer 1: big streaming matmul.  Accumulate directly into the resident
# f32 output block; bias + leaky_relu fused into the last K step.
# ---------------------------------------------------------------------------
def _linear_leaky_kernel(x_ref, w_ref, b_ref, o_ref):
    k = pl.program_id(1)

    x = x_ref[...]
    w = w_ref[...]
    if w.dtype != jnp.float32:
        # Native low-precision MXU path (e.g. bf16 x bf16 -> f32 accumulate).
        x = x.astype(w.dtype)
    partial = jnp.dot(x, w, preferred_element_type=jnp.float32)

    @pl.when(k == 0)
    def _():
        o_ref[...] = partial  # first K step: write, no zero-fill + RMW

    @pl.when(k > 0)
    def _():
        o_ref[...] += partial

    @pl.when(k == pl.num_programs(1) - 1)
    def _():
        o_ref[...] = _leaky(o_ref[...] + b_ref[...]).astype(o_ref.dtype)


def linear_leaky_stream(x, w, b_row, *, tk=6400, tn=512):
    """leaky_relu(x @ w + b) for a large, HBM-resident w of shape (K, N).

    `w` may be f32 (exact) or bf16 (half the HBM traffic); accumulation is
    always f32.  `b_row` must already be shaped (1, N).
    """
    B, K = x.shape
    Kw, N = w.shape
    assert K == Kw
    assert b_row.shape == (1, N)
    tk = min(tk, K)
    tn = min(tn, N)
    assert K % tk == 0 and N % tn == 0 and tn % LANE == 0 and tk % LANE == 0

    w_bytes = jnp.dtype(w.dtype).itemsize
    cost = pl.CostEstimate(
        flops=2 * B * K * N,
        transcendentals=0,
        bytes_accessed=4 * B * K + w_bytes * K * N + 4 * N + 4 * B * N,
    )

    return pl.pallas_call(
        _linear_leaky_kernel,
        out_shape=jax.ShapeDtypeStruct((B, N), jnp.float32),
        grid_spec=pltpu.PrefetchScalarGridSpec(
            num_scalar_prefetch=0,
            grid=(N // tn, K // tk),
            in_specs=[
                pl.BlockSpec((B, tk), lambda j, k: (0, k)),
                pl.BlockSpec((tk, tn), lambda j, k: (k, j)),
                pl.BlockSpec((1, tn), lambda j, k: (0, j)),
            ],
            out_specs=pl.BlockSpec((B, tn), lambda j, k: (0, j)),
        ),
        compiler_params=pltpu.CompilerParams(
            dimension_semantics=("parallel", "arbitrary"),
            vmem_limit_bytes=48 * 1024 * 1024,
        ),
        cost_estimate=cost,
    )(x, w, b_row)


# ---------------------------------------------------------------------------
# Layers 2 + 3 fused: both weight matrices fit trivially in VMEM, so one
# grid-less pallas_call computes leaky(leaky(h @ W2 + b2) @ W3 + b3).
# W3 / b3 are pre-padded to 128 output lanes at parameter-prep time.
# ---------------------------------------------------------------------------
def _mlp_tail_kernel(h_ref, w2_ref, b2_ref, w3_ref, b3_ref, o_ref):
    h2 = _leaky(
        jnp.dot(h_ref[...], w2_ref[...], preferred_element_type=jnp.float32)
        + b2_ref[...]
    )
    h3 = _leaky(
        jnp.dot(h2, w3_ref[...], preferred_element_type=jnp.float32)
        + b3_ref[...]
    )
    o_ref[...] = h3.astype(o_ref.dtype)


def mlp_tail(h, w2, b2_row, w3_pad, b3_pad_row):
    B = h.shape[0]
    Np = w3_pad.shape[1]
    return pl.pallas_call(
        _mlp_tail_kernel,
        out_shape=jax.ShapeDtypeStruct((B, Np), jnp.float32),
        compiler_params=pltpu.CompilerParams(vmem_limit_bytes=8 * 1024 * 1024),
    )(h, w2, b2_row, w3_pad, b3_pad_row)


# ---------------------------------------------------------------------------
# Parameters + forward
# ---------------------------------------------------------------------------
def init_params(key):
    """Deterministic PyTorch-like (uniform +-1/sqrt(fan_in)) init.

    Returns raw [(w, b), ...] with weights stored as (in_features, out)."""
    dims = [(NUM_FTRS, 1024), (1024, 128), (128, NUM_CLASSES)]
    params = []
    for fan_in, fan_out in dims:
        key, kw, kb = jax.random.split(key, 3)
        bound = 1.0 / jnp.sqrt(jnp.float32(fan_in))
        w = jax.random.uniform(kw, (fan_in, fan_out), jnp.float32, -bound, bound)
        b = jax.random.uniform(kb, (fan_out,), jnp.float32, -bound, bound)
        params.append((w, b))
    return params


def prepare_params(raw_params, w1_dtype=jnp.float32):
    """One-time layout prep (outside the hot path):
      * W1 optionally cast to a narrower streaming dtype (bf16 ~2x speedup).
      * biases reshaped to (1, N).
      * W3 / b3 zero-padded to 128 output lanes (lane-dense tail output)."""
    (w1, b1), (w2, b2), (w3, b3) = raw_params
    n_pad = (-NUM_CLASSES) % LANE  # 34 -> 128
    return {
        "w1": w1.astype(w1_dtype),
        "b1": b1.reshape(1, -1),
        "w2": w2,
        "b2": b2.reshape(1, -1),
        "w3": jnp.pad(w3, ((0, 0), (0, n_pad))),
        "b3": jnp.pad(b3, ((0, n_pad),)).reshape(1, -1),
    }


@jax.jit
def net_forward(x, kp):
    # x.view(x.size(0), -1)
    xb = x.reshape(x.shape[0], -1)
    h1 = linear_leaky_stream(xb, kp["w1"], kp["b1"], tk=6400, tn=512)  # (B, 1024)
    out_pad = mlp_tail(h1, kp["w2"], kp["b2"], kp["w3"], kp["b3"])     # (B, 128)
    return out_pad[:, :NUM_CLASSES]                                    # (B, 34)


if __name__ == "__main__":
    key = jax.random.PRNGKey(0)
    k_in, k_par = jax.random.split(key)

    # Input consistent with num_ftrs = 800 * 64 (e.g. a spectrogram), batch=2.
    x = jax.random.normal(k_in, (2, 800, 64), dtype=jnp.float32)
    raw_params = init_params(k_par)

    # Pure-JAX reference (optionally with bf16 layer-1 weights).
    def ref(x, raw, w1_dtype=jnp.float32):
        h = x.reshape(x.shape[0], -1)
        for i, (w, b) in enumerate(raw):
            if i == 0 and w1_dtype != jnp.float32:
                h = jnp.dot(
                    h.astype(w1_dtype), w.astype(w1_dtype),
                    preferred_element_type=jnp.float32,
                ) + b
            else:
                h = h @ w + b
            h = jnp.where(h > 0, h, NEG_SLOPE * h)
        return h

    # --- Exact-semantics path: f32 weight streaming (matches PyTorch). ---
    kp_f32 = prepare_params(raw_params, w1_dtype=jnp.float32)
    out = jax.block_until_ready(net_forward(x, kp_f32))
    assert out.shape == (2, 34), out.shape
    ref32 = ref(x, raw_params, jnp.float32)
    assert jnp.allclose(out, ref32, atol=1e-4, rtol=1e-4), float(
        jnp.max(jnp.abs(out - ref32))
    )

    # --- High-performance path: bf16 W1 streaming (~2x, bandwidth-bound). ---
    kp_bf16 = prepare_params(raw_params, w1_dtype=jnp.bfloat16)
    out_bf16 = jax.block_until_ready(net_forward(x, kp_bf16))
    ref_bf16 = ref(x, raw_params, jnp.bfloat16)
    assert jnp.allclose(out_bf16, ref_bf16, atol=1e-2, rtol=1e-2), float(
        jnp.max(jnp.abs(out_bf16 - ref_bf16))
    )

    print("KERNEL_OK")
</pallas_src>

<mosaic_0001>
module attributes {stable_mosaic.version = 11 : i64} {
  func.func @_linear_leaky_kernel(%arg0: i32, %arg1: i32, %arg2: memref<2x6400xf32, #tpu.memory_space<vmem>>, %arg3: memref<6400x512xf32, #tpu.memory_space<vmem>>, %arg4: memref<1x512xf32, #tpu.memory_space<vmem>>, %arg5: memref<2x512xf32, #tpu.memory_space<vmem>>) attributes {dimension_semantics = [#tpu.dimension_semantics<parallel>, #tpu.dimension_semantics<arbitrary>], iteration_bounds = array<i64: 2, 8>, scalar_prefetch = 0 : i64, scratch_operands = 0 : i64, tpu.core_type = #tpu.core_type<tc>, window_params = [{transform_indices = @transform_0, window_bounds = array<i64: 2, 6400>}, {transform_indices = @transform_1, window_bounds = array<i64: 6400, 512>}, {transform_indices = @transform_2, window_bounds = array<i64: 1, 512>}, {transform_indices = @transform_3, window_bounds = array<i64: 2, 512>}]} {
    %c0 = arith.constant 0 : index
    %c0_0 = arith.constant 0 : index
    %0 = vector.load %arg2[%c0, %c0_0] : memref<2x6400xf32, #tpu.memory_space<vmem>>, vector<2x6400xf32>
    %c0_1 = arith.constant 0 : index
    %c0_2 = arith.constant 0 : index
    %1 = vector.load %arg3[%c0_1, %c0_2] : memref<6400x512xf32, #tpu.memory_space<vmem>>, vector<6400x512xf32>
    %cst = arith.constant dense<0.000000e+00> : vector<2x512xf32>
    %2 = tpu.matmul %0, %1, %cst {dimension_numbers = #tpu.dot_dimension_numbers<[1], [0], [0], [1], [0, 0, 1, 1], [], []>} : vector<2x6400xf32>, vector<6400x512xf32>, vector<2x512xf32> -> vector<2x512xf32>
    %c0_i32 = arith.constant 0 : i32
    %3 = arith.cmpi eq, %arg1, %c0_i32 : i32
    %4 = arith.extui %3 : i1 to i32
    %c0_i32_3 = arith.constant 0 : i32
    %5 = arith.cmpi ne, %4, %c0_i32_3 : i32
    scf.if %5 {
      %c0_7 = arith.constant 0 : index
      %c0_8 = arith.constant 0 : index
      %12 = vector.load %arg5[%c0_7, %c0_8] : memref<2x512xf32, #tpu.memory_space<vmem>>, vector<2x512xf32>
      tpu.vector_store %arg5[%c0_7, %c0_8], %2 {strides = array<i32>} : memref<2x512xf32, #tpu.memory_space<vmem>>, vector<2x512xf32>,
    } else {
    }
    %c0_i32_4 = arith.constant 0 : i32
    %6 = arith.cmpi sgt, %arg1, %c0_i32_4 : i32
    %7 = arith.extui %6 : i1 to i32
    %c0_i32_5 = arith.constant 0 : i32
    %8 = arith.cmpi ne, %7, %c0_i32_5 : i32
    scf.if %8 {
      %c0_7 = arith.constant 0 : index
      %c0_8 = arith.constant 0 : index
      %12 = vector.load %arg5[%c0_7, %c0_8] : memref<2x512xf32, #tpu.memory_space<vmem>>, vector<2x512xf32>
      %13 = arith.addf %12, %2 : vector<2x512xf32>
      %c0_9 = arith.constant 0 : index
      %c0_10 = arith.constant 0 : index
      %14 = vector.load %arg5[%c0_9, %c0_10] : memref<2x512xf32, #tpu.memory_space<vmem>>, vector<2x512xf32>
      tpu.vector_store %arg5[%c0_9, %c0_10], %13 {strides = array<i32>} : memref<2x512xf32, #tpu.memory_space<vmem>>, vector<2x512xf32>,
    } else {
    }
    %c7_i32 = arith.constant 7 : i32
    %9 = arith.cmpi eq, %arg1, %c7_i32 : i32
    %10 = arith.extui %9 : i1 to i32
    %c0_i32_6 = arith.constant 0 : i32
    %11 = arith.cmpi ne, %10, %c0_i32_6 : i32
    scf.if %11 {
      %c0_7 = arith.constant 0 : index
      %c0_8 = arith.constant 0 : index
      %12 = vector.load %arg5[%c0_7, %c0_8] : memref<2x512xf32, #tpu.memory_space<vmem>>, vector<2x512xf32>
      %c0_9 = arith.constant 0 : index
      %c0_10 = arith.constant 0 : index
      %13 = vector.load %arg4[%c0_9, %c0_10] : memref<1x512xf32, #tpu.memory_space<vmem>>, vector<1x512xf32>
      %14 = vector.broadcast %13 : vector<1x512xf32> to vector<2x512xf32>
      %15 = arith.addf %12, %14 : vector<2x512xf32>
      %cst_11 = arith.constant 0.000000e+00 : f32
      %16 = vector.broadcast %cst_11 : f32 to vector<2x512xf32>
      %17 = arith.cmpf ogt, %15, %16 : vector<2x512xf32>
      %cst_12 = arith.constant 0.00999999977 : f32
      %18 = vector.broadcast %cst_12 : f32 to vector<2x512xf32>
      %19 = arith.mulf %18, %15 : vector<2x512xf32>
      %20 = arith.select %17, %15, %19 : vector<2x512xi1>, vector<2x512xf32>
      %c0_13 = arith.constant 0 : index
      %c0_14 = arith.constant 0 : index
      %21 = vector.load %arg5[%c0_13, %c0_14] : memref<2x512xf32, #tpu.memory_space<vmem>>, vector<2x512xf32>
      tpu.vector_store %arg5[%c0_13, %c0_14], %20 {strides = array<i32>} : memref<2x512xf32, #tpu.memory_space<vmem>>, vector<2x512xf32>,
    } else {
    }
    return
  }
  func.func @transform_0(%arg0: i32, %arg1: i32) -> (i32, i32) {
    %c0_i32 = arith.constant 0 : i32
    %c0_i32_0 = arith.constant 0 : i32
    return %c0_i32, %arg1 : i32, i32
  }
  func.func @transform_1(%arg0: i32, %arg1: i32) -> (i32, i32) {
    %c0_i32 = arith.constant 0 : i32
    return %arg1, %arg0 : i32, i32
  }
  func.func @transform_2(%arg0: i32, %arg1: i32) -> (i32, i32) {
    %c0_i32 = arith.constant 0 : i32
    %c0_i32_0 = arith.constant 0 : i32
    return %c0_i32, %arg0 : i32, i32
  }
  func.func @transform_3(%arg0: i32, %arg1: i32) -> (i32, i32) {
    %c0_i32 = arith.constant 0 : i32
    %c0_i32_0 = arith.constant 0 : i32
    return %c0_i32, %arg0 : i32, i32
  }
}

module attributes {stable_mosaic.version = 11 : i64} {
  func.func @_mlp_tail_kernel(%arg0: memref<2x1024xf32, #tpu.memory_space<vmem>>, %arg1: memref<1024x128xf32, #tpu.memory_space<vmem>>, %arg2: memref<1x128xf32, #tpu.memory_space<vmem>>, %arg3: memref<128x128xf32, #tpu.memory_space<vmem>>, %arg4: memref<1x128xf32, #tpu.memory_space<vmem>>, %arg5: memref<2x128xf32, #tpu.memory_space<vmem>>) attributes {dimension_semantics = [], scalar_prefetch = 0 : i64, scratch_operands = 0 : i64, tpu.core_type = #tpu.core_type<tc>} {
    %c0 = arith.constant 0 : index
    %c0_0 = arith.constant 0 : index
    %0 = vector.load %arg0[%c0, %c0_0] : memref<2x1024xf32, #tpu.memory_space<vmem>>, vector<2x1024xf32>
    %c0_1 = arith.constant 0 : index
    %c0_2 = arith.constant 0 : index
    %1 = vector.load %arg1[%c0_1, %c0_2] : memref<1024x128xf32, #tpu.memory_space<vmem>>, vector<1024x128xf32>
    %cst = arith.constant dense<0.000000e+00> : vector<2x128xf32>
    %2 = tpu.matmul %0, %1, %cst {dimension_numbers = #tpu.dot_dimension_numbers<[1], [0], [0], [1], [0, 0, 1, 1], [], []>} : vector<2x1024xf32>, vector<1024x128xf32>, vector<2x128xf32> -> vector<2x128xf32>
    %c0_3 = arith.constant 0 : index
    %c0_4 = arith.constant 0 : index
    %3 = vector.load %arg2[%c0_3, %c0_4] : memref<1x128xf32, #tpu.memory_space<vmem>>, vector<1x128xf32>
    %4 = vector.broadcast %3 : vector<1x128xf32> to vector<2x128xf32>
    %5 = arith.addf %2, %4 : vector<2x128xf32>
    %cst_5 = arith.constant 0.000000e+00 : f32
    %6 = vector.broadcast %cst_5 : f32 to vector<2x128xf32>
    %7 = arith.cmpf ogt, %5, %6 : vector<2x128xf32>
    %cst_6 = arith.constant 0.00999999977 : f32
    %8 = vector.broadcast %cst_6 : f32 to vector<2x128xf32>
    %9 = arith.mulf %8, %5 : vector<2x128xf32>
    %10 = arith.select %7, %5, %9 : vector<2x128xi1>, vector<2x128xf32>
    %c0_7 = arith.constant 0 : index
    %c0_8 = arith.constant 0 : index
    %11 = vector.load %arg3[%c0_7, %c0_8] : memref<128x128xf32, #tpu.memory_space<vmem>>, vector<128x128xf32>
    %cst_9 = arith.constant dense<0.000000e+00> : vector<2x128xf32>
    %12 = tpu.matmul %10, %11, %cst_9 {dimension_numbers = #tpu.dot_dimension_numbers<[1], [0], [0], [1], [0, 0, 1, 1], [], []>} : vector<2x128xf32>, vector<128x128xf32>, vector<2x128xf32> -> vector<2x128xf32>
    %c0_10 = arith.constant 0 : index
    %c0_11 = arith.constant 0 : index
    %13 = vector.load %arg4[%c0_10, %c0_11] : memref<1x128xf32, #tpu.memory_space<vmem>>, vector<1x128xf32>
    %14 = vector.broadcast %13 : vector<1x128xf32> to vector<2x128xf32>
    %15 = arith.addf %12, %14 : vector<2x128xf32>
    %cst_12 = arith.constant 0.000000e+00 : f32
    %16 = vector.broadcast %cst_12 : f32 to vector<2x128xf32>
    %17 = arith.cmpf ogt, %15, %16 : vector<2x128xf32>
    %cst_13 = arith.constant 0.00999999977 : f32
    %18 = vector.broadcast %cst_13 : f32 to vector<2x128xf32>
    %19 = arith.mulf %18, %15 : vector<2x128xf32>
    %20 = arith.select %17, %15, %19 : vector<2x128xi1>, vector<2x128xf32>
    %c0_14 = arith.constant 0 : index
    %c0_15 = arith.constant 0 : index
    %21 = vector.load %arg5[%c0_14, %c0_15] : memref<2x128xf32, #tpu.memory_space<vmem>>, vector<2x128xf32>
    tpu.vector_store %arg5[%c0_14, %c0_15], %20 {strides = array<i32>} : memref<2x128xf32, #tpu.memory_space<vmem>>, vector<2x128xf32>,
    return
  }
}

</mosaic_0001>

<bundles_post_ra>
// kernel: net_forward.3
= control target key start
LH: loop header
LB: loop body
LE: loop exit
PB: predicated region body
PF: predicated region fallthrough
CT: control target
= control target key end

     0   :  { %v818_v30 = vmov 1983009808   ;;  %v164_v32 = vlaneseq  ;;  %s1305_s0 = inlined_call_operand.vmem [shape: f32[2,1024], index: 0, kind: input, shape index: {}]   ;;  %s1306_s1 = inlined_call_operand.vmem [shape: f32[1024,128], index: 1, kind: input, shape index: {}]   ;;  %s1307_s2 = inlined_call_operand.vmem [shape: f32[1,128], index: 2, kind: input, shape index: {}]   ;;  %s1308_s3 = inlined_call_operand.vmem [shape: f32[128,128], index: 3, kind: input, shape index: {}]   ;;  %s1309_s4 = inlined_call_operand.vmem [shape: f32[1,128], index: 4, kind: input, shape index: {}]   ;;  %s1310_s5 = inlined_call_operand.hbm [shape: f32[2,128], index: 5, kind: output, shape index: {}]  }
   0x1   :  { %v54_v0 = vld [vmem:[%s1306_s1 + $0xf8] sm:$0xff]  ;;  %v53_v4 = vld [vmem:[%s1306_s1 + $0xf0] sm:$0xff]  ;;  %v52_v8 = vld [vmem:[%s1306_s1 + $0xe8] sm:$0xff]  ;;  %v162_v31 = vunpack.c.l.s4 %v818_v30 }
   0x2   :  { %v86_v1 = vld [vmem:[%s1306_s1 + $0x1f8] sm:$0xff]  ;;  %598 = vmatprep.subr.mxu0 %v54_v0  ;;  %v85_v5 = vld [vmem:[%s1306_s1 + $0x1f0] sm:$0xff]  ;;  %v84_v9 = vld [vmem:[%s1306_s1 + $0x1e8] sm:$0xff]  ;;  %v165_v42 = vshrl.u32 %v164_v32, 7 }
   0x3   :  { %v38_v2 = vld [vmem:[%s1306_s1 + $0x78] sm:$0xff]  ;;  %633 = vmatprep.subr.mxu1 %v86_v1  ;;  %v37_v6 = vld [vmem:[%s1306_s1 + $0x70] sm:$0xff]  ;;  %v36_v10 = vld [vmem:[%s1306_s1 + $0x68] sm:$0xff]  ;;  %v163_v41 = vunpack.c.0.s8 %v162_v31 }
   0x4   :  { %v70_v3 = vld [vmem:[%s1306_s1 + $0x178] sm:$0xff]  ;;  %599 = vmatpush3.msra.mxu0 %v38_v2  ;;  %v69_v7 = vld [vmem:[%s1306_s1 + $0x170] sm:$0xff]  ;;  %v68_v11 = vld [vmem:[%s1306_s1 + $0x168] sm:$0xff] }
   0x5   :  { %634 = vmatpush3.msra.mxu1 %v70_v3  ;;  %600 = vmatprep.subr.mxu0 %v53_v4  ;;  %v51_v12 = vld [vmem:[%s1306_s1 + $0xe0] sm:$0xff]  ;;  %v50_v16 = vld [vmem:[%s1306_s1 + $0xd8] sm:$0xff]  ;;  %v49_v20 = vld [vmem:[%s1306_s1 + $0xd0] sm:$0xff]  ;;  %v990_v51 = vsub.s32 %v163_v41, %v165_v42 }
   0x6   :  { %635 = vmatprep.subr.mxu1 %v85_v5  ;;  %601 = vmatpush3.msra.mxu0 %v37_v6  ;;  %v83_v13 = vld [vmem:[%s1306_s1 + $0x1e0] sm:$0xff]  ;;  %v82_v17 = vld [vmem:[%s1306_s1 + $0x1d8] sm:$0xff]  ;;  %v81_v21 = vld [vmem:[%s1306_s1 + $0x1d0] sm:$0xff] }
   0x7   :  { %636 = vmatpush3.msra.mxu1 %v69_v7  ;;  %602 = vmatprep.subr.mxu0 %v52_v8  ;;  %v35_v14 = vld [vmem:[%s1306_s1 + $0x60] sm:$0xff]  ;;  %v34_v18 = vld [vmem:[%s1306_s1 + $0x58] sm:$0xff]  ;;  %v33_v22 = vld [vmem:[%s1306_s1 + $0x50] sm:$0xff] }
   0x8   :  { %637 = vmatprep.subr.mxu1 %v84_v9  ;;  %v67_v15 = vld [vmem:[%s1306_s1 + $0x160] sm:$0xff]  ;;  %603 = vmatpush3.msra.mxu0 %v36_v10  ;;  %v66_v19 = vld [vmem:[%s1306_s1 + $0x158] sm:$0xff]  ;;  %v65_v23 = vld [vmem:[%s1306_s1 + $0x150] sm:$0xff] }
   0x9   :  { %638 = vmatpush3.msra.mxu1 %v68_v11  ;;  %604 = vmatprep.subr.mxu0 %v51_v12  ;;  %v48_v24 = vld [vmem:[%s1306_s1 + $0xc8] sm:$0xff]  ;;  %v47_v28 = vld [vmem:[%s1306_s1 + $0xc0] sm:$0xff]  ;;  %v46_v35 = vld [vmem:[%s1306_s1 + $0xb8] sm:$0xff] }
   0xa   :  { %639 = vmatprep.subr.mxu1 %v83_v13  ;;  %605 = vmatpush3.msra.mxu0 %v35_v14  ;;  %v80_v25 = vld [vmem:[%s1306_s1 + $0x1c8] sm:$0xff]  ;;  %v79_v29 = vld [vmem:[%s1306_s1 + $0x1c0] sm:$0xff]  ;;  %v78_v36 = vld [vmem:[%s1306_s1 + $0x1b8] sm:$0xff] }
   0xb   :  { %640 = vmatpush3.msra.mxu1 %v67_v15  ;;  %606 = vmatprep.subr.mxu0 %v50_v16  ;;  %v32_v26 = vld [vmem:[%s1306_s1 + $0x48] sm:$0xff]  ;;  %v31_v33 = vld [vmem:[%s1306_s1 + $0x40] sm:$0xff]  ;;  %v30_v37 = vld [vmem:[%s1306_s1 + $0x38] sm:$0xff] }
   0xc   :  { %641 = vmatprep.subr.mxu1 %v82_v17  ;;  %607 = vmatpush3.msra.mxu0 %v34_v18  ;;  %v64_v27 = vld [vmem:[%s1306_s1 + $0x148] sm:$0xff]  ;;  %v63_v34 = vld [vmem:[%s1306_s1 + $0x140] sm:$0xff]  ;;  %v62_v38 = vld [vmem:[%s1306_s1 + $0x138] sm:$0xff] }
   0xd   :  { %642 = vmatpush3.msra.mxu1 %v66_v19  ;;  %608 = vmatprep.subr.mxu0 %v49_v20  ;;  %v45_v39 = vld [vmem:[%s1306_s1 + $0xb0] sm:$0xff]  ;;  %v44_v45 = vld [vmem:[%s1306_s1 + $0xa8] sm:$0xff]  ;;  %v43_v49 = vld [vmem:[%s1306_s1 + $0xa0] sm:$0xff] }
   0xe   :  { %643 = vmatprep.subr.mxu1 %v81_v21  ;;  %609 = vmatpush3.msra.mxu0 %v33_v22  ;;  %v77_v40 = vld [vmem:[%s1306_s1 + $0x1b0] sm:$0xff]  ;;  %v76_v46 = vld [vmem:[%s1306_s1 + $0x1a8] sm:$0xff]  ;;  %v75_v50 = vld [vmem:[%s1306_s1 + $0x1a0] sm:$0xff] }
   0xf   :  { %644 = vmatpush3.msra.mxu1 %v65_v23  ;;  %610 = vmatprep.subr.mxu0 %v48_v24  ;;  %v29_v43 = vld [vmem:[%s1306_s1 + $0x30] sm:$0xff]  ;;  %v28_v47 = vld [vmem:[%s1306_s1 + $0x28] sm:$0xff]  ;;  %v27_v52 = vld [vmem:[%s1306_s1 + $0x20] sm:$0xff] }
  0x10   :  { %645 = vmatprep.subr.mxu1 %v80_v25  ;;  %611 = vmatpush3.msra.mxu0 %v32_v26  ;;  %v61_v44 = vld [vmem:[%s1306_s1 + $0x130] sm:$0xff]  ;;  %v60_v48 = vld [vmem:[%s1306_s1 + $0x128] sm:$0xff]  ;;  %v59_v53 = vld [vmem:[%s1306_s1 + $0x120] sm:$0xff] }
  0x11   :  { %646 = vmatpush3.msra.mxu1 %v64_v27  ;;  %612 = vmatprep.subr.mxu0 %v47_v28  ;;  %v21_v54 = vld [vmem:[%s1305_s0] sm:$0xff]  ;;  %v42_v55 = vld [vmem:[%s1306_s1 + $0x98] sm:$0xff]  ;;  %v41_v60 = vld [vmem:[%s1306_s1 + $0x90] sm:$0xff] }
  0x12   :  { %647 = vmatprep.subr.mxu1 %v79_v29  ;;  %613 = vmatpush3.msra.mxu0 %v31_v33  ;;  %v74_v56 = vld [vmem:[%s1306_s1 + $0x198] sm:$0xff]  ;;  %v160_v57 = vcombine.high %v21_v54, %v21_v54  ;;  %v73_v61 = vld [vmem:[%s1306_s1 + $0x190] sm:$0xff]  ;;  %v167_v62 = vrot.slane %v21_v54, %v990_v51  ;;  %v40_v1 = vld [vmem:[%s1306_s1 + $0x88] sm:$0xff] }
  0x13   :  { %648 = vmatpush3.msra.mxu1 %v63_v34  ;;  %614 = vmatprep.subr.mxu0 %v46_v35  ;;  %v26_v58 = vld [vmem:[%s1306_s1 + $0x18] sm:$0xff]  ;;  %v25_v63 = vld [vmem:[%s1306_s1 + $0x10] sm:$0xff]  ;;  %v72_v2 = vld [vmem:[%s1306_s1 + $0x188] sm:$0xff] }
  0x14   :  { %649 = vmatprep.subr.mxu1 %v78_v36  ;;  %615 = vmatpush3.msra.mxu0 %v30_v37  ;;  %v58_v59 = vld [vmem:[%s1306_s1 + $0x118] sm:$0xff]  ;;  %v57_v0 = vld [vmem:[%s1306_s1 + $0x110] sm:$0xff]  ;;  %v174_v3 = vrot.slane %v160_v57, %v990_v51  ;;  %v24_v4 = vld [vmem:[%s1306_s1 + $0x8] sm:$0xff]  ;;  %v175_v8 = vcombine.high %v167_v62, %v167_v62 }
  0x15   :  { %650 = vmatpush3.msra.mxu1 %v62_v38  ;;  %616 = vmatprep.subr.mxu0 %v45_v39  ;;  %v56_v5 = vld [vmem:[%s1306_s1 + $0x108] sm:$0xff]  ;;  %v39_v6 = vld [vmem:[%s1306_s1 + $0x80] sm:$0xff]  ;;  %v118_v12 = vld [vmem:[%s1306_s1 + $0x2f8] sm:$0xff] }
  0x16   :  { %651 = vmatprep.subr.mxu1 %v77_v40  ;;  %617 = vmatpush3.msra.mxu0 %v29_v43  ;;  %v71_v7 = vld [vmem:[%s1306_s1 + $0x180] sm:$0xff]  ;;  %v176_v11 = vcombine.high %v174_v3, %v174_v3  ;;  %v150_v13 = vld [vmem:[%s1306_s1 + $0x3f8] sm:$0xff]  ;;  %v117_v16 = vld [vmem:[%s1306_s1 + $0x2f0] sm:$0xff] }
  0x17   :  { %652 = vmatpush3.msra.mxu1 %v61_v44  ;;  %618 = vmatprep.subr.mxu0 %v44_v45  ;;  %v23_v9 = vld [vmem:[%s1306_s1] sm:$0xff]  ;;  %v102_v14 = vld [vmem:[%s1306_s1 + $0x278] sm:$0xff]  ;;  %v149_v17 = vld [vmem:[%s1306_s1 + $0x3f0] sm:$0xff] }
  0x18   :  { %653 = vmatprep.subr.mxu1 %v76_v46  ;;  %619 = vmatpush3.msra.mxu0 %v28_v47  ;;  %v55_v10 = vld [vmem:[%s1306_s1 + $0x100] sm:$0xff]  ;;  %v134_v15 = vld [vmem:[%s1306_s1 + $0x378] sm:$0xff]  ;;  %v101_v18 = vld [vmem:[%s1306_s1 + $0x270] sm:$0xff] }
  0x19   :  { %654 = vmatpush3.msra.mxu1 %v60_v48  ;;  %620 = vmatprep.subr.mxu0 %v43_v49  ;;  %v133_v19 = vld [vmem:[%s1306_s1 + $0x370] sm:$0xff]  ;;  %v116_v20 = vld [vmem:[%s1306_s1 + $0x2e8] sm:$0xff]  ;;  %v115_v24 = vld [vmem:[%s1306_s1 + $0x2e0] sm:$0xff] }
  0x1a   :  { %655 = vmatprep.subr.mxu1 %v75_v50  ;;  %621 = vmatpush3.msra.mxu0 %v27_v52  ;;  %v148_v21 = vld [vmem:[%s1306_s1 + $0x3e8] sm:$0xff]  ;;  %v147_v25 = vld [vmem:[%s1306_s1 + $0x3e0] sm:$0xff]  ;;  %v114_v28 = vld [vmem:[%s1306_s1 + $0x2d8] sm:$0xff] }
  0x1b   :  { %656 = vmatpush3.msra.mxu1 %v59_v53  ;;  %622 = vmatprep.subr.mxu0 %v42_v55  ;;  %v100_v22 = vld [vmem:[%s1306_s1 + $0x268] sm:$0xff]  ;;  %v99_v26 = vld [vmem:[%s1306_s1 + $0x260] sm:$0xff]  ;;  %v146_v29 = vld [vmem:[%s1306_s1 + $0x3d8] sm:$0xff] }
  0x1c   :  { %657 = vmatprep.subr.mxu1 %v74_v56  ;;  %623 = vmatpush3.msra.mxu0 %v26_v58  ;;  %v132_v23 = vld [vmem:[%s1306_s1 + $0x368] sm:$0xff]  ;;  %v131_v27 = vld [vmem:[%s1306_s1 + $0x360] sm:$0xff]  ;;  %v98_v30 = vld [vmem:[%s1306_s1 + $0x258] sm:$0xff] }
  0x1d   :  { %658 = vmatpush3.msra.mxu1 %v58_v59  ;;  %624 = vmatprep.subr.mxu0 %v41_v60  ;;  %v130_v31 = vld [vmem:[%s1306_s1 + $0x358] sm:$0xff]  ;;  %v113_v32 = vld [vmem:[%s1306_s1 + $0x2d0] sm:$0xff] }
  0x1e   :  { %659 = vmatprep.subr.mxu1 %v73_v61  ;;  %625 = vmatpush3.msra.mxu0 %v25_v63  ;;  %v145_v33 = vld [vmem:[%s1306_s1 + $0x3d0] sm:$0xff] }
  0x1f   :  { %660 = vmatpush3.msra.mxu1 %v57_v0  ;;  %626 = vmatprep.subr.mxu0 %v40_v1  ;;  %v97_v34 = vld [vmem:[%s1306_s1 + $0x250] sm:$0xff] }
  0x20   :  { %661 = vmatprep.subr.mxu1 %v72_v2  ;;  %627 = vmatpush3.msra.mxu0 %v24_v4  ;;  %v129_v35 = vld [vmem:[%s1306_s1 + $0x350] sm:$0xff] }
  0x21   :  { %662 = vmatpush3.msra.mxu1 %v56_v5  ;;  %628 = vmatprep.subr.mxu0 %v39_v6 }
  0x22   :  { %663 = vmatprep.subr.mxu1 %v71_v7  ;;  %629 = vmatpush3.msra.mxu0 %v23_v9 }
  0x23   :  { %266 = vmatprep.mubr.f32.mxu0 %v175_v8  ;;  %664 = vmatpush3.msra.mxu1 %v55_v10 }
  0x24   :  { %267 = vmatmul.mubr.f32.vlgmr.msra.gmra.mxu0 %v167_v62  ;;  %336 = vmatprep.mubr.f32.mxu1 %v176_v11 }
  0x25   :  { %668 = vmatprep.subr.mxu0 %v118_v12  ;;  %703 = vmatprep.subr.mxu1 %v150_v13 }
  0x26   :  { %337 = vmatmul.mubr.f32.vlgmr.msra.gmra.mxu1 %v174_v3  ;;  %669 = vmatpush3.msra.mxu0 %v102_v14 }
  0x27   :  { %704 = vmatpush3.msra.mxu1 %v134_v15  ;;  %670 = vmatprep.subr.mxu0 %v117_v16 }
  0x28   :  { %705 = vmatprep.subr.mxu1 %v149_v17  ;;  %671 = vmatpush3.msra.mxu0 %v101_v18 }
  0x29   :  { %706 = vmatpush3.msra.mxu1 %v133_v19  ;;  %672 = vmatprep.subr.mxu0 %v116_v20 }
  0x2a   :  { %707 = vmatprep.subr.mxu1 %v148_v21  ;;  %673 = vmatpush3.msra.mxu0 %v100_v22 }
  0x2b   :  { %708 = vmatpush3.msra.mxu1 %v132_v23  ;;  %674 = vmatprep.subr.mxu0 %v115_v24 }
  0x2c   :  { %709 = vmatprep.subr.mxu1 %v147_v25  ;;  %675 = vmatpush3.msra.mxu0 %v99_v26 }
  0x2d   :  { %710 = vmatpush3.msra.mxu1 %v131_v27  ;;  %676 = vmatprep.subr.mxu0 %v114_v28 }
  0x2e   :  { %711 = vmatprep.subr.mxu1 %v146_v29 }
  0x2f   :  { %10 = vsyncpa [#allocation3], 0  ;;  %677 = vmatpush3.msra.mxu0 %v98_v30  ;;  %712 = vmatpush3.msra.mxu1 %v130_v31  ;;  %v112_v36 = vld [vmem:[%s1306_s1 + $0x2c8] sm:$0xff]  ;;  %v111_v40 = vld [vmem:[%s1306_s1 + $0x2c0] sm:$0xff]  ;;  %v819_v19 = vmov 0.0   ;;  %vm820_vm0 = vmmov 0  }
  0x30   :  { %v144_v37 = vld [vmem:[%s1306_s1 + $0x3c8] sm:$0xff]  ;;  %678 = vmatprep.subr.mxu0 %v113_v32  ;;  %713 = vmatprep.subr.mxu1 %v145_v33  ;;  %v143_v41 = vld [vmem:[%s1306_s1 + $0x3c0] sm:$0xff]  ;;  %v110_v44 = vld [vmem:[%s1306_s1 + $0x2b8] sm:$0xff] }
  0x31   :  { %v96_v38 = vld [vmem:[%s1306_s1 + $0x248] sm:$0xff]  ;;  %679 = vmatpush3.msra.mxu0 %v97_v34  ;;  %714 = vmatpush3.msra.mxu1 %v129_v35  ;;  %v95_v42 = vld [vmem:[%s1306_s1 + $0x240] sm:$0xff]  ;;  %v142_v45 = vld [vmem:[%s1306_s1 + $0x3b8] sm:$0xff] }
  0x32   :  { %v128_v39 = vld [vmem:[%s1306_s1 + $0x348] sm:$0xff]  ;;  %680 = vmatprep.subr.mxu0 %v112_v36  ;;  %715 = vmatprep.subr.mxu1 %v144_v37  ;;  %v127_v43 = vld [vmem:[%s1306_s1 + $0x340] sm:$0xff]  ;;  %v94_v46 = vld [vmem:[%s1306_s1 + $0x238] sm:$0xff] }
  0x33   :  { %681 = vmatpush3.msra.mxu0 %v96_v38  ;;  %716 = vmatpush3.msra.mxu1 %v128_v39  ;;  %v126_v47 = vld [vmem:[%s1306_s1 + $0x338] sm:$0xff]  ;;  %v109_v48 = vld [vmem:[%s1306_s1 + $0x2b0] sm:$0xff]  ;;  %v108_v53 = vld [vmem:[%s1306_s1 + $0x2a8] sm:$0xff] }
  0x34   :  { %682 = vmatprep.subr.mxu0 %v111_v40  ;;  %717 = vmatprep.subr.mxu1 %v143_v41  ;;  %v141_v49 = vld [vmem:[%s1306_s1 + $0x3b0] sm:$0xff]  ;;  %v140_v54 = vld [vmem:[%s1306_s1 + $0x3a8] sm:$0xff]  ;;  %v107_v58 = vld [vmem:[%s1306_s1 + $0x2a0] sm:$0xff] }
  0x35   :  { %683 = vmatpush3.msra.mxu0 %v95_v42  ;;  %718 = vmatpush3.msra.mxu1 %v127_v43  ;;  %v93_v50 = vld [vmem:[%s1306_s1 + $0x230] sm:$0xff]  ;;  %v22_v55 = vld [vmem:[%s1305_s0 + $0x8] sm:$0xff]  ;;  %v139_v59 = vld [vmem:[%s1306_s1 + $0x3a0] sm:$0xff] }
  0x36   :  { %684 = vmatprep.subr.mxu0 %v110_v44  ;;  %719 = vmatprep.subr.mxu1 %v142_v45  ;;  %v125_v52 = vld [vmem:[%s1306_s1 + $0x330] sm:$0xff]  ;;  %v92_v56 = vld [vmem:[%s1306_s1 + $0x228] sm:$0xff]  ;;  %v91_v60 = vld [vmem:[%s1306_s1 + $0x220] sm:$0xff]  ;;  %v177_v62 = vcombine.high %v22_v55, %v22_v55  ;;  %v184_v5 = vrot.slane %v22_v55, %v990_v51 }
  0x37   :  { %685 = vmatpush3.msra.mxu0 %v94_v46  ;;  %720 = vmatpush3.msra.mxu1 %v126_v47  ;;  %v124_v57 = vld [vmem:[%s1306_s1 + $0x328] sm:$0xff]  ;;  %v123_v61 = vld [vmem:[%s1306_s1 + $0x320] sm:$0xff]  ;;  %v106_v63 = vld [vmem:[%s1306_s1 + $0x298] sm:$0xff] }
  0x38   :  { %686 = vmatprep.subr.mxu0 %v109_v48  ;;  %721 = vmatprep.subr.mxu1 %v141_v49  ;;  %v138_v0 = vld [vmem:[%s1306_s1 + $0x398] sm:$0xff]  ;;  %v105_v3 = vld [vmem:[%s1306_s1 + $0x290] sm:$0xff]  ;;  %v191_v8 = vrot.slane %v177_v62, %v990_v51  ;;  %v104_v9 = vld [vmem:[%s1306_s1 + $0x288] sm:$0xff]  ;;  %v192_v14 = vcombine.high %v184_v5, %v184_v5 }
  0x39   :  { %687 = vmatpush3.msra.mxu0 %v93_v50  ;;  %722 = vmatpush3.msra.mxu1 %v125_v52  ;;  %v90_v1 = vld [vmem:[%s1306_s1 + $0x218] sm:$0xff]  ;;  %v137_v4 = vld [vmem:[%s1306_s1 + $0x390] sm:$0xff]  ;;  %v136_v10 = vld [vmem:[%s1306_s1 + $0x388] sm:$0xff] }
  0x3a   :  { %688 = vmatprep.subr.mxu0 %v108_v53  ;;  %723 = vmatprep.subr.mxu1 %v140_v54  ;;  %v122_v2 = vld [vmem:[%s1306_s1 + $0x318] sm:$0xff]  ;;  %v89_v6 = vld [vmem:[%s1306_s1 + $0x210] sm:$0xff]  ;;  %v88_v11 = vld [vmem:[%s1306_s1 + $0x208] sm:$0xff]  ;;  %v193_v16 = vcombine.high %v191_v8, %v191_v8 }
  0x3b   :  { %689 = vmatpush3.msra.mxu0 %v92_v56  ;;  %724 = vmatpush3.msra.mxu1 %v124_v57  ;;  %v121_v7 = vld [vmem:[%s1306_s1 + $0x310] sm:$0xff]  ;;  %v120_v51 = vld [vmem:[%s1306_s1 + $0x308] sm:$0xff]  ;;  %v103_v12 = vld [vmem:[%s1306_s1 + $0x280] sm:$0xff] }
  0x3c   :  { %690 = vmatprep.subr.mxu0 %v107_v58  ;;  %725 = vmatprep.subr.mxu1 %v139_v59  ;;  %v135_v13 = vld [vmem:[%s1306_s1 + $0x380] sm:$0xff]  ;;  %v500_v18 = vld [vmem:[%s1308_s3 + $0x78] sm:$0xff]  ;;  %v499_v20 = vld [vmem:[%s1308_s3 + $0x70] sm:$0xff] }
  0x3d   :  { %691 = vmatpush3.msra.mxu0 %v91_v60  ;;  %726 = vmatpush3.msra.mxu1 %v123_v61  ;;  %v87_v15 = vld [vmem:[%s1306_s1 + $0x200] sm:$0xff]  ;;  %v498_v21 = vld [vmem:[%s1308_s3 + $0x68] sm:$0xff]  ;;  %v496_v23 = vld [vmem:[%s1308_s3 + $0x58] sm:$0xff] }
  0x3e   :  { %692 = vmatprep.subr.mxu0 %v106_v63  ;;  %727 = vmatprep.subr.mxu1 %v138_v0  ;;  %v119_v17 = vld [vmem:[%s1306_s1 + $0x300] sm:$0xff]  ;;  %v495_v24 = vld [vmem:[%s1308_s3 + $0x50] sm:$0xff]  ;;  %v494_v25 = vld [vmem:[%s1308_s3 + $0x48] sm:$0xff] }
  0x3f   :  { %693 = vmatpush3.msra.mxu0 %v90_v1  ;;  %728 = vmatpush3.msra.mxu1 %v122_v2  ;;  %v497_v22 = vld [vmem:[%s1308_s3 + $0x60] sm:$0xff]  ;;  %v492_v27 = vld [vmem:[%s1308_s3 + $0x38] sm:$0xff]  ;;  %v491_v28 = vld [vmem:[%s1308_s3 + $0x30] sm:$0xff] }
  0x40   :  { %694 = vmatprep.subr.mxu0 %v105_v3  ;;  %729 = vmatprep.subr.mxu1 %v137_v4  ;;  %v493_v26 = vld [vmem:[%s1308_s3 + $0x40] sm:$0xff]  ;;  %v490_v29 = vld [vmem:[%s1308_s3 + $0x28] sm:$0xff]  ;;  %v488_v31 = vld [vmem:[%s1308_s3 + $0x18] sm:$0xff] }
  0x41   :  { %695 = vmatpush3.msra.mxu0 %v89_v6  ;;  %730 = vmatpush3.msra.mxu1 %v121_v7  ;;  %v489_v30 = vld [vmem:[%s1308_s3 + $0x20] sm:$0xff]  ;;  %v487_v32 = vld [vmem:[%s1308_s3 + $0x10] sm:$0xff]  ;;  %v486_v33 = vld [vmem:[%s1308_s3 + $0x8] sm:$0xff] }
  0x42   :  { %696 = vmatprep.subr.mxu0 %v104_v9  ;;  %731 = vmatprep.subr.mxu1 %v136_v10  ;;  %v485_v34 = vld [vmem:[%s1308_s3] sm:$0xff] }
  0x43   :  { %697 = vmatpush3.msra.mxu0 %v88_v11  ;;  %732 = vmatpush3.msra.mxu1 %v120_v51  ;;  %v596_v39 = vld [vmem:[%s1307_s2] ss:$0 sm:$0xff]  ;;  %s821_s2 = smov [#allocation2]  }
  0x44   :  { %698 = vmatprep.subr.mxu0 %v103_v12  ;;  %733 = vmatprep.subr.mxu1 %v135_v13  ;;  %v597_v55 = vld [vmem:[%s1309_s4] ss:$0 sm:$0xff]  ;;  %s588_s8 = sshll.u32 %s821_s2, 4  ;;  %s589_s8 = int_to_ptr.vmem [resolvable:$true] %s588_s8 }
  0x45   :  { %699 = vmatpush3.msra.mxu0 %v87_v15  ;;  %406 = vmatprep.mubr.f32.mxu0 %v192_v14  ;;  %s796_s9 = scalar_lea.vmem %s589_s8, 32  ;;  %p801_p1 = scmp.lt.s32.totalorder %s589_s8, %s589_s8 }
  0x46   :  { %734 = vmatpush3.msra.mxu1 %v119_v17  ;;  %476 = vmatprep.mubr.f32.mxu1 %v193_v16  ;;  %p797_p0 = scmp.ne.s32.totalorder %s589_s8, %s796_s9  ;;  %p802_p2 = scmp.lt.s32.totalorder %s796_s9, %s796_s9 }
  0x47   :  { %407 = vmatmul.mubr.f32.vlgmr.msra.gmra.mxu0 %v184_v5  ;;  %477 = vmatmul.mubr.f32.vlgmr.msra.gmra.mxu1 %v191_v8 }
  0x48   :  { %755 = vmatprep.subr.mxu0 %v819_v19  ;;  %787 = vmatprep.mubr.msk.f32.mxu0 %vm820_vm0, %v819_v19  ;;  %p803_p3 = por %p802_p2, %p801_p1 }
  0x49   :  { %756 = vmatpush3.msra.mxu0 %v500_v18 }
  0x4a   :  { %757 = vmatprep.subr.mxu0 %v819_v19  ;;  %p804_p4 = pnand %p803_p3, %p797_p0 }
  0x4b   :  { %758 = vmatpush3.msra.mxu0 %v499_v20 }
  0x4c   :  { %759 = vmatprep.subr.mxu0 %v819_v19 }
  0x4d   :  { %760 = vmatpush3.msra.mxu0 %v498_v21 }
  0x4e   :  { %761 = vmatprep.subr.mxu0 %v819_v19 }
  0x4f   :  { %762 = vmatpush3.msra.mxu0 %v497_v22 }
  0x50   :  { %763 = vmatprep.subr.mxu0 %v819_v19 }
  0x51   :  { %764 = vmatpush3.msra.mxu0 %v496_v23 }
  0x52   :  { %765 = vmatprep.subr.mxu0 %v819_v19 }
  0x53   :  { %766 = vmatpush3.msra.mxu0 %v495_v24 }
  0x54   :  { %767 = vmatprep.subr.mxu0 %v819_v19 }
  0x55   :  { %768 = vmatpush3.msra.mxu0 %v494_v25 }
  0x56   :  { %769 = vmatprep.subr.mxu0 %v819_v19 }
  0x57   :  { %770 = vmatpush3.msra.mxu0 %v493_v26 }
  0x58   :  { %771 = vmatprep.subr.mxu0 %v819_v19 }
  0x59   :  { %772 = vmatpush3.msra.mxu0 %v492_v27 }
  0x5a   :  { %773 = vmatprep.subr.mxu0 %v819_v19 }
  0x5b   :  { %774 = vmatpush3.msra.mxu0 %v491_v28 }
  0x5c   :  { %775 = vmatprep.subr.mxu0 %v819_v19 }
  0x5d   :  { %776 = vmatpush3.msra.mxu0 %v490_v29 }
  0x5e   :  { %777 = vmatprep.subr.mxu0 %v819_v19 }
  0x5f   :  { %778 = vmatpush3.msra.mxu0 %v489_v30 }
  0x60   :  { %779 = vmatprep.subr.mxu0 %v819_v19 }
  0x61   :  { %780 = vmatpush3.msra.mxu0 %v488_v31 }
  0x62   :  { %781 = vmatprep.subr.mxu0 %v819_v19 }
  0x63   :  { %782 = vmatpush3.msra.mxu0 %v487_v32 }
  0x64   :  { %783 = vmatprep.subr.mxu0 %v819_v19 }
  0x65   :  { %784 = vmatpush3.msra.mxu0 %v486_v33 }
  0x66   :  { %785 = vmatprep.subr.mxu0 %v819_v19 }
  0x67   :  { %786 = vmatpush3.msra.mxu0 %v485_v34 }
  0xe4   :  { %v630_v35 = vpop.f32.mrf.mxu0 }
  0xe6   :  { %v665_v36 = vpop.f32.mrf.mxu1  ;;  %v631_v37 = vpop.f32.mrf.mxu0 }
  0xe7   :  { %v632_v38 = vadd.f32 %v631_v37, %v630_v35 }
  0xe8   :  { %v666_v40 = vpop.f32.mrf.mxu1 }
  0xe9   :  { %v269_v41 = vadd.f32 %v632_v38, %v596_v39  ;;  %v667_v42 = vadd.f32 %v666_v40, %v665_v36 }
  0xeb   :  { %v339_v47 = vadd.f32 %v667_v42, %v269_v41 }
 0x107   :  { %v700_v43 = vpop.f32.mrf.mxu0  ;;  %v735_v44 = vpop.f32.mrf.mxu1 }
 0x109   :  { %v701_v45 = vpop.f32.mrf.mxu0  ;;  %v736_v46 = vpop.f32.mrf.mxu1 }
 0x10a   :  { %v702_v48 = vadd.f32 %v701_v45, %v700_v43  ;;  %v737_v50 = vadd.f32 %v736_v46, %v735_v44 }
 0x10c   :  { %v409_v49 = vadd.f32 %v702_v48, %v339_v47 }
 0x10e   :  { %v479_v52 = vadd.f32 %v737_v50, %v409_v49 }
 0x110   :  { %v483_v53 = vmul.f32 0.01, %v479_v52  ;;  %vm482_vm1 = vcmp.gt.f32.partialorder %v479_v52, 0.0 }
 0x112   :  { %v484_v54 = vsel %vm482_vm1, %v479_v52, %v483_v53 }
 0x113   :  { %788 = vmatmul.mubr.f32.vlgmr.msra.gmra.mxu0 %v484_v54 }
 0x1d3   :  { %v574_v56 = vpop.f32.mrf.mxu0 }
 0x1d4   :  { %v575_v57 = vadd.f32 %v597_v55, %v574_v56 }
 0x1d5   :  { %v789_v58 = vpop.f32.mrf.mxu0 }
 0x1d6   :  { %v579_v59 = vmul.f32 0.01, %v575_v57  ;;  %vm578_vm2 = vcmp.gt.f32.partialorder %v575_v57, 0.0 }
 0x1d8   :  { %v580_v60 = vsel %vm578_vm2, %v575_v57, %v579_v59 }
 0x1d9   :  { %581 = vst [vmem:[#allocation2] sm:$0x3] %v580_v60 }
 0x1da   :  { %807 = shalt.err (!%p804_p4)
}
 0x1db   :  { %591 = dma.vmem_to_hbm [thread:$0]  %s589_s8, 32, %s1310_s5, [#allocation3]  }
 0x1dc   :  { %816 = dma.done.wait [#allocation3], 32  }
 0x1dd   :  { %817 = vsyncadd [#allocation3], 4294967264 }
 0x1de   :  { %595 = vsyncpa [#allocation3], 1 }

// kernel: net_forward.2
= control target key start
LH: loop header
LB: loop body
LE: loop exit
PB: predicated region body
PF: predicated region fallthrough
CT: control target
= control target key end

     0   :  { %s11602_s0 = inlined_call_operand.vmem [shape: f32[2,51200], index: 0, kind: input, shape index: {}]   ;;  %s11603_s1 = inlined_call_operand.hbm [shape: f32[51200,1024], index: 1, kind: input, shape index: {}]   ;;  %s11604_s2 = inlined_call_operand.hbm [shape: f32[1,1024], index: 2, kind: input, shape index: {}]   ;;  %s11605_s3 = inlined_call_operand.vmem [shape: f32[2,1024], index: 3, kind: output, shape index: {}]  }
   0x1   :  { %11613 = sst [smem:[#allocation11_spill]] %s11602_s0 }
   0x2   :  { %11614 = sst [smem:[#allocation12_spill]] %s11603_s1 }
   0x3   :  { %8 = vsyncpa [#allocation3], 0 }
   0x4   :  { %10 = vsyncpa [#allocation3 + $0x1], 0 }
   0x5   :  { %11 = vsyncpa [#allocation5], 0 }
   0x6   :  { %13 = vsyncpa [#allocation5 + $0x1], 0  ;;  %s7849_s12 = smov 0   ;;  %s7851_s13 = smov 0  }
   0x7   :  { %s7853_s14 = smov 0   ;;  %s7855_s15 = smov 0  }
   0x8   :  { %s7857_s16 = smov 0   ;;  %s7859_s17 = smov 0  }
   0x9   :  { %s7861_s18 = smov 0   ;;  %s7863_s19 = smov 0  }
   0xa   :  { %s7865_s20 = smov 0   ;;  %s7867_s21 = smov 0  }
   0xb   :  { %s7869_s22 = smov 0  }
   0xc LB: > { %11615 = sst [smem:[#allocation8_spill]] %s7805_s18  ;;  %s28_s23 = sadd.s32 1, %s7813_s20  ;;  %s7821_s22 = sphi %s7869_s22, %s19_s22   ;;  %s7817_s21 = sphi %s7867_s21, %s11647_s21   ;;  %s7813_s20 = sphi %s7865_s20, %s11646_s20   ;;  %s7809_s19 = sphi %s7863_s19, %s11645_s19   ;;  %s7805_s18 = sphi %s7861_s18, %s11644_s18   ;;  %s7801_s17 = sphi %s7859_s17, %s11643_s17   ;;  %s7797_s16 = sphi %s7857_s16, %s11642_s16   ;;  %s7793_s15 = sphi %s7855_s15, %s11641_s15   ;;  %s7789_s14 = sphi %s7853_s14, %s11640_s14   ;;  %s7785_s13 = sphi %s7851_s13, %s11639_s13   ;;  %s7781_s12 = sphi %s7849_s12, %s11638_s12  }
   0xd   : > { %p7906_p0 = scmp.ge.s32.totalorder %s28_s23, 8  ;;  %p73_p1 = scmp.ne.s32.totalorder %s7801_s17, %s7797_s16 }
   0xe   : > { %p74_p2 = scmp.eq.s32.totalorder %s7821_s22, 0  ;;  %p7565_p4 = scmp.lt.s32.totalorder %s7821_s22, 16 }
   0xf   : > { %s11649_s23 = smov (%p7906_p0, %s28_s23), 0  ;;  %s164_s27 = sand.u32 1, %s7801_s17  }
  0x10   : > { %p75_p3 = por %p74_p2, %p73_p1  ;;  %s7552_s28 = smul.u32 25600, %s164_s27 }
  0x11   : > { %s7533_s29 = sshll.u32 %s7817_s21, 2  ;;  %s7550_s30 = smul.u32 6400, %s7813_s20 }
  0x12   : > { %p7927_p5 = pnand %p7565_p4, %p75_p3  ;;  %s168_s6 = scalar_lea.vmem [#allocation2], %s7552_s28 }
  0x13   : > { %s175_s5 = sadd.s32 %s7550_s30, %s7533_s29  ;;  %s178_s7 = sshll.u32 %s168_s6, 4  ;;  %s179_s7 = int_to_ptr.vmem [resolvable:$true] %s178_s7 }
  0x14   : > { %s7535_s8 = sshll.u32 %s175_s5, 7  ;;  %s11618_s1 = sld [smem:[#allocation12_spill]] }
  0x15   : > { %p7539_p6 = scmp.ge.s32.totalorder %s7821_s22, 1  ;;  %s165_s24 = scalar_lea.sflag [#allocation3], %s164_s27 }
  0x16   : > { %p7673_p7 = pneg %p7927_p5  ;;  %s7684_s26 = scalar_lea.vmem %s179_s7, 409600 }
  0x17   : > { %p7685_p8 = scmp.ne.s32.totalorder %s179_s7, %s7684_s26  ;;  %s7823_s0 = smov [#allocation2]  }
  0x18   : > { %s7689_s18 = sshll.u32 %s7823_s0, 4  ;;  %s7690_s18 = int_to_ptr.vmem [resolvable:$false] %s7689_s18 }
  0x19   : > { %p7687_p9 = pnand %p7685_p8, %p7673_p7  ;;  %s7691_s29 = scalar_lea.vmem %s7690_s18, 819200 }
  0x1a   : > { %s177_s11 = scalar_lea.hbm %s11618_s1, %s7535_s8  ;;  %p7692_p11 = scmp.lt.s32.totalorder %s179_s7, %s7690_s18 }
  0x1b   : > { %p7688_p10 = pneg %p7687_p9  ;;  %p7693_p12 = scmp.lt.s32.totalorder %s7691_s29, %s7684_s26 }
  0x1d   : > { %p7694_p13 = por %p7693_p12, %p7692_p11 }
  0x1f   : > { %p7695_p1 = pnand %p7694_p13, %p7688_p10 }
  0x21   : > { %7698 = shalt.err (!%p7695_p1)
}
  0x22   : > { %s7824_s28 = smov 1024   ;;  %s7825_s0 = smov 512  }
  0x23   : > { %s7826_s18 = smov 32   ;;  %p205_p3 = scmp.lt.s32.totalorder %s7821_s22, 17 }
  0x24   : > { %7561 = dma.hbm_to_vmem [thread:$0]  (!%p7927_p5), %s177_s11, 409600, %s179_s7, %s165_s24, %s7824_s28, %s7825_s0, %s7826_s18  }
  0x25   : > { %p7942_p7 = pnand %p7539_p6, %p205_p3  ;;  %s7529_s27 = sadd.s32 4294967295, %s7821_s22  }
  0x26   : > { %s31_s30 = sadd.s32 1, %s7817_s21  ;;  %p79_p8 = scmp.ne.s32.totalorder %s7797_s16, %s7793_s15 }
  0x27   : > { %s11651_s30 = smov (!%p7906_p0, %s31_s30), %s7817_s21  ;;  %p7953_p9 = scmp.eq.s32.totalorder %s7529_s27, 0 }
  0x28   : > { %p33_p5 = scmp.ge.s32.totalorder %s11651_s30, 2  ;;  %s92_s24 = sadd.s32 1, %s7789_s14 }
  0x29   : > { %p7960_p6 = por %p7953_p9, %p79_p8  ;;  %p99_p10 = scmp.ne.s32.totalorder %s7789_s14, %s7785_s13 }
  0x2a   : > { %s11653_s30 = smov (%p33_p5, %s11651_s30), 0  ;;  %p105_p11 = scmp.ne.s32.totalorder %s7785_s13, %s7781_s12 }
  0x2b   : > { %p7970_p0 = por %p99_p10, %p74_p2  ;;  %s62_s25 = ssub.s32 %s7817_s21, %s11653_s30 }
  0x2c   : > { %s188_s6 = sand.u32 1, %s7789_s14   ;;  %s11623_s7 = ssub.s32 %s7813_s20, %s11649_s23 }
  0x2d   : > { %s63_s8 = sor.u32 %s62_s25, %s11623_s7  ;;  %p90_p12 = scmp.eq.s32.totalorder %s62_s25, 0 }
  0x2e   : > { %p64_p13 = scmp.eq.s32.totalorder %s63_s8, 0  ;;  %p7984_p1 = por %p105_p11, %p7953_p9 }
  0x2f   : > { %s7989_s10 = scalar_select %p90_p12, %s7789_s14, %s92_s24  }
  0x30   : > { %s11625_s11 = sadd.s32 1, %s7801_s17  ;;  %s7536_s28 = sshll.u32 %s188_s6, 2 }
  0x31   : > { %s7994_s29 = scalar_select %p64_p13, %s7801_s17, %s11625_s11  }
  0x32   : > { %s7551_s0 = sshll.u32 %s7817_s21, 6  ;;  %s192_s1 = scalar_lea.vmem [#allocation4], %s7536_s28 }
  0x33   : > { %s198_s27 = scalar_lea.hbm %s11604_s2, %s7551_s0  ;;  %s200_s7 = sshll.u32 %s192_s1, 4  ;;  %s201_s7 = int_to_ptr.vmem [resolvable:$true] %s200_s7 }
  0x34   : > { %p8004_p2 = pnand %p7565_p4, %p7970_p0  ;;  %s189_s24 = scalar_lea.sflag [#allocation5], %s188_s6 }
  0x35   : > { %s7712_s25 = scalar_lea.vmem %s201_s7, 64  ;;  %s7827_s8 = smov [#allocation4]  }
  0x36   : > { %p7701_p3 = pneg %p8004_p2  ;;  %p7713_p8 = scmp.ne.s32.totalorder %s201_s7, %s7712_s25 }
  0x37   : > { %s7717_s11 = sshll.u32 %s7827_s8, 4  ;;  %s7718_s11 = int_to_ptr.vmem [resolvable:$false] %s7717_s11 }
  0x38   : > { %p7715_p9 = pnand %p7713_p8, %p7701_p3  ;;  %s7719_s28 = scalar_lea.vmem %s7718_s11, 128 }
  0x39   : > { %p7720_p10 = scmp.lt.s32.totalorder %s201_s7, %s7718_s11  ;;  %p7721_p11 = scmp.lt.s32.totalorder %s7719_s28, %s7712_s25 }
  0x3a   : > { %p7716_p5 = pneg %p7715_p9 }
  0x3b   : > { %p7722_p12 = por %p7721_p11, %p7720_p10 }
  0x3d   : > { %p7723_p13 = pnand %p7722_p12, %p7716_p5 }
  0x3f   : > { %7726 = shalt.err (!%p7723_p13)
}
  0x40   : > { %7564 = dma.hbm_to_vmem [thread:$0]  (!%p8004_p2), %s198_s27, 64, %s201_s7, %s189_s24  }
  0x41   : > { %209 = sbr.rel (%p7942_p7) target bundleno = 1987 (0x7c3), region = 32 }
  0x46   : > { %s211_s1 = sand.u32 1, %s7797_s16  }
  0x47   : > { %s7553_s15 = smul.u32 25600, %s211_s1  ;;  %s212_s6 = scalar_lea.sflag [#allocation3], %s211_s1 }
  0x49   : > { %s8015_s0 = scalar_lea.vmem [#allocation2], %s7553_s15 }
  0x4a   : > { %7772 = dma.done.wait (%p7960_p6), %s212_s6, 409600  }
  0x4b   : > { %7774 = vsyncadd (%p7960_p6), %s212_s6, 4294557696  ;;  %s220_s18 = sand.u32 1, %s7785_s13  }
  0x4c   : > { %s8022_s12 = sshll.u32 %s220_s18, 2  ;;  %s221_s26 = scalar_lea.sflag [#allocation5], %s220_s18 }
  0x4d   : > { %s224_s27 = scalar_lea.vmem [#allocation4], %s8022_s12 }
  0x4e   : > { %7776 = dma.done.wait (%p7984_p1), %s221_s26, 64  }
  0x4f   : > { %7778 = vsyncadd (%p7984_p1), %s221_s26, 4294967232  ;;  %s7542_s5 = sshll.u32 %s7809_s19, 2  ;;  %v346_v0 = vld [vmem:[%s8015_s0 + $0x1e8] sm:$0xff]  ;;  %v345_v2 = vld [vmem:[%s8015_s0 + $0x1e0] sm:$0xff]  ;;  %s11627_s19 = sld [smem:[#allocation8_spill]] }
  0x50   : > { %p267_p4 = scmp.lt.s32.totalorder %s7542_s5, 7  ;;  %v474_v1 = vld [vmem:[%s8015_s0 + $0x5e8] sm:$0xff]  ;;  %3760 = vmatprep.subr.mxu0 %v346_v0  ;;  %v473_v3 = vld [vmem:[%s8015_s0 + $0x5e0] sm:$0xff]  ;;  %s11629_s15 = sld [smem:[#allocation11_spill]] }
  0x51   : > { %3831 = vmatprep.subr.mxu1 %v474_v1  ;;  %v342_v4 = vld [vmem:[%s8015_s0 + $0x1c8] sm:$0xff]  ;;  %3761 = vmatpush1.msra.mxu0 %v345_v2  ;;  %v341_v6 = vld [vmem:[%s8015_s0 + $0x1c0] sm:$0xff] }
  0x52   : > { %s11655_s5 = smov (!%p267_p4, %s7542_s5), 7  ;;  %v470_v5 = vld [vmem:[%s8015_s0 + $0x5c8] sm:$0xff]  ;;  %3832 = vmatpush1.msra.mxu1 %v473_v3  ;;  %v469_v7 = vld [vmem:[%s8015_s0 + $0x5c0] sm:$0xff]  ;;  %3762 = vmatprep.subr.mxu0 %v342_v4 }
  0x53   : > { %s7543_s7 = sshll.u32 %s11655_s5, 1  ;;  %v338_v8 = vld [vmem:[%s8015_s0 + $0x1a8] sm:$0xff]  ;;  %3833 = vmatprep.subr.mxu1 %v470_v5  ;;  %v337_v10 = vld [vmem:[%s8015_s0 + $0x1a0] sm:$0xff]  ;;  %3763 = vmatpush1.msra.mxu0 %v341_v6 }
  0x54   : > { %s8033_s25 = scalar_lea.vmem %s11605_s3, %s7543_s7  ;;  %v466_v9 = vld [vmem:[%s8015_s0 + $0x5a8] sm:$0xff]  ;;  %v465_v11 = vld [vmem:[%s8015_s0 + $0x5a0] sm:$0xff]  ;;  %3834 = vmatpush1.msra.mxu1 %v469_v7  ;;  %3764 = vmatprep.subr.mxu0 %v338_v8 }
  0x55   : > { %v334_v12 = vld [vmem:[%s8015_s0 + $0x188] sm:$0xff]  ;;  %3835 = vmatprep.subr.mxu1 %v466_v9  ;;  %v333_v14 = vld [vmem:[%s8015_s0 + $0x180] sm:$0xff]  ;;  %3765 = vmatpush1.msra.mxu0 %v337_v10  ;;  %s257_s9 = smul.u32 50, %s11627_s19  ;;  %p7545_p6 = scmp.ne.s32.totalorder %s11627_s19, 0 }
  0x56   : > { %v462_v13 = vld [vmem:[%s8015_s0 + $0x588] sm:$0xff]  ;;  %v461_v15 = vld [vmem:[%s8015_s0 + $0x580] sm:$0xff]  ;;  %3836 = vmatpush1.msra.mxu1 %v465_v11  ;;  %3766 = vmatprep.subr.mxu0 %v334_v12 }
  0x57   : > { %v330_v16 = vld [vmem:[%s8015_s0 + $0x168] sm:$0xff]  ;;  %3837 = vmatprep.subr.mxu1 %v462_v13  ;;  %v329_v18 = vld [vmem:[%s8015_s0 + $0x160] sm:$0xff]  ;;  %3767 = vmatpush1.msra.mxu0 %v333_v14  ;;  %p8116_p7 = scmp.lt.s32.totalorder %s257_s9, 399 }
  0x58   : > { %v458_v17 = vld [vmem:[%s8015_s0 + $0x568] sm:$0xff]  ;;  %v457_v19 = vld [vmem:[%s8015_s0 + $0x560] sm:$0xff]  ;;  %3838 = vmatpush1.msra.mxu1 %v461_v15  ;;  %3768 = vmatprep.subr.mxu0 %v330_v16 }
  0x59   : > { %v326_v20 = vld [vmem:[%s8015_s0 + $0x148] sm:$0xff]  ;;  %3839 = vmatprep.subr.mxu1 %v458_v17  ;;  %v325_v22 = vld [vmem:[%s8015_s0 + $0x140] sm:$0xff]  ;;  %3769 = vmatpush1.msra.mxu0 %v329_v18  ;;  %s11657_s9 = smov (!%p8116_p7, %s257_s9), 399 }
  0x5a   : > { %v454_v21 = vld [vmem:[%s8015_s0 + $0x548] sm:$0xff]  ;;  %v453_v23 = vld [vmem:[%s8015_s0 + $0x540] sm:$0xff]  ;;  %3840 = vmatpush1.msra.mxu1 %v457_v19  ;;  %3770 = vmatprep.subr.mxu0 %v326_v20  ;;  %s7541_s11 = sshll.u32 %s11657_s9, 1 }
  0x5b   : > { %v322_v24 = vld [vmem:[%s8015_s0 + $0x128] sm:$0xff]  ;;  %3841 = vmatprep.subr.mxu1 %v454_v21  ;;  %v321_v26 = vld [vmem:[%s8015_s0 + $0x120] sm:$0xff]  ;;  %3771 = vmatpush1.msra.mxu0 %v325_v22  ;;  %s8152_s6 = scalar_lea.vmem %s11629_s15, %s7541_s11 }
  0x5c   : > { %v450_v25 = vld [vmem:[%s8015_s0 + $0x528] sm:$0xff]  ;;  %v449_v27 = vld [vmem:[%s8015_s0 + $0x520] sm:$0xff]  ;;  %3842 = vmatpush1.msra.mxu1 %v453_v23  ;;  %3772 = vmatprep.subr.mxu0 %v322_v24 }
  0x5d   : > { %v318_v28 = vld [vmem:[%s8015_s0 + $0x108] sm:$0xff]  ;;  %3843 = vmatprep.subr.mxu1 %v450_v25  ;;  %v317_v30 = vld [vmem:[%s8015_s0 + $0x100] sm:$0xff]  ;;  %3773 = vmatpush1.msra.mxu0 %v321_v26 }
  0x5e   : > { %v446_v29 = vld [vmem:[%s8015_s0 + $0x508] sm:$0xff]  ;;  %v445_v31 = vld [vmem:[%s8015_s0 + $0x500] sm:$0xff]  ;;  %3844 = vmatpush1.msra.mxu1 %v449_v27  ;;  %3774 = vmatprep.subr.mxu0 %v318_v28 }
  0x5f   : > { %v314_v32 = vld [vmem:[%s8015_s0 + $0xe8] sm:$0xff]  ;;  %3845 = vmatprep.subr.mxu1 %v446_v29  ;;  %v313_v34 = vld [vmem:[%s8015_s0 + $0xe0] sm:$0xff]  ;;  %3775 = vmatpush1.msra.mxu0 %v317_v30  ;;  %v7828_v30 = vmov 1983009808  }
  0x60   : > { %v442_v33 = vld [vmem:[%s8015_s0 + $0x4e8] sm:$0xff]  ;;  %v441_v35 = vld [vmem:[%s8015_s0 + $0x4e0] sm:$0xff]  ;;  %3846 = vmatpush1.msra.mxu1 %v445_v31  ;;  %3776 = vmatprep.subr.mxu0 %v314_v32  ;;  %v3500_v31 = vunpack.c.l.s4 %v7828_v30  ;;  %v3502_v32 = vlaneseq }
  0x61   : > { %v310_v36 = vld [vmem:[%s8015_s0 + $0xc8] sm:$0xff]  ;;  %3847 = vmatprep.subr.mxu1 %v442_v33  ;;  %v309_v38 = vld [vmem:[%s8015_s0 + $0xc0] sm:$0xff]  ;;  %3777 = vmatpush1.msra.mxu0 %v313_v34 }
  0x62   : > { %v438_v37 = vld [vmem:[%s8015_s0 + $0x4c8] sm:$0xff]  ;;  %v437_v39 = vld [vmem:[%s8015_s0 + $0x4c0] sm:$0xff]  ;;  %3848 = vmatpush1.msra.mxu1 %v441_v35  ;;  %3778 = vmatprep.subr.mxu0 %v310_v36 }
  0x63   : > { %v306_v40 = vld [vmem:[%s8015_s0 + $0xa8] sm:$0xff]  ;;  %3849 = vmatprep.subr.mxu1 %v438_v37  ;;  %v305_v42 = vld [vmem:[%s8015_s0 + $0xa0] sm:$0xff]  ;;  %3779 = vmatpush1.msra.mxu0 %v309_v38 }
  0x64   : > { %v434_v41 = vld [vmem:[%s8015_s0 + $0x4a8] sm:$0xff]  ;;  %v433_v43 = vld [vmem:[%s8015_s0 + $0x4a0] sm:$0xff]  ;;  %3850 = vmatpush1.msra.mxu1 %v437_v39  ;;  %3780 = vmatprep.subr.mxu0 %v306_v40 }
  0x65   : > { %v302_v44 = vld [vmem:[%s8015_s0 + $0x88] sm:$0xff]  ;;  %3851 = vmatprep.subr.mxu1 %v434_v41  ;;  %v301_v46 = vld [vmem:[%s8015_s0 + $0x80] sm:$0xff]  ;;  %3781 = vmatpush1.msra.mxu0 %v305_v42  ;;  %v3501_v41 = vunpack.c.0.s8 %v3500_v31  ;;  %v8156_v42 = vshrl.u32 %v3502_v32, 7 }
  0x66   : > { %v430_v45 = vld [vmem:[%s8015_s0 + $0x488] sm:$0xff]  ;;  %v429_v47 = vld [vmem:[%s8015_s0 + $0x480] sm:$0xff]  ;;  %3852 = vmatpush1.msra.mxu1 %v433_v43  ;;  %3782 = vmatprep.subr.mxu0 %v302_v44 }
  0x67   : > { %v298_v48 = vld [vmem:[%s8015_s0 + $0x68] sm:$0xff]  ;;  %3853 = vmatprep.subr.mxu1 %v430_v45  ;;  %v297_v50 = vld [vmem:[%s8015_s0 + $0x60] sm:$0xff]  ;;  %3783 = vmatpush1.msra.mxu0 %v301_v46  ;;  %11630 = vst [vmem:[#allocation9_spill] sm:$0xff] %v8156_v42 }
  0x68   : > { %v426_v49 = vld [vmem:[%s8015_s0 + $0x468] sm:$0xff]  ;;  %v425_v51 = vld [vmem:[%s8015_s0 + $0x460] sm:$0xff]  ;;  %3854 = vmatpush1.msra.mxu1 %v429_v47  ;;  %3784 = vmatprep.subr.mxu0 %v298_v48 }
  0x69   : > { %v294_v52 = vld [vmem:[%s8015_s0 + $0x48] sm:$0xff]  ;;  %3855 = vmatprep.subr.mxu1 %v426_v49  ;;  %v293_v54 = vld [vmem:[%s8015_s0 + $0x40] sm:$0xff]  ;;  %3785 = vmatpush1.msra.mxu0 %v297_v50 }
  0x6a   : > { %v422_v53 = vld [vmem:[%s8015_s0 + $0x448] sm:$0xff]  ;;  %v421_v55 = vld [vmem:[%s8015_s0 + $0x440] sm:$0xff]  ;;  %3856 = vmatpush1.msra.mxu1 %v425_v51  ;;  %3786 = vmatprep.subr.mxu0 %v294_v52  ;;  %v8168_v52 = vsub.s32 %v3501_v41, %v8156_v42  ;;  %v867_v42 = vld [vmem:[%s8015_s0 + $0x1230] sm:$0xff] }
  0x6b   : > { %v290_v56 = vld [vmem:[%s8015_s0 + $0x28] sm:$0xff]  ;;  %3857 = vmatprep.subr.mxu1 %v422_v53  ;;  %v289_v58 = vld [vmem:[%s8015_s0 + $0x20] sm:$0xff]  ;;  %3787 = vmatpush1.msra.mxu0 %v293_v54 }
  0x6c   : > { %v418_v57 = vld [vmem:[%s8015_s0 + $0x428] sm:$0xff]  ;;  %v417_v59 = vld [vmem:[%s8015_s0 + $0x420] sm:$0xff]  ;;  %3858 = vmatpush1.msra.mxu1 %v421_v55  ;;  %3788 = vmatprep.subr.mxu0 %v290_v56  ;;  %11631 = vst [vmem:[#allocation10_spill] sm:$0xff] %v8168_v52 }
  0x6d   : > { %v286_v60 = vld [vmem:[%s8015_s0 + $0x8] sm:$0xff]  ;;  %3859 = vmatprep.subr.mxu1 %v418_v57  ;;  %v285_v62 = vld [vmem:[%s8015_s0] sm:$0xff]  ;;  %3789 = vmatpush1.msra.mxu0 %v289_v58 }
  0x6e   : > { %v414_v61 = vld [vmem:[%s8015_s0 + $0x408] sm:$0xff]  ;;  %v413_v63 = vld [vmem:[%s8015_s0 + $0x400] sm:$0xff]  ;;  %3860 = vmatpush1.msra.mxu1 %v417_v59  ;;  %3790 = vmatprep.subr.mxu0 %v286_v60 }
  0x6f   : > { %v410_v0 = vld [vmem:[%s8015_s0 + $0x3e8] sm:$0xff]  ;;  %3861 = vmatprep.subr.mxu1 %v414_v61  ;;  %v409_v2 = vld [vmem:[%s8015_s0 + $0x3e0] sm:$0xff]  ;;  %3791 = vmatpush1.msra.mxu0 %v285_v62 }
  0x70   : > { %v538_v1 = vld [vmem:[%s8015_s0 + $0x7e8] sm:$0xff]  ;;  %v537_v3 = vld [vmem:[%s8015_s0 + $0x7e0] sm:$0xff]  ;;  %3862 = vmatpush1.msra.mxu1 %v413_v63  ;;  %3792 = vmatprep.subr.mxu0 %v410_v0 }
  0x71   : > { %v406_v4 = vld [vmem:[%s8015_s0 + $0x3c8] sm:$0xff]  ;;  %3863 = vmatprep.subr.mxu1 %v538_v1  ;;  %v405_v6 = vld [vmem:[%s8015_s0 + $0x3c0] sm:$0xff]  ;;  %3793 = vmatpush2.msra.mxu0 %v409_v2 }
  0x72   : > { %v534_v5 = vld [vmem:[%s8015_s0 + $0x7c8] sm:$0xff]  ;;  %v533_v7 = vld [vmem:[%s8015_s0 + $0x7c0] sm:$0xff]  ;;  %3864 = vmatpush2.msra.mxu1 %v537_v3  ;;  %3794 = vmatprep.subr.mxu0 %v406_v4 }
  0x73   : > { %v402_v8 = vld [vmem:[%s8015_s0 + $0x3a8] sm:$0xff]  ;;  %3865 = vmatprep.subr.mxu1 %v534_v5  ;;  %v401_v10 = vld [vmem:[%s8015_s0 + $0x3a0] sm:$0xff]  ;;  %3795 = vmatpush2.msra.mxu0 %v405_v6 }
  0x74   : > { %v530_v9 = vld [vmem:[%s8015_s0 + $0x7a8] sm:$0xff]  ;;  %v529_v11 = vld [vmem:[%s8015_s0 + $0x7a0] sm:$0xff]  ;;  %3866 = vmatpush2.msra.mxu1 %v533_v7  ;;  %3796 = vmatprep.subr.mxu0 %v402_v8 }
  0x75   : > { %v398_v12 = vld [vmem:[%s8015_s0 + $0x388] sm:$0xff]  ;;  %3867 = vmatprep.subr.mxu1 %v530_v9  ;;  %v397_v14 = vld [vmem:[%s8015_s0 + $0x380] sm:$0xff]  ;;  %3797 = vmatpush2.msra.mxu0 %v401_v10 }
  0x76   : > { %v526_v13 = vld [vmem:[%s8015_s0 + $0x788] sm:$0xff]  ;;  %v525_v15 = vld [vmem:[%s8015_s0 + $0x780] sm:$0xff]  ;;  %3868 = vmatpush2.msra.mxu1 %v529_v11  ;;  %3798 = vmatprep.subr.mxu0 %v398_v12 }
  0x77   : > { %v394_v16 = vld [vmem:[%s8015_s0 + $0x368] sm:$0xff]  ;;  %3869 = vmatprep.subr.mxu1 %v526_v13  ;;  %v393_v18 = vld [vmem:[%s8015_s0 + $0x360] sm:$0xff]  ;;  %3799 = vmatpush2.msra.mxu0 %v397_v14 }
  0x78   : > { %v522_v17 = vld [vmem:[%s8015_s0 + $0x768] sm:$0xff]  ;;  %v521_v19 = vld [vmem:[%s8015_s0 + $0x760] sm:$0xff]  ;;  %3870 = vmatpush2.msra.mxu1 %v525_v15  ;;  %3800 = vmatprep.subr.mxu0 %v394_v16 }
  0x79   : > { %v390_v20 = vld [vmem:[%s8015_s0 + $0x348] sm:$0xff]  ;;  %3871 = vmatprep.subr.mxu1 %v522_v17  ;;  %v389_v22 = vld [vmem:[%s8015_s0 + $0x340] sm:$0xff]  ;;  %3801 = vmatpush2.msra.mxu0 %v393_v18 }
  0x7a   : > { %v518_v21 = vld [vmem:[%s8015_s0 + $0x748] sm:$0xff]  ;;  %v517_v23 = vld [vmem:[%s8015_s0 + $0x740] sm:$0xff]  ;;  %3872 = vmatpush2.msra.mxu1 %v521_v19  ;;  %3802 = vmatprep.subr.mxu0 %v390_v20 }
  0x7b   : > { %v386_v24 = vld [vmem:[%s8015_s0 + $0x328] sm:$0xff]  ;;  %3873 = vmatprep.subr.mxu1 %v518_v21  ;;  %v385_v26 = vld [vmem:[%s8015_s0 + $0x320] sm:$0xff]  ;;  %3803 = vmatpush2.msra.mxu0 %v389_v22 }
  0x7c   : > { %v514_v25 = vld [vmem:[%s8015_s0 + $0x728] sm:$0xff]  ;;  %v513_v27 = vld [vmem:[%s8015_s0 + $0x720] sm:$0xff]  ;;  %3874 = vmatpush2.msra.mxu1 %v517_v23  ;;  %3804 = vmatprep.subr.mxu0 %v386_v24 }
  0x7d   : > { %v382_v28 = vld [vmem:[%s8015_s0 + $0x308] sm:$0xff]  ;;  %3875 = vmatprep.subr.mxu1 %v514_v25  ;;  %v381_v33 = vld [vmem:[%s8015_s0 + $0x300] sm:$0xff]  ;;  %3805 = vmatpush2.msra.mxu0 %v385_v26 }
  0x7e   : > { %v510_v29 = vld [vmem:[%s8015_s0 + $0x708] sm:$0xff]  ;;  %v509_v34 = vld [vmem:[%s8015_s0 + $0x700] sm:$0xff]  ;;  %3876 = vmatpush2.msra.mxu1 %v513_v27  ;;  %3806 = vmatprep.subr.mxu0 %v382_v28 }
  0x7f   : > { %v378_v35 = vld [vmem:[%s8015_s0 + $0x2e8] sm:$0xff]  ;;  %3877 = vmatprep.subr.mxu1 %v510_v29  ;;  %v377_v37 = vld [vmem:[%s8015_s0 + $0x2e0] sm:$0xff]  ;;  %3807 = vmatpush2.msra.mxu0 %v381_v33 }
  0x80   : > { %v506_v36 = vld [vmem:[%s8015_s0 + $0x6e8] sm:$0xff]  ;;  %v505_v38 = vld [vmem:[%s8015_s0 + $0x6e0] sm:$0xff]  ;;  %3878 = vmatpush2.msra.mxu1 %v509_v34  ;;  %3808 = vmatprep.subr.mxu0 %v378_v35 }
  0x81   : > { %v374_v39 = vld [vmem:[%s8015_s0 + $0x2c8] sm:$0xff]  ;;  %3879 = vmatprep.subr.mxu1 %v506_v36  ;;  %v373_v43 = vld [vmem:[%s8015_s0 + $0x2c0] sm:$0xff]  ;;  %3809 = vmatpush2.msra.mxu0 %v377_v37 }
  0x82   : > { %v502_v40 = vld [vmem:[%s8015_s0 + $0x6c8] sm:$0xff]  ;;  %v501_v44 = vld [vmem:[%s8015_s0 + $0x6c0] sm:$0xff]  ;;  %3880 = vmatpush2.msra.mxu1 %v505_v38  ;;  %3810 = vmatprep.subr.mxu0 %v374_v39 }
  0x83   : > { %v370_v45 = vld [vmem:[%s8015_s0 + $0x2a8] sm:$0xff]  ;;  %v272_v47 = vld [vmem:[%s8152_s6] sm:$0xff]  ;;  %3881 = vmatprep.subr.mxu1 %v502_v40  ;;  %3811 = vmatpush2.msra.mxu0 %v373_v43 }
  0x84   : > { %v498_v46 = vld [vmem:[%s8015_s0 + $0x6a8] sm:$0xff]  ;;  %v369_v48 = vld [vmem:[%s8015_s0 + $0x2a0] sm:$0xff]  ;;  %3882 = vmatpush2.msra.mxu1 %v501_v44  ;;  %3812 = vmatprep.subr.mxu0 %v370_v45  ;;  %v3498_v55 = vcombine.high %v272_v47, %v272_v47  ;;  %v8179_v62 = vrot.slane %v272_v47, %v8168_v52 }
  0x85   : > { %v497_v49 = vld [vmem:[%s8015_s0 + $0x6a0] sm:$0xff]  ;;  %v366_v50 = vld [vmem:[%s8015_s0 + $0x288] sm:$0xff]  ;;  %3883 = vmatprep.subr.mxu1 %v498_v46  ;;  %3813 = vmatpush2.msra.mxu0 %v369_v48 }
  0x86   : > { %v494_v51 = vld [vmem:[%s8015_s0 + $0x688] sm:$0xff]  ;;  %v365_v53 = vld [vmem:[%s8015_s0 + $0x280] sm:$0xff]  ;;  %3884 = vmatpush2.msra.mxu1 %v497_v49  ;;  %3814 = vmatprep.subr.mxu0 %v366_v50  ;;  %v8184_v1 = vrot.slane %v3498_v55, %v8168_v52  ;;  %v8194_v8 = vcombine.high %v8179_v62, %v8179_v62 }
  0x87   : > { %v493_v54 = vld [vmem:[%s8015_s0 + $0x680] sm:$0xff]  ;;  %v362_v56 = vld [vmem:[%s8015_s0 + $0x268] sm:$0xff]  ;;  %3885 = vmatprep.subr.mxu1 %v494_v51  ;;  %3815 = vmatpush2.msra.mxu0 %v365_v53 }
  0x88   : > { %v490_v57 = vld [vmem:[%s8015_s0 + $0x668] sm:$0xff]  ;;  %v361_v58 = vld [vmem:[%s8015_s0 + $0x260] sm:$0xff]  ;;  %3886 = vmatpush2.msra.mxu1 %v493_v54  ;;  %3816 = vmatprep.subr.mxu0 %v362_v56  ;;  %v8199_v10 = vcombine.high %v8184_v1, %v8184_v1 }
  0x89   : > { %v489_v59 = vld [vmem:[%s8015_s0 + $0x660] sm:$0xff]  ;;  %v358_v60 = vld [vmem:[%s8015_s0 + $0x248] sm:$0xff]  ;;  %3887 = vmatprep.subr.mxu1 %v490_v57  ;;  %3817 = vmatpush2.msra.mxu0 %v361_v58 }
  0x8a   : > { %v486_v61 = vld [vmem:[%s8015_s0 + $0x648] sm:$0xff]  ;;  %v357_v63 = vld [vmem:[%s8015_s0 + $0x240] sm:$0xff]  ;;  %3888 = vmatpush2.msra.mxu1 %v489_v59  ;;  %3818 = vmatprep.subr.mxu0 %v358_v60 }
  0x8b   : > { %v485_v0 = vld [vmem:[%s8015_s0 + $0x640] sm:$0xff]  ;;  %v354_v2 = vld [vmem:[%s8015_s0 + $0x228] sm:$0xff]  ;;  %3889 = vmatprep.subr.mxu1 %v486_v61  ;;  %3819 = vmatpush2.msra.mxu0 %v357_v63 }
  0x8c   : > { %v482_v3 = vld [vmem:[%s8015_s0 + $0x628] sm:$0xff]  ;;  %v353_v4 = vld [vmem:[%s8015_s0 + $0x220] sm:$0xff]  ;;  %3890 = vmatpush2.msra.mxu1 %v485_v0  ;;  %3820 = vmatprep.subr.mxu0 %v354_v2 }
  0x8d   : > { %v481_v5 = vld [vmem:[%s8015_s0 + $0x620] sm:$0xff]  ;;  %v350_v6 = vld [vmem:[%s8015_s0 + $0x208] sm:$0xff]  ;;  %3891 = vmatprep.subr.mxu1 %v482_v3  ;;  %3821 = vmatpush2.msra.mxu0 %v353_v4 }
  0x8e   : > { %v478_v7 = vld [vmem:[%s8015_s0 + $0x608] sm:$0xff]  ;;  %v349_v9 = vld [vmem:[%s8015_s0 + $0x200] sm:$0xff]  ;;  %3892 = vmatpush2.msra.mxu1 %v481_v5  ;;  %3822 = vmatprep.subr.mxu0 %v350_v6 }
  0x8f   : > { %v477_v11 = vld [vmem:[%s8015_s0 + $0x600] sm:$0xff]  ;;  %3893 = vmatprep.subr.mxu1 %v478_v7  ;;  %3823 = vmatpush2.msra.mxu0 %v349_v9  ;;  %v602_v12 = vld [vmem:[%s8015_s0 + $0x9e8] sm:$0xff] }
  0x90   : > { %3824 = vmatprep.mubr.f32.mxu0 %v8194_v8  ;;  %v730_v13 = vld [vmem:[%s8015_s0 + $0xde8] sm:$0xff]  ;;  %3894 = vmatpush2.msra.mxu1 %v477_v11  ;;  %v601_v14 = vld [vmem:[%s8015_s0 + $0x9e0] sm:$0xff] }
  0x91   : > { %3895 = vmatprep.mubr.f32.mxu1 %v8199_v10  ;;  %v729_v15 = vld [vmem:[%s8015_s0 + $0xde0] sm:$0xff]  ;;  %3825 = vmatmul.mubr.f32.vlgmr.msra.gmra.mxu0 %v8179_v62  ;;  %v598_v16 = vld [vmem:[%s8015_s0 + $0x9c8] sm:$0xff] }
  0x92   : > { %3896 = vmatmul.mubr.f32.vlgmr.msra.gmra.mxu1 %v8184_v1  ;;  %v726_v17 = vld [vmem:[%s8015_s0 + $0xdc8] sm:$0xff]  ;;  %3902 = vmatprep.subr.mxu0 %v602_v12  ;;  %v597_v18 = vld [vmem:[%s8015_s0 + $0x9c0] sm:$0xff] }
  0x93   : > { %3973 = vmatprep.subr.mxu1 %v730_v13  ;;  %v725_v19 = vld [vmem:[%s8015_s0 + $0xdc0] sm:$0xff]  ;;  %3903 = vmatpush1.msra.mxu0 %v601_v14  ;;  %v594_v20 = vld [vmem:[%s8015_s0 + $0x9a8] sm:$0xff] }
  0x94   : > { %3974 = vmatpush1.msra.mxu1 %v729_v15  ;;  %v722_v21 = vld [vmem:[%s8015_s0 + $0xda8] sm:$0xff]  ;;  %3904 = vmatprep.subr.mxu0 %v598_v16  ;;  %v593_v22 = vld [vmem:[%s8015_s0 + $0x9a0] sm:$0xff] }
  0x95   : > { %3975 = vmatprep.subr.mxu1 %v726_v17  ;;  %v721_v23 = vld [vmem:[%s8015_s0 + $0xda0] sm:$0xff]  ;;  %3905 = vmatpush1.msra.mxu0 %v597_v18  ;;  %v590_v24 = vld [vmem:[%s8015_s0 + $0x988] sm:$0xff] }
  0x96   : > { %3976 = vmatpush1.msra.mxu1 %v725_v19  ;;  %v718_v25 = vld [vmem:[%s8015_s0 + $0xd88] sm:$0xff]  ;;  %3906 = vmatprep.subr.mxu0 %v594_v20  ;;  %v589_v26 = vld [vmem:[%s8015_s0 + $0x980] sm:$0xff] }
  0x97   : > { %3977 = vmatprep.subr.mxu1 %v722_v21  ;;  %v717_v27 = vld [vmem:[%s8015_s0 + $0xd80] sm:$0xff]  ;;  %3907 = vmatpush1.msra.mxu0 %v593_v22  ;;  %v586_v28 = vld [vmem:[%s8015_s0 + $0x968] sm:$0xff] }
  0x98   : > { %3978 = vmatpush1.msra.mxu1 %v721_v23  ;;  %v714_v29 = vld [vmem:[%s8015_s0 + $0xd68] sm:$0xff]  ;;  %3908 = vmatprep.subr.mxu0 %v590_v24  ;;  %v585_v30 = vld [vmem:[%s8015_s0 + $0x960] sm:$0xff] }
  0x99   : > { %3979 = vmatprep.subr.mxu1 %v718_v25  ;;  %v713_v31 = vld [vmem:[%s8015_s0 + $0xd60] sm:$0xff]  ;;  %3909 = vmatpush1.msra.mxu0 %v589_v26  ;;  %v582_v32 = vld [vmem:[%s8015_s0 + $0x948] sm:$0xff] }
  0x9a   : > { %3980 = vmatpush1.msra.mxu1 %v717_v27  ;;  %v710_v33 = vld [vmem:[%s8015_s0 + $0xd48] sm:$0xff]  ;;  %3910 = vmatprep.subr.mxu0 %v586_v28  ;;  %v581_v34 = vld [vmem:[%s8015_s0 + $0x940] sm:$0xff] }
  0x9b   : > { %3981 = vmatprep.subr.mxu1 %v714_v29  ;;  %v709_v35 = vld [vmem:[%s8015_s0 + $0xd40] sm:$0xff]  ;;  %3911 = vmatpush1.msra.mxu0 %v585_v30  ;;  %v578_v36 = vld [vmem:[%s8015_s0 + $0x928] sm:$0xff] }
  0x9c   : > { %3982 = vmatpush1.msra.mxu1 %v713_v31  ;;  %v706_v37 = vld [vmem:[%s8015_s0 + $0xd28] sm:$0xff]  ;;  %3912 = vmatprep.subr.mxu0 %v582_v32  ;;  %v577_v38 = vld [vmem:[%s8015_s0 + $0x920] sm:$0xff] }
  0x9d   : > { %3983 = vmatprep.subr.mxu1 %v710_v33  ;;  %v705_v39 = vld [vmem:[%s8015_s0 + $0xd20] sm:$0xff]  ;;  %3913 = vmatpush1.msra.mxu0 %v581_v34  ;;  %v574_v40 = vld [vmem:[%s8015_s0 + $0x908] sm:$0xff] }
  0x9e   : > { %3984 = vmatpush1.msra.mxu1 %v709_v35  ;;  %v702_v41 = vld [vmem:[%s8015_s0 + $0xd08] sm:$0xff]  ;;  %3914 = vmatprep.subr.mxu0 %v578_v36  ;;  %v573_v43 = vld [vmem:[%s8015_s0 + $0x900] sm:$0xff] }
  0x9f   : > { %3985 = vmatprep.subr.mxu1 %v706_v37  ;;  %v701_v44 = vld [vmem:[%s8015_s0 + $0xd00] sm:$0xff]  ;;  %3915 = vmatpush1.msra.mxu0 %v577_v38  ;;  %v570_v45 = vld [vmem:[%s8015_s0 + $0x8e8] sm:$0xff] }
  0xa0   : > { %3986 = vmatpush1.msra.mxu1 %v705_v39  ;;  %v698_v46 = vld [vmem:[%s8015_s0 + $0xce8] sm:$0xff]  ;;  %3916 = vmatprep.subr.mxu0 %v574_v40  ;;  %v569_v47 = vld [vmem:[%s8015_s0 + $0x8e0] sm:$0xff] }
  0xa1   : > { %3987 = vmatprep.subr.mxu1 %v702_v41  ;;  %v697_v48 = vld [vmem:[%s8015_s0 + $0xce0] sm:$0xff]  ;;  %3917 = vmatpush1.msra.mxu0 %v573_v43  ;;  %v566_v49 = vld [vmem:[%s8015_s0 + $0x8c8] sm:$0xff] }
  0xa2   : > { %3988 = vmatpush1.msra.mxu1 %v701_v44  ;;  %v694_v50 = vld [vmem:[%s8015_s0 + $0xcc8] sm:$0xff]  ;;  %3918 = vmatprep.subr.mxu0 %v570_v45  ;;  %v565_v51 = vld [vmem:[%s8015_s0 + $0x8c0] sm:$0xff] }
  0xa3   : > { %3989 = vmatprep.subr.mxu1 %v698_v46  ;;  %v693_v53 = vld [vmem:[%s8015_s0 + $0xcc0] sm:$0xff]  ;;  %3919 = vmatpush1.msra.mxu0 %v569_v47  ;;  %v562_v54 = vld [vmem:[%s8015_s0 + $0x8a8] sm:$0xff] }
  0xa4   : > { %3990 = vmatpush1.msra.mxu1 %v697_v48  ;;  %v690_v55 = vld [vmem:[%s8015_s0 + $0xca8] sm:$0xff]  ;;  %3920 = vmatprep.subr.mxu0 %v566_v49  ;;  %v561_v56 = vld [vmem:[%s8015_s0 + $0x8a0] sm:$0xff] }
  0xa5   : > { %3991 = vmatprep.subr.mxu1 %v694_v50  ;;  %v689_v57 = vld [vmem:[%s8015_s0 + $0xca0] sm:$0xff]  ;;  %3921 = vmatpush1.msra.mxu0 %v565_v51  ;;  %v558_v58 = vld [vmem:[%s8015_s0 + $0x888] sm:$0xff] }
  0xa6   : > { %3992 = vmatpush1.msra.mxu1 %v693_v53  ;;  %v686_v59 = vld [vmem:[%s8015_s0 + $0xc88] sm:$0xff]  ;;  %3922 = vmatprep.subr.mxu0 %v562_v54  ;;  %v557_v60 = vld [vmem:[%s8015_s0 + $0x880] sm:$0xff] }
  0xa7   : > { %3993 = vmatprep.subr.mxu1 %v690_v55  ;;  %v685_v61 = vld [vmem:[%s8015_s0 + $0xc80] sm:$0xff]  ;;  %3923 = vmatpush1.msra.mxu0 %v561_v56  ;;  %v554_v63 = vld [vmem:[%s8015_s0 + $0x868] sm:$0xff] }
  0xa8   : > { %3994 = vmatpush1.msra.mxu1 %v689_v57  ;;  %v682_v0 = vld [vmem:[%s8015_s0 + $0xc68] sm:$0xff]  ;;  %3924 = vmatprep.subr.mxu0 %v558_v58  ;;  %v553_v2 = vld [vmem:[%s8015_s0 + $0x860] sm:$0xff] }
  0xa9   : > { %3995 = vmatprep.subr.mxu1 %v686_v59  ;;  %v681_v3 = vld [vmem:[%s8015_s0 + $0xc60] sm:$0xff]  ;;  %3925 = vmatpush1.msra.mxu0 %v557_v60  ;;  %v550_v4 = vld [vmem:[%s8015_s0 + $0x848] sm:$0xff] }
  0xaa   : > { %3996 = vmatpush1.msra.mxu1 %v685_v61  ;;  %v678_v5 = vld [vmem:[%s8015_s0 + $0xc48] sm:$0xff]  ;;  %3926 = vmatprep.subr.mxu0 %v554_v63  ;;  %v549_v6 = vld [vmem:[%s8015_s0 + $0x840] sm:$0xff] }
  0xab   : > { %3997 = vmatprep.subr.mxu1 %v682_v0  ;;  %v677_v7 = vld [vmem:[%s8015_s0 + $0xc40] sm:$0xff]  ;;  %3927 = vmatpush1.msra.mxu0 %v553_v2  ;;  %v546_v9 = vld [vmem:[%s8015_s0 + $0x828] sm:$0xff] }
  0xac   : > { %3998 = vmatpush1.msra.mxu1 %v681_v3  ;;  %v674_v11 = vld [vmem:[%s8015_s0 + $0xc28] sm:$0xff]  ;;  %3928 = vmatprep.subr.mxu0 %v550_v4  ;;  %v545_v12 = vld [vmem:[%s8015_s0 + $0x820] sm:$0xff] }
  0xad   : > { %3999 = vmatprep.subr.mxu1 %v678_v5  ;;  %v673_v13 = vld [vmem:[%s8015_s0 + $0xc20] sm:$0xff]  ;;  %3929 = vmatpush1.msra.mxu0 %v549_v6  ;;  %v542_v14 = vld [vmem:[%s8015_s0 + $0x808] sm:$0xff] }
  0xae   : > { %4000 = vmatpush1.msra.mxu1 %v677_v7  ;;  %v670_v15 = vld [vmem:[%s8015_s0 + $0xc08] sm:$0xff]  ;;  %3930 = vmatprep.subr.mxu0 %v546_v9  ;;  %v541_v16 = vld [vmem:[%s8015_s0 + $0x800] sm:$0xff] }
  0xaf   : > { %4001 = vmatprep.subr.mxu1 %v674_v11  ;;  %v669_v17 = vld [vmem:[%s8015_s0 + $0xc00] sm:$0xff]  ;;  %3931 = vmatpush1.msra.mxu0 %v545_v12  ;;  %v666_v18 = vld [vmem:[%s8015_s0 + $0xbe8] sm:$0xff] }
  0xb0   : > { %4002 = vmatpush1.msra.mxu1 %v673_v13  ;;  %v794_v19 = vld [vmem:[%s8015_s0 + $0xfe8] sm:$0xff]  ;;  %3932 = vmatprep.subr.mxu0 %v542_v14  ;;  %v665_v20 = vld [vmem:[%s8015_s0 + $0xbe0] sm:$0xff] }
  0xb1   : > { %4003 = vmatprep.subr.mxu1 %v670_v15  ;;  %v793_v21 = vld [vmem:[%s8015_s0 + $0xfe0] sm:$0xff]  ;;  %3933 = vmatpush1.msra.mxu0 %v541_v16  ;;  %v662_v22 = vld [vmem:[%s8015_s0 + $0xbc8] sm:$0xff] }
  0xb2   : > { %4004 = vmatpush1.msra.mxu1 %v669_v17  ;;  %v790_v23 = vld [vmem:[%s8015_s0 + $0xfc8] sm:$0xff]  ;;  %3934 = vmatprep.subr.mxu0 %v666_v18  ;;  %v661_v24 = vld [vmem:[%s8015_s0 + $0xbc0] sm:$0xff] }
  0xb3   : > { %4005 = vmatprep.subr.mxu1 %v794_v19  ;;  %v789_v25 = vld [vmem:[%s8015_s0 + $0xfc0] sm:$0xff]  ;;  %3935 = vmatpush2.msra.mxu0 %v665_v20  ;;  %v658_v26 = vld [vmem:[%s8015_s0 + $0xba8] sm:$0xff] }
  0xb4   : > { %4006 = vmatpush2.msra.mxu1 %v793_v21  ;;  %v786_v27 = vld [vmem:[%s8015_s0 + $0xfa8] sm:$0xff]  ;;  %3936 = vmatprep.subr.mxu0 %v662_v22  ;;  %v657_v28 = vld [vmem:[%s8015_s0 + $0xba0] sm:$0xff] }
  0xb5   : > { %4007 = vmatprep.subr.mxu1 %v790_v23  ;;  %v785_v29 = vld [vmem:[%s8015_s0 + $0xfa0] sm:$0xff]  ;;  %3937 = vmatpush2.msra.mxu0 %v661_v24  ;;  %v654_v30 = vld [vmem:[%s8015_s0 + $0xb88] sm:$0xff] }
  0xb6   : > { %4008 = vmatpush2.msra.mxu1 %v789_v25  ;;  %v782_v31 = vld [vmem:[%s8015_s0 + $0xf88] sm:$0xff]  ;;  %3938 = vmatprep.subr.mxu0 %v658_v26  ;;  %v653_v32 = vld [vmem:[%s8015_s0 + $0xb80] sm:$0xff] }
  0xb7   : > { %4009 = vmatprep.subr.mxu1 %v786_v27  ;;  %v781_v33 = vld [vmem:[%s8015_s0 + $0xf80] sm:$0xff]  ;;  %3939 = vmatpush2.msra.mxu0 %v657_v28  ;;  %v650_v34 = vld [vmem:[%s8015_s0 + $0xb68] sm:$0xff] }
  0xb8   : > { %4010 = vmatpush2.msra.mxu1 %v785_v29  ;;  %v778_v35 = vld [vmem:[%s8015_s0 + $0xf68] sm:$0xff]  ;;  %3940 = vmatprep.subr.mxu0 %v654_v30  ;;  %v649_v36 = vld [vmem:[%s8015_s0 + $0xb60] sm:$0xff] }
  0xb9   : > { %4011 = vmatprep.subr.mxu1 %v782_v31  ;;  %v777_v37 = vld [vmem:[%s8015_s0 + $0xf60] sm:$0xff]  ;;  %3941 = vmatpush2.msra.mxu0 %v653_v32  ;;  %v646_v38 = vld [vmem:[%s8015_s0 + $0xb48] sm:$0xff] }
  0xba   : > { %4012 = vmatpush2.msra.mxu1 %v781_v33  ;;  %v774_v39 = vld [vmem:[%s8015_s0 + $0xf48] sm:$0xff]  ;;  %3942 = vmatprep.subr.mxu0 %v650_v34  ;;  %v645_v40 = vld [vmem:[%s8015_s0 + $0xb40] sm:$0xff] }
  0xbb   : > { %4013 = vmatprep.subr.mxu1 %v778_v35  ;;  %v773_v41 = vld [vmem:[%s8015_s0 + $0xf40] sm:$0xff]  ;;  %3943 = vmatpush2.msra.mxu0 %v649_v36  ;;  %v642_v43 = vld [vmem:[%s8015_s0 + $0xb28] sm:$0xff] }
  0xbc   : > { %4014 = vmatpush2.msra.mxu1 %v777_v37  ;;  %v770_v44 = vld [vmem:[%s8015_s0 + $0xf28] sm:$0xff]  ;;  %3944 = vmatprep.subr.mxu0 %v646_v38  ;;  %v641_v45 = vld [vmem:[%s8015_s0 + $0xb20] sm:$0xff] }
  0xbd   : > { %4015 = vmatprep.subr.mxu1 %v774_v39  ;;  %v769_v46 = vld [vmem:[%s8015_s0 + $0xf20] sm:$0xff]  ;;  %3945 = vmatpush2.msra.mxu0 %v645_v40  ;;  %v638_v47 = vld [vmem:[%s8015_s0 + $0xb08] sm:$0xff] }
  0xbe   : > { %4016 = vmatpush2.msra.mxu1 %v773_v41  ;;  %v766_v48 = vld [vmem:[%s8015_s0 + $0xf08] sm:$0xff]  ;;  %3946 = vmatprep.subr.mxu0 %v642_v43  ;;  %v637_v49 = vld [vmem:[%s8015_s0 + $0xb00] sm:$0xff] }
  0xbf   : > { %4017 = vmatprep.subr.mxu1 %v770_v44  ;;  %v765_v50 = vld [vmem:[%s8015_s0 + $0xf00] sm:$0xff]  ;;  %3947 = vmatpush2.msra.mxu0 %v641_v45  ;;  %v634_v51 = vld [vmem:[%s8015_s0 + $0xae8] sm:$0xff] }
  0xc0   : > { %4018 = vmatpush2.msra.mxu1 %v769_v46  ;;  %v762_v53 = vld [vmem:[%s8015_s0 + $0xee8] sm:$0xff]  ;;  %3948 = vmatprep.subr.mxu0 %v638_v47  ;;  %v633_v54 = vld [vmem:[%s8015_s0 + $0xae0] sm:$0xff] }
  0xc1   : > { %4019 = vmatprep.subr.mxu1 %v766_v48  ;;  %v761_v55 = vld [vmem:[%s8015_s0 + $0xee0] sm:$0xff]  ;;  %3949 = vmatpush2.msra.mxu0 %v637_v49  ;;  %v630_v56 = vld [vmem:[%s8015_s0 + $0xac8] sm:$0xff] }
  0xc2   : > { %4020 = vmatpush2.msra.mxu1 %v765_v50  ;;  %v758_v57 = vld [vmem:[%s8015_s0 + $0xec8] sm:$0xff]  ;;  %3950 = vmatprep.subr.mxu0 %v634_v51  ;;  %v629_v58 = vld [vmem:[%s8015_s0 + $0xac0] sm:$0xff] }
  0xc3   : > { %4021 = vmatprep.subr.mxu1 %v762_v53  ;;  %v757_v59 = vld [vmem:[%s8015_s0 + $0xec0] sm:$0xff]  ;;  %3951 = vmatpush2.msra.mxu0 %v633_v54  ;;  %v626_v60 = vld [vmem:[%s8015_s0 + $0xaa8] sm:$0xff] }
  0xc4   : > { %4022 = vmatpush2.msra.mxu1 %v761_v55  ;;  %v754_v61 = vld [vmem:[%s8015_s0 + $0xea8] sm:$0xff]  ;;  %3952 = vmatprep.subr.mxu0 %v630_v56  ;;  %v625_v63 = vld [vmem:[%s8015_s0 + $0xaa0] sm:$0xff] }
  0xc5   : > { %4023 = vmatprep.subr.mxu1 %v758_v57  ;;  %v753_v0 = vld [vmem:[%s8015_s0 + $0xea0] sm:$0xff]  ;;  %v273_v2 = vld [vmem:[%s8152_s6 + $0x8] sm:$0xff]  ;;  %3953 = vmatpush2.msra.mxu0 %v629_v58 }
  0xc6   : > { %4024 = vmatpush2.msra.mxu1 %v757_v59  ;;  %v622_v3 = vld [vmem:[%s8015_s0 + $0xa88] sm:$0xff]  ;;  %3954 = vmatprep.subr.mxu0 %v626_v60  ;;  %v621_v5 = vld [vmem:[%s8015_s0 + $0xa80] sm:$0xff]  ;;  %v3515_v11 = vcombine.high %v273_v2, %v273_v2  ;;  %v8326_v16 = vrot.slane %v273_v2, %v8168_v52 }
  0xc7   : > { %v750_v4 = vld [vmem:[%s8015_s0 + $0xe88] sm:$0xff]  ;;  %4025 = vmatprep.subr.mxu1 %v754_v61  ;;  %v749_v6 = vld [vmem:[%s8015_s0 + $0xe80] sm:$0xff]  ;;  %3955 = vmatpush2.msra.mxu0 %v625_v63 }
  0xc8   : > { %4026 = vmatpush2.msra.mxu1 %v753_v0  ;;  %v618_v7 = vld [vmem:[%s8015_s0 + $0xa68] sm:$0xff]  ;;  %3956 = vmatprep.subr.mxu0 %v622_v3  ;;  %v617_v12 = vld [vmem:[%s8015_s0 + $0xa60] sm:$0xff]  ;;  %v8333_v21 = vrot.slane %v3515_v11, %v8168_v52  ;;  %v8341_v26 = vcombine.high %v8326_v16, %v8326_v16 }
  0xc9   : > { %v746_v9 = vld [vmem:[%s8015_s0 + $0xe68] sm:$0xff]  ;;  %4027 = vmatprep.subr.mxu1 %v750_v4  ;;  %v745_v13 = vld [vmem:[%s8015_s0 + $0xe60] sm:$0xff]  ;;  %3957 = vmatpush2.msra.mxu0 %v621_v5 }
  0xca   : > { %4028 = vmatpush2.msra.mxu1 %v749_v6  ;;  %v614_v14 = vld [vmem:[%s8015_s0 + $0xa48] sm:$0xff]  ;;  %3958 = vmatprep.subr.mxu0 %v618_v7  ;;  %v613_v17 = vld [vmem:[%s8015_s0 + $0xa40] sm:$0xff]  ;;  %v8347_v29 = vcombine.high %v8333_v21, %v8333_v21 }
  0xcb   : > { %v742_v15 = vld [vmem:[%s8015_s0 + $0xe48] sm:$0xff]  ;;  %4029 = vmatprep.subr.mxu1 %v746_v9  ;;  %v741_v18 = vld [vmem:[%s8015_s0 + $0xe40] sm:$0xff]  ;;  %3959 = vmatpush2.msra.mxu0 %v617_v12 }
  0xcc   : > { %4030 = vmatpush2.msra.mxu1 %v745_v13  ;;  %v610_v19 = vld [vmem:[%s8015_s0 + $0xa28] sm:$0xff]  ;;  %3960 = vmatprep.subr.mxu0 %v614_v14  ;;  %v609_v22 = vld [vmem:[%s8015_s0 + $0xa20] sm:$0xff] }
  0xcd   : > { %v738_v20 = vld [vmem:[%s8015_s0 + $0xe28] sm:$0xff]  ;;  %4031 = vmatprep.subr.mxu1 %v742_v15  ;;  %v737_v23 = vld [vmem:[%s8015_s0 + $0xe20] sm:$0xff]  ;;  %3961 = vmatpush2.msra.mxu0 %v613_v17 }
  0xce   : > { %4032 = vmatpush2.msra.mxu1 %v741_v18  ;;  %v606_v24 = vld [vmem:[%s8015_s0 + $0xa08] sm:$0xff]  ;;  %3962 = vmatprep.subr.mxu0 %v610_v19  ;;  %v605_v27 = vld [vmem:[%s8015_s0 + $0xa00] sm:$0xff] }
  0xcf   : > { %v734_v25 = vld [vmem:[%s8015_s0 + $0xe08] sm:$0xff]  ;;  %4033 = vmatprep.subr.mxu1 %v738_v20  ;;  %3963 = vmatpush2.msra.mxu0 %v609_v22  ;;  %v733_v28 = vld [vmem:[%s8015_s0 + $0xe00] sm:$0xff] }
  0xd0   : > { %4034 = vmatpush2.msra.mxu1 %v737_v23  ;;  %3964 = vmatprep.subr.mxu0 %v606_v24  ;;  %v858_v30 = vld [vmem:[%s8015_s0 + $0x11e8] sm:$0xff]  ;;  %v857_v32 = vld [vmem:[%s8015_s0 + $0x11e0] sm:$0xff] }
  0xd1   : > { %4035 = vmatprep.subr.mxu1 %v734_v25  ;;  %3965 = vmatpush2.msra.mxu0 %v605_v27  ;;  %v986_v31 = vld [vmem:[%s8015_s0 + $0x15e8] sm:$0xff]  ;;  %v985_v33 = vld [vmem:[%s8015_s0 + $0x15e0] sm:$0xff] }
  0xd2   : > { %3966 = vmatprep.mubr.f32.mxu0 %v8341_v26  ;;  %4036 = vmatpush2.msra.mxu1 %v733_v28  ;;  %v854_v34 = vld [vmem:[%s8015_s0 + $0x11c8] sm:$0xff]  ;;  %v853_v36 = vld [vmem:[%s8015_s0 + $0x11c0] sm:$0xff] }
  0xd3   : > { %3967 = vmatmul.mubr.f32.vlgmr.msra.gmra.mxu0 %v8326_v16  ;;  %4037 = vmatprep.mubr.f32.mxu1 %v8347_v29  ;;  %v982_v35 = vld [vmem:[%s8015_s0 + $0x15c8] sm:$0xff]  ;;  %v981_v37 = vld [vmem:[%s8015_s0 + $0x15c0] sm:$0xff] }
  0xd4   : > { %4044 = vmatprep.subr.mxu0 %v858_v30  ;;  %4115 = vmatprep.subr.mxu1 %v986_v31  ;;  %v850_v38 = vld [vmem:[%s8015_s0 + $0x11a8] sm:$0xff]  ;;  %v849_v40 = vld [vmem:[%s8015_s0 + $0x11a0] sm:$0xff] }
  0xd5   : > { %4038 = vmatmul.mubr.f32.vlgmr.msra.gmra.mxu1 %v8333_v21  ;;  %4045 = vmatpush1.msra.mxu0 %v857_v32  ;;  %v978_v39 = vld [vmem:[%s8015_s0 + $0x15a8] sm:$0xff]  ;;  %v977_v41 = vld [vmem:[%s8015_s0 + $0x15a0] sm:$0xff] }
  0xd6   : > { %4116 = vmatpush1.msra.mxu1 %v985_v33  ;;  %4046 = vmatprep.subr.mxu0 %v854_v34  ;;  %v846_v43 = vld [vmem:[%s8015_s0 + $0x1188] sm:$0xff]  ;;  %v845_v45 = vld [vmem:[%s8015_s0 + $0x1180] sm:$0xff] }
  0xd7   : > { %4117 = vmatprep.subr.mxu1 %v982_v35  ;;  %4047 = vmatpush1.msra.mxu0 %v853_v36  ;;  %v974_v44 = vld [vmem:[%s8015_s0 + $0x1588] sm:$0xff]  ;;  %v973_v46 = vld [vmem:[%s8015_s0 + $0x1580] sm:$0xff] }
  0xd8   : > { %4118 = vmatpush1.msra.mxu1 %v981_v37  ;;  %4048 = vmatprep.subr.mxu0 %v850_v38  ;;  %v842_v47 = vld [vmem:[%s8015_s0 + $0x1168] sm:$0xff]  ;;  %v841_v49 = vld [vmem:[%s8015_s0 + $0x1160] sm:$0xff] }
  0xd9   : > { %4119 = vmatprep.subr.mxu1 %v978_v39  ;;  %4049 = vmatpush1.msra.mxu0 %v849_v40  ;;  %v970_v48 = vld [vmem:[%s8015_s0 + $0x1568] sm:$0xff]  ;;  %v969_v50 = vld [vmem:[%s8015_s0 + $0x1560] sm:$0xff] }
  0xda   : > { %4120 = vmatpush1.msra.mxu1 %v977_v41  ;;  %4050 = vmatprep.subr.mxu0 %v846_v43  ;;  %v838_v51 = vld [vmem:[%s8015_s0 + $0x1148] sm:$0xff]  ;;  %v837_v54 = vld [vmem:[%s8015_s0 + $0x1140] sm:$0xff] }
  0xdb   : > { %4121 = vmatprep.subr.mxu1 %v974_v44  ;;  %4051 = vmatpush1.msra.mxu0 %v845_v45  ;;  %v966_v53 = vld [vmem:[%s8015_s0 + $0x1548] sm:$0xff]  ;;  %v965_v55 = vld [vmem:[%s8015_s0 + $0x1540] sm:$0xff] }
  0xdc   : > { %4122 = vmatpush1.msra.mxu1 %v973_v46  ;;  %4052 = vmatprep.subr.mxu0 %v842_v47  ;;  %v834_v56 = vld [vmem:[%s8015_s0 + $0x1128] sm:$0xff]  ;;  %v833_v58 = vld [vmem:[%s8015_s0 + $0x1120] sm:$0xff] }
  0xdd   : > { %4123 = vmatprep.subr.mxu1 %v970_v48  ;;  %4053 = vmatpush1.msra.mxu0 %v841_v49  ;;  %v962_v57 = vld [vmem:[%s8015_s0 + $0x1528] sm:$0xff]  ;;  %v961_v59 = vld [vmem:[%s8015_s0 + $0x1520] sm:$0xff] }
  0xde   : > { %4124 = vmatpush1.msra.mxu1 %v969_v50  ;;  %4054 = vmatprep.subr.mxu0 %v838_v51  ;;  %v830_v60 = vld [vmem:[%s8015_s0 + $0x1108] sm:$0xff]  ;;  %v829_v63 = vld [vmem:[%s8015_s0 + $0x1100] sm:$0xff] }
  0xdf   : > { %4125 = vmatprep.subr.mxu1 %v966_v53  ;;  %4055 = vmatpush1.msra.mxu0 %v837_v54  ;;  %v958_v61 = vld [vmem:[%s8015_s0 + $0x1508] sm:$0xff]  ;;  %v957_v0 = vld [vmem:[%s8015_s0 + $0x1500] sm:$0xff] }
  0xe0   : > { %4126 = vmatpush1.msra.mxu1 %v965_v55  ;;  %4056 = vmatprep.subr.mxu0 %v834_v56  ;;  %v826_v2 = vld [vmem:[%s8015_s0 + $0x10e8] sm:$0xff]  ;;  %v825_v4 = vld [vmem:[%s8015_s0 + $0x10e0] sm:$0xff] }
  0xe1   : > { %4127 = vmatprep.subr.mxu1 %v962_v57  ;;  %4057 = vmatpush1.msra.mxu0 %v833_v58  ;;  %v954_v3 = vld [vmem:[%s8015_s0 + $0x14e8] sm:$0xff]  ;;  %v953_v5 = vld [vmem:[%s8015_s0 + $0x14e0] sm:$0xff] }
  0xe2   : > { %4128 = vmatpush1.msra.mxu1 %v961_v59  ;;  %4058 = vmatprep.subr.mxu0 %v830_v60  ;;  %v822_v6 = vld [vmem:[%s8015_s0 + $0x10c8] sm:$0xff]  ;;  %v821_v9 = vld [vmem:[%s8015_s0 + $0x10c0] sm:$0xff] }
  0xe3   : > { %4129 = vmatprep.subr.mxu1 %v958_v61  ;;  %4059 = vmatpush1.msra.mxu0 %v829_v63  ;;  %v950_v7 = vld [vmem:[%s8015_s0 + $0x14c8] sm:$0xff]  ;;  %v949_v11 = vld [vmem:[%s8015_s0 + $0x14c0] sm:$0xff] }
  0xe4   : > { %4130 = vmatpush1.msra.mxu1 %v957_v0  ;;  %4060 = vmatprep.subr.mxu0 %v826_v2  ;;  %v818_v12 = vld [vmem:[%s8015_s0 + $0x10a8] sm:$0xff]  ;;  %v817_v14 = vld [vmem:[%s8015_s0 + $0x10a0] sm:$0xff] }
  0xe5   : > { %4131 = vmatprep.subr.mxu1 %v954_v3  ;;  %4061 = vmatpush1.msra.mxu0 %v825_v4  ;;  %v946_v13 = vld [vmem:[%s8015_s0 + $0x14a8] sm:$0xff]  ;;  %v945_v15 = vld [vmem:[%s8015_s0 + $0x14a0] sm:$0xff] }
  0xe6   : > { %4132 = vmatpush1.msra.mxu1 %v953_v5  ;;  %4062 = vmatprep.subr.mxu0 %v822_v6  ;;  %v814_v17 = vld [vmem:[%s8015_s0 + $0x1088] sm:$0xff]  ;;  %v813_v19 = vld [vmem:[%s8015_s0 + $0x1080] sm:$0xff] }
  0xe7   : > { %4133 = vmatprep.subr.mxu1 %v950_v7  ;;  %4063 = vmatpush1.msra.mxu0 %v821_v9  ;;  %v942_v18 = vld [vmem:[%s8015_s0 + $0x1488] sm:$0xff]  ;;  %v941_v20 = vld [vmem:[%s8015_s0 + $0x1480] sm:$0xff] }
  0xe8   : > { %4134 = vmatpush1.msra.mxu1 %v949_v11  ;;  %4064 = vmatprep.subr.mxu0 %v818_v12  ;;  %v810_v22 = vld [vmem:[%s8015_s0 + $0x1068] sm:$0xff]  ;;  %v809_v24 = vld [vmem:[%s8015_s0 + $0x1060] sm:$0xff] }
  0xe9   : > { %4135 = vmatprep.subr.mxu1 %v946_v13  ;;  %4065 = vmatpush1.msra.mxu0 %v817_v14  ;;  %v938_v23 = vld [vmem:[%s8015_s0 + $0x1468] sm:$0xff]  ;;  %v937_v25 = vld [vmem:[%s8015_s0 + $0x1460] sm:$0xff] }
  0xea   : > { %4136 = vmatpush1.msra.mxu1 %v945_v15  ;;  %4066 = vmatprep.subr.mxu0 %v814_v17  ;;  %v806_v27 = vld [vmem:[%s8015_s0 + $0x1048] sm:$0xff]  ;;  %v805_v30 = vld [vmem:[%s8015_s0 + $0x1040] sm:$0xff] }
  0xeb   : > { %4137 = vmatprep.subr.mxu1 %v942_v18  ;;  %4067 = vmatpush1.msra.mxu0 %v813_v19  ;;  %v934_v28 = vld [vmem:[%s8015_s0 + $0x1448] sm:$0xff]  ;;  %v933_v31 = vld [vmem:[%s8015_s0 + $0x1440] sm:$0xff] }
  0xec   : > { %4138 = vmatpush1.msra.mxu1 %v941_v20  ;;  %4068 = vmatprep.subr.mxu0 %v810_v22  ;;  %v802_v32 = vld [vmem:[%s8015_s0 + $0x1028] sm:$0xff]  ;;  %v801_v34 = vld [vmem:[%s8015_s0 + $0x1020] sm:$0xff] }
  0xed   : > { %4139 = vmatprep.subr.mxu1 %v938_v23  ;;  %4069 = vmatpush1.msra.mxu0 %v809_v24  ;;  %v930_v33 = vld [vmem:[%s8015_s0 + $0x1428] sm:$0xff]  ;;  %v929_v35 = vld [vmem:[%s8015_s0 + $0x1420] sm:$0xff] }
  0xee   : > { %4140 = vmatpush1.msra.mxu1 %v937_v25  ;;  %4070 = vmatprep.subr.mxu0 %v806_v27  ;;  %v798_v36 = vld [vmem:[%s8015_s0 + $0x1008] sm:$0xff]  ;;  %v797_v38 = vld [vmem:[%s8015_s0 + $0x1000] sm:$0xff] }
  0xef   : > { %4141 = vmatprep.subr.mxu1 %v934_v28  ;;  %4071 = vmatpush1.msra.mxu0 %v805_v30  ;;  %v926_v37 = vld [vmem:[%s8015_s0 + $0x1408] sm:$0xff]  ;;  %v925_v39 = vld [vmem:[%s8015_s0 + $0x1400] sm:$0xff]  ;;  %v274_v30 = vld [vmem:[%s8152_s6 + $0x10] sm:$0xff] }
  0xf0   : > { %4142 = vmatpush1.msra.mxu1 %v933_v31  ;;  %4072 = vmatprep.subr.mxu0 %v802_v32  ;;  %v922_v40 = vld [vmem:[%s8015_s0 + $0x13e8] sm:$0xff]  ;;  %v921_v43 = vld [vmem:[%s8015_s0 + $0x13e0] sm:$0xff] }
  0xf1   : > { %4143 = vmatprep.subr.mxu1 %v930_v33  ;;  %4073 = vmatpush1.msra.mxu0 %v801_v34  ;;  %v1050_v41 = vld [vmem:[%s8015_s0 + $0x17e8] sm:$0xff]  ;;  %v1049_v44 = vld [vmem:[%s8015_s0 + $0x17e0] sm:$0xff] }
  0xf2   : > { %4144 = vmatpush1.msra.mxu1 %v929_v35  ;;  %4074 = vmatprep.subr.mxu0 %v798_v36  ;;  %v918_v45 = vld [vmem:[%s8015_s0 + $0x13c8] sm:$0xff]  ;;  %v917_v47 = vld [vmem:[%s8015_s0 + $0x13c0] sm:$0xff] }
  0xf3   : > { %4145 = vmatprep.subr.mxu1 %v926_v37  ;;  %4075 = vmatpush1.msra.mxu0 %v797_v38  ;;  %v1046_v46 = vld [vmem:[%s8015_s0 + $0x17c8] sm:$0xff]  ;;  %v1045_v48 = vld [vmem:[%s8015_s0 + $0x17c0] sm:$0xff]  ;;  %v3532_v37 = vcombine.high %v274_v30, %v274_v30 }
  0xf4   : > { %4146 = vmatpush1.msra.mxu1 %v925_v39  ;;  %4076 = vmatprep.subr.mxu0 %v922_v40  ;;  %v914_v49 = vld [vmem:[%s8015_s0 + $0x13a8] sm:$0xff]  ;;  %v913_v51 = vld [vmem:[%s8015_s0 + $0x13a0] sm:$0xff] }
  0xf5   : > { %4147 = vmatprep.subr.mxu1 %v1050_v41  ;;  %4077 = vmatpush2.msra.mxu0 %v921_v43  ;;  %v1042_v50 = vld [vmem:[%s8015_s0 + $0x17a8] sm:$0xff]  ;;  %v1041_v53 = vld [vmem:[%s8015_s0 + $0x17a0] sm:$0xff]  ;;  %v8473_v43 = vrot.slane %v274_v30, %v8168_v52 }
  0xf6   : > { %4148 = vmatpush2.msra.mxu1 %v1049_v44  ;;  %4078 = vmatprep.subr.mxu0 %v918_v45  ;;  %v910_v54 = vld [vmem:[%s8015_s0 + $0x1388] sm:$0xff]  ;;  %v909_v56 = vld [vmem:[%s8015_s0 + $0x1380] sm:$0xff] }
  0xf7   : > { %4149 = vmatprep.subr.mxu1 %v1046_v46  ;;  %4079 = vmatpush2.msra.mxu0 %v917_v47  ;;  %v1038_v55 = vld [vmem:[%s8015_s0 + $0x1788] sm:$0xff]  ;;  %v1037_v57 = vld [vmem:[%s8015_s0 + $0x1780] sm:$0xff] }
  0xf8   : > { %4150 = vmatpush2.msra.mxu1 %v1045_v48  ;;  %4080 = vmatprep.subr.mxu0 %v914_v49  ;;  %v906_v58 = vld [vmem:[%s8015_s0 + $0x1368] sm:$0xff]  ;;  %v905_v60 = vld [vmem:[%s8015_s0 + $0x1360] sm:$0xff]  ;;  %v8480_v48 = vrot.slane %v3532_v37, %v8168_v52 }
  0xf9   : > { %4151 = vmatprep.subr.mxu1 %v1042_v50  ;;  %4081 = vmatpush2.msra.mxu0 %v913_v51  ;;  %v1034_v59 = vld [vmem:[%s8015_s0 + $0x1768] sm:$0xff]  ;;  %v1033_v61 = vld [vmem:[%s8015_s0 + $0x1760] sm:$0xff] }
  0xfa   : > { %4152 = vmatpush2.msra.mxu1 %v1041_v53  ;;  %4082 = vmatprep.subr.mxu0 %v910_v54  ;;  %v902_v63 = vld [vmem:[%s8015_s0 + $0x1348] sm:$0xff]  ;;  %v901_v2 = vld [vmem:[%s8015_s0 + $0x1340] sm:$0xff]  ;;  %v8488_v54 = vcombine.high %v8473_v43, %v8473_v43 }
  0xfb   : > { %4153 = vmatprep.subr.mxu1 %v1038_v55  ;;  %4083 = vmatpush2.msra.mxu0 %v909_v56  ;;  %v1030_v0 = vld [vmem:[%s8015_s0 + $0x1748] sm:$0xff]  ;;  %v1029_v3 = vld [vmem:[%s8015_s0 + $0x1740] sm:$0xff] }
  0xfc   : > { %4154 = vmatpush2.msra.mxu1 %v1037_v57  ;;  %4084 = vmatprep.subr.mxu0 %v906_v58  ;;  %v898_v4 = vld [vmem:[%s8015_s0 + $0x1328] sm:$0xff]  ;;  %v897_v6 = vld [vmem:[%s8015_s0 + $0x1320] sm:$0xff]  ;;  %v8494_v57 = vcombine.high %v8480_v48, %v8480_v48 }
  0xfd   : > { %4155 = vmatprep.subr.mxu1 %v1034_v59  ;;  %4085 = vmatpush2.msra.mxu0 %v905_v60  ;;  %v1026_v5 = vld [vmem:[%s8015_s0 + $0x1728] sm:$0xff]  ;;  %v1025_v7 = vld [vmem:[%s8015_s0 + $0x1720] sm:$0xff] }
  0xfe   : > { %4156 = vmatpush2.msra.mxu1 %v1033_v61  ;;  %4086 = vmatprep.subr.mxu0 %v902_v63  ;;  %v894_v9 = vld [vmem:[%s8015_s0 + $0x1308] sm:$0xff]  ;;  %v893_v12 = vld [vmem:[%s8015_s0 + $0x1300] sm:$0xff] }
  0xff   : > { %4157 = vmatprep.subr.mxu1 %v1030_v0  ;;  %4087 = vmatpush2.msra.mxu0 %v901_v2  ;;  %v1022_v11 = vld [vmem:[%s8015_s0 + $0x1708] sm:$0xff]  ;;  %v1021_v13 = vld [vmem:[%s8015_s0 + $0x1700] sm:$0xff] }
 0x100   : > { %4158 = vmatpush2.msra.mxu1 %v1029_v3  ;;  %4088 = vmatprep.subr.mxu0 %v898_v4  ;;  %v890_v14 = vld [vmem:[%s8015_s0 + $0x12e8] sm:$0xff]  ;;  %v889_v17 = vld [vmem:[%s8015_s0 + $0x12e0] sm:$0xff] }
 0x101   : > { %4159 = vmatprep.subr.mxu1 %v1026_v5  ;;  %4089 = vmatpush2.msra.mxu0 %v897_v6  ;;  %v1018_v15 = vld [vmem:[%s8015_s0 + $0x16e8] sm:$0xff]  ;;  %v1017_v18 = vld [vmem:[%s8015_s0 + $0x16e0] sm:$0xff] }
 0x102   : > { %4160 = vmatpush2.msra.mxu1 %v1025_v7  ;;  %4090 = vmatprep.subr.mxu0 %v894_v9  ;;  %v886_v19 = vld [vmem:[%s8015_s0 + $0x12c8] sm:$0xff]  ;;  %v885_v22 = vld [vmem:[%s8015_s0 + $0x12c0] sm:$0xff] }
 0x103   : > { %4161 = vmatprep.subr.mxu1 %v1022_v11  ;;  %4091 = vmatpush2.msra.mxu0 %v893_v12  ;;  %v1014_v20 = vld [vmem:[%s8015_s0 + $0x16c8] sm:$0xff]  ;;  %v1013_v23 = vld [vmem:[%s8015_s0 + $0x16c0] sm:$0xff] }
 0x104   : > { %4162 = vmatpush2.msra.mxu1 %v1021_v13  ;;  %4092 = vmatprep.subr.mxu0 %v890_v14  ;;  %v882_v24 = vld [vmem:[%s8015_s0 + $0x12a8] sm:$0xff]  ;;  %v881_v27 = vld [vmem:[%s8015_s0 + $0x12a0] sm:$0xff] }
 0x105   : > { %4163 = vmatprep.subr.mxu1 %v1018_v15  ;;  %4093 = vmatpush2.msra.mxu0 %v889_v17  ;;  %v1010_v25 = vld [vmem:[%s8015_s0 + $0x16a8] sm:$0xff]  ;;  %v1009_v28 = vld [vmem:[%s8015_s0 + $0x16a0] sm:$0xff] }
 0x106   : > { %4164 = vmatpush2.msra.mxu1 %v1017_v18  ;;  %4094 = vmatprep.subr.mxu0 %v886_v19  ;;  %v878_v31 = vld [vmem:[%s8015_s0 + $0x1288] sm:$0xff]  ;;  %v877_v33 = vld [vmem:[%s8015_s0 + $0x1280] sm:$0xff] }
 0x107   : > { %4165 = vmatprep.subr.mxu1 %v1014_v20  ;;  %4095 = vmatpush2.msra.mxu0 %v885_v22  ;;  %v1006_v32 = vld [vmem:[%s8015_s0 + $0x1688] sm:$0xff]  ;;  %v1005_v34 = vld [vmem:[%s8015_s0 + $0x1680] sm:$0xff] }
 0x108   : > { %4166 = vmatpush2.msra.mxu1 %v1013_v23  ;;  %4096 = vmatprep.subr.mxu0 %v882_v24  ;;  %v874_v35 = vld [vmem:[%s8015_s0 + $0x1268] sm:$0xff]  ;;  %v873_v38 = vld [vmem:[%s8015_s0 + $0x1260] sm:$0xff] }
 0x109   : > { %4167 = vmatprep.subr.mxu1 %v1010_v25  ;;  %4097 = vmatpush2.msra.mxu0 %v881_v27  ;;  %v1002_v36 = vld [vmem:[%s8015_s0 + $0x1668] sm:$0xff]  ;;  %v1001_v39 = vld [vmem:[%s8015_s0 + $0x1660] sm:$0xff] }
 0x10a   : > { %4168 = vmatpush2.msra.mxu1 %v1009_v28  ;;  %4098 = vmatprep.subr.mxu0 %v878_v31  ;;  %v870_v40 = vld [vmem:[%s8015_s0 + $0x1248] sm:$0xff]  ;;  %v869_v44 = vld [vmem:[%s8015_s0 + $0x1240] sm:$0xff] }
 0x10b   : > { %4169 = vmatprep.subr.mxu1 %v1006_v32  ;;  %4099 = vmatpush2.msra.mxu0 %v877_v33  ;;  %v998_v41 = vld [vmem:[%s8015_s0 + $0x1648] sm:$0xff]  ;;  %v997_v45 = vld [vmem:[%s8015_s0 + $0x1640] sm:$0xff] }
 0x10c   : > { %4170 = vmatpush2.msra.mxu1 %v1005_v34  ;;  %4100 = vmatprep.subr.mxu0 %v874_v35  ;;  %v866_v46 = vld [vmem:[%s8015_s0 + $0x1228] sm:$0xff]  ;;  %v865_v49 = vld [vmem:[%s8015_s0 + $0x1220] sm:$0xff] }
 0x10d   : > { %4171 = vmatprep.subr.mxu1 %v1002_v36  ;;  %4101 = vmatpush2.msra.mxu0 %v873_v38  ;;  %v994_v47 = vld [vmem:[%s8015_s0 + $0x1628] sm:$0xff]  ;;  %v993_v50 = vld [vmem:[%s8015_s0 + $0x1620] sm:$0xff] }
 0x10e   : > { %4172 = vmatpush2.msra.mxu1 %v1001_v39  ;;  %4102 = vmatprep.subr.mxu0 %v870_v40  ;;  %v862_v51 = vld [vmem:[%s8015_s0 + $0x1208] sm:$0xff]  ;;  %v861_v55 = vld [vmem:[%s8015_s0 + $0x1200] sm:$0xff] }
 0x10f   : > { %4173 = vmatprep.subr.mxu1 %v998_v41  ;;  %4103 = vmatpush2.msra.mxu0 %v869_v44  ;;  %v990_v53 = vld [vmem:[%s8015_s0 + $0x1608] sm:$0xff]  ;;  %v989_v56 = vld [vmem:[%s8015_s0 + $0x1600] sm:$0xff] }
 0x110   : > { %4174 = vmatpush2.msra.mxu1 %v997_v45  ;;  %4104 = vmatprep.subr.mxu0 %v866_v46  ;;  %v1114_v58 = vld [vmem:[%s8015_s0 + $0x19e8] sm:$0xff]  ;;  %v1113_v60 = vld [vmem:[%s8015_s0 + $0x19e0] sm:$0xff] }
 0x111   : > { %4175 = vmatprep.subr.mxu1 %v994_v47  ;;  %4105 = vmatpush2.msra.mxu0 %v865_v49  ;;  %v1242_v59 = vld [vmem:[%s8015_s0 + $0x1de8] sm:$0xff]  ;;  %v1241_v61 = vld [vmem:[%s8015_s0 + $0x1de0] sm:$0xff] }
 0x112   : > { %4176 = vmatpush2.msra.mxu1 %v993_v50  ;;  %4106 = vmatprep.subr.mxu0 %v862_v51  ;;  %v1110_v63 = vld [vmem:[%s8015_s0 + $0x19c8] sm:$0xff]  ;;  %v1109_v2 = vld [vmem:[%s8015_s0 + $0x19c0] sm:$0xff] }
 0x113   : > { %4177 = vmatprep.subr.mxu1 %v990_v53  ;;  %4107 = vmatpush2.msra.mxu0 %v861_v55  ;;  %v1238_v0 = vld [vmem:[%s8015_s0 + $0x1dc8] sm:$0xff]  ;;  %v1237_v3 = vld [vmem:[%s8015_s0 + $0x1dc0] sm:$0xff] }
 0x114   : > { %4108 = vmatprep.mubr.f32.mxu0 %v8488_v54  ;;  %4178 = vmatpush2.msra.mxu1 %v989_v56  ;;  %v1106_v4 = vld [vmem:[%s8015_s0 + $0x19a8] sm:$0xff]  ;;  %v1105_v6 = vld [vmem:[%s8015_s0 + $0x19a0] sm:$0xff] }
 0x115   : > { %4109 = vmatmul.mubr.f32.vlgmr.msra.gmra.mxu0 %v8473_v43  ;;  %4179 = vmatprep.mubr.f32.mxu1 %v8494_v57  ;;  %v1234_v5 = vld [vmem:[%s8015_s0 + $0x1da8] sm:$0xff]  ;;  %v1233_v7 = vld [vmem:[%s8015_s0 + $0x1da0] sm:$0xff] }
 0x116   : > { %4186 = vmatprep.subr.mxu0 %v1114_v58  ;;  %4257 = vmatprep.subr.mxu1 %v1242_v59  ;;  %v1102_v9 = vld [vmem:[%s8015_s0 + $0x1988] sm:$0xff]  ;;  %v1101_v12 = vld [vmem:[%s8015_s0 + $0x1980] sm:$0xff] }
 0x117   : > { %4180 = vmatmul.mubr.f32.vlgmr.msra.gmra.mxu1 %v8480_v48  ;;  %4187 = vmatpush1.msra.mxu0 %v1113_v60  ;;  %v1230_v11 = vld [vmem:[%s8015_s0 + $0x1d88] sm:$0xff]  ;;  %v1229_v13 = vld [vmem:[%s8015_s0 + $0x1d80] sm:$0xff] }
 0x118   : > { %4258 = vmatpush1.msra.mxu1 %v1241_v61  ;;  %4188 = vmatprep.subr.mxu0 %v1110_v63  ;;  %v1098_v14 = vld [vmem:[%s8015_s0 + $0x1968] sm:$0xff]  ;;  %v1097_v17 = vld [vmem:[%s8015_s0 + $0x1960] sm:$0xff] }
 0x119   : > { %4259 = vmatprep.subr.mxu1 %v1238_v0  ;;  %4189 = vmatpush1.msra.mxu0 %v1109_v2  ;;  %v1226_v15 = vld [vmem:[%s8015_s0 + $0x1d68] sm:$0xff]  ;;  %v1225_v18 = vld [vmem:[%s8015_s0 + $0x1d60] sm:$0xff] }
 0x11a   : > { %4260 = vmatpush1.msra.mxu1 %v1237_v3  ;;  %4190 = vmatprep.subr.mxu0 %v1106_v4  ;;  %v1094_v19 = vld [vmem:[%s8015_s0 + $0x1948] sm:$0xff]  ;;  %v1093_v22 = vld [vmem:[%s8015_s0 + $0x1940] sm:$0xff] }
 0x11b   : > { %4261 = vmatprep.subr.mxu1 %v1234_v5  ;;  %4191 = vmatpush1.msra.mxu0 %v1105_v6  ;;  %v1222_v20 = vld [vmem:[%s8015_s0 + $0x1d48] sm:$0xff]  ;;  %v1221_v23 = vld [vmem:[%s8015_s0 + $0x1d40] sm:$0xff] }
 0x11c   : > { %4262 = vmatpush1.msra.mxu1 %v1233_v7  ;;  %4192 = vmatprep.subr.mxu0 %v1102_v9  ;;  %v1090_v24 = vld [vmem:[%s8015_s0 + $0x1928] sm:$0xff]  ;;  %v1089_v27 = vld [vmem:[%s8015_s0 + $0x1920] sm:$0xff] }
 0x11d   : > { %4263 = vmatprep.subr.mxu1 %v1230_v11  ;;  %4193 = vmatpush1.msra.mxu0 %v1101_v12  ;;  %v1218_v25 = vld [vmem:[%s8015_s0 + $0x1d28] sm:$0xff]  ;;  %v1217_v28 = vld [vmem:[%s8015_s0 + $0x1d20] sm:$0xff] }
 0x11e   : > { %4264 = vmatpush1.msra.mxu1 %v1229_v13  ;;  %4194 = vmatprep.subr.mxu0 %v1098_v14  ;;  %v1086_v30 = vld [vmem:[%s8015_s0 + $0x1908] sm:$0xff]  ;;  %v1085_v32 = vld [vmem:[%s8015_s0 + $0x1900] sm:$0xff] }
 0x11f   : > { %4265 = vmatprep.subr.mxu1 %v1226_v15  ;;  %4195 = vmatpush1.msra.mxu0 %v1097_v17  ;;  %v1214_v31 = vld [vmem:[%s8015_s0 + $0x1d08] sm:$0xff]  ;;  %v1213_v33 = vld [vmem:[%s8015_s0 + $0x1d00] sm:$0xff] }
 0x120   : > { %4266 = vmatpush1.msra.mxu1 %v1225_v18  ;;  %4196 = vmatprep.subr.mxu0 %v1094_v19  ;;  %v1082_v34 = vld [vmem:[%s8015_s0 + $0x18e8] sm:$0xff]  ;;  %v1081_v36 = vld [vmem:[%s8015_s0 + $0x18e0] sm:$0xff] }
 0x121   : > { %4267 = vmatprep.subr.mxu1 %v1222_v20  ;;  %4197 = vmatpush1.msra.mxu0 %v1093_v22  ;;  %v1210_v35 = vld [vmem:[%s8015_s0 + $0x1ce8] sm:$0xff]  ;;  %v1209_v37 = vld [vmem:[%s8015_s0 + $0x1ce0] sm:$0xff] }
 0x122   : > { %4268 = vmatpush1.msra.mxu1 %v1221_v23  ;;  %4198 = vmatprep.subr.mxu0 %v1090_v24  ;;  %v1078_v38 = vld [vmem:[%s8015_s0 + $0x18c8] sm:$0xff]  ;;  %v1077_v40 = vld [vmem:[%s8015_s0 + $0x18c0] sm:$0xff] }
 0x123   : > { %4269 = vmatprep.subr.mxu1 %v1218_v25  ;;  %4199 = vmatpush1.msra.mxu0 %v1089_v27  ;;  %v1206_v39 = vld [vmem:[%s8015_s0 + $0x1cc8] sm:$0xff]  ;;  %v1205_v41 = vld [vmem:[%s8015_s0 + $0x1cc0] sm:$0xff] }
 0x124   : > { %4270 = vmatpush1.msra.mxu1 %v1217_v28  ;;  %4200 = vmatprep.subr.mxu0 %v1086_v30  ;;  %v1074_v44 = vld [vmem:[%s8015_s0 + $0x18a8] sm:$0xff]  ;;  %v1073_v46 = vld [vmem:[%s8015_s0 + $0x18a0] sm:$0xff] }
 0x125   : > { %4271 = vmatprep.subr.mxu1 %v1214_v31  ;;  %4201 = vmatpush1.msra.mxu0 %v1085_v32  ;;  %v1202_v45 = vld [vmem:[%s8015_s0 + $0x1ca8] sm:$0xff]  ;;  %v1201_v47 = vld [vmem:[%s8015_s0 + $0x1ca0] sm:$0xff] }
 0x126   : > { %4272 = vmatpush1.msra.mxu1 %v1213_v33  ;;  %4202 = vmatprep.subr.mxu0 %v1082_v34  ;;  %v1070_v49 = vld [vmem:[%s8015_s0 + $0x1888] sm:$0xff]  ;;  %v1069_v51 = vld [vmem:[%s8015_s0 + $0x1880] sm:$0xff] }
 0x127   : > { %4273 = vmatprep.subr.mxu1 %v1210_v35  ;;  %4203 = vmatpush1.msra.mxu0 %v1081_v36  ;;  %v1198_v50 = vld [vmem:[%s8015_s0 + $0x1c88] sm:$0xff]  ;;  %v1197_v53 = vld [vmem:[%s8015_s0 + $0x1c80] sm:$0xff] }
 0x128   : > { %4274 = vmatpush1.msra.mxu1 %v1209_v37  ;;  %4204 = vmatprep.subr.mxu0 %v1078_v38  ;;  %v1066_v55 = vld [vmem:[%s8015_s0 + $0x1868] sm:$0xff]  ;;  %v1065_v58 = vld [vmem:[%s8015_s0 + $0x1860] sm:$0xff] }
 0x129   : > { %4275 = vmatprep.subr.mxu1 %v1206_v39  ;;  %4205 = vmatpush1.msra.mxu0 %v1077_v40  ;;  %v1194_v56 = vld [vmem:[%s8015_s0 + $0x1c68] sm:$0xff]  ;;  %v1193_v59 = vld [vmem:[%s8015_s0 + $0x1c60] sm:$0xff] }
 0x12a   : > { %4276 = vmatpush1.msra.mxu1 %v1205_v41  ;;  %4206 = vmatprep.subr.mxu0 %v1074_v44  ;;  %v1062_v60 = vld [vmem:[%s8015_s0 + $0x1848] sm:$0xff]  ;;  %v1061_v63 = vld [vmem:[%s8015_s0 + $0x1840] sm:$0xff] }
 0x12b   : > { %4277 = vmatprep.subr.mxu1 %v1202_v45  ;;  %4207 = vmatpush1.msra.mxu0 %v1073_v46  ;;  %v1190_v61 = vld [vmem:[%s8015_s0 + $0x1c48] sm:$0xff]  ;;  %v1189_v0 = vld [vmem:[%s8015_s0 + $0x1c40] sm:$0xff] }
 0x12c   : > { %4278 = vmatpush1.msra.mxu1 %v1201_v47  ;;  %4208 = vmatprep.subr.mxu0 %v1070_v49  ;;  %v1058_v2 = vld [vmem:[%s8015_s0 + $0x1828] sm:$0xff]  ;;  %v1057_v4 = vld [vmem:[%s8015_s0 + $0x1820] sm:$0xff] }
 0x12d   : > { %4279 = vmatprep.subr.mxu1 %v1198_v50  ;;  %4209 = vmatpush1.msra.mxu0 %v1069_v51  ;;  %v1186_v3 = vld [vmem:[%s8015_s0 + $0x1c28] sm:$0xff]  ;;  %v1185_v5 = vld [vmem:[%s8015_s0 + $0x1c20] sm:$0xff] }
 0x12e   : > { %4280 = vmatpush1.msra.mxu1 %v1197_v53  ;;  %4210 = vmatprep.subr.mxu0 %v1066_v55  ;;  %v1054_v6 = vld [vmem:[%s8015_s0 + $0x1808] sm:$0xff]  ;;  %v1053_v9 = vld [vmem:[%s8015_s0 + $0x1800] sm:$0xff] }
 0x12f   : > { %4281 = vmatprep.subr.mxu1 %v1194_v56  ;;  %4211 = vmatpush1.msra.mxu0 %v1065_v58  ;;  %v1182_v7 = vld [vmem:[%s8015_s0 + $0x1c08] sm:$0xff]  ;;  %v1181_v11 = vld [vmem:[%s8015_s0 + $0x1c00] sm:$0xff] }
 0x130   : > { %4282 = vmatpush1.msra.mxu1 %v1193_v59  ;;  %4212 = vmatprep.subr.mxu0 %v1062_v60  ;;  %v1178_v12 = vld [vmem:[%s8015_s0 + $0x1be8] sm:$0xff]  ;;  %v1177_v14 = vld [vmem:[%s8015_s0 + $0x1be0] sm:$0xff] }
 0x131   : > { %4283 = vmatprep.subr.mxu1 %v1190_v61  ;;  %4213 = vmatpush1.msra.mxu0 %v1061_v63  ;;  %v1306_v13 = vld [vmem:[%s8015_s0 + $0x1fe8] sm:$0xff]  ;;  %v1305_v15 = vld [vmem:[%s8015_s0 + $0x1fe0] sm:$0xff] }
 0x132   : > { %4284 = vmatpush1.msra.mxu1 %v1189_v0  ;;  %4214 = vmatprep.subr.mxu0 %v1058_v2  ;;  %v1174_v17 = vld [vmem:[%s8015_s0 + $0x1bc8] sm:$0xff]  ;;  %v1173_v19 = vld [vmem:[%s8015_s0 + $0x1bc0] sm:$0xff] }
 0x133   : > { %4285 = vmatprep.subr.mxu1 %v1186_v3  ;;  %4215 = vmatpush1.msra.mxu0 %v1057_v4  ;;  %v1302_v18 = vld [vmem:[%s8015_s0 + $0x1fc8] sm:$0xff]  ;;  %v1301_v20 = vld [vmem:[%s8015_s0 + $0x1fc0] sm:$0xff]  ;;  %v275_v4 = vld [vmem:[%s8152_s6 + $0x18] sm:$0xff] }
 0x134   : > { %4286 = vmatpush1.msra.mxu1 %v1185_v5  ;;  %4216 = vmatprep.subr.mxu0 %v1054_v6  ;;  %v1170_v22 = vld [vmem:[%s8015_s0 + $0x1ba8] sm:$0xff]  ;;  %v1169_v24 = vld [vmem:[%s8015_s0 + $0x1ba0] sm:$0xff] }
 0x135   : > { %4287 = vmatprep.subr.mxu1 %v1182_v7  ;;  %4217 = vmatpush1.msra.mxu0 %v1053_v9  ;;  %v1298_v23 = vld [vmem:[%s8015_s0 + $0x1fa8] sm:$0xff]  ;;  %v1297_v25 = vld [vmem:[%s8015_s0 + $0x1fa0] sm:$0xff] }
 0x136   : > { %4288 = vmatpush1.msra.mxu1 %v1181_v11  ;;  %4218 = vmatprep.subr.mxu0 %v1178_v12  ;;  %v1166_v27 = vld [vmem:[%s8015_s0 + $0x1b88] sm:$0xff]  ;;  %v1165_v30 = vld [vmem:[%s8015_s0 + $0x1b80] sm:$0xff] }
 0x137   : > { %4289 = vmatprep.subr.mxu1 %v1306_v13  ;;  %4219 = vmatpush2.msra.mxu0 %v1177_v14  ;;  %v1294_v28 = vld [vmem:[%s8015_s0 + $0x1f88] sm:$0xff]  ;;  %v1293_v31 = vld [vmem:[%s8015_s0 + $0x1f80] sm:$0xff]  ;;  %v3549_v13 = vcombine.high %v275_v4, %v275_v4 }
 0x138   : > { %4290 = vmatpush2.msra.mxu1 %v1305_v15  ;;  %4220 = vmatprep.subr.mxu0 %v1174_v17  ;;  %v1162_v32 = vld [vmem:[%s8015_s0 + $0x1b68] sm:$0xff]  ;;  %v1161_v34 = vld [vmem:[%s8015_s0 + $0x1b60] sm:$0xff] }
 0x139   : > { %4291 = vmatprep.subr.mxu1 %v1302_v18  ;;  %4221 = vmatpush2.msra.mxu0 %v1173_v19  ;;  %v1290_v33 = vld [vmem:[%s8015_s0 + $0x1f68] sm:$0xff]  ;;  %v1289_v35 = vld [vmem:[%s8015_s0 + $0x1f60] sm:$0xff]  ;;  %v8620_v19 = vrot.slane %v275_v4, %v8168_v52 }
 0x13a   : > { %4292 = vmatpush2.msra.mxu1 %v1301_v20  ;;  %4222 = vmatprep.subr.mxu0 %v1170_v22  ;;  %v1158_v36 = vld [vmem:[%s8015_s0 + $0x1b48] sm:$0xff]  ;;  %v1157_v38 = vld [vmem:[%s8015_s0 + $0x1b40] sm:$0xff] }
 0x13b   : > { %4293 = vmatprep.subr.mxu1 %v1298_v23  ;;  %4223 = vmatpush2.msra.mxu0 %v1169_v24  ;;  %v1286_v37 = vld [vmem:[%s8015_s0 + $0x1f48] sm:$0xff]  ;;  %v1285_v39 = vld [vmem:[%s8015_s0 + $0x1f40] sm:$0xff] }
 0x13c   : > { %4294 = vmatpush2.msra.mxu1 %v1297_v25  ;;  %4224 = vmatprep.subr.mxu0 %v1166_v27  ;;  %v1154_v40 = vld [vmem:[%s8015_s0 + $0x1b28] sm:$0xff]  ;;  %v1153_v44 = vld [vmem:[%s8015_s0 + $0x1b20] sm:$0xff]  ;;  %v8627_v25 = vrot.slane %v3549_v13, %v8168_v52 }
 0x13d   : > { %4295 = vmatprep.subr.mxu1 %v1294_v28  ;;  %4225 = vmatpush2.msra.mxu0 %v1165_v30  ;;  %v1282_v41 = vld [vmem:[%s8015_s0 + $0x1f28] sm:$0xff]  ;;  %v1281_v45 = vld [vmem:[%s8015_s0 + $0x1f20] sm:$0xff] }
 0x13e   : > { %4296 = vmatpush2.msra.mxu1 %v1293_v31  ;;  %4226 = vmatprep.subr.mxu0 %v1162_v32  ;;  %v1150_v46 = vld [vmem:[%s8015_s0 + $0x1b08] sm:$0xff]  ;;  %v1149_v49 = vld [vmem:[%s8015_s0 + $0x1b00] sm:$0xff]  ;;  %v8635_v32 = vcombine.high %v8620_v19, %v8620_v19 }
 0x13f   : > { %4297 = vmatprep.subr.mxu1 %v1290_v33  ;;  %4227 = vmatpush2.msra.mxu0 %v1161_v34  ;;  %v1278_v47 = vld [vmem:[%s8015_s0 + $0x1f08] sm:$0xff]  ;;  %v1277_v50 = vld [vmem:[%s8015_s0 + $0x1f00] sm:$0xff] }
 0x140   : > { %4298 = vmatpush2.msra.mxu1 %v1289_v35  ;;  %4228 = vmatprep.subr.mxu0 %v1158_v36  ;;  %v1146_v51 = vld [vmem:[%s8015_s0 + $0x1ae8] sm:$0xff]  ;;  %v1145_v55 = vld [vmem:[%s8015_s0 + $0x1ae0] sm:$0xff]  ;;  %v8641_v35 = vcombine.high %v8627_v25, %v8627_v25 }
 0x141   : > { %4299 = vmatprep.subr.mxu1 %v1286_v37  ;;  %4229 = vmatpush2.msra.mxu0 %v1157_v38  ;;  %v1274_v53 = vld [vmem:[%s8015_s0 + $0x1ee8] sm:$0xff]  ;;  %v1273_v56 = vld [vmem:[%s8015_s0 + $0x1ee0] sm:$0xff] }
 0x142   : > { %4300 = vmatpush2.msra.mxu1 %v1285_v39  ;;  %4230 = vmatprep.subr.mxu0 %v1154_v40  ;;  %v1142_v58 = vld [vmem:[%s8015_s0 + $0x1ac8] sm:$0xff]  ;;  %v1141_v60 = vld [vmem:[%s8015_s0 + $0x1ac0] sm:$0xff] }
 0x143   : > { %4301 = vmatprep.subr.mxu1 %v1282_v41  ;;  %4231 = vmatpush2.msra.mxu0 %v1153_v44  ;;  %v1270_v59 = vld [vmem:[%s8015_s0 + $0x1ec8] sm:$0xff]  ;;  %v1269_v61 = vld [vmem:[%s8015_s0 + $0x1ec0] sm:$0xff] }
 0x144   : > { %4302 = vmatpush2.msra.mxu1 %v1281_v45  ;;  %4232 = vmatprep.subr.mxu0 %v1150_v46  ;;  %v1138_v63 = vld [vmem:[%s8015_s0 + $0x1aa8] sm:$0xff]  ;;  %v1137_v2 = vld [vmem:[%s8015_s0 + $0x1aa0] sm:$0xff] }
 0x145   : > { %4303 = vmatprep.subr.mxu1 %v1278_v47  ;;  %4233 = vmatpush2.msra.mxu0 %v1149_v49  ;;  %v1266_v0 = vld [vmem:[%s8015_s0 + $0x1ea8] sm:$0xff]  ;;  %v1265_v3 = vld [vmem:[%s8015_s0 + $0x1ea0] sm:$0xff] }
 0x146   : > { %4304 = vmatpush2.msra.mxu1 %v1277_v50  ;;  %4234 = vmatprep.subr.mxu0 %v1146_v51  ;;  %v1134_v5 = vld [vmem:[%s8015_s0 + $0x1a88] sm:$0xff]  ;;  %v1133_v7 = vld [vmem:[%s8015_s0 + $0x1a80] sm:$0xff] }
 0x147   : > { %4305 = vmatprep.subr.mxu1 %v1274_v53  ;;  %4235 = vmatpush2.msra.mxu0 %v1145_v55  ;;  %v1262_v6 = vld [vmem:[%s8015_s0 + $0x1e88] sm:$0xff]  ;;  %v1261_v9 = vld [vmem:[%s8015_s0 + $0x1e80] sm:$0xff] }
 0x148   : > { %4306 = vmatpush2.msra.mxu1 %v1273_v56  ;;  %4236 = vmatprep.subr.mxu0 %v1142_v58  ;;  %v1130_v11 = vld [vmem:[%s8015_s0 + $0x1a68] sm:$0xff]  ;;  %v1129_v14 = vld [vmem:[%s8015_s0 + $0x1a60] sm:$0xff] }
 0x149   : > { %4307 = vmatprep.subr.mxu1 %v1270_v59  ;;  %4237 = vmatpush2.msra.mxu0 %v1141_v60  ;;  %v1258_v12 = vld [vmem:[%s8015_s0 + $0x1e68] sm:$0xff]  ;;  %v1257_v15 = vld [vmem:[%s8015_s0 + $0x1e60] sm:$0xff] }
 0x14a   : > { %4308 = vmatpush2.msra.mxu1 %v1269_v61  ;;  %4238 = vmatprep.subr.mxu0 %v1138_v63  ;;  %v1126_v17 = vld [vmem:[%s8015_s0 + $0x1a48] sm:$0xff]  ;;  %v1125_v20 = vld [vmem:[%s8015_s0 + $0x1a40] sm:$0xff] }
 0x14b   : > { %4309 = vmatprep.subr.mxu1 %v1266_v0  ;;  %4239 = vmatpush2.msra.mxu0 %v1137_v2  ;;  %v1254_v18 = vld [vmem:[%s8015_s0 + $0x1e48] sm:$0xff]  ;;  %v1253_v22 = vld [vmem:[%s8015_s0 + $0x1e40] sm:$0xff] }
 0x14c   : > { %4310 = vmatpush2.msra.mxu1 %v1265_v3  ;;  %4240 = vmatprep.subr.mxu0 %v1134_v5  ;;  %v1122_v23 = vld [vmem:[%s8015_s0 + $0x1a28] sm:$0xff]  ;;  %v1121_v27 = vld [vmem:[%s8015_s0 + $0x1a20] sm:$0xff] }
 0x14d   : > { %4311 = vmatprep.subr.mxu1 %v1262_v6  ;;  %4241 = vmatpush2.msra.mxu0 %v1133_v7  ;;  %v1250_v24 = vld [vmem:[%s8015_s0 + $0x1e28] sm:$0xff]  ;;  %v1249_v28 = vld [vmem:[%s8015_s0 + $0x1e20] sm:$0xff] }
 0x14e   : > { %4312 = vmatpush2.msra.mxu1 %v1261_v9  ;;  %4242 = vmatprep.subr.mxu0 %v1130_v11  ;;  %v1118_v30 = vld [vmem:[%s8015_s0 + $0x1a08] sm:$0xff]  ;;  %v1117_v33 = vld [vmem:[%s8015_s0 + $0x1a00] sm:$0xff] }
 0x14f   : > { %4313 = vmatprep.subr.mxu1 %v1258_v12  ;;  %4243 = vmatpush2.msra.mxu0 %v1129_v14  ;;  %v1246_v31 = vld [vmem:[%s8015_s0 + $0x1e08] sm:$0xff]  ;;  %v1245_v34 = vld [vmem:[%s8015_s0 + $0x1e00] sm:$0xff] }
 0x150   : > { %4314 = vmatpush2.msra.mxu1 %v1257_v15  ;;  %4244 = vmatprep.subr.mxu0 %v1126_v17  ;;  %v1370_v36 = vld [vmem:[%s8015_s0 + $0x21e8] sm:$0xff]  ;;  %v1369_v38 = vld [vmem:[%s8015_s0 + $0x21e0] sm:$0xff] }
 0x151   : > { %4315 = vmatprep.subr.mxu1 %v1254_v18  ;;  %4245 = vmatpush2.msra.mxu0 %v1125_v20  ;;  %v1498_v37 = vld [vmem:[%s8015_s0 + $0x25e8] sm:$0xff]  ;;  %v1497_v39 = vld [vmem:[%s8015_s0 + $0x25e0] sm:$0xff] }
 0x152   : > { %4316 = vmatpush2.msra.mxu1 %v1253_v22  ;;  %4246 = vmatprep.subr.mxu0 %v1122_v23  ;;  %v1366_v40 = vld [vmem:[%s8015_s0 + $0x21c8] sm:$0xff]  ;;  %v1365_v44 = vld [vmem:[%s8015_s0 + $0x21c0] sm:$0xff] }
 0x153   : > { %4317 = vmatprep.subr.mxu1 %v1250_v24  ;;  %4247 = vmatpush2.msra.mxu0 %v1121_v27  ;;  %v1494_v41 = vld [vmem:[%s8015_s0 + $0x25c8] sm:$0xff]  ;;  %v1493_v45 = vld [vmem:[%s8015_s0 + $0x25c0] sm:$0xff] }
 0x154   : > { %4318 = vmatpush2.msra.mxu1 %v1249_v28  ;;  %4248 = vmatprep.subr.mxu0 %v1118_v30  ;;  %v1362_v46 = vld [vmem:[%s8015_s0 + $0x21a8] sm:$0xff]  ;;  %v1361_v49 = vld [vmem:[%s8015_s0 + $0x21a0] sm:$0xff] }
 0x155   : > { %4319 = vmatprep.subr.mxu1 %v1246_v31  ;;  %4249 = vmatpush2.msra.mxu0 %v1117_v33  ;;  %v1490_v47 = vld [vmem:[%s8015_s0 + $0x25a8] sm:$0xff]  ;;  %v1489_v50 = vld [vmem:[%s8015_s0 + $0x25a0] sm:$0xff] }
 0x156   : > { %4250 = vmatprep.mubr.f32.mxu0 %v8635_v32  ;;  %4320 = vmatpush2.msra.mxu1 %v1245_v34  ;;  %v1358_v51 = vld [vmem:[%s8015_s0 + $0x2188] sm:$0xff]  ;;  %v1357_v55 = vld [vmem:[%s8015_s0 + $0x2180] sm:$0xff] }
 0x157   : > { %4251 = vmatmul.mubr.f32.vlgmr.msra.gmra.mxu0 %v8620_v19  ;;  %4321 = vmatprep.mubr.f32.mxu1 %v8641_v35  ;;  %v1486_v53 = vld [vmem:[%s8015_s0 + $0x2588] sm:$0xff]  ;;  %v1485_v56 = vld [vmem:[%s8015_s0 + $0x2580] sm:$0xff] }
 0x158   : > { %4328 = vmatprep.subr.mxu0 %v1370_v36  ;;  %4399 = vmatprep.subr.mxu1 %v1498_v37  ;;  %v1354_v58 = vld [vmem:[%s8015_s0 + $0x2168] sm:$0xff]  ;;  %v1353_v60 = vld [vmem:[%s8015_s0 + $0x2160] sm:$0xff] }
 0x159   : > { %4322 = vmatmul.mubr.f32.vlgmr.msra.gmra.mxu1 %v8627_v25  ;;  %4329 = vmatpush1.msra.mxu0 %v1369_v38  ;;  %v1482_v59 = vld [vmem:[%s8015_s0 + $0x2568] sm:$0xff]  ;;  %v1481_v61 = vld [vmem:[%s8015_s0 + $0x2560] sm:$0xff] }
 0x15a   : > { %4400 = vmatpush1.msra.mxu1 %v1497_v39  ;;  %4330 = vmatprep.subr.mxu0 %v1366_v40  ;;  %v1350_v63 = vld [vmem:[%s8015_s0 + $0x2148] sm:$0xff]  ;;  %v1349_v2 = vld [vmem:[%s8015_s0 + $0x2140] sm:$0xff] }
 0x15b   : > { %4401 = vmatprep.subr.mxu1 %v1494_v41  ;;  %4331 = vmatpush1.msra.mxu0 %v1365_v44  ;;  %v1478_v0 = vld [vmem:[%s8015_s0 + $0x2548] sm:$0xff]  ;;  %v1477_v3 = vld [vmem:[%s8015_s0 + $0x2540] sm:$0xff] }
 0x15c   : > { %4402 = vmatpush1.msra.mxu1 %v1493_v45  ;;  %4332 = vmatprep.subr.mxu0 %v1362_v46  ;;  %v1346_v4 = vld [vmem:[%s8015_s0 + $0x2128] sm:$0xff]  ;;  %v1345_v6 = vld [vmem:[%s8015_s0 + $0x2120] sm:$0xff] }
 0x15d   : > { %4403 = vmatprep.subr.mxu1 %v1490_v47  ;;  %4333 = vmatpush1.msra.mxu0 %v1361_v49  ;;  %v1474_v5 = vld [vmem:[%s8015_s0 + $0x2528] sm:$0xff]  ;;  %v1473_v7 = vld [vmem:[%s8015_s0 + $0x2520] sm:$0xff] }
 0x15e   : > { %4404 = vmatpush1.msra.mxu1 %v1489_v50  ;;  %4334 = vmatprep.subr.mxu0 %v1358_v51  ;;  %v1342_v9 = vld [vmem:[%s8015_s0 + $0x2108] sm:$0xff]  ;;  %v1341_v12 = vld [vmem:[%s8015_s0 + $0x2100] sm:$0xff] }
 0x15f   : > { %4405 = vmatprep.subr.mxu1 %v1486_v53  ;;  %4335 = vmatpush1.msra.mxu0 %v1357_v55  ;;  %v1470_v11 = vld [vmem:[%s8015_s0 + $0x2508] sm:$0xff]  ;;  %v1469_v13 = vld [vmem:[%s8015_s0 + $0x2500] sm:$0xff] }
 0x160   : > { %4406 = vmatpush1.msra.mxu1 %v1485_v56  ;;  %4336 = vmatprep.subr.mxu0 %v1354_v58  ;;  %v1338_v14 = vld [vmem:[%s8015_s0 + $0x20e8] sm:$0xff]  ;;  %v1337_v17 = vld [vmem:[%s8015_s0 + $0x20e0] sm:$0xff] }
 0x161   : > { %4407 = vmatprep.subr.mxu1 %v1482_v59  ;;  %4337 = vmatpush1.msra.mxu0 %v1353_v60  ;;  %v1466_v15 = vld [vmem:[%s8015_s0 + $0x24e8] sm:$0xff]  ;;  %v1465_v18 = vld [vmem:[%s8015_s0 + $0x24e0] sm:$0xff] }
 0x162   : > { %4408 = vmatpush1.msra.mxu1 %v1481_v61  ;;  %4338 = vmatprep.subr.mxu0 %v1350_v63  ;;  %v1334_v20 = vld [vmem:[%s8015_s0 + $0x20c8] sm:$0xff]  ;;  %v1333_v23 = vld [vmem:[%s8015_s0 + $0x20c0] sm:$0xff] }
 0x163   : > { %4409 = vmatprep.subr.mxu1 %v1478_v0  ;;  %4339 = vmatpush1.msra.mxu0 %v1349_v2  ;;  %v1462_v22 = vld [vmem:[%s8015_s0 + $0x24c8] sm:$0xff]  ;;  %v1461_v24 = vld [vmem:[%s8015_s0 + $0x24c0] sm:$0xff] }
 0x164   : > { %4410 = vmatpush1.msra.mxu1 %v1477_v3  ;;  %4340 = vmatprep.subr.mxu0 %v1346_v4  ;;  %v1330_v27 = vld [vmem:[%s8015_s0 + $0x20a8] sm:$0xff]  ;;  %v1329_v30 = vld [vmem:[%s8015_s0 + $0x20a0] sm:$0xff] }
 0x165   : > { %4411 = vmatprep.subr.mxu1 %v1474_v5  ;;  %4341 = vmatpush1.msra.mxu0 %v1345_v6  ;;  %v1458_v28 = vld [vmem:[%s8015_s0 + $0x24a8] sm:$0xff]  ;;  %v1457_v31 = vld [vmem:[%s8015_s0 + $0x24a0] sm:$0xff] }
 0x166   : > { %4412 = vmatpush1.msra.mxu1 %v1473_v7  ;;  %4342 = vmatprep.subr.mxu0 %v1342_v9  ;;  %v1326_v33 = vld [vmem:[%s8015_s0 + $0x2088] sm:$0xff]  ;;  %v1325_v36 = vld [vmem:[%s8015_s0 + $0x2080] sm:$0xff] }
 0x167   : > { %4413 = vmatprep.subr.mxu1 %v1470_v11  ;;  %4343 = vmatpush1.msra.mxu0 %v1341_v12  ;;  %v1454_v34 = vld [vmem:[%s8015_s0 + $0x2488] sm:$0xff]  ;;  %v1453_v37 = vld [vmem:[%s8015_s0 + $0x2480] sm:$0xff] }
 0x168   : > { %4414 = vmatpush1.msra.mxu1 %v1469_v13  ;;  %4344 = vmatprep.subr.mxu0 %v1338_v14  ;;  %v1322_v38 = vld [vmem:[%s8015_s0 + $0x2068] sm:$0xff]  ;;  %v1321_v40 = vld [vmem:[%s8015_s0 + $0x2060] sm:$0xff] }
 0x169   : > { %4415 = vmatprep.subr.mxu1 %v1466_v15  ;;  %4345 = vmatpush1.msra.mxu0 %v1337_v17  ;;  %v1450_v39 = vld [vmem:[%s8015_s0 + $0x2468] sm:$0xff]  ;;  %v1449_v41 = vld [vmem:[%s8015_s0 + $0x2460] sm:$0xff] }
 0x16a   : > { %4416 = vmatpush1.msra.mxu1 %v1465_v18  ;;  %4346 = vmatprep.subr.mxu0 %v1334_v20  ;;  %v1318_v44 = vld [vmem:[%s8015_s0 + $0x2048] sm:$0xff]  ;;  %v1317_v46 = vld [vmem:[%s8015_s0 + $0x2040] sm:$0xff] }
 0x16b   : > { %4417 = vmatprep.subr.mxu1 %v1462_v22  ;;  %4347 = vmatpush1.msra.mxu0 %v1333_v23  ;;  %v1446_v45 = vld [vmem:[%s8015_s0 + $0x2448] sm:$0xff]  ;;  %v1445_v47 = vld [vmem:[%s8015_s0 + $0x2440] sm:$0xff] }
 0x16c   : > { %4418 = vmatpush1.msra.mxu1 %v1461_v24  ;;  %4348 = vmatprep.subr.mxu0 %v1330_v27  ;;  %v1314_v49 = vld [vmem:[%s8015_s0 + $0x2028] sm:$0xff]  ;;  %v1313_v51 = vld [vmem:[%s8015_s0 + $0x2020] sm:$0xff] }
 0x16d   : > { %4419 = vmatprep.subr.mxu1 %v1458_v28  ;;  %4349 = vmatpush1.msra.mxu0 %v1329_v30  ;;  %v1442_v50 = vld [vmem:[%s8015_s0 + $0x2428] sm:$0xff]  ;;  %v1441_v53 = vld [vmem:[%s8015_s0 + $0x2420] sm:$0xff] }
 0x16e   : > { %4420 = vmatpush1.msra.mxu1 %v1457_v31  ;;  %4350 = vmatprep.subr.mxu0 %v1326_v33  ;;  %v1310_v55 = vld [vmem:[%s8015_s0 + $0x2008] sm:$0xff]  ;;  %v1309_v58 = vld [vmem:[%s8015_s0 + $0x2000] sm:$0xff] }
 0x16f   : > { %4421 = vmatprep.subr.mxu1 %v1454_v34  ;;  %4351 = vmatpush1.msra.mxu0 %v1325_v36  ;;  %v1438_v56 = vld [vmem:[%s8015_s0 + $0x2408] sm:$0xff]  ;;  %v1437_v59 = vld [vmem:[%s8015_s0 + $0x2400] sm:$0xff] }
 0x170   : > { %4422 = vmatpush1.msra.mxu1 %v1453_v37  ;;  %4352 = vmatprep.subr.mxu0 %v1322_v38  ;;  %v1434_v60 = vld [vmem:[%s8015_s0 + $0x23e8] sm:$0xff]  ;;  %v1433_v63 = vld [vmem:[%s8015_s0 + $0x23e0] sm:$0xff] }
 0x171   : > { %4423 = vmatprep.subr.mxu1 %v1450_v39  ;;  %4353 = vmatpush1.msra.mxu0 %v1321_v40  ;;  %v1562_v61 = vld [vmem:[%s8015_s0 + $0x27e8] sm:$0xff]  ;;  %v1561_v0 = vld [vmem:[%s8015_s0 + $0x27e0] sm:$0xff] }
 0x172   : > { %4424 = vmatpush1.msra.mxu1 %v1449_v41  ;;  %4354 = vmatprep.subr.mxu0 %v1318_v44  ;;  %v1430_v2 = vld [vmem:[%s8015_s0 + $0x23c8] sm:$0xff]  ;;  %v1429_v4 = vld [vmem:[%s8015_s0 + $0x23c0] sm:$0xff] }
 0x173   : > { %4425 = vmatprep.subr.mxu1 %v1446_v45  ;;  %4355 = vmatpush1.msra.mxu0 %v1317_v46  ;;  %v1558_v3 = vld [vmem:[%s8015_s0 + $0x27c8] sm:$0xff]  ;;  %v1557_v5 = vld [vmem:[%s8015_s0 + $0x27c0] sm:$0xff] }
 0x174   : > { %4426 = vmatpush1.msra.mxu1 %v1445_v47  ;;  %4356 = vmatprep.subr.mxu0 %v1314_v49  ;;  %v1426_v6 = vld [vmem:[%s8015_s0 + $0x23a8] sm:$0xff]  ;;  %v1425_v9 = vld [vmem:[%s8015_s0 + $0x23a0] sm:$0xff] }
 0x175   : > { %4427 = vmatprep.subr.mxu1 %v1442_v50  ;;  %4357 = vmatpush1.msra.mxu0 %v1313_v51  ;;  %v1554_v7 = vld [vmem:[%s8015_s0 + $0x27a8] sm:$0xff]  ;;  %v1553_v11 = vld [vmem:[%s8015_s0 + $0x27a0] sm:$0xff] }
 0x176   : > { %4428 = vmatpush1.msra.mxu1 %v1441_v53  ;;  %4358 = vmatprep.subr.mxu0 %v1310_v55  ;;  %v1422_v12 = vld [vmem:[%s8015_s0 + $0x2388] sm:$0xff]  ;;  %v1421_v14 = vld [vmem:[%s8015_s0 + $0x2380] sm:$0xff] }
 0x177   : > { %4429 = vmatprep.subr.mxu1 %v1438_v56  ;;  %4359 = vmatpush1.msra.mxu0 %v1309_v58  ;;  %v1550_v13 = vld [vmem:[%s8015_s0 + $0x2788] sm:$0xff]  ;;  %v1549_v15 = vld [vmem:[%s8015_s0 + $0x2780] sm:$0xff] }
 0x178   : > { %4430 = vmatpush1.msra.mxu1 %v1437_v59  ;;  %4360 = vmatprep.subr.mxu0 %v1434_v60  ;;  %v1418_v17 = vld [vmem:[%s8015_s0 + $0x2368] sm:$0xff]  ;;  %v1417_v20 = vld [vmem:[%s8015_s0 + $0x2360] sm:$0xff] }
 0x179   : > { %4431 = vmatprep.subr.mxu1 %v1562_v61  ;;  %4361 = vmatpush2.msra.mxu0 %v1433_v63  ;;  %v1546_v18 = vld [vmem:[%s8015_s0 + $0x2768] sm:$0xff]  ;;  %v1545_v22 = vld [vmem:[%s8015_s0 + $0x2760] sm:$0xff] }
 0x17a   : > { %4432 = vmatpush2.msra.mxu1 %v1561_v0  ;;  %4362 = vmatprep.subr.mxu0 %v1430_v2  ;;  %v1414_v23 = vld [vmem:[%s8015_s0 + $0x2348] sm:$0xff]  ;;  %v1413_v27 = vld [vmem:[%s8015_s0 + $0x2340] sm:$0xff] }
 0x17b   : > { %4433 = vmatprep.subr.mxu1 %v1558_v3  ;;  %4363 = vmatpush2.msra.mxu0 %v1429_v4  ;;  %v1542_v24 = vld [vmem:[%s8015_s0 + $0x2748] sm:$0xff]  ;;  %v1541_v28 = vld [vmem:[%s8015_s0 + $0x2740] sm:$0xff] }
 0x17c   : > { %4434 = vmatpush2.msra.mxu1 %v1557_v5  ;;  %4364 = vmatprep.subr.mxu0 %v1426_v6  ;;  %v1410_v30 = vld [vmem:[%s8015_s0 + $0x2328] sm:$0xff]  ;;  %v1409_v33 = vld [vmem:[%s8015_s0 + $0x2320] sm:$0xff] }
 0x17d   : > { %4435 = vmatprep.subr.mxu1 %v1554_v7  ;;  %4365 = vmatpush2.msra.mxu0 %v1425_v9  ;;  %v1538_v31 = vld [vmem:[%s8015_s0 + $0x2728] sm:$0xff]  ;;  %v1537_v34 = vld [vmem:[%s8015_s0 + $0x2720] sm:$0xff] }
 0x17e   : > { %4436 = vmatpush2.msra.mxu1 %v1553_v11  ;;  %4366 = vmatprep.subr.mxu0 %v1422_v12  ;;  %v1406_v36 = vld [vmem:[%s8015_s0 + $0x2308] sm:$0xff]  ;;  %v1405_v38 = vld [vmem:[%s8015_s0 + $0x2300] sm:$0xff] }
 0x17f   : > { %4437 = vmatprep.subr.mxu1 %v1550_v13  ;;  %4367 = vmatpush2.msra.mxu0 %v1421_v14  ;;  %v1534_v37 = vld [vmem:[%s8015_s0 + $0x2708] sm:$0xff]  ;;  %v1533_v39 = vld [vmem:[%s8015_s0 + $0x2700] sm:$0xff] }
 0x180   : > { %4438 = vmatpush2.msra.mxu1 %v1549_v15  ;;  %4368 = vmatprep.subr.mxu0 %v1418_v17  ;;  %v1402_v40 = vld [vmem:[%s8015_s0 + $0x22e8] sm:$0xff]  ;;  %v1401_v44 = vld [vmem:[%s8015_s0 + $0x22e0] sm:$0xff] }
 0x181   : > { %4439 = vmatprep.subr.mxu1 %v1546_v18  ;;  %4369 = vmatpush2.msra.mxu0 %v1417_v20  ;;  %v1530_v41 = vld [vmem:[%s8015_s0 + $0x26e8] sm:$0xff]  ;;  %v1529_v45 = vld [vmem:[%s8015_s0 + $0x26e0] sm:$0xff] }
 0x182   : > { %4440 = vmatpush2.msra.mxu1 %v1545_v22  ;;  %4370 = vmatprep.subr.mxu0 %v1414_v23  ;;  %v1398_v46 = vld [vmem:[%s8015_s0 + $0x22c8] sm:$0xff]  ;;  %v1397_v49 = vld [vmem:[%s8015_s0 + $0x22c0] sm:$0xff] }
 0x183   : > { %4441 = vmatprep.subr.mxu1 %v1542_v24  ;;  %4371 = vmatpush2.msra.mxu0 %v1413_v27  ;;  %v1526_v47 = vld [vmem:[%s8015_s0 + $0x26c8] sm:$0xff]  ;;  %v1525_v50 = vld [vmem:[%s8015_s0 + $0x26c0] sm:$0xff] }
 0x184   : > { %4442 = vmatpush2.msra.mxu1 %v1541_v28  ;;  %4372 = vmatprep.subr.mxu0 %v1410_v30  ;;  %v1394_v51 = vld [vmem:[%s8015_s0 + $0x22a8] sm:$0xff]  ;;  %v1393_v55 = vld [vmem:[%s8015_s0 + $0x22a0] sm:$0xff] }
 0x185   : > { %4443 = vmatprep.subr.mxu1 %v1538_v31  ;;  %4373 = vmatpush2.msra.mxu0 %v1409_v33  ;;  %v1522_v53 = vld [vmem:[%s8015_s0 + $0x26a8] sm:$0xff]  ;;  %v1521_v56 = vld [vmem:[%s8015_s0 + $0x26a0] sm:$0xff] }
 0x186   : > { %4444 = vmatpush2.msra.mxu1 %v1537_v34  ;;  %4374 = vmatprep.subr.mxu0 %v1406_v36  ;;  %v276_v58 = vld [vmem:[%s8152_s6 + $0x20] sm:$0xff]  ;;  %v1390_v59 = vld [vmem:[%s8015_s0 + $0x2288] sm:$0xff] }
 0x187   : > { %4445 = vmatprep.subr.mxu1 %v1534_v37  ;;  %4375 = vmatpush2.msra.mxu0 %v1405_v38  ;;  %v1518_v60 = vld [vmem:[%s8015_s0 + $0x2688] sm:$0xff]  ;;  %v1389_v61 = vld [vmem:[%s8015_s0 + $0x2280] sm:$0xff]  ;;  %v3566_v3 = vcombine.high %v276_v58, %v276_v58  ;;  %v8767_v9 = vrot.slane %v276_v58, %v8168_v52 }
 0x188   : > { %4446 = vmatpush2.msra.mxu1 %v1533_v39  ;;  %4376 = vmatprep.subr.mxu0 %v1402_v40  ;;  %v1517_v63 = vld [vmem:[%s8015_s0 + $0x2680] sm:$0xff]  ;;  %v1386_v0 = vld [vmem:[%s8015_s0 + $0x2268] sm:$0xff] }
 0x189   : > { %4447 = vmatprep.subr.mxu1 %v1530_v41  ;;  %4377 = vmatpush2.msra.mxu0 %v1401_v44  ;;  %v1514_v2 = vld [vmem:[%s8015_s0 + $0x2668] sm:$0xff]  ;;  %v1385_v4 = vld [vmem:[%s8015_s0 + $0x2260] sm:$0xff]  ;;  %v8774_v15 = vrot.slane %v3566_v3, %v8168_v52  ;;  %v8782_v23 = vcombine.high %v8767_v9, %v8767_v9 }
 0x18a   : > { %4448 = vmatpush2.msra.mxu1 %v1529_v45  ;;  %4378 = vmatprep.subr.mxu0 %v1398_v46  ;;  %v1513_v5 = vld [vmem:[%s8015_s0 + $0x2660] sm:$0xff]  ;;  %v1382_v6 = vld [vmem:[%s8015_s0 + $0x2248] sm:$0xff] }
 0x18b   : > { %4449 = vmatprep.subr.mxu1 %v1526_v47  ;;  %4379 = vmatpush2.msra.mxu0 %v1397_v49  ;;  %v1510_v7 = vld [vmem:[%s8015_s0 + $0x2648] sm:$0xff]  ;;  %v1381_v11 = vld [vmem:[%s8015_s0 + $0x2240] sm:$0xff]  ;;  %v8788_v28 = vcombine.high %v8774_v15, %v8774_v15 }
 0x18c   : > { %4450 = vmatpush2.msra.mxu1 %v1525_v50  ;;  %4380 = vmatprep.subr.mxu0 %v1394_v51  ;;  %v1509_v12 = vld [vmem:[%s8015_s0 + $0x2640] sm:$0xff]  ;;  %v1378_v13 = vld [vmem:[%s8015_s0 + $0x2228] sm:$0xff] }
 0x18d   : > { %4451 = vmatprep.subr.mxu1 %v1522_v53  ;;  %4381 = vmatpush2.msra.mxu0 %v1393_v55  ;;  %v1506_v14 = vld [vmem:[%s8015_s0 + $0x2628] sm:$0xff]  ;;  %v1377_v17 = vld [vmem:[%s8015_s0 + $0x2220] sm:$0xff] }
 0x18e   : > { %4452 = vmatpush2.msra.mxu1 %v1521_v56  ;;  %4382 = vmatprep.subr.mxu0 %v1390_v59  ;;  %v1505_v18 = vld [vmem:[%s8015_s0 + $0x2620] sm:$0xff]  ;;  %v1374_v20 = vld [vmem:[%s8015_s0 + $0x2208] sm:$0xff] }
 0x18f   : > { %4453 = vmatprep.subr.mxu1 %v1518_v60  ;;  %4383 = vmatpush2.msra.mxu0 %v1389_v61  ;;  %v1502_v22 = vld [vmem:[%s8015_s0 + $0x2608] sm:$0xff]  ;;  %v1373_v24 = vld [vmem:[%s8015_s0 + $0x2200] sm:$0xff] }
 0x190   : > { %4454 = vmatpush2.msra.mxu1 %v1517_v63  ;;  %4384 = vmatprep.subr.mxu0 %v1386_v0  ;;  %v1501_v27 = vld [vmem:[%s8015_s0 + $0x2600] sm:$0xff]  ;;  %v1626_v30 = vld [vmem:[%s8015_s0 + $0x29e8] sm:$0xff] }
 0x191   : > { %4455 = vmatprep.subr.mxu1 %v1514_v2  ;;  %4385 = vmatpush2.msra.mxu0 %v1385_v4  ;;  %v1754_v31 = vld [vmem:[%s8015_s0 + $0x2de8] sm:$0xff]  ;;  %v1625_v33 = vld [vmem:[%s8015_s0 + $0x29e0] sm:$0xff] }
 0x192   : > { %4456 = vmatpush2.msra.mxu1 %v1513_v5  ;;  %4386 = vmatprep.subr.mxu0 %v1382_v6  ;;  %v1753_v34 = vld [vmem:[%s8015_s0 + $0x2de0] sm:$0xff]  ;;  %v1622_v36 = vld [vmem:[%s8015_s0 + $0x29c8] sm:$0xff] }
 0x193   : > { %4457 = vmatprep.subr.mxu1 %v1510_v7  ;;  %4387 = vmatpush2.msra.mxu0 %v1381_v11  ;;  %v1750_v37 = vld [vmem:[%s8015_s0 + $0x2dc8] sm:$0xff]  ;;  %v1621_v38 = vld [vmem:[%s8015_s0 + $0x29c0] sm:$0xff] }
 0x194   : > { %4458 = vmatpush2.msra.mxu1 %v1509_v12  ;;  %4388 = vmatprep.subr.mxu0 %v1378_v13  ;;  %v1749_v39 = vld [vmem:[%s8015_s0 + $0x2dc0] sm:$0xff]  ;;  %v1618_v40 = vld [vmem:[%s8015_s0 + $0x29a8] sm:$0xff] }
 0x195   : > { %4459 = vmatprep.subr.mxu1 %v1506_v14  ;;  %4389 = vmatpush2.msra.mxu0 %v1377_v17  ;;  %v1746_v41 = vld [vmem:[%s8015_s0 + $0x2da8] sm:$0xff]  ;;  %v1617_v44 = vld [vmem:[%s8015_s0 + $0x29a0] sm:$0xff] }
 0x196   : > { %4460 = vmatpush2.msra.mxu1 %v1505_v18  ;;  %4390 = vmatprep.subr.mxu0 %v1374_v20  ;;  %v1745_v45 = vld [vmem:[%s8015_s0 + $0x2da0] sm:$0xff]  ;;  %v1614_v46 = vld [vmem:[%s8015_s0 + $0x2988] sm:$0xff] }
 0x197   : > { %4461 = vmatprep.subr.mxu1 %v1502_v22  ;;  %4391 = vmatpush2.msra.mxu0 %v1373_v24  ;;  %v1742_v47 = vld [vmem:[%s8015_s0 + $0x2d88] sm:$0xff]  ;;  %v1613_v49 = vld [vmem:[%s8015_s0 + $0x2980] sm:$0xff] }
 0x198   : > { %4392 = vmatprep.mubr.f32.mxu0 %v8782_v23  ;;  %4462 = vmatpush2.msra.mxu1 %v1501_v27  ;;  %v1741_v50 = vld [vmem:[%s8015_s0 + $0x2d80] sm:$0xff]  ;;  %v1610_v51 = vld [vmem:[%s8015_s0 + $0x2968] sm:$0xff] }
 0x199   : > { %4393 = vmatmul.mubr.f32.vlgmr.msra.gmra.mxu0 %v8767_v9  ;;  %4463 = vmatprep.mubr.f32.mxu1 %v8788_v28  ;;  %v1738_v53 = vld [vmem:[%s8015_s0 + $0x2d68] sm:$0xff]  ;;  %v1609_v55 = vld [vmem:[%s8015_s0 + $0x2960] sm:$0xff] }
 0x19a   : > { %4470 = vmatprep.subr.mxu0 %v1626_v30  ;;  %4541 = vmatprep.subr.mxu1 %v1754_v31  ;;  %v1737_v56 = vld [vmem:[%s8015_s0 + $0x2d60] sm:$0xff]  ;;  %v1606_v58 = vld [vmem:[%s8015_s0 + $0x2948] sm:$0xff] }
 0x19b   : > { %4464 = vmatmul.mubr.f32.vlgmr.msra.gmra.mxu1 %v8774_v15  ;;  %4471 = vmatpush1.msra.mxu0 %v1625_v33  ;;  %v1734_v59 = vld [vmem:[%s8015_s0 + $0x2d48] sm:$0xff]  ;;  %v1605_v60 = vld [vmem:[%s8015_s0 + $0x2940] sm:$0xff] }
 0x19c   : > { %4542 = vmatpush1.msra.mxu1 %v1753_v34  ;;  %4472 = vmatprep.subr.mxu0 %v1622_v36  ;;  %v1733_v61 = vld [vmem:[%s8015_s0 + $0x2d40] sm:$0xff]  ;;  %v1602_v63 = vld [vmem:[%s8015_s0 + $0x2928] sm:$0xff] }
 0x19d   : > { %4543 = vmatprep.subr.mxu1 %v1750_v37  ;;  %4473 = vmatpush1.msra.mxu0 %v1621_v38  ;;  %v1730_v0 = vld [vmem:[%s8015_s0 + $0x2d28] sm:$0xff]  ;;  %v1601_v2 = vld [vmem:[%s8015_s0 + $0x2920] sm:$0xff] }
 0x19e   : > { %4544 = vmatpush1.msra.mxu1 %v1749_v39  ;;  %4474 = vmatprep.subr.mxu0 %v1618_v40  ;;  %v1729_v3 = vld [vmem:[%s8015_s0 + $0x2d20] sm:$0xff]  ;;  %v1598_v4 = vld [vmem:[%s8015_s0 + $0x2908] sm:$0xff] }
 0x19f   : > { %4545 = vmatprep.subr.mxu1 %v1746_v41  ;;  %4475 = vmatpush1.msra.mxu0 %v1617_v44  ;;  %v1726_v5 = vld [vmem:[%s8015_s0 + $0x2d08] sm:$0xff]  ;;  %v1597_v6 = vld [vmem:[%s8015_s0 + $0x2900] sm:$0xff] }
 0x1a0   : > { %4546 = vmatpush1.msra.mxu1 %v1745_v45  ;;  %4476 = vmatprep.subr.mxu0 %v1614_v46  ;;  %v1725_v7 = vld [vmem:[%s8015_s0 + $0x2d00] sm:$0xff]  ;;  %v1594_v11 = vld [vmem:[%s8015_s0 + $0x28e8] sm:$0xff] }
 0x1a1   : > { %4547 = vmatprep.subr.mxu1 %v1742_v47  ;;  %4477 = vmatpush1.msra.mxu0 %v1613_v49  ;;  %v1722_v12 = vld [vmem:[%s8015_s0 + $0x2ce8] sm:$0xff]  ;;  %v1593_v13 = vld [vmem:[%s8015_s0 + $0x28e0] sm:$0xff] }
 0x1a2   : > { %4548 = vmatpush1.msra.mxu1 %v1741_v50  ;;  %4478 = vmatprep.subr.mxu0 %v1610_v51  ;;  %v1721_v14 = vld [vmem:[%s8015_s0 + $0x2ce0] sm:$0xff]  ;;  %v1590_v17 = vld [vmem:[%s8015_s0 + $0x28c8] sm:$0xff] }
 0x1a3   : > { %4549 = vmatprep.subr.mxu1 %v1738_v53  ;;  %4479 = vmatpush1.msra.mxu0 %v1609_v55  ;;  %v1718_v18 = vld [vmem:[%s8015_s0 + $0x2cc8] sm:$0xff]  ;;  %v1589_v20 = vld [vmem:[%s8015_s0 + $0x28c0] sm:$0xff] }
 0x1a4   : > { %4550 = vmatpush1.msra.mxu1 %v1737_v56  ;;  %4480 = vmatprep.subr.mxu0 %v1606_v58  ;;  %v1717_v22 = vld [vmem:[%s8015_s0 + $0x2cc0] sm:$0xff]  ;;  %v1586_v24 = vld [vmem:[%s8015_s0 + $0x28a8] sm:$0xff] }
 0x1a5   : > { %4551 = vmatprep.subr.mxu1 %v1734_v59  ;;  %4481 = vmatpush1.msra.mxu0 %v1605_v60  ;;  %v1714_v27 = vld [vmem:[%s8015_s0 + $0x2ca8] sm:$0xff]  ;;  %v1585_v30 = vld [vmem:[%s8015_s0 + $0x28a0] sm:$0xff] }
 0x1a6   : > { %4552 = vmatpush1.msra.mxu1 %v1733_v61  ;;  %4482 = vmatprep.subr.mxu0 %v1602_v63  ;;  %v1713_v31 = vld [vmem:[%s8015_s0 + $0x2ca0] sm:$0xff]  ;;  %v1582_v33 = vld [vmem:[%s8015_s0 + $0x2888] sm:$0xff] }
 0x1a7   : > { %4553 = vmatprep.subr.mxu1 %v1730_v0  ;;  %4483 = vmatpush1.msra.mxu0 %v1601_v2  ;;  %v1710_v34 = vld [vmem:[%s8015_s0 + $0x2c88] sm:$0xff]  ;;  %v1581_v36 = vld [vmem:[%s8015_s0 + $0x2880] sm:$0xff] }
 0x1a8   : > { %4554 = vmatpush1.msra.mxu1 %v1729_v3  ;;  %4484 = vmatprep.subr.mxu0 %v1598_v4  ;;  %v1709_v37 = vld [vmem:[%s8015_s0 + $0x2c80] sm:$0xff]  ;;  %v1578_v38 = vld [vmem:[%s8015_s0 + $0x2868] sm:$0xff] }
 0x1a9   : > { %4555 = vmatprep.subr.mxu1 %v1726_v5  ;;  %4485 = vmatpush1.msra.mxu0 %v1597_v6  ;;  %v1706_v39 = vld [vmem:[%s8015_s0 + $0x2c68] sm:$0xff]  ;;  %v1577_v40 = vld [vmem:[%s8015_s0 + $0x2860] sm:$0xff] }
 0x1aa   : > { %4556 = vmatpush1.msra.mxu1 %v1725_v7  ;;  %4486 = vmatprep.subr.mxu0 %v1594_v11  ;;  %v1705_v41 = vld [vmem:[%s8015_s0 + $0x2c60] sm:$0xff]  ;;  %v1574_v44 = vld [vmem:[%s8015_s0 + $0x2848] sm:$0xff] }
 0x1ab   : > { %4557 = vmatprep.subr.mxu1 %v1722_v12  ;;  %4487 = vmatpush1.msra.mxu0 %v1593_v13  ;;  %v1702_v45 = vld [vmem:[%s8015_s0 + $0x2c48] sm:$0xff]  ;;  %v1573_v46 = vld [vmem:[%s8015_s0 + $0x2840] sm:$0xff] }
 0x1ac   : > { %4558 = vmatpush1.msra.mxu1 %v1721_v14  ;;  %4488 = vmatprep.subr.mxu0 %v1590_v17  ;;  %v1701_v47 = vld [vmem:[%s8015_s0 + $0x2c40] sm:$0xff]  ;;  %v1570_v49 = vld [vmem:[%s8015_s0 + $0x2828] sm:$0xff] }
 0x1ad   : > { %4559 = vmatprep.subr.mxu1 %v1718_v18  ;;  %4489 = vmatpush1.msra.mxu0 %v1589_v20  ;;  %v1698_v50 = vld [vmem:[%s8015_s0 + $0x2c28] sm:$0xff]  ;;  %v1569_v51 = vld [vmem:[%s8015_s0 + $0x2820] sm:$0xff] }
 0x1ae   : > { %4560 = vmatpush1.msra.mxu1 %v1717_v22  ;;  %4490 = vmatprep.subr.mxu0 %v1586_v24  ;;  %v1697_v53 = vld [vmem:[%s8015_s0 + $0x2c20] sm:$0xff]  ;;  %v1566_v55 = vld [vmem:[%s8015_s0 + $0x2808] sm:$0xff] }
 0x1af   : > { %4561 = vmatprep.subr.mxu1 %v1714_v27  ;;  %4491 = vmatpush1.msra.mxu0 %v1585_v30  ;;  %v1694_v56 = vld [vmem:[%s8015_s0 + $0x2c08] sm:$0xff]  ;;  %v1565_v58 = vld [vmem:[%s8015_s0 + $0x2800] sm:$0xff] }
 0x1b0   : > { %4562 = vmatpush1.msra.mxu1 %v1713_v31  ;;  %4492 = vmatprep.subr.mxu0 %v1582_v33  ;;  %v1693_v59 = vld [vmem:[%s8015_s0 + $0x2c00] sm:$0xff]  ;;  %v1690_v60 = vld [vmem:[%s8015_s0 + $0x2be8] sm:$0xff] }
 0x1b1   : > { %4563 = vmatprep.subr.mxu1 %v1710_v34  ;;  %4493 = vmatpush1.msra.mxu0 %v1581_v36  ;;  %v1818_v61 = vld [vmem:[%s8015_s0 + $0x2fe8] sm:$0xff]  ;;  %v1689_v63 = vld [vmem:[%s8015_s0 + $0x2be0] sm:$0xff] }
 0x1b2   : > { %4564 = vmatpush1.msra.mxu1 %v1709_v37  ;;  %4494 = vmatprep.subr.mxu0 %v1578_v38  ;;  %v1817_v0 = vld [vmem:[%s8015_s0 + $0x2fe0] sm:$0xff]  ;;  %v1686_v2 = vld [vmem:[%s8015_s0 + $0x2bc8] sm:$0xff] }
 0x1b3   : > { %4565 = vmatprep.subr.mxu1 %v1706_v39  ;;  %4495 = vmatpush1.msra.mxu0 %v1577_v40  ;;  %v1814_v3 = vld [vmem:[%s8015_s0 + $0x2fc8] sm:$0xff]  ;;  %v1685_v4 = vld [vmem:[%s8015_s0 + $0x2bc0] sm:$0xff] }
 0x1b4   : > { %4566 = vmatpush1.msra.mxu1 %v1705_v41  ;;  %4496 = vmatprep.subr.mxu0 %v1574_v44  ;;  %v1813_v5 = vld [vmem:[%s8015_s0 + $0x2fc0] sm:$0xff]  ;;  %v1682_v6 = vld [vmem:[%s8015_s0 + $0x2ba8] sm:$0xff] }
 0x1b5   : > { %4567 = vmatprep.subr.mxu1 %v1702_v45  ;;  %4497 = vmatpush1.msra.mxu0 %v1573_v46  ;;  %v1810_v7 = vld [vmem:[%s8015_s0 + $0x2fa8] sm:$0xff]  ;;  %v1681_v11 = vld [vmem:[%s8015_s0 + $0x2ba0] sm:$0xff] }
 0x1b6   : > { %4568 = vmatpush1.msra.mxu1 %v1701_v47  ;;  %4498 = vmatprep.subr.mxu0 %v1570_v49  ;;  %v1809_v12 = vld [vmem:[%s8015_s0 + $0x2fa0] sm:$0xff]  ;;  %v1678_v13 = vld [vmem:[%s8015_s0 + $0x2b88] sm:$0xff] }
 0x1b7   : > { %4569 = vmatprep.subr.mxu1 %v1698_v50  ;;  %4499 = vmatpush1.msra.mxu0 %v1569_v51  ;;  %v1806_v14 = vld [vmem:[%s8015_s0 + $0x2f88] sm:$0xff]  ;;  %v1677_v17 = vld [vmem:[%s8015_s0 + $0x2b80] sm:$0xff] }
 0x1b8   : > { %4570 = vmatpush1.msra.mxu1 %v1697_v53  ;;  %4500 = vmatprep.subr.mxu0 %v1566_v55  ;;  %v1805_v18 = vld [vmem:[%s8015_s0 + $0x2f80] sm:$0xff]  ;;  %v1674_v20 = vld [vmem:[%s8015_s0 + $0x2b68] sm:$0xff] }
 0x1b9   : > { %4571 = vmatprep.subr.mxu1 %v1694_v56  ;;  %4501 = vmatpush1.msra.mxu0 %v1565_v58  ;;  %v1802_v22 = vld [vmem:[%s8015_s0 + $0x2f68] sm:$0xff]  ;;  %v1673_v24 = vld [vmem:[%s8015_s0 + $0x2b60] sm:$0xff] }
 0x1ba   : > { %4572 = vmatpush1.msra.mxu1 %v1693_v59  ;;  %4502 = vmatprep.subr.mxu0 %v1690_v60  ;;  %v1801_v27 = vld [vmem:[%s8015_s0 + $0x2f60] sm:$0xff]  ;;  %v1670_v30 = vld [vmem:[%s8015_s0 + $0x2b48] sm:$0xff] }
 0x1bb   : > { %4573 = vmatprep.subr.mxu1 %v1818_v61  ;;  %4503 = vmatpush2.msra.mxu0 %v1689_v63  ;;  %v1798_v31 = vld [vmem:[%s8015_s0 + $0x2f48] sm:$0xff]  ;;  %v1669_v33 = vld [vmem:[%s8015_s0 + $0x2b40] sm:$0xff] }
 0x1bc   : > { %4574 = vmatpush2.msra.mxu1 %v1817_v0  ;;  %4504 = vmatprep.subr.mxu0 %v1686_v2  ;;  %v1797_v34 = vld [vmem:[%s8015_s0 + $0x2f40] sm:$0xff]  ;;  %v1666_v36 = vld [vmem:[%s8015_s0 + $0x2b28] sm:$0xff] }
 0x1bd   : > { %4575 = vmatprep.subr.mxu1 %v1814_v3  ;;  %4505 = vmatpush2.msra.mxu0 %v1685_v4  ;;  %v1794_v37 = vld [vmem:[%s8015_s0 + $0x2f28] sm:$0xff]  ;;  %v1665_v38 = vld [vmem:[%s8015_s0 + $0x2b20] sm:$0xff] }
 0x1be   : > { %4576 = vmatpush2.msra.mxu1 %v1813_v5  ;;  %4506 = vmatprep.subr.mxu0 %v1682_v6  ;;  %v1793_v39 = vld [vmem:[%s8015_s0 + $0x2f20] sm:$0xff]  ;;  %v1662_v40 = vld [vmem:[%s8015_s0 + $0x2b08] sm:$0xff] }
 0x1bf   : > { %4577 = vmatprep.subr.mxu1 %v1810_v7  ;;  %4507 = vmatpush2.msra.mxu0 %v1681_v11  ;;  %v1790_v41 = vld [vmem:[%s8015_s0 + $0x2f08] sm:$0xff]  ;;  %v1661_v44 = vld [vmem:[%s8015_s0 + $0x2b00] sm:$0xff] }
 0x1c0   : > { %4578 = vmatpush2.msra.mxu1 %v1809_v12  ;;  %4508 = vmatprep.subr.mxu0 %v1678_v13  ;;  %v1789_v45 = vld [vmem:[%s8015_s0 + $0x2f00] sm:$0xff]  ;;  %v1658_v46 = vld [vmem:[%s8015_s0 + $0x2ae8] sm:$0xff] }
 0x1c1   : > { %4579 = vmatprep.subr.mxu1 %v1806_v14  ;;  %4509 = vmatpush2.msra.mxu0 %v1677_v17  ;;  %v1786_v47 = vld [vmem:[%s8015_s0 + $0x2ee8] sm:$0xff]  ;;  %v1657_v49 = vld [vmem:[%s8015_s0 + $0x2ae0] sm:$0xff] }
 0x1c2   : > { %4580 = vmatpush2.msra.mxu1 %v1805_v18  ;;  %4510 = vmatprep.subr.mxu0 %v1674_v20  ;;  %v1785_v50 = vld [vmem:[%s8015_s0 + $0x2ee0] sm:$0xff]  ;;  %v1654_v51 = vld [vmem:[%s8015_s0 + $0x2ac8] sm:$0xff] }
 0x1c3   : > { %4581 = vmatprep.subr.mxu1 %v1802_v22  ;;  %4511 = vmatpush2.msra.mxu0 %v1673_v24  ;;  %v1782_v53 = vld [vmem:[%s8015_s0 + $0x2ec8] sm:$0xff]  ;;  %v1653_v55 = vld [vmem:[%s8015_s0 + $0x2ac0] sm:$0xff] }
 0x1c4   : > { %4582 = vmatpush2.msra.mxu1 %v1801_v27  ;;  %4512 = vmatprep.subr.mxu0 %v1670_v30  ;;  %v1781_v56 = vld [vmem:[%s8015_s0 + $0x2ec0] sm:$0xff]  ;;  %v1650_v58 = vld [vmem:[%s8015_s0 + $0x2aa8] sm:$0xff] }
 0x1c5   : > { %4583 = vmatprep.subr.mxu1 %v1798_v31  ;;  %4513 = vmatpush2.msra.mxu0 %v1669_v33  ;;  %v1778_v59 = vld [vmem:[%s8015_s0 + $0x2ea8] sm:$0xff]  ;;  %v1649_v60 = vld [vmem:[%s8015_s0 + $0x2aa0] sm:$0xff] }
 0x1c6   : > { %4584 = vmatpush2.msra.mxu1 %v1797_v34  ;;  %4514 = vmatprep.subr.mxu0 %v1666_v36  ;;  %v1777_v61 = vld [vmem:[%s8015_s0 + $0x2ea0] sm:$0xff]  ;;  %v277_v63 = vld [vmem:[%s8152_s6 + $0x28] sm:$0xff] }
 0x1c7   : > { %4585 = vmatprep.subr.mxu1 %v1794_v37  ;;  %4515 = vmatpush2.msra.mxu0 %v1665_v38  ;;  %v1646_v0 = vld [vmem:[%s8015_s0 + $0x2a88] sm:$0xff]  ;;  %v1645_v3 = vld [vmem:[%s8015_s0 + $0x2a80] sm:$0xff]  ;;  %v3583_v7 = vcombine.high %v277_v63, %v277_v63  ;;  %v8914_v17 = vrot.slane %v277_v63, %v8168_v52 }
 0x1c8   : > { %4586 = vmatpush2.msra.mxu1 %v1793_v39  ;;  %4516 = vmatprep.subr.mxu0 %v1662_v40  ;;  %v1774_v2 = vld [vmem:[%s8015_s0 + $0x2e88] sm:$0xff]  ;;  %v1773_v4 = vld [vmem:[%s8015_s0 + $0x2e80] sm:$0xff] }
 0x1c9   : > { %4587 = vmatprep.subr.mxu1 %v1790_v41  ;;  %4517 = vmatpush2.msra.mxu0 %v1661_v44  ;;  %v1642_v5 = vld [vmem:[%s8015_s0 + $0x2a68] sm:$0xff]  ;;  %v1641_v11 = vld [vmem:[%s8015_s0 + $0x2a60] sm:$0xff]  ;;  %v8921_v27 = vrot.slane %v3583_v7, %v8168_v52  ;;  %v8929_v36 = vcombine.high %v8914_v17, %v8914_v17 }
 0x1ca   : > { %4588 = vmatpush2.msra.mxu1 %v1789_v45  ;;  %4518 = vmatprep.subr.mxu0 %v1658_v46  ;;  %v1770_v6 = vld [vmem:[%s8015_s0 + $0x2e68] sm:$0xff]  ;;  %v1769_v12 = vld [vmem:[%s8015_s0 + $0x2e60] sm:$0xff] }
 0x1cb   : > { %4589 = vmatprep.subr.mxu1 %v1786_v47  ;;  %4519 = vmatpush2.msra.mxu0 %v1657_v49  ;;  %v1638_v13 = vld [vmem:[%s8015_s0 + $0x2a48] sm:$0xff]  ;;  %v1637_v18 = vld [vmem:[%s8015_s0 + $0x2a40] sm:$0xff]  ;;  %v8935_v39 = vcombine.high %v8921_v27, %v8921_v27 }
 0x1cc   : > { %4590 = vmatpush2.msra.mxu1 %v1785_v50  ;;  %4520 = vmatprep.subr.mxu0 %v1654_v51  ;;  %v1766_v14 = vld [vmem:[%s8015_s0 + $0x2e48] sm:$0xff]  ;;  %v1765_v20 = vld [vmem:[%s8015_s0 + $0x2e40] sm:$0xff] }
 0x1cd   : > { %4591 = vmatprep.subr.mxu1 %v1782_v53  ;;  %4521 = vmatpush2.msra.mxu0 %v1653_v55  ;;  %v1634_v22 = vld [vmem:[%s8015_s0 + $0x2a28] sm:$0xff]  ;;  %v1633_v30 = vld [vmem:[%s8015_s0 + $0x2a20] sm:$0xff] }
 0x1ce   : > { %4592 = vmatpush2.msra.mxu1 %v1781_v56  ;;  %4522 = vmatprep.subr.mxu0 %v1650_v58  ;;  %v1762_v24 = vld [vmem:[%s8015_s0 + $0x2e28] sm:$0xff]  ;;  %v1761_v31 = vld [vmem:[%s8015_s0 + $0x2e20] sm:$0xff] }
 0x1cf   : > { %4593 = vmatprep.subr.mxu1 %v1778_v59  ;;  %4523 = vmatpush2.msra.mxu0 %v1649_v60  ;;  %v1630_v33 = vld [vmem:[%s8015_s0 + $0x2a08] sm:$0xff]  ;;  %v1629_v37 = vld [vmem:[%s8015_s0 + $0x2a00] sm:$0xff] }
 0x1d0   : > { %4594 = vmatpush2.msra.mxu1 %v1777_v61  ;;  %4524 = vmatprep.subr.mxu0 %v1646_v0  ;;  %v1758_v34 = vld [vmem:[%s8015_s0 + $0x2e08] sm:$0xff]  ;;  %v1757_v38 = vld [vmem:[%s8015_s0 + $0x2e00] sm:$0xff] }
 0x1d1   : > { %4595 = vmatprep.subr.mxu1 %v1774_v2  ;;  %4525 = vmatpush2.msra.mxu0 %v1645_v3  ;;  %v1882_v40 = vld [vmem:[%s8015_s0 + $0x31e8] sm:$0xff]  ;;  %v1881_v44 = vld [vmem:[%s8015_s0 + $0x31e0] sm:$0xff] }
 0x1d2   : > { %4596 = vmatpush2.msra.mxu1 %v1773_v4  ;;  %4526 = vmatprep.subr.mxu0 %v1642_v5  ;;  %v2010_v41 = vld [vmem:[%s8015_s0 + $0x35e8] sm:$0xff]  ;;  %v2009_v45 = vld [vmem:[%s8015_s0 + $0x35e0] sm:$0xff] }
 0x1d3   : > { %4597 = vmatprep.subr.mxu1 %v1770_v6  ;;  %4527 = vmatpush2.msra.mxu0 %v1641_v11  ;;  %v1878_v46 = vld [vmem:[%s8015_s0 + $0x31c8] sm:$0xff]  ;;  %v1877_v49 = vld [vmem:[%s8015_s0 + $0x31c0] sm:$0xff] }
 0x1d4   : > { %4598 = vmatpush2.msra.mxu1 %v1769_v12  ;;  %4528 = vmatprep.subr.mxu0 %v1638_v13  ;;  %v2006_v47 = vld [vmem:[%s8015_s0 + $0x35c8] sm:$0xff]  ;;  %v2005_v50 = vld [vmem:[%s8015_s0 + $0x35c0] sm:$0xff] }
 0x1d5   : > { %4599 = vmatprep.subr.mxu1 %v1766_v14  ;;  %4529 = vmatpush2.msra.mxu0 %v1637_v18  ;;  %v1874_v51 = vld [vmem:[%s8015_s0 + $0x31a8] sm:$0xff]  ;;  %v1873_v55 = vld [vmem:[%s8015_s0 + $0x31a0] sm:$0xff] }
 0x1d6   : > { %4600 = vmatpush2.msra.mxu1 %v1765_v20  ;;  %4530 = vmatprep.subr.mxu0 %v1634_v22  ;;  %v2002_v53 = vld [vmem:[%s8015_s0 + $0x35a8] sm:$0xff]  ;;  %v2001_v56 = vld [vmem:[%s8015_s0 + $0x35a0] sm:$0xff] }
 0x1d7   : > { %4601 = vmatprep.subr.mxu1 %v1762_v24  ;;  %4531 = vmatpush2.msra.mxu0 %v1633_v30  ;;  %v1870_v58 = vld [vmem:[%s8015_s0 + $0x3188] sm:$0xff]  ;;  %v1869_v60 = vld [vmem:[%s8015_s0 + $0x3180] sm:$0xff] }
 0x1d8   : > { %4602 = vmatpush2.msra.mxu1 %v1761_v31  ;;  %4532 = vmatprep.subr.mxu0 %v1630_v33  ;;  %v1998_v59 = vld [vmem:[%s8015_s0 + $0x3588] sm:$0xff]  ;;  %v1997_v61 = vld [vmem:[%s8015_s0 + $0x3580] sm:$0xff] }
 0x1d9   : > { %4603 = vmatprep.subr.mxu1 %v1758_v34  ;;  %4533 = vmatpush2.msra.mxu0 %v1629_v37  ;;  %v1866_v63 = vld [vmem:[%s8015_s0 + $0x3168] sm:$0xff]  ;;  %v1865_v2 = vld [vmem:[%s8015_s0 + $0x3160] sm:$0xff] }
 0x1da   : > { %4534 = vmatprep.mubr.f32.mxu0 %v8929_v36  ;;  %4604 = vmatpush2.msra.mxu1 %v1757_v38  ;;  %v1994_v0 = vld [vmem:[%s8015_s0 + $0x3568] sm:$0xff]  ;;  %v1993_v3 = vld [vmem:[%s8015_s0 + $0x3560] sm:$0xff] }
 0x1db   : > { %4535 = vmatmul.mubr.f32.vlgmr.msra.gmra.mxu0 %v8914_v17  ;;  %4605 = vmatprep.mubr.f32.mxu1 %v8935_v39  ;;  %v1862_v4 = vld [vmem:[%s8015_s0 + $0x3148] sm:$0xff]  ;;  %v1861_v6 = vld [vmem:[%s8015_s0 + $0x3140] sm:$0xff] }
 0x1dc   : > { %4612 = vmatprep.subr.mxu0 %v1882_v40  ;;  %4683 = vmatprep.subr.mxu1 %v2010_v41  ;;  %v1990_v5 = vld [vmem:[%s8015_s0 + $0x3548] sm:$0xff]  ;;  %v1989_v7 = vld [vmem:[%s8015_s0 + $0x3540] sm:$0xff] }
 0x1dd   : > { %4606 = vmatmul.mubr.f32.vlgmr.msra.gmra.mxu1 %v8921_v27  ;;  %4613 = vmatpush1.msra.mxu0 %v1881_v44  ;;  %v1858_v11 = vld [vmem:[%s8015_s0 + $0x3128] sm:$0xff]  ;;  %v1857_v13 = vld [vmem:[%s8015_s0 + $0x3120] sm:$0xff] }
 0x1de   : > { %4684 = vmatpush1.msra.mxu1 %v2009_v45  ;;  %4614 = vmatprep.subr.mxu0 %v1878_v46  ;;  %v1986_v12 = vld [vmem:[%s8015_s0 + $0x3528] sm:$0xff]  ;;  %v1985_v14 = vld [vmem:[%s8015_s0 + $0x3520] sm:$0xff] }
 0x1df   : > { %4685 = vmatprep.subr.mxu1 %v2006_v47  ;;  %4615 = vmatpush1.msra.mxu0 %v1877_v49  ;;  %v1854_v18 = vld [vmem:[%s8015_s0 + $0x3108] sm:$0xff]  ;;  %v1853_v22 = vld [vmem:[%s8015_s0 + $0x3100] sm:$0xff] }
 0x1e0   : > { %4686 = vmatpush1.msra.mxu1 %v2005_v50  ;;  %4616 = vmatprep.subr.mxu0 %v1874_v51  ;;  %v1982_v20 = vld [vmem:[%s8015_s0 + $0x3508] sm:$0xff]  ;;  %v1981_v24 = vld [vmem:[%s8015_s0 + $0x3500] sm:$0xff] }
 0x1e1   : > { %4687 = vmatprep.subr.mxu1 %v2002_v53  ;;  %4617 = vmatpush1.msra.mxu0 %v1873_v55  ;;  %v1850_v30 = vld [vmem:[%s8015_s0 + $0x30e8] sm:$0xff]  ;;  %v1849_v33 = vld [vmem:[%s8015_s0 + $0x30e0] sm:$0xff] }
 0x1e2   : > { %4688 = vmatpush1.msra.mxu1 %v2001_v56  ;;  %4618 = vmatprep.subr.mxu0 %v1870_v58  ;;  %v1978_v31 = vld [vmem:[%s8015_s0 + $0x34e8] sm:$0xff]  ;;  %v1977_v34 = vld [vmem:[%s8015_s0 + $0x34e0] sm:$0xff] }
 0x1e3   : > { %4689 = vmatprep.subr.mxu1 %v1998_v59  ;;  %4619 = vmatpush1.msra.mxu0 %v1869_v60  ;;  %v1846_v37 = vld [vmem:[%s8015_s0 + $0x30c8] sm:$0xff]  ;;  %v1845_v40 = vld [vmem:[%s8015_s0 + $0x30c0] sm:$0xff] }
 0x1e4   : > { %4690 = vmatpush1.msra.mxu1 %v1997_v61  ;;  %4620 = vmatprep.subr.mxu0 %v1866_v63  ;;  %v1974_v38 = vld [vmem:[%s8015_s0 + $0x34c8] sm:$0xff]  ;;  %v1973_v41 = vld [vmem:[%s8015_s0 + $0x34c0] sm:$0xff] }
 0x1e5   : > { %4691 = vmatprep.subr.mxu1 %v1994_v0  ;;  %4621 = vmatpush1.msra.mxu0 %v1865_v2  ;;  %v1842_v44 = vld [vmem:[%s8015_s0 + $0x30a8] sm:$0xff]  ;;  %v1841_v46 = vld [vmem:[%s8015_s0 + $0x30a0] sm:$0xff] }
 0x1e6   : > { %4692 = vmatpush1.msra.mxu1 %v1993_v3  ;;  %4622 = vmatprep.subr.mxu0 %v1862_v4  ;;  %v1970_v45 = vld [vmem:[%s8015_s0 + $0x34a8] sm:$0xff]  ;;  %v1969_v47 = vld [vmem:[%s8015_s0 + $0x34a0] sm:$0xff] }
 0x1e7   : > { %4693 = vmatprep.subr.mxu1 %v1990_v5  ;;  %4623 = vmatpush1.msra.mxu0 %v1861_v6  ;;  %v1838_v49 = vld [vmem:[%s8015_s0 + $0x3088] sm:$0xff]  ;;  %v1837_v51 = vld [vmem:[%s8015_s0 + $0x3080] sm:$0xff] }
 0x1e8   : > { %4694 = vmatpush1.msra.mxu1 %v1989_v7  ;;  %4624 = vmatprep.subr.mxu0 %v1858_v11  ;;  %v1966_v50 = vld [vmem:[%s8015_s0 + $0x3488] sm:$0xff]  ;;  %v1965_v53 = vld [vmem:[%s8015_s0 + $0x3480] sm:$0xff] }
 0x1e9   : > { %4695 = vmatprep.subr.mxu1 %v1986_v12  ;;  %4625 = vmatpush1.msra.mxu0 %v1857_v13  ;;  %v1834_v55 = vld [vmem:[%s8015_s0 + $0x3068] sm:$0xff]  ;;  %v1833_v58 = vld [vmem:[%s8015_s0 + $0x3060] sm:$0xff] }
 0x1ea   : > { %4696 = vmatpush1.msra.mxu1 %v1985_v14  ;;  %4626 = vmatprep.subr.mxu0 %v1854_v18  ;;  %v1962_v56 = vld [vmem:[%s8015_s0 + $0x3468] sm:$0xff]  ;;  %v1961_v59 = vld [vmem:[%s8015_s0 + $0x3460] sm:$0xff] }
 0x1eb   : > { %4697 = vmatprep.subr.mxu1 %v1982_v20  ;;  %4627 = vmatpush1.msra.mxu0 %v1853_v22  ;;  %v1830_v60 = vld [vmem:[%s8015_s0 + $0x3048] sm:$0xff]  ;;  %v1829_v63 = vld [vmem:[%s8015_s0 + $0x3040] sm:$0xff] }
 0x1ec   : > { %4698 = vmatpush1.msra.mxu1 %v1981_v24  ;;  %4628 = vmatprep.subr.mxu0 %v1850_v30  ;;  %v1958_v61 = vld [vmem:[%s8015_s0 + $0x3448] sm:$0xff]  ;;  %v1957_v0 = vld [vmem:[%s8015_s0 + $0x3440] sm:$0xff] }
 0x1ed   : > { %4699 = vmatprep.subr.mxu1 %v1978_v31  ;;  %4629 = vmatpush1.msra.mxu0 %v1849_v33  ;;  %v1826_v2 = vld [vmem:[%s8015_s0 + $0x3028] sm:$0xff]  ;;  %v1825_v4 = vld [vmem:[%s8015_s0 + $0x3020] sm:$0xff] }
 0x1ee   : > { %4700 = vmatpush1.msra.mxu1 %v1977_v34  ;;  %4630 = vmatprep.subr.mxu0 %v1846_v37  ;;  %v1954_v3 = vld [vmem:[%s8015_s0 + $0x3428] sm:$0xff]  ;;  %v1953_v5 = vld [vmem:[%s8015_s0 + $0x3420] sm:$0xff] }
 0x1ef   : > { %4701 = vmatprep.subr.mxu1 %v1974_v38  ;;  %4631 = vmatpush1.msra.mxu0 %v1845_v40  ;;  %v1822_v6 = vld [vmem:[%s8015_s0 + $0x3008] sm:$0xff]  ;;  %v1821_v11 = vld [vmem:[%s8015_s0 + $0x3000] sm:$0xff] }
 0x1f0   : > { %4702 = vmatpush1.msra.mxu1 %v1973_v41  ;;  %4632 = vmatprep.subr.mxu0 %v1842_v44  ;;  %v1950_v7 = vld [vmem:[%s8015_s0 + $0x3408] sm:$0xff]  ;;  %v1949_v12 = vld [vmem:[%s8015_s0 + $0x3400] sm:$0xff] }
 0x1f1   : > { %4703 = vmatprep.subr.mxu1 %v1970_v45  ;;  %4633 = vmatpush1.msra.mxu0 %v1841_v46  ;;  %v1946_v13 = vld [vmem:[%s8015_s0 + $0x33e8] sm:$0xff]  ;;  %v1945_v18 = vld [vmem:[%s8015_s0 + $0x33e0] sm:$0xff] }
 0x1f2   : > { %4704 = vmatpush1.msra.mxu1 %v1969_v47  ;;  %4634 = vmatprep.subr.mxu0 %v1838_v49  ;;  %v2074_v14 = vld [vmem:[%s8015_s0 + $0x37e8] sm:$0xff]  ;;  %v2073_v20 = vld [vmem:[%s8015_s0 + $0x37e0] sm:$0xff] }
 0x1f3   : > { %4705 = vmatprep.subr.mxu1 %v1966_v50  ;;  %4635 = vmatpush1.msra.mxu0 %v1837_v51  ;;  %v1942_v22 = vld [vmem:[%s8015_s0 + $0x33c8] sm:$0xff]  ;;  %v1941_v30 = vld [vmem:[%s8015_s0 + $0x33c0] sm:$0xff] }
 0x1f4   : > { %4706 = vmatpush1.msra.mxu1 %v1965_v53  ;;  %4636 = vmatprep.subr.mxu0 %v1834_v55  ;;  %v2070_v24 = vld [vmem:[%s8015_s0 + $0x37c8] sm:$0xff]  ;;  %v2069_v31 = vld [vmem:[%s8015_s0 + $0x37c0] sm:$0xff] }
 0x1f5   : > { %4707 = vmatprep.subr.mxu1 %v1962_v56  ;;  %4637 = vmatpush1.msra.mxu0 %v1833_v58  ;;  %v1938_v33 = vld [vmem:[%s8015_s0 + $0x33a8] sm:$0xff]  ;;  %v1937_v37 = vld [vmem:[%s8015_s0 + $0x33a0] sm:$0xff] }
 0x1f6   : > { %4708 = vmatpush1.msra.mxu1 %v1961_v59  ;;  %4638 = vmatprep.subr.mxu0 %v1830_v60  ;;  %v2066_v34 = vld [vmem:[%s8015_s0 + $0x37a8] sm:$0xff]  ;;  %v2065_v38 = vld [vmem:[%s8015_s0 + $0x37a0] sm:$0xff] }
 0x1f7   : > { %4709 = vmatprep.subr.mxu1 %v1958_v61  ;;  %4639 = vmatpush1.msra.mxu0 %v1829_v63  ;;  %v1934_v40 = vld [vmem:[%s8015_s0 + $0x3388] sm:$0xff]  ;;  %v1933_v44 = vld [vmem:[%s8015_s0 + $0x3380] sm:$0xff] }
 0x1f8   : > { %4710 = vmatpush1.msra.mxu1 %v1957_v0  ;;  %4640 = vmatprep.subr.mxu0 %v1826_v2  ;;  %v2062_v41 = vld [vmem:[%s8015_s0 + $0x3788] sm:$0xff]  ;;  %v2061_v45 = vld [vmem:[%s8015_s0 + $0x3780] sm:$0xff] }
 0x1f9   : > { %4711 = vmatprep.subr.mxu1 %v1954_v3  ;;  %4641 = vmatpush1.msra.mxu0 %v1825_v4  ;;  %v1930_v46 = vld [vmem:[%s8015_s0 + $0x3368] sm:$0xff]  ;;  %v1929_v49 = vld [vmem:[%s8015_s0 + $0x3360] sm:$0xff] }
 0x1fa   : > { %4712 = vmatpush1.msra.mxu1 %v1953_v5  ;;  %4642 = vmatprep.subr.mxu0 %v1822_v6  ;;  %v2058_v47 = vld [vmem:[%s8015_s0 + $0x3768] sm:$0xff]  ;;  %v2057_v50 = vld [vmem:[%s8015_s0 + $0x3760] sm:$0xff] }
 0x1fb   : > { %4713 = vmatprep.subr.mxu1 %v1950_v7  ;;  %4643 = vmatpush1.msra.mxu0 %v1821_v11  ;;  %v1926_v51 = vld [vmem:[%s8015_s0 + $0x3348] sm:$0xff]  ;;  %v1925_v55 = vld [vmem:[%s8015_s0 + $0x3340] sm:$0xff] }
 0x1fc   : > { %4714 = vmatpush1.msra.mxu1 %v1949_v12  ;;  %4644 = vmatprep.subr.mxu0 %v1946_v13  ;;  %v2054_v53 = vld [vmem:[%s8015_s0 + $0x3748] sm:$0xff]  ;;  %v2053_v56 = vld [vmem:[%s8015_s0 + $0x3740] sm:$0xff] }
 0x1fd   : > { %4715 = vmatprep.subr.mxu1 %v2074_v14  ;;  %4645 = vmatpush2.msra.mxu0 %v1945_v18  ;;  %v1922_v58 = vld [vmem:[%s8015_s0 + $0x3328] sm:$0xff]  ;;  %v1921_v60 = vld [vmem:[%s8015_s0 + $0x3320] sm:$0xff] }
 0x1fe   : > { %4716 = vmatpush2.msra.mxu1 %v2073_v20  ;;  %4646 = vmatprep.subr.mxu0 %v1942_v22  ;;  %v2050_v59 = vld [vmem:[%s8015_s0 + $0x3728] sm:$0xff]  ;;  %v2049_v61 = vld [vmem:[%s8015_s0 + $0x3720] sm:$0xff] }
 0x1ff   : > { %4717 = vmatprep.subr.mxu1 %v2070_v24  ;;  %4647 = vmatpush2.msra.mxu0 %v1941_v30  ;;  %v1918_v63 = vld [vmem:[%s8015_s0 + $0x3308] sm:$0xff]  ;;  %v1917_v2 = vld [vmem:[%s8015_s0 + $0x3300] sm:$0xff]  ;;  %v278_v30 = vld [vmem:[%s8152_s6 + $0x30] sm:$0xff] }
 0x200   : > { %4718 = vmatpush2.msra.mxu1 %v2069_v31  ;;  %4648 = vmatprep.subr.mxu0 %v1938_v33  ;;  %v2046_v0 = vld [vmem:[%s8015_s0 + $0x3708] sm:$0xff]  ;;  %v2045_v3 = vld [vmem:[%s8015_s0 + $0x3700] sm:$0xff] }
 0x201   : > { %4719 = vmatprep.subr.mxu1 %v2066_v34  ;;  %4649 = vmatpush2.msra.mxu0 %v1937_v37  ;;  %v1914_v4 = vld [vmem:[%s8015_s0 + $0x32e8] sm:$0xff]  ;;  %v1913_v6 = vld [vmem:[%s8015_s0 + $0x32e0] sm:$0xff] }
 0x202   : > { %4720 = vmatpush2.msra.mxu1 %v2065_v38  ;;  %4650 = vmatprep.subr.mxu0 %v1934_v40  ;;  %v2042_v5 = vld [vmem:[%s8015_s0 + $0x36e8] sm:$0xff]  ;;  %v2041_v7 = vld [vmem:[%s8015_s0 + $0x36e0] sm:$0xff] }
 0x203   : > { %4721 = vmatprep.subr.mxu1 %v2062_v41  ;;  %4651 = vmatpush2.msra.mxu0 %v1933_v44  ;;  %v1910_v11 = vld [vmem:[%s8015_s0 + $0x32c8] sm:$0xff]  ;;  %v1909_v13 = vld [vmem:[%s8015_s0 + $0x32c0] sm:$0xff]  ;;  %v3600_v41 = vcombine.high %v278_v30, %v278_v30 }
 0x204   : > { %4722 = vmatpush2.msra.mxu1 %v2061_v45  ;;  %4652 = vmatprep.subr.mxu0 %v1930_v46  ;;  %v2038_v12 = vld [vmem:[%s8015_s0 + $0x36c8] sm:$0xff]  ;;  %v2037_v14 = vld [vmem:[%s8015_s0 + $0x36c0] sm:$0xff] }
 0x205   : > { %4723 = vmatprep.subr.mxu1 %v2058_v47  ;;  %4653 = vmatpush2.msra.mxu0 %v1929_v49  ;;  %v1906_v18 = vld [vmem:[%s8015_s0 + $0x32a8] sm:$0xff]  ;;  %v1905_v22 = vld [vmem:[%s8015_s0 + $0x32a0] sm:$0xff]  ;;  %v9061_v49 = vrot.slane %v278_v30, %v8168_v52 }
 0x206   : > { %4724 = vmatpush2.msra.mxu1 %v2057_v50  ;;  %4654 = vmatprep.subr.mxu0 %v1926_v51  ;;  %v2034_v20 = vld [vmem:[%s8015_s0 + $0x36a8] sm:$0xff]  ;;  %v2033_v24 = vld [vmem:[%s8015_s0 + $0x36a0] sm:$0xff] }
 0x207   : > { %4725 = vmatprep.subr.mxu1 %v2054_v53  ;;  %4655 = vmatpush2.msra.mxu0 %v1925_v55  ;;  %v1902_v31 = vld [vmem:[%s8015_s0 + $0x3288] sm:$0xff]  ;;  %v1901_v34 = vld [vmem:[%s8015_s0 + $0x3280] sm:$0xff] }
 0x208   : > { %4726 = vmatpush2.msra.mxu1 %v2053_v56  ;;  %4656 = vmatprep.subr.mxu0 %v1922_v58  ;;  %v2030_v33 = vld [vmem:[%s8015_s0 + $0x3688] sm:$0xff]  ;;  %v2029_v37 = vld [vmem:[%s8015_s0 + $0x3680] sm:$0xff]  ;;  %v9068_v56 = vrot.slane %v3600_v41, %v8168_v52 }
 0x209   : > { %4727 = vmatprep.subr.mxu1 %v2050_v59  ;;  %4657 = vmatpush2.msra.mxu0 %v1921_v60  ;;  %v1898_v38 = vld [vmem:[%s8015_s0 + $0x3268] sm:$0xff]  ;;  %v1897_v44 = vld [vmem:[%s8015_s0 + $0x3260] sm:$0xff] }
 0x20a   : > { %4728 = vmatpush2.msra.mxu1 %v2049_v61  ;;  %4658 = vmatprep.subr.mxu0 %v1918_v63  ;;  %v2026_v40 = vld [vmem:[%s8015_s0 + $0x3668] sm:$0xff]  ;;  %v2025_v45 = vld [vmem:[%s8015_s0 + $0x3660] sm:$0xff]  ;;  %v9076_v63 = vcombine.high %v9061_v49, %v9061_v49 }
 0x20b   : > { %4729 = vmatprep.subr.mxu1 %v2046_v0  ;;  %4659 = vmatpush2.msra.mxu0 %v1917_v2  ;;  %v1894_v46 = vld [vmem:[%s8015_s0 + $0x3248] sm:$0xff]  ;;  %v1893_v50 = vld [vmem:[%s8015_s0 + $0x3240] sm:$0xff] }
 0x20c   : > { %4730 = vmatpush2.msra.mxu1 %v2045_v3  ;;  %4660 = vmatprep.subr.mxu0 %v1914_v4  ;;  %v2022_v47 = vld [vmem:[%s8015_s0 + $0x3648] sm:$0xff]  ;;  %v2021_v51 = vld [vmem:[%s8015_s0 + $0x3640] sm:$0xff]  ;;  %v9082_v3 = vcombine.high %v9068_v56, %v9068_v56 }
 0x20d   : > { %4731 = vmatprep.subr.mxu1 %v2042_v5  ;;  %4661 = vmatpush2.msra.mxu0 %v1913_v6  ;;  %v1890_v53 = vld [vmem:[%s8015_s0 + $0x3228] sm:$0xff]  ;;  %v1889_v58 = vld [vmem:[%s8015_s0 + $0x3220] sm:$0xff] }
 0x20e   : > { %4732 = vmatpush2.msra.mxu1 %v2041_v7  ;;  %4662 = vmatprep.subr.mxu0 %v1910_v11  ;;  %v2018_v55 = vld [vmem:[%s8015_s0 + $0x3628] sm:$0xff]  ;;  %v2017_v59 = vld [vmem:[%s8015_s0 + $0x3620] sm:$0xff] }
 0x20f   : > { %4733 = vmatprep.subr.mxu1 %v2038_v12  ;;  %4663 = vmatpush2.msra.mxu0 %v1909_v13  ;;  %v1886_v60 = vld [vmem:[%s8015_s0 + $0x3208] sm:$0xff]  ;;  %v1885_v0 = vld [vmem:[%s8015_s0 + $0x3200] sm:$0xff] }
 0x210   : > { %4734 = vmatpush2.msra.mxu1 %v2037_v14  ;;  %4664 = vmatprep.subr.mxu0 %v1906_v18  ;;  %v2014_v61 = vld [vmem:[%s8015_s0 + $0x3608] sm:$0xff]  ;;  %v2013_v2 = vld [vmem:[%s8015_s0 + $0x3600] sm:$0xff] }
 0x211   : > { %4735 = vmatprep.subr.mxu1 %v2034_v20  ;;  %4665 = vmatpush2.msra.mxu0 %v1905_v22  ;;  %v2138_v4 = vld [vmem:[%s8015_s0 + $0x39e8] sm:$0xff]  ;;  %v2137_v6 = vld [vmem:[%s8015_s0 + $0x39e0] sm:$0xff] }
 0x212   : > { %4736 = vmatpush2.msra.mxu1 %v2033_v24  ;;  %4666 = vmatprep.subr.mxu0 %v1902_v31  ;;  %v2266_v5 = vld [vmem:[%s8015_s0 + $0x3de8] sm:$0xff]  ;;  %v2265_v7 = vld [vmem:[%s8015_s0 + $0x3de0] sm:$0xff] }
 0x213   : > { %4737 = vmatprep.subr.mxu1 %v2030_v33  ;;  %4667 = vmatpush2.msra.mxu0 %v1901_v34  ;;  %v2134_v11 = vld [vmem:[%s8015_s0 + $0x39c8] sm:$0xff]  ;;  %v2133_v13 = vld [vmem:[%s8015_s0 + $0x39c0] sm:$0xff] }
 0x214   : > { %4738 = vmatpush2.msra.mxu1 %v2029_v37  ;;  %4668 = vmatprep.subr.mxu0 %v1898_v38  ;;  %v2262_v12 = vld [vmem:[%s8015_s0 + $0x3dc8] sm:$0xff]  ;;  %v2261_v14 = vld [vmem:[%s8015_s0 + $0x3dc0] sm:$0xff] }
 0x215   : > { %4739 = vmatprep.subr.mxu1 %v2026_v40  ;;  %4669 = vmatpush2.msra.mxu0 %v1897_v44  ;;  %v2130_v18 = vld [vmem:[%s8015_s0 + $0x39a8] sm:$0xff]  ;;  %v2129_v22 = vld [vmem:[%s8015_s0 + $0x39a0] sm:$0xff] }
 0x216   : > { %4740 = vmatpush2.msra.mxu1 %v2025_v45  ;;  %4670 = vmatprep.subr.mxu0 %v1894_v46  ;;  %v2258_v20 = vld [vmem:[%s8015_s0 + $0x3da8] sm:$0xff]  ;;  %v2257_v24 = vld [vmem:[%s8015_s0 + $0x3da0] sm:$0xff] }
 0x217   : > { %4741 = vmatprep.subr.mxu1 %v2022_v47  ;;  %4671 = vmatpush2.msra.mxu0 %v1893_v50  ;;  %v2126_v30 = vld [vmem:[%s8015_s0 + $0x3988] sm:$0xff]  ;;  %v2125_v33 = vld [vmem:[%s8015_s0 + $0x3980] sm:$0xff] }
 0x218   : > { %4742 = vmatpush2.msra.mxu1 %v2021_v51  ;;  %4672 = vmatprep.subr.mxu0 %v1890_v53  ;;  %v2254_v31 = vld [vmem:[%s8015_s0 + $0x3d88] sm:$0xff]  ;;  %v2253_v34 = vld [vmem:[%s8015_s0 + $0x3d80] sm:$0xff] }
 0x219   : > { %4743 = vmatprep.subr.mxu1 %v2018_v55  ;;  %4673 = vmatpush2.msra.mxu0 %v1889_v58  ;;  %v2122_v37 = vld [vmem:[%s8015_s0 + $0x3968] sm:$0xff]  ;;  %v2121_v40 = vld [vmem:[%s8015_s0 + $0x3960] sm:$0xff] }
 0x21a   : > { %4744 = vmatpush2.msra.mxu1 %v2017_v59  ;;  %4674 = vmatprep.subr.mxu0 %v1886_v60  ;;  %v2250_v38 = vld [vmem:[%s8015_s0 + $0x3d68] sm:$0xff]  ;;  %v2249_v41 = vld [vmem:[%s8015_s0 + $0x3d60] sm:$0xff] }
 0x21b   : > { %4745 = vmatprep.subr.mxu1 %v2014_v61  ;;  %4675 = vmatpush2.msra.mxu0 %v1885_v0  ;;  %v2118_v44 = vld [vmem:[%s8015_s0 + $0x3948] sm:$0xff]  ;;  %v2117_v46 = vld [vmem:[%s8015_s0 + $0x3940] sm:$0xff] }
 0x21c   : > { %4676 = vmatprep.mubr.f32.mxu0 %v9076_v63  ;;  %4746 = vmatpush2.msra.mxu1 %v2013_v2  ;;  %v2246_v45 = vld [vmem:[%s8015_s0 + $0x3d48] sm:$0xff]  ;;  %v2245_v47 = vld [vmem:[%s8015_s0 + $0x3d40] sm:$0xff] }
 0x21d   : > { %4677 = vmatmul.mubr.f32.vlgmr.msra.gmra.mxu0 %v9061_v49  ;;  %4747 = vmatprep.mubr.f32.mxu1 %v9082_v3  ;;  %v2114_v50 = vld [vmem:[%s8015_s0 + $0x3928] sm:$0xff]  ;;  %v2113_v53 = vld [vmem:[%s8015_s0 + $0x3920] sm:$0xff] }
 0x21e   : > { %4754 = vmatprep.subr.mxu0 %v2138_v4  ;;  %4825 = vmatprep.subr.mxu1 %v2266_v5  ;;  %v2242_v51 = vld [vmem:[%s8015_s0 + $0x3d28] sm:$0xff]  ;;  %v2241_v55 = vld [vmem:[%s8015_s0 + $0x3d20] sm:$0xff] }
 0x21f   : > { %4748 = vmatmul.mubr.f32.vlgmr.msra.gmra.mxu1 %v9068_v56  ;;  %4755 = vmatpush1.msra.mxu0 %v2137_v6  ;;  %v2110_v58 = vld [vmem:[%s8015_s0 + $0x3908] sm:$0xff]  ;;  %v2109_v60 = vld [vmem:[%s8015_s0 + $0x3900] sm:$0xff] }
 0x220   : > { %4826 = vmatpush1.msra.mxu1 %v2265_v7  ;;  %4756 = vmatprep.subr.mxu0 %v2134_v11  ;;  %v2238_v59 = vld [vmem:[%s8015_s0 + $0x3d08] sm:$0xff]  ;;  %v2237_v61 = vld [vmem:[%s8015_s0 + $0x3d00] sm:$0xff] }
 0x221   : > { %4827 = vmatprep.subr.mxu1 %v2262_v12  ;;  %4757 = vmatpush1.msra.mxu0 %v2133_v13  ;;  %v2106_v0 = vld [vmem:[%s8015_s0 + $0x38e8] sm:$0xff]  ;;  %v2105_v4 = vld [vmem:[%s8015_s0 + $0x38e0] sm:$0xff] }
 0x222   : > { %4828 = vmatpush1.msra.mxu1 %v2261_v14  ;;  %4758 = vmatprep.subr.mxu0 %v2130_v18  ;;  %v2234_v2 = vld [vmem:[%s8015_s0 + $0x3ce8] sm:$0xff]  ;;  %v2233_v5 = vld [vmem:[%s8015_s0 + $0x3ce0] sm:$0xff] }
 0x223   : > { %4829 = vmatprep.subr.mxu1 %v2258_v20  ;;  %4759 = vmatpush1.msra.mxu0 %v2129_v22  ;;  %v2102_v6 = vld [vmem:[%s8015_s0 + $0x38c8] sm:$0xff]  ;;  %v2101_v11 = vld [vmem:[%s8015_s0 + $0x38c0] sm:$0xff] }
 0x224   : > { %4830 = vmatpush1.msra.mxu1 %v2257_v24  ;;  %4760 = vmatprep.subr.mxu0 %v2126_v30  ;;  %v2230_v7 = vld [vmem:[%s8015_s0 + $0x3cc8] sm:$0xff]  ;;  %v2229_v12 = vld [vmem:[%s8015_s0 + $0x3cc0] sm:$0xff] }
 0x225   : > { %4831 = vmatprep.subr.mxu1 %v2254_v31  ;;  %4761 = vmatpush1.msra.mxu0 %v2125_v33  ;;  %v2098_v13 = vld [vmem:[%s8015_s0 + $0x38a8] sm:$0xff]  ;;  %v2097_v18 = vld [vmem:[%s8015_s0 + $0x38a0] sm:$0xff] }
 0x226   : > { %4832 = vmatpush1.msra.mxu1 %v2253_v34  ;;  %4762 = vmatprep.subr.mxu0 %v2122_v37  ;;  %v2226_v14 = vld [vmem:[%s8015_s0 + $0x3ca8] sm:$0xff]  ;;  %v2225_v20 = vld [vmem:[%s8015_s0 + $0x3ca0] sm:$0xff] }
 0x227   : > { %4833 = vmatprep.subr.mxu1 %v2250_v38  ;;  %4763 = vmatpush1.msra.mxu0 %v2121_v40  ;;  %v2094_v22 = vld [vmem:[%s8015_s0 + $0x3888] sm:$0xff]  ;;  %v2093_v30 = vld [vmem:[%s8015_s0 + $0x3880] sm:$0xff] }
 0x228   : > { %4834 = vmatpush1.msra.mxu1 %v2249_v41  ;;  %4764 = vmatprep.subr.mxu0 %v2118_v44  ;;  %v2222_v24 = vld [vmem:[%s8015_s0 + $0x3c88] sm:$0xff]  ;;  %v2221_v31 = vld [vmem:[%s8015_s0 + $0x3c80] sm:$0xff] }
 0x229   : > { %4835 = vmatprep.subr.mxu1 %v2246_v45  ;;  %4765 = vmatpush1.msra.mxu0 %v2117_v46  ;;  %v2090_v33 = vld [vmem:[%s8015_s0 + $0x3868] sm:$0xff]  ;;  %v2089_v37 = vld [vmem:[%s8015_s0 + $0x3860] sm:$0xff] }
 0x22a   : > { %4836 = vmatpush1.msra.mxu1 %v2245_v47  ;;  %4766 = vmatprep.subr.mxu0 %v2114_v50  ;;  %v2218_v34 = vld [vmem:[%s8015_s0 + $0x3c68] sm:$0xff]  ;;  %v2217_v38 = vld [vmem:[%s8015_s0 + $0x3c60] sm:$0xff] }
 0x22b   : > { %4837 = vmatprep.subr.mxu1 %v2242_v51  ;;  %4767 = vmatpush1.msra.mxu0 %v2113_v53  ;;  %v2086_v40 = vld [vmem:[%s8015_s0 + $0x3848] sm:$0xff]  ;;  %v2085_v44 = vld [vmem:[%s8015_s0 + $0x3840] sm:$0xff] }
 0x22c   : > { %4838 = vmatpush1.msra.mxu1 %v2241_v55  ;;  %4768 = vmatprep.subr.mxu0 %v2110_v58  ;;  %v2214_v41 = vld [vmem:[%s8015_s0 + $0x3c48] sm:$0xff]  ;;  %v2213_v45 = vld [vmem:[%s8015_s0 + $0x3c40] sm:$0xff] }
 0x22d   : > { %4839 = vmatprep.subr.mxu1 %v2238_v59  ;;  %4769 = vmatpush1.msra.mxu0 %v2109_v60  ;;  %v2082_v46 = vld [vmem:[%s8015_s0 + $0x3828] sm:$0xff]  ;;  %v2081_v50 = vld [vmem:[%s8015_s0 + $0x3820] sm:$0xff] }
 0x22e   : > { %4840 = vmatpush1.msra.mxu1 %v2237_v61  ;;  %4770 = vmatprep.subr.mxu0 %v2106_v0  ;;  %v2210_v47 = vld [vmem:[%s8015_s0 + $0x3c28] sm:$0xff]  ;;  %v2209_v51 = vld [vmem:[%s8015_s0 + $0x3c20] sm:$0xff] }
 0x22f   : > { %4841 = vmatprep.subr.mxu1 %v2234_v2  ;;  %4771 = vmatpush1.msra.mxu0 %v2105_v4  ;;  %v2078_v53 = vld [vmem:[%s8015_s0 + $0x3808] sm:$0xff]  ;;  %v2077_v58 = vld [vmem:[%s8015_s0 + $0x3800] sm:$0xff] }
 0x230   : > { %4842 = vmatpush1.msra.mxu1 %v2233_v5  ;;  %4772 = vmatprep.subr.mxu0 %v2102_v6  ;;  %v2206_v55 = vld [vmem:[%s8015_s0 + $0x3c08] sm:$0xff]  ;;  %v2205_v59 = vld [vmem:[%s8015_s0 + $0x3c00] sm:$0xff] }
 0x231   : > { %4843 = vmatprep.subr.mxu1 %v2230_v7  ;;  %4773 = vmatpush1.msra.mxu0 %v2101_v11  ;;  %v2202_v60 = vld [vmem:[%s8015_s0 + $0x3be8] sm:$0xff]  ;;  %v2201_v0 = vld [vmem:[%s8015_s0 + $0x3be0] sm:$0xff] }
 0x232   : > { %4844 = vmatpush1.msra.mxu1 %v2229_v12  ;;  %4774 = vmatprep.subr.mxu0 %v2098_v13  ;;  %v2330_v61 = vld [vmem:[%s8015_s0 + $0x3fe8] sm:$0xff]  ;;  %v2329_v2 = vld [vmem:[%s8015_s0 + $0x3fe0] sm:$0xff] }
 0x233   : > { %4845 = vmatprep.subr.mxu1 %v2226_v14  ;;  %4775 = vmatpush1.msra.mxu0 %v2097_v18  ;;  %v2198_v4 = vld [vmem:[%s8015_s0 + $0x3bc8] sm:$0xff]  ;;  %v2197_v6 = vld [vmem:[%s8015_s0 + $0x3bc0] sm:$0xff] }
 0x234   : > { %4846 = vmatpush1.msra.mxu1 %v2225_v20  ;;  %4776 = vmatprep.subr.mxu0 %v2094_v22  ;;  %v2326_v5 = vld [vmem:[%s8015_s0 + $0x3fc8] sm:$0xff]  ;;  %v2325_v7 = vld [vmem:[%s8015_s0 + $0x3fc0] sm:$0xff] }
 0x235   : > { %4847 = vmatprep.subr.mxu1 %v2222_v24  ;;  %4777 = vmatpush1.msra.mxu0 %v2093_v30  ;;  %v2194_v11 = vld [vmem:[%s8015_s0 + $0x3ba8] sm:$0xff]  ;;  %v2193_v13 = vld [vmem:[%s8015_s0 + $0x3ba0] sm:$0xff] }
 0x236   : > { %4848 = vmatpush1.msra.mxu1 %v2221_v31  ;;  %4778 = vmatprep.subr.mxu0 %v2090_v33  ;;  %v2322_v12 = vld [vmem:[%s8015_s0 + $0x3fa8] sm:$0xff]  ;;  %v2321_v14 = vld [vmem:[%s8015_s0 + $0x3fa0] sm:$0xff] }
 0x237   : > { %4849 = vmatprep.subr.mxu1 %v2218_v34  ;;  %4779 = vmatpush1.msra.mxu0 %v2089_v37  ;;  %v2190_v18 = vld [vmem:[%s8015_s0 + $0x3b88] sm:$0xff]  ;;  %v2189_v22 = vld [vmem:[%s8015_s0 + $0x3b80] sm:$0xff] }
 0x238   : > { %4850 = vmatpush1.msra.mxu1 %v2217_v38  ;;  %4780 = vmatprep.subr.mxu0 %v2086_v40  ;;  %v2318_v20 = vld [vmem:[%s8015_s0 + $0x3f88] sm:$0xff]  ;;  %v2317_v24 = vld [vmem:[%s8015_s0 + $0x3f80] sm:$0xff] }
 0x239   : > { %4851 = vmatprep.subr.mxu1 %v2214_v41  ;;  %4781 = vmatpush1.msra.mxu0 %v2085_v44  ;;  %v2186_v30 = vld [vmem:[%s8015_s0 + $0x3b68] sm:$0xff]  ;;  %v2185_v33 = vld [vmem:[%s8015_s0 + $0x3b60] sm:$0xff] }
 0x23a   : > { %4852 = vmatpush1.msra.mxu1 %v2213_v45  ;;  %4782 = vmatprep.subr.mxu0 %v2082_v46  ;;  %v2314_v31 = vld [vmem:[%s8015_s0 + $0x3f68] sm:$0xff]  ;;  %v2313_v34 = vld [vmem:[%s8015_s0 + $0x3f60] sm:$0xff] }
 0x23b   : > { %4853 = vmatprep.subr.mxu1 %v2210_v47  ;;  %4783 = vmatpush1.msra.mxu0 %v2081_v50  ;;  %v2182_v37 = vld [vmem:[%s8015_s0 + $0x3b48] sm:$0xff]  ;;  %v2181_v40 = vld [vmem:[%s8015_s0 + $0x3b40] sm:$0xff] }
 0x23c   : > { %4854 = vmatpush1.msra.mxu1 %v2209_v51  ;;  %4784 = vmatprep.subr.mxu0 %v2078_v53  ;;  %v2310_v38 = vld [vmem:[%s8015_s0 + $0x3f48] sm:$0xff]  ;;  %v2309_v41 = vld [vmem:[%s8015_s0 + $0x3f40] sm:$0xff] }
 0x23d   : > { %4855 = vmatprep.subr.mxu1 %v2206_v55  ;;  %4785 = vmatpush1.msra.mxu0 %v2077_v58  ;;  %v2178_v44 = vld [vmem:[%s8015_s0 + $0x3b28] sm:$0xff]  ;;  %v2177_v46 = vld [vmem:[%s8015_s0 + $0x3b20] sm:$0xff] }
 0x23e   : > { %4856 = vmatpush1.msra.mxu1 %v2205_v59  ;;  %4786 = vmatprep.subr.mxu0 %v2202_v60  ;;  %v2306_v45 = vld [vmem:[%s8015_s0 + $0x3f28] sm:$0xff]  ;;  %v2305_v47 = vld [vmem:[%s8015_s0 + $0x3f20] sm:$0xff] }
 0x23f   : > { %4857 = vmatprep.subr.mxu1 %v2330_v61  ;;  %4787 = vmatpush2.msra.mxu0 %v2201_v0  ;;  %v2174_v50 = vld [vmem:[%s8015_s0 + $0x3b08] sm:$0xff]  ;;  %v2173_v53 = vld [vmem:[%s8015_s0 + $0x3b00] sm:$0xff] }
 0x240   : > { %4858 = vmatpush2.msra.mxu1 %v2329_v2  ;;  %4788 = vmatprep.subr.mxu0 %v2198_v4  ;;  %v2302_v51 = vld [vmem:[%s8015_s0 + $0x3f08] sm:$0xff]  ;;  %v2301_v55 = vld [vmem:[%s8015_s0 + $0x3f00] sm:$0xff] }
 0x241   : > { %4859 = vmatprep.subr.mxu1 %v2326_v5  ;;  %4789 = vmatpush2.msra.mxu0 %v2197_v6  ;;  %v2170_v58 = vld [vmem:[%s8015_s0 + $0x3ae8] sm:$0xff]  ;;  %v2169_v60 = vld [vmem:[%s8015_s0 + $0x3ae0] sm:$0xff] }
 0x242   : > { %4860 = vmatpush2.msra.mxu1 %v2325_v7  ;;  %4790 = vmatprep.subr.mxu0 %v2194_v11  ;;  %v2298_v59 = vld [vmem:[%s8015_s0 + $0x3ee8] sm:$0xff]  ;;  %v2297_v61 = vld [vmem:[%s8015_s0 + $0x3ee0] sm:$0xff] }
 0x243   : > { %4861 = vmatprep.subr.mxu1 %v2322_v12  ;;  %4791 = vmatpush2.msra.mxu0 %v2193_v13  ;;  %v2166_v0 = vld [vmem:[%s8015_s0 + $0x3ac8] sm:$0xff]  ;;  %v2165_v4 = vld [vmem:[%s8015_s0 + $0x3ac0] sm:$0xff]  ;;  %v279_v13 = vld [vmem:[%s8152_s6 + $0x38] sm:$0xff] }
 0x244   : > { %4862 = vmatpush2.msra.mxu1 %v2321_v14  ;;  %4792 = vmatprep.subr.mxu0 %v2190_v18  ;;  %v2294_v2 = vld [vmem:[%s8015_s0 + $0x3ec8] sm:$0xff]  ;;  %v2293_v5 = vld [vmem:[%s8015_s0 + $0x3ec0] sm:$0xff] }
 0x245   : > { %4863 = vmatprep.subr.mxu1 %v2318_v20  ;;  %4793 = vmatpush2.msra.mxu0 %v2189_v22  ;;  %v2162_v6 = vld [vmem:[%s8015_s0 + $0x3aa8] sm:$0xff]  ;;  %v2161_v11 = vld [vmem:[%s8015_s0 + $0x3aa0] sm:$0xff] }
 0x246   : > { %4864 = vmatpush2.msra.mxu1 %v2317_v24  ;;  %4794 = vmatprep.subr.mxu0 %v2186_v30  ;;  %v2290_v7 = vld [vmem:[%s8015_s0 + $0x3ea8] sm:$0xff]  ;;  %v2289_v12 = vld [vmem:[%s8015_s0 + $0x3ea0] sm:$0xff] }
 0x247   : > { %4865 = vmatprep.subr.mxu1 %v2314_v31  ;;  %4795 = vmatpush2.msra.mxu0 %v2185_v33  ;;  %v2158_v14 = vld [vmem:[%s8015_s0 + $0x3a88] sm:$0xff]  ;;  %v2157_v20 = vld [vmem:[%s8015_s0 + $0x3a80] sm:$0xff]  ;;  %v3617_v31 = vcombine.high %v279_v13, %v279_v13 }
 0x248   : > { %4866 = vmatpush2.msra.mxu1 %v2313_v34  ;;  %4796 = vmatprep.subr.mxu0 %v2182_v37  ;;  %v2286_v18 = vld [vmem:[%s8015_s0 + $0x3e88] sm:$0xff]  ;;  %v2285_v22 = vld [vmem:[%s8015_s0 + $0x3e80] sm:$0xff] }
 0x249   : > { %4867 = vmatprep.subr.mxu1 %v2310_v38  ;;  %4797 = vmatpush2.msra.mxu0 %v2181_v40  ;;  %v2154_v24 = vld [vmem:[%s8015_s0 + $0x3a68] sm:$0xff]  ;;  %v2153_v33 = vld [vmem:[%s8015_s0 + $0x3a60] sm:$0xff]  ;;  %v9208_v40 = vrot.slane %v279_v13, %v8168_v52 }
 0x24a   : > { %4868 = vmatpush2.msra.mxu1 %v2309_v41  ;;  %4798 = vmatprep.subr.mxu0 %v2178_v44  ;;  %v2282_v30 = vld [vmem:[%s8015_s0 + $0x3e68] sm:$0xff]  ;;  %v2281_v34 = vld [vmem:[%s8015_s0 + $0x3e60] sm:$0xff] }
 0x24b   : > { %4869 = vmatprep.subr.mxu1 %v2306_v45  ;;  %4799 = vmatpush2.msra.mxu0 %v2177_v46  ;;  %v2150_v37 = vld [vmem:[%s8015_s0 + $0x3a48] sm:$0xff]  ;;  %v2149_v41 = vld [vmem:[%s8015_s0 + $0x3a40] sm:$0xff] }
 0x24c   : > { %4870 = vmatpush2.msra.mxu1 %v2305_v47  ;;  %4800 = vmatprep.subr.mxu0 %v2174_v50  ;;  %v2278_v38 = vld [vmem:[%s8015_s0 + $0x3e48] sm:$0xff]  ;;  %v2277_v44 = vld [vmem:[%s8015_s0 + $0x3e40] sm:$0xff]  ;;  %v9215_v47 = vrot.slane %v3617_v31, %v8168_v52 }
 0x24d   : > { %4871 = vmatprep.subr.mxu1 %v2302_v51  ;;  %4801 = vmatpush2.msra.mxu0 %v2173_v53  ;;  %v2146_v45 = vld [vmem:[%s8015_s0 + $0x3a28] sm:$0xff]  ;;  %v2145_v50 = vld [vmem:[%s8015_s0 + $0x3a20] sm:$0xff] }
 0x24e   : > { %4872 = vmatpush2.msra.mxu1 %v2301_v55  ;;  %4802 = vmatprep.subr.mxu0 %v2170_v58  ;;  %v2274_v46 = vld [vmem:[%s8015_s0 + $0x3e28] sm:$0xff]  ;;  %v2273_v51 = vld [vmem:[%s8015_s0 + $0x3e20] sm:$0xff]  ;;  %v9223_v58 = vcombine.high %v9208_v40, %v9208_v40 }
 0x24f   : > { %4873 = vmatprep.subr.mxu1 %v2298_v59  ;;  %4803 = vmatpush2.msra.mxu0 %v2169_v60  ;;  %v2142_v53 = vld [vmem:[%s8015_s0 + $0x3a08] sm:$0xff]  ;;  %v2141_v59 = vld [vmem:[%s8015_s0 + $0x3a00] sm:$0xff] }
 0x250   : > { %4874 = vmatpush2.msra.mxu1 %v2297_v61  ;;  %4804 = vmatprep.subr.mxu0 %v2166_v0  ;;  %v2270_v55 = vld [vmem:[%s8015_s0 + $0x3e08] sm:$0xff]  ;;  %v2269_v60 = vld [vmem:[%s8015_s0 + $0x3e00] sm:$0xff]  ;;  %v9229_v61 = vcombine.high %v9215_v47, %v9215_v47 }
 0x251   : > { %4875 = vmatprep.subr.mxu1 %v2294_v2  ;;  %4805 = vmatpush2.msra.mxu0 %v2165_v4  ;;  %v2394_v0 = vld [vmem:[%s8015_s0 + $0x41e8] sm:$0xff]  ;;  %v2393_v4 = vld [vmem:[%s8015_s0 + $0x41e0] sm:$0xff] }
 0x252   : > { %4876 = vmatpush2.msra.mxu1 %v2293_v5  ;;  %4806 = vmatprep.subr.mxu0 %v2162_v6  ;;  %v2522_v2 = vld [vmem:[%s8015_s0 + $0x45e8] sm:$0xff]  ;;  %v2521_v5 = vld [vmem:[%s8015_s0 + $0x45e0] sm:$0xff] }
 0x253   : > { %4877 = vmatprep.subr.mxu1 %v2290_v7  ;;  %4807 = vmatpush2.msra.mxu0 %v2161_v11  ;;  %v2390_v6 = vld [vmem:[%s8015_s0 + $0x41c8] sm:$0xff]  ;;  %v2389_v11 = vld [vmem:[%s8015_s0 + $0x41c0] sm:$0xff] }
 0x254   : > { %4878 = vmatpush2.msra.mxu1 %v2289_v12  ;;  %4808 = vmatprep.subr.mxu0 %v2158_v14  ;;  %v2518_v7 = vld [vmem:[%s8015_s0 + $0x45c8] sm:$0xff]  ;;  %v2517_v12 = vld [vmem:[%s8015_s0 + $0x45c0] sm:$0xff] }
 0x255   : > { %4879 = vmatprep.subr.mxu1 %v2286_v18  ;;  %4809 = vmatpush2.msra.mxu0 %v2157_v20  ;;  %v2386_v13 = vld [vmem:[%s8015_s0 + $0x41a8] sm:$0xff]  ;;  %v2385_v18 = vld [vmem:[%s8015_s0 + $0x41a0] sm:$0xff] }
 0x256   : > { %4880 = vmatpush2.msra.mxu1 %v2285_v22  ;;  %4810 = vmatprep.subr.mxu0 %v2154_v24  ;;  %v2514_v14 = vld [vmem:[%s8015_s0 + $0x45a8] sm:$0xff]  ;;  %v2513_v20 = vld [vmem:[%s8015_s0 + $0x45a0] sm:$0xff] }
 0x257   : > { %4881 = vmatprep.subr.mxu1 %v2282_v30  ;;  %4811 = vmatpush2.msra.mxu0 %v2153_v33  ;;  %v2382_v22 = vld [vmem:[%s8015_s0 + $0x4188] sm:$0xff]  ;;  %v2381_v30 = vld [vmem:[%s8015_s0 + $0x4180] sm:$0xff] }
 0x258   : > { %4882 = vmatpush2.msra.mxu1 %v2281_v34  ;;  %4812 = vmatprep.subr.mxu0 %v2150_v37  ;;  %v2510_v24 = vld [vmem:[%s8015_s0 + $0x4588] sm:$0xff]  ;;  %v2509_v31 = vld [vmem:[%s8015_s0 + $0x4580] sm:$0xff] }
 0x259   : > { %4883 = vmatprep.subr.mxu1 %v2278_v38  ;;  %4813 = vmatpush2.msra.mxu0 %v2149_v41  ;;  %v2378_v33 = vld [vmem:[%s8015_s0 + $0x4168] sm:$0xff]  ;;  %v2377_v37 = vld [vmem:[%s8015_s0 + $0x4160] sm:$0xff] }
 0x25a   : > { %4884 = vmatpush2.msra.mxu1 %v2277_v44  ;;  %4814 = vmatprep.subr.mxu0 %v2146_v45  ;;  %v2506_v34 = vld [vmem:[%s8015_s0 + $0x4568] sm:$0xff]  ;;  %v2505_v38 = vld [vmem:[%s8015_s0 + $0x4560] sm:$0xff] }
 0x25b   : > { %4885 = vmatprep.subr.mxu1 %v2274_v46  ;;  %4815 = vmatpush2.msra.mxu0 %v2145_v50  ;;  %v2374_v41 = vld [vmem:[%s8015_s0 + $0x4148] sm:$0xff]  ;;  %v2373_v45 = vld [vmem:[%s8015_s0 + $0x4140] sm:$0xff] }
 0x25c   : > { %4886 = vmatpush2.msra.mxu1 %v2273_v51  ;;  %4816 = vmatprep.subr.mxu0 %v2142_v53  ;;  %v2502_v44 = vld [vmem:[%s8015_s0 + $0x4548] sm:$0xff]  ;;  %v2501_v46 = vld [vmem:[%s8015_s0 + $0x4540] sm:$0xff] }
 0x25d   : > { %4887 = vmatprep.subr.mxu1 %v2270_v55  ;;  %4817 = vmatpush2.msra.mxu0 %v2141_v59  ;;  %v2370_v50 = vld [vmem:[%s8015_s0 + $0x4128] sm:$0xff]  ;;  %v2369_v53 = vld [vmem:[%s8015_s0 + $0x4120] sm:$0xff] }
 0x25e   : > { %4818 = vmatprep.mubr.f32.mxu0 %v9223_v58  ;;  %4888 = vmatpush2.msra.mxu1 %v2269_v60  ;;  %v2498_v51 = vld [vmem:[%s8015_s0 + $0x4528] sm:$0xff]  ;;  %v2497_v55 = vld [vmem:[%s8015_s0 + $0x4520] sm:$0xff] }
 0x25f   : > { %4819 = vmatmul.mubr.f32.vlgmr.msra.gmra.mxu0 %v9208_v40  ;;  %4889 = vmatprep.mubr.f32.mxu1 %v9229_v61  ;;  %v2366_v59 = vld [vmem:[%s8015_s0 + $0x4108] sm:$0xff] }
 0x260   : > { %4896 = vmatprep.subr.mxu0 %v2394_v0  ;;  %4967 = vmatprep.subr.mxu1 %v2522_v2  ;;  %v2494_v60 = vld [vmem:[%s8015_s0 + $0x4508] sm:$0xff]  ;;  %v2365_v0 = vld [vmem:[%s8015_s0 + $0x4100] sm:$0xff] }
 0x261   : > { %4890 = vmatmul.mubr.f32.vlgmr.msra.gmra.mxu1 %v9215_v47  ;;  %4897 = vmatpush1.msra.mxu0 %v2393_v4  ;;  %v2493_v2 = vld [vmem:[%s8015_s0 + $0x4500] sm:$0xff]  ;;  %v2362_v4 = vld [vmem:[%s8015_s0 + $0x40e8] sm:$0xff] }
 0x262   : > { %4968 = vmatpush1.msra.mxu1 %v2521_v5  ;;  %4898 = vmatprep.subr.mxu0 %v2390_v6  ;;  %v2490_v5 = vld [vmem:[%s8015_s0 + $0x44e8] sm:$0xff]  ;;  %v2361_v6 = vld [vmem:[%s8015_s0 + $0x40e0] sm:$0xff] }
 0x263   : > { %4969 = vmatprep.subr.mxu1 %v2518_v7  ;;  %4899 = vmatpush1.msra.mxu0 %v2389_v11  ;;  %v2489_v7 = vld [vmem:[%s8015_s0 + $0x44e0] sm:$0xff]  ;;  %v2358_v11 = vld [vmem:[%s8015_s0 + $0x40c8] sm:$0xff] }
 0x264   : > { %4970 = vmatpush1.msra.mxu1 %v2517_v12  ;;  %4900 = vmatprep.subr.mxu0 %v2386_v13  ;;  %v2486_v12 = vld [vmem:[%s8015_s0 + $0x44c8] sm:$0xff]  ;;  %v2357_v13 = vld [vmem:[%s8015_s0 + $0x40c0] sm:$0xff] }
 0x265   : > { %4971 = vmatprep.subr.mxu1 %v2514_v14  ;;  %4901 = vmatpush1.msra.mxu0 %v2385_v18  ;;  %v2485_v14 = vld [vmem:[%s8015_s0 + $0x44c0] sm:$0xff]  ;;  %v2354_v18 = vld [vmem:[%s8015_s0 + $0x40a8] sm:$0xff] }
 0x266   : > { %4972 = vmatpush1.msra.mxu1 %v2513_v20  ;;  %4902 = vmatprep.subr.mxu0 %v2382_v22  ;;  %v2482_v20 = vld [vmem:[%s8015_s0 + $0x44a8] sm:$0xff]  ;;  %v2353_v22 = vld [vmem:[%s8015_s0 + $0x40a0] sm:$0xff] }
 0x267   : > { %4973 = vmatprep.subr.mxu1 %v2510_v24  ;;  %4903 = vmatpush1.msra.mxu0 %v2381_v30  ;;  %v2481_v24 = vld [vmem:[%s8015_s0 + $0x44a0] sm:$0xff]  ;;  %v2350_v30 = vld [vmem:[%s8015_s0 + $0x4088] sm:$0xff] }
 0x268   : > { %4974 = vmatpush1.msra.mxu1 %v2509_v31  ;;  %4904 = vmatprep.subr.mxu0 %v2378_v33  ;;  %v2478_v31 = vld [vmem:[%s8015_s0 + $0x4488] sm:$0xff]  ;;  %v2349_v33 = vld [vmem:[%s8015_s0 + $0x4080] sm:$0xff] }
 0x269   : > { %4975 = vmatprep.subr.mxu1 %v2506_v34  ;;  %4905 = vmatpush1.msra.mxu0 %v2377_v37  ;;  %v2477_v34 = vld [vmem:[%s8015_s0 + $0x4480] sm:$0xff]  ;;  %v2346_v37 = vld [vmem:[%s8015_s0 + $0x4068] sm:$0xff] }
 0x26a   : > { %4976 = vmatpush1.msra.mxu1 %v2505_v38  ;;  %4906 = vmatprep.subr.mxu0 %v2374_v41  ;;  %v2474_v38 = vld [vmem:[%s8015_s0 + $0x4468] sm:$0xff]  ;;  %v2345_v41 = vld [vmem:[%s8015_s0 + $0x4060] sm:$0xff] }
 0x26b   : > { %4977 = vmatprep.subr.mxu1 %v2502_v44  ;;  %4907 = vmatpush1.msra.mxu0 %v2373_v45  ;;  %v2473_v44 = vld [vmem:[%s8015_s0 + $0x4460] sm:$0xff]  ;;  %v2342_v45 = vld [vmem:[%s8015_s0 + $0x4048] sm:$0xff] }
 0x26c   : > { %4978 = vmatpush1.msra.mxu1 %v2501_v46  ;;  %4908 = vmatprep.subr.mxu0 %v2370_v50  ;;  %v2470_v46 = vld [vmem:[%s8015_s0 + $0x4448] sm:$0xff]  ;;  %v2341_v50 = vld [vmem:[%s8015_s0 + $0x4040] sm:$0xff] }
 0x26d   : > { %4979 = vmatprep.subr.mxu1 %v2498_v51  ;;  %4909 = vmatpush1.msra.mxu0 %v2369_v53  ;;  %v2469_v51 = vld [vmem:[%s8015_s0 + $0x4440] sm:$0xff]  ;;  %v2338_v53 = vld [vmem:[%s8015_s0 + $0x4028] sm:$0xff] }
 0x26e   : > { %4980 = vmatpush1.msra.mxu1 %v2497_v55  ;;  %4910 = vmatprep.subr.mxu0 %v2366_v59  ;;  %v2466_v55 = vld [vmem:[%s8015_s0 + $0x4428] sm:$0xff]  ;;  %v2337_v59 = vld [vmem:[%s8015_s0 + $0x4020] sm:$0xff] }
 0x26f   : > { %4981 = vmatprep.subr.mxu1 %v2494_v60  ;;  %4911 = vmatpush1.msra.mxu0 %v2365_v0  ;;  %v2465_v60 = vld [vmem:[%s8015_s0 + $0x4420] sm:$0xff]  ;;  %v2334_v0 = vld [vmem:[%s8015_s0 + $0x4008] sm:$0xff] }
 0x270   : > { %4982 = vmatpush1.msra.mxu1 %v2493_v2  ;;  %4912 = vmatprep.subr.mxu0 %v2362_v4  ;;  %v2462_v2 = vld [vmem:[%s8015_s0 + $0x4408] sm:$0xff]  ;;  %v2333_v4 = vld [vmem:[%s8015_s0 + $0x4000] sm:$0xff] }
 0x271   : > { %4983 = vmatprep.subr.mxu1 %v2490_v5  ;;  %4913 = vmatpush1.msra.mxu0 %v2361_v6  ;;  %v2461_v5 = vld [vmem:[%s8015_s0 + $0x4400] sm:$0xff]  ;;  %v2458_v6 = vld [vmem:[%s8015_s0 + $0x43e8] sm:$0xff] }
 0x272   : > { %4984 = vmatpush1.msra.mxu1 %v2489_v7  ;;  %4914 = vmatprep.subr.mxu0 %v2358_v11  ;;  %v2586_v7 = vld [vmem:[%s8015_s0 + $0x47e8] sm:$0xff]  ;;  %v2457_v11 = vld [vmem:[%s8015_s0 + $0x43e0] sm:$0xff] }
 0x273   : > { %4985 = vmatprep.subr.mxu1 %v2486_v12  ;;  %4915 = vmatpush1.msra.mxu0 %v2357_v13  ;;  %v2585_v12 = vld [vmem:[%s8015_s0 + $0x47e0] sm:$0xff]  ;;  %v2454_v13 = vld [vmem:[%s8015_s0 + $0x43c8] sm:$0xff] }
 0x274   : > { %4986 = vmatpush1.msra.mxu1 %v2485_v14  ;;  %4916 = vmatprep.subr.mxu0 %v2354_v18  ;;  %v2582_v14 = vld [vmem:[%s8015_s0 + $0x47c8] sm:$0xff]  ;;  %v2453_v18 = vld [vmem:[%s8015_s0 + $0x43c0] sm:$0xff] }
 0x275   : > { %4987 = vmatprep.subr.mxu1 %v2482_v20  ;;  %4917 = vmatpush1.msra.mxu0 %v2353_v22  ;;  %v2581_v20 = vld [vmem:[%s8015_s0 + $0x47c0] sm:$0xff]  ;;  %v2450_v22 = vld [vmem:[%s8015_s0 + $0x43a8] sm:$0xff] }
 0x276   : > { %4988 = vmatpush1.msra.mxu1 %v2481_v24  ;;  %4918 = vmatprep.subr.mxu0 %v2350_v30  ;;  %v2578_v24 = vld [vmem:[%s8015_s0 + $0x47a8] sm:$0xff]  ;;  %v2449_v30 = vld [vmem:[%s8015_s0 + $0x43a0] sm:$0xff] }
 0x277   : > { %4989 = vmatprep.subr.mxu1 %v2478_v31  ;;  %4919 = vmatpush1.msra.mxu0 %v2349_v33  ;;  %v2577_v31 = vld [vmem:[%s8015_s0 + $0x47a0] sm:$0xff]  ;;  %v2446_v33 = vld [vmem:[%s8015_s0 + $0x4388] sm:$0xff] }
 0x278   : > { %4990 = vmatpush1.msra.mxu1 %v2477_v34  ;;  %4920 = vmatprep.subr.mxu0 %v2346_v37  ;;  %v2574_v34 = vld [vmem:[%s8015_s0 + $0x4788] sm:$0xff]  ;;  %v2445_v37 = vld [vmem:[%s8015_s0 + $0x4380] sm:$0xff] }
 0x279   : > { %4991 = vmatprep.subr.mxu1 %v2474_v38  ;;  %4921 = vmatpush1.msra.mxu0 %v2345_v41  ;;  %v2573_v38 = vld [vmem:[%s8015_s0 + $0x4780] sm:$0xff]  ;;  %v2442_v41 = vld [vmem:[%s8015_s0 + $0x4368] sm:$0xff] }
 0x27a   : > { %4992 = vmatpush1.msra.mxu1 %v2473_v44  ;;  %4922 = vmatprep.subr.mxu0 %v2342_v45  ;;  %v2570_v44 = vld [vmem:[%s8015_s0 + $0x4768] sm:$0xff]  ;;  %v2441_v45 = vld [vmem:[%s8015_s0 + $0x4360] sm:$0xff] }
 0x27b   : > { %4993 = vmatprep.subr.mxu1 %v2470_v46  ;;  %4923 = vmatpush1.msra.mxu0 %v2341_v50  ;;  %v2569_v46 = vld [vmem:[%s8015_s0 + $0x4760] sm:$0xff]  ;;  %v2438_v50 = vld [vmem:[%s8015_s0 + $0x4348] sm:$0xff] }
 0x27c   : > { %4994 = vmatpush1.msra.mxu1 %v2469_v51  ;;  %4924 = vmatprep.subr.mxu0 %v2338_v53  ;;  %v2566_v51 = vld [vmem:[%s8015_s0 + $0x4748] sm:$0xff]  ;;  %v2437_v53 = vld [vmem:[%s8015_s0 + $0x4340] sm:$0xff] }
 0x27d   : > { %4995 = vmatprep.subr.mxu1 %v2466_v55  ;;  %4925 = vmatpush1.msra.mxu0 %v2337_v59  ;;  %v2565_v55 = vld [vmem:[%s8015_s0 + $0x4740] sm:$0xff]  ;;  %v2434_v59 = vld [vmem:[%s8015_s0 + $0x4328] sm:$0xff] }
 0x27e   : > { %4996 = vmatpush1.msra.mxu1 %v2465_v60  ;;  %4926 = vmatprep.subr.mxu0 %v2334_v0  ;;  %v2562_v60 = vld [vmem:[%s8015_s0 + $0x4728] sm:$0xff]  ;;  %v2433_v0 = vld [vmem:[%s8015_s0 + $0x4320] sm:$0xff] }
 0x27f   : > { %4997 = vmatprep.subr.mxu1 %v2462_v2  ;;  %4927 = vmatpush1.msra.mxu0 %v2333_v4  ;;  %v2561_v2 = vld [vmem:[%s8015_s0 + $0x4720] sm:$0xff]  ;;  %v2430_v4 = vld [vmem:[%s8015_s0 + $0x4308] sm:$0xff] }
 0x280   : > { %4998 = vmatpush1.msra.mxu1 %v2461_v5  ;;  %4928 = vmatprep.subr.mxu0 %v2458_v6  ;;  %v2558_v5 = vld [vmem:[%s8015_s0 + $0x4708] sm:$0xff]  ;;  %v2429_v6 = vld [vmem:[%s8015_s0 + $0x4300] sm:$0xff] }
 0x281   : > { %4999 = vmatprep.subr.mxu1 %v2586_v7  ;;  %4929 = vmatpush2.msra.mxu0 %v2457_v11  ;;  %v2557_v7 = vld [vmem:[%s8015_s0 + $0x4700] sm:$0xff]  ;;  %v2426_v11 = vld [vmem:[%s8015_s0 + $0x42e8] sm:$0xff] }
 0x282   : > { %5000 = vmatpush2.msra.mxu1 %v2585_v12  ;;  %4930 = vmatprep.subr.mxu0 %v2454_v13  ;;  %v2554_v12 = vld [vmem:[%s8015_s0 + $0x46e8] sm:$0xff]  ;;  %v2425_v13 = vld [vmem:[%s8015_s0 + $0x42e0] sm:$0xff] }
 0x283   : > { %5001 = vmatprep.subr.mxu1 %v2582_v14  ;;  %4931 = vmatpush2.msra.mxu0 %v2453_v18  ;;  %v2553_v14 = vld [vmem:[%s8015_s0 + $0x46e0] sm:$0xff]  ;;  %v2422_v18 = vld [vmem:[%s8015_s0 + $0x42c8] sm:$0xff] }
 0x284   : > { %5002 = vmatpush2.msra.mxu1 %v2581_v20  ;;  %4932 = vmatprep.subr.mxu0 %v2450_v22  ;;  %v2550_v20 = vld [vmem:[%s8015_s0 + $0x46c8] sm:$0xff]  ;;  %v2421_v22 = vld [vmem:[%s8015_s0 + $0x42c0] sm:$0xff] }
 0x285   : > { %5003 = vmatprep.subr.mxu1 %v2578_v24  ;;  %4933 = vmatpush2.msra.mxu0 %v2449_v30  ;;  %v2549_v24 = vld [vmem:[%s8015_s0 + $0x46c0] sm:$0xff]  ;;  %v2418_v30 = vld [vmem:[%s8015_s0 + $0x42a8] sm:$0xff] }
 0x286   : > { %5004 = vmatpush2.msra.mxu1 %v2577_v31  ;;  %4934 = vmatprep.subr.mxu0 %v2446_v33  ;;  %v2546_v31 = vld [vmem:[%s8015_s0 + $0x46a8] sm:$0xff]  ;;  %v2417_v33 = vld [vmem:[%s8015_s0 + $0x42a0] sm:$0xff] }
 0x287   : > { %5005 = vmatprep.subr.mxu1 %v2574_v34  ;;  %4935 = vmatpush2.msra.mxu0 %v2445_v37  ;;  %v2545_v34 = vld [vmem:[%s8015_s0 + $0x46a0] sm:$0xff] }
 0x288   : > { %5006 = vmatpush2.msra.mxu1 %v2573_v38  ;;  %4936 = vmatprep.subr.mxu0 %v2442_v41  ;;  %v280_v37 = vld [vmem:[%s8152_s6 + $0x40] sm:$0xff]  ;;  %v2414_v38 = vld [vmem:[%s8015_s0 + $0x4288] sm:$0xff] }
 0x289   : > { %5007 = vmatprep.subr.mxu1 %v2570_v44  ;;  %4937 = vmatpush2.msra.mxu0 %v2441_v45  ;;  %v2542_v41 = vld [vmem:[%s8015_s0 + $0x4688] sm:$0xff]  ;;  %v2413_v44 = vld [vmem:[%s8015_s0 + $0x4280] sm:$0xff] }
 0x28a   : > { %5008 = vmatpush2.msra.mxu1 %v2569_v46  ;;  %4938 = vmatprep.subr.mxu0 %v2438_v50  ;;  %v2541_v45 = vld [vmem:[%s8015_s0 + $0x4680] sm:$0xff]  ;;  %v2410_v46 = vld [vmem:[%s8015_s0 + $0x4268] sm:$0xff] }
 0x28b   : > { %5009 = vmatprep.subr.mxu1 %v2566_v51  ;;  %4939 = vmatpush2.msra.mxu0 %v2437_v53  ;;  %v2538_v50 = vld [vmem:[%s8015_s0 + $0x4668] sm:$0xff]  ;;  %v3634_v51 = vcombine.high %v280_v37, %v280_v37  ;;  %v2409_v53 = vld [vmem:[%s8015_s0 + $0x4260] sm:$0xff] }
 0x28c   : > { %5010 = vmatpush2.msra.mxu1 %v2565_v55  ;;  %4940 = vmatprep.subr.mxu0 %v2434_v59  ;;  %v2537_v55 = vld [vmem:[%s8015_s0 + $0x4660] sm:$0xff]  ;;  %v2406_v59 = vld [vmem:[%s8015_s0 + $0x4248] sm:$0xff] }
 0x28d   : > { %5011 = vmatprep.subr.mxu1 %v2562_v60  ;;  %4941 = vmatpush2.msra.mxu0 %v2433_v0  ;;  %v2534_v60 = vld [vmem:[%s8015_s0 + $0x4648] sm:$0xff]  ;;  %v9355_v0 = vrot.slane %v280_v37, %v8168_v52 }
 0x28e   : > { %5012 = vmatpush2.msra.mxu1 %v2561_v2  ;;  %4942 = vmatprep.subr.mxu0 %v2430_v4  ;;  %v2405_v2 = vld [vmem:[%s8015_s0 + $0x4240] sm:$0xff]  ;;  %v2646_v37 = vld [vmem:[%s8015_s0 + $0x49c8] sm:$0xff] }
 0x28f   : > { %5013 = vmatprep.subr.mxu1 %v2558_v5  ;;  %4943 = vmatpush2.msra.mxu0 %v2429_v6  ;;  %v2533_v4 = vld [vmem:[%s8015_s0 + $0x4640] sm:$0xff]  ;;  %v2402_v5 = vld [vmem:[%s8015_s0 + $0x4228] sm:$0xff] }
 0x290   : > { %5014 = vmatpush2.msra.mxu1 %v2557_v7  ;;  %4944 = vmatprep.subr.mxu0 %v2426_v11  ;;  %v2530_v6 = vld [vmem:[%s8015_s0 + $0x4628] sm:$0xff]  ;;  %v9362_v7 = vrot.slane %v3634_v51, %v8168_v52  ;;  %v2401_v11 = vld [vmem:[%s8015_s0 + $0x4220] sm:$0xff] }
 0x291   : > { %5015 = vmatprep.subr.mxu1 %v2554_v12  ;;  %4945 = vmatpush2.msra.mxu0 %v2425_v13  ;;  %v2529_v12 = vld [vmem:[%s8015_s0 + $0x4620] sm:$0xff]  ;;  %v2398_v13 = vld [vmem:[%s8015_s0 + $0x4208] sm:$0xff] }
 0x292   : > { %5016 = vmatpush2.msra.mxu1 %v2553_v14  ;;  %4946 = vmatprep.subr.mxu0 %v2422_v18  ;;  %v2526_v14 = vld [vmem:[%s8015_s0 + $0x4608] sm:$0xff]  ;;  %v9370_v18 = vcombine.high %v9355_v0, %v9355_v0  ;;  %v2769_v51 = vld [vmem:[%s8015_s0 + $0x4da0] sm:$0xff] }
 0x293   : > { %5017 = vmatprep.subr.mxu1 %v2550_v20  ;;  %4947 = vmatpush2.msra.mxu0 %v2421_v22  ;;  %v2397_v20 = vld [vmem:[%s8015_s0 + $0x4200] sm:$0xff] }
 0x294   : > { %5018 = vmatpush2.msra.mxu1 %v2549_v24  ;;  %4948 = vmatprep.subr.mxu0 %v2418_v30  ;;  %v2525_v22 = vld [vmem:[%s8015_s0 + $0x4600] sm:$0xff]  ;;  %v9376_v24 = vcombine.high %v9362_v7, %v9362_v7  ;;  %v2650_v30 = vld [vmem:[%s8015_s0 + $0x49e8] sm:$0xff] }
 0x295   : > { %5019 = vmatprep.subr.mxu1 %v2546_v31  ;;  %4949 = vmatpush2.msra.mxu0 %v2417_v33  ;;  %v2778_v31 = vld [vmem:[%s8015_s0 + $0x4de8] sm:$0xff]  ;;  %v2649_v33 = vld [vmem:[%s8015_s0 + $0x49e0] sm:$0xff] }
 0x296   : > { %5020 = vmatpush2.msra.mxu1 %v2545_v34  ;;  %4950 = vmatprep.subr.mxu0 %v2414_v38  ;;  %v2777_v34 = vld [vmem:[%s8015_s0 + $0x4de0] sm:$0xff]  ;;  %v2774_v38 = vld [vmem:[%s8015_s0 + $0x4dc8] sm:$0xff] }
 0x297   : > { %5021 = vmatprep.subr.mxu1 %v2542_v41  ;;  %4951 = vmatpush2.msra.mxu0 %v2413_v44  ;;  %v2645_v41 = vld [vmem:[%s8015_s0 + $0x49c0] sm:$0xff] }
 0x298   : > { %5022 = vmatpush2.msra.mxu1 %v2541_v45  ;;  %4952 = vmatprep.subr.mxu0 %v2410_v46  ;;  %v2773_v44 = vld [vmem:[%s8015_s0 + $0x4dc0] sm:$0xff]  ;;  %v2642_v45 = vld [vmem:[%s8015_s0 + $0x49a8] sm:$0xff] }
 0x299   : > { %5023 = vmatprep.subr.mxu1 %v2538_v50  ;;  %4953 = vmatpush2.msra.mxu0 %v2409_v53  ;;  %v2770_v46 = vld [vmem:[%s8015_s0 + $0x4da8] sm:$0xff]  ;;  %v2641_v50 = vld [vmem:[%s8015_s0 + $0x49a0] sm:$0xff] }
 0x29a   : > { %5024 = vmatpush2.msra.mxu1 %v2537_v55  ;;  %4954 = vmatprep.subr.mxu0 %v2406_v59  ;;  %v2638_v53 = vld [vmem:[%s8015_s0 + $0x4988] sm:$0xff]  ;;  %v2637_v59 = vld [vmem:[%s8015_s0 + $0x4980] sm:$0xff] }
 0x29b   : > { %5025 = vmatprep.subr.mxu1 %v2534_v60  ;;  %4955 = vmatpush2.msra.mxu0 %v2405_v2  ;;  %v2766_v55 = vld [vmem:[%s8015_s0 + $0x4d88] sm:$0xff]  ;;  %v2765_v60 = vld [vmem:[%s8015_s0 + $0x4d80] sm:$0xff] }
 0x29c   : > { %5026 = vmatpush2.msra.mxu1 %v2533_v4  ;;  %4956 = vmatprep.subr.mxu0 %v2402_v5  ;;  %v2634_v2 = vld [vmem:[%s8015_s0 + $0x4968] sm:$0xff]  ;;  %v2633_v5 = vld [vmem:[%s8015_s0 + $0x4960] sm:$0xff] }
 0x29d   : > { %5027 = vmatprep.subr.mxu1 %v2530_v6  ;;  %4957 = vmatpush2.msra.mxu0 %v2401_v11  ;;  %v2762_v4 = vld [vmem:[%s8015_s0 + $0x4d68] sm:$0xff]  ;;  %v2761_v6 = vld [vmem:[%s8015_s0 + $0x4d60] sm:$0xff] }
 0x29e   : > { %5028 = vmatpush2.msra.mxu1 %v2529_v12  ;;  %4958 = vmatprep.subr.mxu0 %v2398_v13  ;;  %v2630_v11 = vld [vmem:[%s8015_s0 + $0x4948] sm:$0xff]  ;;  %v2629_v13 = vld [vmem:[%s8015_s0 + $0x4940] sm:$0xff] }
 0x29f   : > { %5029 = vmatprep.subr.mxu1 %v2526_v14  ;;  %4959 = vmatpush2.msra.mxu0 %v2397_v20  ;;  %v2758_v12 = vld [vmem:[%s8015_s0 + $0x4d48] sm:$0xff]  ;;  %v2757_v14 = vld [vmem:[%s8015_s0 + $0x4d40] sm:$0xff] }
 0x2a0   : > { %4960 = vmatprep.mubr.f32.mxu0 %v9370_v18  ;;  %5030 = vmatpush2.msra.mxu1 %v2525_v22  ;;  %v2626_v20 = vld [vmem:[%s8015_s0 + $0x4928] sm:$0xff] }
 0x2a1   : > { %4961 = vmatmul.mubr.f32.vlgmr.msra.gmra.mxu0 %v9355_v0  ;;  %5031 = vmatprep.mubr.f32.mxu1 %v9376_v24  ;;  %v2754_v22 = vld [vmem:[%s8015_s0 + $0x4d28] sm:$0xff] }
 0x2a2   : > { %5038 = vmatprep.subr.mxu0 %v2650_v30  ;;  %5109 = vmatprep.subr.mxu1 %v2778_v31  ;;  %v2625_v30 = vld [vmem:[%s8015_s0 + $0x4920] sm:$0xff] }
 0x2a3   : > { %5032 = vmatmul.mubr.f32.vlgmr.msra.gmra.mxu1 %v9362_v7  ;;  %5039 = vmatpush1.msra.mxu0 %v2649_v33  ;;  %v2753_v31 = vld [vmem:[%s8015_s0 + $0x4d20] sm:$0xff]  ;;  %v2622_v33 = vld [vmem:[%s8015_s0 + $0x4908] sm:$0xff] }
 0x2a4   : > { %5110 = vmatpush1.msra.mxu1 %v2777_v34  ;;  %5040 = vmatprep.subr.mxu0 %v2646_v37  ;;  %v2750_v34 = vld [vmem:[%s8015_s0 + $0x4d08] sm:$0xff]  ;;  %v2621_v37 = vld [vmem:[%s8015_s0 + $0x4900] sm:$0xff] }
 0x2a5   : > { %5111 = vmatprep.subr.mxu1 %v2774_v38  ;;  %5041 = vmatpush1.msra.mxu0 %v2645_v41  ;;  %v2749_v38 = vld [vmem:[%s8015_s0 + $0x4d00] sm:$0xff]  ;;  %v2618_v41 = vld [vmem:[%s8015_s0 + $0x48e8] sm:$0xff] }
 0x2a6   : > { %5112 = vmatpush1.msra.mxu1 %v2773_v44  ;;  %5042 = vmatprep.subr.mxu0 %v2642_v45  ;;  %v2746_v44 = vld [vmem:[%s8015_s0 + $0x4ce8] sm:$0xff]  ;;  %v2617_v45 = vld [vmem:[%s8015_s0 + $0x48e0] sm:$0xff] }
 0x2a7   : > { %5113 = vmatprep.subr.mxu1 %v2770_v46  ;;  %5043 = vmatpush1.msra.mxu0 %v2641_v50  ;;  %v2745_v46 = vld [vmem:[%s8015_s0 + $0x4ce0] sm:$0xff]  ;;  %v2614_v50 = vld [vmem:[%s8015_s0 + $0x48c8] sm:$0xff] }
 0x2a8   : > { %5114 = vmatpush1.msra.mxu1 %v2769_v51  ;;  %5044 = vmatprep.subr.mxu0 %v2638_v53  ;;  %v2742_v51 = vld [vmem:[%s8015_s0 + $0x4cc8] sm:$0xff]  ;;  %v2613_v53 = vld [vmem:[%s8015_s0 + $0x48c0] sm:$0xff] }
 0x2a9   : > { %5115 = vmatprep.subr.mxu1 %v2766_v55  ;;  %5045 = vmatpush1.msra.mxu0 %v2637_v59  ;;  %v2741_v55 = vld [vmem:[%s8015_s0 + $0x4cc0] sm:$0xff]  ;;  %v2610_v59 = vld [vmem:[%s8015_s0 + $0x48a8] sm:$0xff] }
 0x2aa   : > { %5116 = vmatpush1.msra.mxu1 %v2765_v60  ;;  %5046 = vmatprep.subr.mxu0 %v2634_v2  ;;  %v2738_v60 = vld [vmem:[%s8015_s0 + $0x4ca8] sm:$0xff]  ;;  %v2609_v2 = vld [vmem:[%s8015_s0 + $0x48a0] sm:$0xff] }
 0x2ab   : > { %5117 = vmatprep.subr.mxu1 %v2762_v4  ;;  %5047 = vmatpush1.msra.mxu0 %v2633_v5  ;;  %v2737_v4 = vld [vmem:[%s8015_s0 + $0x4ca0] sm:$0xff]  ;;  %v2606_v5 = vld [vmem:[%s8015_s0 + $0x4888] sm:$0xff] }
 0x2ac   : > { %5118 = vmatpush1.msra.mxu1 %v2761_v6  ;;  %5048 = vmatprep.subr.mxu0 %v2630_v11  ;;  %v2734_v6 = vld [vmem:[%s8015_s0 + $0x4c88] sm:$0xff]  ;;  %v2605_v11 = vld [vmem:[%s8015_s0 + $0x4880] sm:$0xff] }
 0x2ad   : > { %5119 = vmatprep.subr.mxu1 %v2758_v12  ;;  %5049 = vmatpush1.msra.mxu0 %v2629_v13  ;;  %v2733_v12 = vld [vmem:[%s8015_s0 + $0x4c80] sm:$0xff]  ;;  %v2602_v13 = vld [vmem:[%s8015_s0 + $0x4868] sm:$0xff] }
 0x2ae   : > { %5120 = vmatpush1.msra.mxu1 %v2757_v14  ;;  %5050 = vmatprep.subr.mxu0 %v2626_v20  ;;  %v2730_v14 = vld [vmem:[%s8015_s0 + $0x4c68] sm:$0xff]  ;;  %v2601_v20 = vld [vmem:[%s8015_s0 + $0x4860] sm:$0xff] }
 0x2af   : > { %5121 = vmatprep.subr.mxu1 %v2754_v22  ;;  %5051 = vmatpush1.msra.mxu0 %v2625_v30  ;;  %v2729_v22 = vld [vmem:[%s8015_s0 + $0x4c60] sm:$0xff]  ;;  %v2598_v30 = vld [vmem:[%s8015_s0 + $0x4848] sm:$0xff] }
 0x2b0   : > { %5122 = vmatpush1.msra.mxu1 %v2753_v31  ;;  %5052 = vmatprep.subr.mxu0 %v2622_v33  ;;  %v2726_v31 = vld [vmem:[%s8015_s0 + $0x4c48] sm:$0xff]  ;;  %v2597_v33 = vld [vmem:[%s8015_s0 + $0x4840] sm:$0xff] }
 0x2b1   : > { %5123 = vmatprep.subr.mxu1 %v2750_v34  ;;  %5053 = vmatpush1.msra.mxu0 %v2621_v37  ;;  %v2725_v34 = vld [vmem:[%s8015_s0 + $0x4c40] sm:$0xff]  ;;  %v2594_v37 = vld [vmem:[%s8015_s0 + $0x4828] sm:$0xff] }
 0x2b2   : > { %5124 = vmatpush1.msra.mxu1 %v2749_v38  ;;  %5054 = vmatprep.subr.mxu0 %v2618_v41  ;;  %v2722_v38 = vld [vmem:[%s8015_s0 + $0x4c28] sm:$0xff]  ;;  %v2593_v41 = vld [vmem:[%s8015_s0 + $0x4820] sm:$0xff] }
 0x2b3   : > { %5125 = vmatprep.subr.mxu1 %v2746_v44  ;;  %5055 = vmatpush1.msra.mxu0 %v2617_v45  ;;  %v2721_v44 = vld [vmem:[%s8015_s0 + $0x4c20] sm:$0xff]  ;;  %v2590_v45 = vld [vmem:[%s8015_s0 + $0x4808] sm:$0xff] }
 0x2b4   : > { %5126 = vmatpush1.msra.mxu1 %v2745_v46  ;;  %5056 = vmatprep.subr.mxu0 %v2614_v50  ;;  %v2718_v46 = vld [vmem:[%s8015_s0 + $0x4c08] sm:$0xff]  ;;  %v2589_v50 = vld [vmem:[%s8015_s0 + $0x4800] sm:$0xff] }
 0x2b5   : > { %5127 = vmatprep.subr.mxu1 %v2742_v51  ;;  %5057 = vmatpush1.msra.mxu0 %v2613_v53  ;;  %v2717_v51 = vld [vmem:[%s8015_s0 + $0x4c00] sm:$0xff]  ;;  %v2714_v53 = vld [vmem:[%s8015_s0 + $0x4be8] sm:$0xff] }
 0x2b6   : > { %5128 = vmatpush1.msra.mxu1 %v2741_v55  ;;  %5058 = vmatprep.subr.mxu0 %v2610_v59  ;;  %v2842_v55 = vld [vmem:[%s8015_s0 + $0x4fe8] sm:$0xff]  ;;  %v2713_v59 = vld [vmem:[%s8015_s0 + $0x4be0] sm:$0xff] }
 0x2b7   : > { %5129 = vmatprep.subr.mxu1 %v2738_v60  ;;  %5059 = vmatpush1.msra.mxu0 %v2609_v2  ;;  %v2841_v60 = vld [vmem:[%s8015_s0 + $0x4fe0] sm:$0xff]  ;;  %v2710_v2 = vld [vmem:[%s8015_s0 + $0x4bc8] sm:$0xff] }
 0x2b8   : > { %5130 = vmatpush1.msra.mxu1 %v2737_v4  ;;  %5060 = vmatprep.subr.mxu0 %v2606_v5  ;;  %v2838_v4 = vld [vmem:[%s8015_s0 + $0x4fc8] sm:$0xff]  ;;  %v2709_v5 = vld [vmem:[%s8015_s0 + $0x4bc0] sm:$0xff] }
 0x2b9   : > { %5131 = vmatprep.subr.mxu1 %v2734_v6  ;;  %5061 = vmatpush1.msra.mxu0 %v2605_v11  ;;  %v2837_v6 = vld [vmem:[%s8015_s0 + $0x4fc0] sm:$0xff]  ;;  %v2706_v11 = vld [vmem:[%s8015_s0 + $0x4ba8] sm:$0xff] }
 0x2ba   : > { %5132 = vmatpush1.msra.mxu1 %v2733_v12  ;;  %5062 = vmatprep.subr.mxu0 %v2602_v13  ;;  %v2834_v12 = vld [vmem:[%s8015_s0 + $0x4fa8] sm:$0xff]  ;;  %v2705_v13 = vld [vmem:[%s8015_s0 + $0x4ba0] sm:$0xff] }
 0x2bb   : > { %5133 = vmatprep.subr.mxu1 %v2730_v14  ;;  %5063 = vmatpush1.msra.mxu0 %v2601_v20  ;;  %v2833_v14 = vld [vmem:[%s8015_s0 + $0x4fa0] sm:$0xff]  ;;  %v2702_v20 = vld [vmem:[%s8015_s0 + $0x4b88] sm:$0xff] }
 0x2bc   : > { %5134 = vmatpush1.msra.mxu1 %v2729_v22  ;;  %5064 = vmatprep.subr.mxu0 %v2598_v30  ;;  %v2830_v22 = vld [vmem:[%s8015_s0 + $0x4f88] sm:$0xff]  ;;  %v2701_v30 = vld [vmem:[%s8015_s0 + $0x4b80] sm:$0xff] }
 0x2bd   : > { %5135 = vmatprep.subr.mxu1 %v2726_v31  ;;  %5065 = vmatpush1.msra.mxu0 %v2597_v33  ;;  %v2829_v31 = vld [vmem:[%s8015_s0 + $0x4f80] sm:$0xff]  ;;  %v2698_v33 = vld [vmem:[%s8015_s0 + $0x4b68] sm:$0xff] }
 0x2be   : > { %5136 = vmatpush1.msra.mxu1 %v2725_v34  ;;  %5066 = vmatprep.subr.mxu0 %v2594_v37  ;;  %v2826_v34 = vld [vmem:[%s8015_s0 + $0x4f68] sm:$0xff]  ;;  %v2697_v37 = vld [vmem:[%s8015_s0 + $0x4b60] sm:$0xff] }
 0x2bf   : > { %5137 = vmatprep.subr.mxu1 %v2722_v38  ;;  %5067 = vmatpush1.msra.mxu0 %v2593_v41  ;;  %v2825_v38 = vld [vmem:[%s8015_s0 + $0x4f60] sm:$0xff]  ;;  %v2694_v41 = vld [vmem:[%s8015_s0 + $0x4b48] sm:$0xff] }
 0x2c0   : > { %5138 = vmatpush1.msra.mxu1 %v2721_v44  ;;  %5068 = vmatprep.subr.mxu0 %v2590_v45  ;;  %v2822_v44 = vld [vmem:[%s8015_s0 + $0x4f48] sm:$0xff]  ;;  %v2693_v45 = vld [vmem:[%s8015_s0 + $0x4b40] sm:$0xff] }
 0x2c1   : > { %5139 = vmatprep.subr.mxu1 %v2718_v46  ;;  %5069 = vmatpush1.msra.mxu0 %v2589_v50  ;;  %v2821_v46 = vld [vmem:[%s8015_s0 + $0x4f40] sm:$0xff]  ;;  %v2690_v50 = vld [vmem:[%s8015_s0 + $0x4b28] sm:$0xff] }
 0x2c2   : > { %5140 = vmatpush1.msra.mxu1 %v2717_v51  ;;  %5070 = vmatprep.subr.mxu0 %v2714_v53  ;;  %v2818_v51 = vld [vmem:[%s8015_s0 + $0x4f28] sm:$0xff]  ;;  %v2689_v53 = vld [vmem:[%s8015_s0 + $0x4b20] sm:$0xff] }
 0x2c3   : > { %5141 = vmatprep.subr.mxu1 %v2842_v55  ;;  %5071 = vmatpush2.msra.mxu0 %v2713_v59  ;;  %v2817_v55 = vld [vmem:[%s8015_s0 + $0x4f20] sm:$0xff]  ;;  %v2686_v59 = vld [vmem:[%s8015_s0 + $0x4b08] sm:$0xff] }
 0x2c4   : > { %5142 = vmatpush2.msra.mxu1 %v2841_v60  ;;  %5072 = vmatprep.subr.mxu0 %v2710_v2  ;;  %v2814_v60 = vld [vmem:[%s8015_s0 + $0x4f08] sm:$0xff]  ;;  %v2685_v2 = vld [vmem:[%s8015_s0 + $0x4b00] sm:$0xff] }
 0x2c5   : > { %5143 = vmatprep.subr.mxu1 %v2838_v4  ;;  %5073 = vmatpush2.msra.mxu0 %v2709_v5  ;;  %v2813_v4 = vld [vmem:[%s8015_s0 + $0x4f00] sm:$0xff]  ;;  %v2682_v5 = vld [vmem:[%s8015_s0 + $0x4ae8] sm:$0xff] }
 0x2c6   : > { %5144 = vmatpush2.msra.mxu1 %v2837_v6  ;;  %5074 = vmatprep.subr.mxu0 %v2706_v11  ;;  %v2810_v6 = vld [vmem:[%s8015_s0 + $0x4ee8] sm:$0xff]  ;;  %v2681_v11 = vld [vmem:[%s8015_s0 + $0x4ae0] sm:$0xff] }
 0x2c7   : > { %5145 = vmatprep.subr.mxu1 %v2834_v12  ;;  %5075 = vmatpush2.msra.mxu0 %v2705_v13  ;;  %v2809_v12 = vld [vmem:[%s8015_s0 + $0x4ee0] sm:$0xff]  ;;  %v2678_v13 = vld [vmem:[%s8015_s0 + $0x4ac8] sm:$0xff] }
 0x2c8   : > { %5146 = vmatpush2.msra.mxu1 %v2833_v14  ;;  %5076 = vmatprep.subr.mxu0 %v2702_v20  ;;  %v2806_v14 = vld [vmem:[%s8015_s0 + $0x4ec8] sm:$0xff]  ;;  %v2677_v20 = vld [vmem:[%s8015_s0 + $0x4ac0] sm:$0xff] }
 0x2c9   : > { %5147 = vmatprep.subr.mxu1 %v2830_v22  ;;  %5077 = vmatpush2.msra.mxu0 %v2701_v30  ;;  %v2805_v22 = vld [vmem:[%s8015_s0 + $0x4ec0] sm:$0xff]  ;;  %v2674_v30 = vld [vmem:[%s8015_s0 + $0x4aa8] sm:$0xff] }
 0x2ca   : > { %5148 = vmatpush2.msra.mxu1 %v2829_v31  ;;  %5078 = vmatprep.subr.mxu0 %v2698_v33  ;;  %v2802_v31 = vld [vmem:[%s8015_s0 + $0x4ea8] sm:$0xff]  ;;  %v2673_v33 = vld [vmem:[%s8015_s0 + $0x4aa0] sm:$0xff] }
 0x2cb   : > { %5149 = vmatprep.subr.mxu1 %v2826_v34  ;;  %5079 = vmatpush2.msra.mxu0 %v2697_v37  ;;  %v2801_v34 = vld [vmem:[%s8015_s0 + $0x4ea0] sm:$0xff]  ;;  %v281_v37 = vld [vmem:[%s8152_s6 + $0x48] sm:$0xff] }
 0x2cc   : > { %5150 = vmatpush2.msra.mxu1 %v2825_v38  ;;  %5080 = vmatprep.subr.mxu0 %v2694_v41  ;;  %v2670_v38 = vld [vmem:[%s8015_s0 + $0x4a88] sm:$0xff] }
 0x2cd   : > { %5151 = vmatprep.subr.mxu1 %v2822_v44  ;;  %5081 = vmatpush2.msra.mxu0 %v2693_v45  ;;  %v2798_v41 = vld [vmem:[%s8015_s0 + $0x4e88] sm:$0xff]  ;;  %v2669_v44 = vld [vmem:[%s8015_s0 + $0x4a80] sm:$0xff] }
 0x2ce   : > { %5152 = vmatpush2.msra.mxu1 %v2821_v46  ;;  %5082 = vmatprep.subr.mxu0 %v2690_v50  ;;  %v2797_v45 = vld [vmem:[%s8015_s0 + $0x4e80] sm:$0xff]  ;;  %v2666_v46 = vld [vmem:[%s8015_s0 + $0x4a68] sm:$0xff] }
 0x2cf   : > { %5153 = vmatprep.subr.mxu1 %v2818_v51  ;;  %5083 = vmatpush2.msra.mxu0 %v2689_v53  ;;  %v2794_v50 = vld [vmem:[%s8015_s0 + $0x4e68] sm:$0xff]  ;;  %v3651_v51 = vcombine.high %v281_v37, %v281_v37  ;;  %v2665_v53 = vld [vmem:[%s8015_s0 + $0x4a60] sm:$0xff] }
 0x2d0   : > { %5154 = vmatpush2.msra.mxu1 %v2817_v55  ;;  %5084 = vmatprep.subr.mxu0 %v2686_v59  ;;  %v2793_v55 = vld [vmem:[%s8015_s0 + $0x4e60] sm:$0xff]  ;;  %v2662_v59 = vld [vmem:[%s8015_s0 + $0x4a48] sm:$0xff] }
 0x2d1   : > { %5155 = vmatprep.subr.mxu1 %v2814_v60  ;;  %5085 = vmatpush2.msra.mxu0 %v2685_v2  ;;  %v2790_v60 = vld [vmem:[%s8015_s0 + $0x4e48] sm:$0xff]  ;;  %v9502_v2 = vrot.slane %v281_v37, %v8168_v52 }
 0x2d2   : > { %5156 = vmatpush2.msra.mxu1 %v2813_v4  ;;  %5086 = vmatprep.subr.mxu0 %v2682_v5  ;;  %v2661_v4 = vld [vmem:[%s8015_s0 + $0x4a40] sm:$0xff]  ;;  %v2906_v37 = vld [vmem:[%s8015_s0 + $0x51e8] sm:$0xff] }
 0x2d3   : > { %5157 = vmatprep.subr.mxu1 %v2810_v6  ;;  %5087 = vmatpush2.msra.mxu0 %v2681_v11  ;;  %v2789_v5 = vld [vmem:[%s8015_s0 + $0x4e40] sm:$0xff]  ;;  %v2658_v6 = vld [vmem:[%s8015_s0 + $0x4a28] sm:$0xff] }
 0x2d4   : > { %5158 = vmatpush2.msra.mxu1 %v2809_v12  ;;  %5088 = vmatprep.subr.mxu0 %v2678_v13  ;;  %v2786_v11 = vld [vmem:[%s8015_s0 + $0x4e28] sm:$0xff]  ;;  %v9509_v12 = vrot.slane %v3651_v51, %v8168_v52  ;;  %v2657_v13 = vld [vmem:[%s8015_s0 + $0x4a20] sm:$0xff] }
 0x2d5   : > { %5159 = vmatprep.subr.mxu1 %v2806_v14  ;;  %5089 = vmatpush2.msra.mxu0 %v2677_v20  ;;  %v2785_v14 = vld [vmem:[%s8015_s0 + $0x4e20] sm:$0xff]  ;;  %v2654_v20 = vld [vmem:[%s8015_s0 + $0x4a08] sm:$0xff] }
 0x2d6   : > { %5160 = vmatpush2.msra.mxu1 %v2805_v22  ;;  %5090 = vmatprep.subr.mxu0 %v2674_v30  ;;  %v2782_v22 = vld [vmem:[%s8015_s0 + $0x4e08] sm:$0xff]  ;;  %v9517_v30 = vcombine.high %v9502_v2, %v9502_v2  ;;  %v3029_v51 = vld [vmem:[%s8015_s0 + $0x55c0] sm:$0xff] }
 0x2d7   : > { %5161 = vmatprep.subr.mxu1 %v2802_v31  ;;  %5091 = vmatpush2.msra.mxu0 %v2673_v33  ;;  %v2653_v31 = vld [vmem:[%s8015_s0 + $0x4a00] sm:$0xff] }
 0x2d8   : > { %5162 = vmatpush2.msra.mxu1 %v2801_v34  ;;  %5092 = vmatprep.subr.mxu0 %v2670_v38  ;;  %v2781_v33 = vld [vmem:[%s8015_s0 + $0x4e00] sm:$0xff]  ;;  %v9523_v34 = vcombine.high %v9509_v12, %v9509_v12  ;;  %v3034_v38 = vld [vmem:[%s8015_s0 + $0x55e8] sm:$0xff] }
 0x2d9   : > { %5163 = vmatprep.subr.mxu1 %v2798_v41  ;;  %5093 = vmatpush2.msra.mxu0 %v2669_v44  ;;  %v2905_v41 = vld [vmem:[%s8015_s0 + $0x51e0] sm:$0xff] }
 0x2da   : > { %5164 = vmatpush2.msra.mxu1 %v2797_v45  ;;  %5094 = vmatprep.subr.mxu0 %v2666_v46  ;;  %v3033_v44 = vld [vmem:[%s8015_s0 + $0x55e0] sm:$0xff]  ;;  %v2902_v45 = vld [vmem:[%s8015_s0 + $0x51c8] sm:$0xff] }
 0x2db   : > { %5165 = vmatprep.subr.mxu1 %v2794_v50  ;;  %5095 = vmatpush2.msra.mxu0 %v2665_v53  ;;  %v3030_v46 = vld [vmem:[%s8015_s0 + $0x55c8] sm:$0xff]  ;;  %v2901_v50 = vld [vmem:[%s8015_s0 + $0x51c0] sm:$0xff] }
 0x2dc   : > { %5166 = vmatpush2.msra.mxu1 %v2793_v55  ;;  %5096 = vmatprep.subr.mxu0 %v2662_v59  ;;  %v2898_v53 = vld [vmem:[%s8015_s0 + $0x51a8] sm:$0xff]  ;;  %v2897_v59 = vld [vmem:[%s8015_s0 + $0x51a0] sm:$0xff] }
 0x2dd   : > { %5167 = vmatprep.subr.mxu1 %v2790_v60  ;;  %5097 = vmatpush2.msra.mxu0 %v2661_v4  ;;  %v3026_v55 = vld [vmem:[%s8015_s0 + $0x55a8] sm:$0xff]  ;;  %v3025_v60 = vld [vmem:[%s8015_s0 + $0x55a0] sm:$0xff] }
 0x2de   : > { %5168 = vmatpush2.msra.mxu1 %v2789_v5  ;;  %5098 = vmatprep.subr.mxu0 %v2658_v6  ;;  %v2894_v4 = vld [vmem:[%s8015_s0 + $0x5188] sm:$0xff]  ;;  %v2893_v6 = vld [vmem:[%s8015_s0 + $0x5180] sm:$0xff] }
 0x2df   : > { %5169 = vmatprep.subr.mxu1 %v2786_v11  ;;  %5099 = vmatpush2.msra.mxu0 %v2657_v13  ;;  %v3022_v5 = vld [vmem:[%s8015_s0 + $0x5588] sm:$0xff]  ;;  %v3021_v11 = vld [vmem:[%s8015_s0 + $0x5580] sm:$0xff] }
 0x2e0   : > { %5170 = vmatpush2.msra.mxu1 %v2785_v14  ;;  %5100 = vmatprep.subr.mxu0 %v2654_v20  ;;  %v2890_v13 = vld [vmem:[%s8015_s0 + $0x5168] sm:$0xff]  ;;  %v2889_v20 = vld [vmem:[%s8015_s0 + $0x5160] sm:$0xff] }
 0x2e1   : > { %5171 = vmatprep.subr.mxu1 %v2782_v22  ;;  %5101 = vmatpush2.msra.mxu0 %v2653_v31  ;;  %v3018_v14 = vld [vmem:[%s8015_s0 + $0x5568] sm:$0xff]  ;;  %v3017_v22 = vld [vmem:[%s8015_s0 + $0x5560] sm:$0xff] }
 0x2e2   : > { %5102 = vmatprep.mubr.f32.mxu0 %v9517_v30  ;;  %5172 = vmatpush2.msra.mxu1 %v2781_v33  ;;  %v2886_v31 = vld [vmem:[%s8015_s0 + $0x5148] sm:$0xff] }
 0x2e3   : > { %5103 = vmatmul.mubr.f32.vlgmr.msra.gmra.mxu0 %v9502_v2  ;;  %5173 = vmatprep.mubr.f32.mxu1 %v9523_v34  ;;  %v3014_v33 = vld [vmem:[%s8015_s0 + $0x5548] sm:$0xff] }
 0x2e4   : > { %5180 = vmatprep.subr.mxu0 %v2906_v37  ;;  %5251 = vmatprep.subr.mxu1 %v3034_v38  ;;  %v2885_v37 = vld [vmem:[%s8015_s0 + $0x5140] sm:$0xff] }
 0x2e5   : > { %5174 = vmatmul.mubr.f32.vlgmr.msra.gmra.mxu1 %v9509_v12  ;;  %5181 = vmatpush1.msra.mxu0 %v2905_v41  ;;  %v3013_v38 = vld [vmem:[%s8015_s0 + $0x5540] sm:$0xff]  ;;  %v2882_v41 = vld [vmem:[%s8015_s0 + $0x5128] sm:$0xff] }
 0x2e6   : > { %5252 = vmatpush1.msra.mxu1 %v3033_v44  ;;  %5182 = vmatprep.subr.mxu0 %v2902_v45  ;;  %v3010_v44 = vld [vmem:[%s8015_s0 + $0x5528] sm:$0xff]  ;;  %v2881_v45 = vld [vmem:[%s8015_s0 + $0x5120] sm:$0xff] }
 0x2e7   : > { %5253 = vmatprep.subr.mxu1 %v3030_v46  ;;  %5183 = vmatpush1.msra.mxu0 %v2901_v50  ;;  %v3009_v46 = vld [vmem:[%s8015_s0 + $0x5520] sm:$0xff]  ;;  %v2878_v50 = vld [vmem:[%s8015_s0 + $0x5108] sm:$0xff] }
 0x2e8   : > { %5254 = vmatpush1.msra.mxu1 %v3029_v51  ;;  %5184 = vmatprep.subr.mxu0 %v2898_v53  ;;  %v3006_v51 = vld [vmem:[%s8015_s0 + $0x5508] sm:$0xff]  ;;  %v2877_v53 = vld [vmem:[%s8015_s0 + $0x5100] sm:$0xff] }
 0x2e9   : > { %5255 = vmatprep.subr.mxu1 %v3026_v55  ;;  %5185 = vmatpush1.msra.mxu0 %v2897_v59  ;;  %v3005_v55 = vld [vmem:[%s8015_s0 + $0x5500] sm:$0xff]  ;;  %v2874_v59 = vld [vmem:[%s8015_s0 + $0x50e8] sm:$0xff] }
 0x2ea   : > { %5256 = vmatpush1.msra.mxu1 %v3025_v60  ;;  %5186 = vmatprep.subr.mxu0 %v2894_v4  ;;  %v3002_v60 = vld [vmem:[%s8015_s0 + $0x54e8] sm:$0xff]  ;;  %v2873_v4 = vld [vmem:[%s8015_s0 + $0x50e0] sm:$0xff] }
 0x2eb   : > { %5257 = vmatprep.subr.mxu1 %v3022_v5  ;;  %5187 = vmatpush1.msra.mxu0 %v2893_v6  ;;  %v3001_v5 = vld [vmem:[%s8015_s0 + $0x54e0] sm:$0xff]  ;;  %v2870_v6 = vld [vmem:[%s8015_s0 + $0x50c8] sm:$0xff] }
 0x2ec   : > { %5258 = vmatpush1.msra.mxu1 %v3021_v11  ;;  %5188 = vmatprep.subr.mxu0 %v2890_v13  ;;  %v2998_v11 = vld [vmem:[%s8015_s0 + $0x54c8] sm:$0xff]  ;;  %v2869_v13 = vld [vmem:[%s8015_s0 + $0x50c0] sm:$0xff] }
 0x2ed   : > { %5259 = vmatprep.subr.mxu1 %v3018_v14  ;;  %5189 = vmatpush1.msra.mxu0 %v2889_v20  ;;  %v2997_v14 = vld [vmem:[%s8015_s0 + $0x54c0] sm:$0xff]  ;;  %v2866_v20 = vld [vmem:[%s8015_s0 + $0x50a8] sm:$0xff] }
 0x2ee   : > { %5260 = vmatpush1.msra.mxu1 %v3017_v22  ;;  %5190 = vmatprep.subr.mxu0 %v2886_v31  ;;  %v2994_v22 = vld [vmem:[%s8015_s0 + $0x54a8] sm:$0xff]  ;;  %v2865_v31 = vld [vmem:[%s8015_s0 + $0x50a0] sm:$0xff] }
 0x2ef   : > { %5261 = vmatprep.subr.mxu1 %v3014_v33  ;;  %5191 = vmatpush1.msra.mxu0 %v2885_v37  ;;  %v2993_v33 = vld [vmem:[%s8015_s0 + $0x54a0] sm:$0xff]  ;;  %v2862_v37 = vld [vmem:[%s8015_s0 + $0x5088] sm:$0xff] }
 0x2f0   : > { %5262 = vmatpush1.msra.mxu1 %v3013_v38  ;;  %5192 = vmatprep.subr.mxu0 %v2882_v41  ;;  %v2990_v38 = vld [vmem:[%s8015_s0 + $0x5488] sm:$0xff]  ;;  %v2861_v41 = vld [vmem:[%s8015_s0 + $0x5080] sm:$0xff] }
 0x2f1   : > { %5263 = vmatprep.subr.mxu1 %v3010_v44  ;;  %5193 = vmatpush1.msra.mxu0 %v2881_v45  ;;  %v2989_v44 = vld [vmem:[%s8015_s0 + $0x5480] sm:$0xff]  ;;  %v2858_v45 = vld [vmem:[%s8015_s0 + $0x5068] sm:$0xff] }
 0x2f2   : > { %5264 = vmatpush1.msra.mxu1 %v3009_v46  ;;  %5194 = vmatprep.subr.mxu0 %v2878_v50  ;;  %v2986_v46 = vld [vmem:[%s8015_s0 + $0x5468] sm:$0xff]  ;;  %v2857_v50 = vld [vmem:[%s8015_s0 + $0x5060] sm:$0xff] }
 0x2f3   : > { %5265 = vmatprep.subr.mxu1 %v3006_v51  ;;  %5195 = vmatpush1.msra.mxu0 %v2877_v53  ;;  %v2985_v51 = vld [vmem:[%s8015_s0 + $0x5460] sm:$0xff]  ;;  %v2854_v53 = vld [vmem:[%s8015_s0 + $0x5048] sm:$0xff] }
 0x2f4   : > { %5266 = vmatpush1.msra.mxu1 %v3005_v55  ;;  %5196 = vmatprep.subr.mxu0 %v2874_v59  ;;  %v2982_v55 = vld [vmem:[%s8015_s0 + $0x5448] sm:$0xff]  ;;  %v2853_v59 = vld [vmem:[%s8015_s0 + $0x5040] sm:$0xff] }
 0x2f5   : > { %5267 = vmatprep.subr.mxu1 %v3002_v60  ;;  %5197 = vmatpush1.msra.mxu0 %v2873_v4  ;;  %v2981_v60 = vld [vmem:[%s8015_s0 + $0x5440] sm:$0xff]  ;;  %v2850_v4 = vld [vmem:[%s8015_s0 + $0x5028] sm:$0xff] }
 0x2f6   : > { %5268 = vmatpush1.msra.mxu1 %v3001_v5  ;;  %5198 = vmatprep.subr.mxu0 %v2870_v6  ;;  %v2978_v5 = vld [vmem:[%s8015_s0 + $0x5428] sm:$0xff]  ;;  %v2849_v6 = vld [vmem:[%s8015_s0 + $0x5020] sm:$0xff] }
 0x2f7   : > { %5269 = vmatprep.subr.mxu1 %v2998_v11  ;;  %5199 = vmatpush1.msra.mxu0 %v2869_v13  ;;  %v2977_v11 = vld [vmem:[%s8015_s0 + $0x5420] sm:$0xff]  ;;  %v2846_v13 = vld [vmem:[%s8015_s0 + $0x5008] sm:$0xff] }
 0x2f8   : > { %5270 = vmatpush1.msra.mxu1 %v2997_v14  ;;  %5200 = vmatprep.subr.mxu0 %v2866_v20  ;;  %v2974_v14 = vld [vmem:[%s8015_s0 + $0x5408] sm:$0xff]  ;;  %v2845_v20 = vld [vmem:[%s8015_s0 + $0x5000] sm:$0xff] }
 0x2f9   : > { %5271 = vmatprep.subr.mxu1 %v2994_v22  ;;  %5201 = vmatpush1.msra.mxu0 %v2865_v31  ;;  %v2973_v22 = vld [vmem:[%s8015_s0 + $0x5400] sm:$0xff]  ;;  %v2970_v31 = vld [vmem:[%s8015_s0 + $0x53e8] sm:$0xff] }
 0x2fa   : > { %5272 = vmatpush1.msra.mxu1 %v2993_v33  ;;  %5202 = vmatprep.subr.mxu0 %v2862_v37  ;;  %v3098_v33 = vld [vmem:[%s8015_s0 + $0x57e8] sm:$0xff]  ;;  %v2969_v37 = vld [vmem:[%s8015_s0 + $0x53e0] sm:$0xff] }
 0x2fb   : > { %5273 = vmatprep.subr.mxu1 %v2990_v38  ;;  %5203 = vmatpush1.msra.mxu0 %v2861_v41  ;;  %v3097_v38 = vld [vmem:[%s8015_s0 + $0x57e0] sm:$0xff]  ;;  %v2966_v41 = vld [vmem:[%s8015_s0 + $0x53c8] sm:$0xff] }
 0x2fc   : > { %5274 = vmatpush1.msra.mxu1 %v2989_v44  ;;  %5204 = vmatprep.subr.mxu0 %v2858_v45  ;;  %v3094_v44 = vld [vmem:[%s8015_s0 + $0x57c8] sm:$0xff]  ;;  %v2965_v45 = vld [vmem:[%s8015_s0 + $0x53c0] sm:$0xff] }
 0x2fd   : > { %5275 = vmatprep.subr.mxu1 %v2986_v46  ;;  %5205 = vmatpush1.msra.mxu0 %v2857_v50  ;;  %v3093_v46 = vld [vmem:[%s8015_s0 + $0x57c0] sm:$0xff]  ;;  %v2962_v50 = vld [vmem:[%s8015_s0 + $0x53a8] sm:$0xff] }
 0x2fe   : > { %5276 = vmatpush1.msra.mxu1 %v2985_v51  ;;  %5206 = vmatprep.subr.mxu0 %v2854_v53  ;;  %v3090_v51 = vld [vmem:[%s8015_s0 + $0x57a8] sm:$0xff]  ;;  %v2961_v53 = vld [vmem:[%s8015_s0 + $0x53a0] sm:$0xff] }
 0x2ff   : > { %5277 = vmatprep.subr.mxu1 %v2982_v55  ;;  %5207 = vmatpush1.msra.mxu0 %v2853_v59  ;;  %v3089_v55 = vld [vmem:[%s8015_s0 + $0x57a0] sm:$0xff]  ;;  %v2958_v59 = vld [vmem:[%s8015_s0 + $0x5388] sm:$0xff] }
 0x300   : > { %5278 = vmatpush1.msra.mxu1 %v2981_v60  ;;  %5208 = vmatprep.subr.mxu0 %v2850_v4  ;;  %v3086_v60 = vld [vmem:[%s8015_s0 + $0x5788] sm:$0xff]  ;;  %v2957_v4 = vld [vmem:[%s8015_s0 + $0x5380] sm:$0xff] }
 0x301   : > { %5279 = vmatprep.subr.mxu1 %v2978_v5  ;;  %5209 = vmatpush1.msra.mxu0 %v2849_v6  ;;  %v3085_v5 = vld [vmem:[%s8015_s0 + $0x5780] sm:$0xff]  ;;  %v2954_v6 = vld [vmem:[%s8015_s0 + $0x5368] sm:$0xff] }
 0x302   : > { %5280 = vmatpush1.msra.mxu1 %v2977_v11  ;;  %5210 = vmatprep.subr.mxu0 %v2846_v13  ;;  %v3082_v11 = vld [vmem:[%s8015_s0 + $0x5768] sm:$0xff]  ;;  %v2953_v13 = vld [vmem:[%s8015_s0 + $0x5360] sm:$0xff] }
 0x303   : > { %5281 = vmatprep.subr.mxu1 %v2974_v14  ;;  %5211 = vmatpush1.msra.mxu0 %v2845_v20  ;;  %v3081_v14 = vld [vmem:[%s8015_s0 + $0x5760] sm:$0xff]  ;;  %v2950_v20 = vld [vmem:[%s8015_s0 + $0x5348] sm:$0xff] }
 0x304   : > { %5282 = vmatpush1.msra.mxu1 %v2973_v22  ;;  %5212 = vmatprep.subr.mxu0 %v2970_v31  ;;  %v3078_v22 = vld [vmem:[%s8015_s0 + $0x5748] sm:$0xff]  ;;  %v2949_v31 = vld [vmem:[%s8015_s0 + $0x5340] sm:$0xff] }
 0x305   : > { %5283 = vmatprep.subr.mxu1 %v3098_v33  ;;  %5213 = vmatpush2.msra.mxu0 %v2969_v37  ;;  %v3077_v33 = vld [vmem:[%s8015_s0 + $0x5740] sm:$0xff]  ;;  %v2946_v37 = vld [vmem:[%s8015_s0 + $0x5328] sm:$0xff] }
 0x306   : > { %5284 = vmatpush2.msra.mxu1 %v3097_v38  ;;  %5214 = vmatprep.subr.mxu0 %v2966_v41  ;;  %v3074_v38 = vld [vmem:[%s8015_s0 + $0x5728] sm:$0xff]  ;;  %v2945_v41 = vld [vmem:[%s8015_s0 + $0x5320] sm:$0xff] }
 0x307   : > { %5285 = vmatprep.subr.mxu1 %v3094_v44  ;;  %5215 = vmatpush2.msra.mxu0 %v2965_v45  ;;  %v3073_v44 = vld [vmem:[%s8015_s0 + $0x5720] sm:$0xff]  ;;  %v2942_v45 = vld [vmem:[%s8015_s0 + $0x5308] sm:$0xff] }
 0x308   : > { %5286 = vmatpush2.msra.mxu1 %v3093_v46  ;;  %5216 = vmatprep.subr.mxu0 %v2962_v50  ;;  %v3070_v46 = vld [vmem:[%s8015_s0 + $0x5708] sm:$0xff]  ;;  %v2941_v50 = vld [vmem:[%s8015_s0 + $0x5300] sm:$0xff] }
 0x309   : > { %5287 = vmatprep.subr.mxu1 %v3090_v51  ;;  %5217 = vmatpush2.msra.mxu0 %v2961_v53  ;;  %v3069_v51 = vld [vmem:[%s8015_s0 + $0x5700] sm:$0xff]  ;;  %v2938_v53 = vld [vmem:[%s8015_s0 + $0x52e8] sm:$0xff] }
 0x30a   : > { %5288 = vmatpush2.msra.mxu1 %v3089_v55  ;;  %5218 = vmatprep.subr.mxu0 %v2958_v59  ;;  %v3066_v55 = vld [vmem:[%s8015_s0 + $0x56e8] sm:$0xff]  ;;  %v2937_v59 = vld [vmem:[%s8015_s0 + $0x52e0] sm:$0xff] }
 0x30b   : > { %5289 = vmatprep.subr.mxu1 %v3086_v60  ;;  %5219 = vmatpush2.msra.mxu0 %v2957_v4  ;;  %v3065_v60 = vld [vmem:[%s8015_s0 + $0x56e0] sm:$0xff]  ;;  %v2934_v4 = vld [vmem:[%s8015_s0 + $0x52c8] sm:$0xff] }
 0x30c   : > { %5290 = vmatpush2.msra.mxu1 %v3085_v5  ;;  %5220 = vmatprep.subr.mxu0 %v2954_v6  ;;  %v3062_v5 = vld [vmem:[%s8015_s0 + $0x56c8] sm:$0xff]  ;;  %v2933_v6 = vld [vmem:[%s8015_s0 + $0x52c0] sm:$0xff] }
 0x30d   : > { %5291 = vmatprep.subr.mxu1 %v3082_v11  ;;  %5221 = vmatpush2.msra.mxu0 %v2953_v13  ;;  %v3061_v11 = vld [vmem:[%s8015_s0 + $0x56c0] sm:$0xff]  ;;  %v2930_v13 = vld [vmem:[%s8015_s0 + $0x52a8] sm:$0xff] }
 0x30e   : > { %5292 = vmatpush2.msra.mxu1 %v3081_v14  ;;  %5222 = vmatprep.subr.mxu0 %v2950_v20  ;;  %v3058_v14 = vld [vmem:[%s8015_s0 + $0x56a8] sm:$0xff]  ;;  %v2929_v20 = vld [vmem:[%s8015_s0 + $0x52a0] sm:$0xff] }
 0x30f   : > { %5293 = vmatprep.subr.mxu1 %v3078_v22  ;;  %5223 = vmatpush2.msra.mxu0 %v2949_v31  ;;  %v3057_v22 = vld [vmem:[%s8015_s0 + $0x56a0] sm:$0xff]  ;;  %v282_v31 = vld [vmem:[%s8152_s6 + $0x50] sm:$0xff] }
 0x310   : > { %5294 = vmatpush2.msra.mxu1 %v3077_v33  ;;  %5224 = vmatprep.subr.mxu0 %v2946_v37  ;;  %v2926_v33 = vld [vmem:[%s8015_s0 + $0x5288] sm:$0xff] }
 0x311   : > { %5295 = vmatprep.subr.mxu1 %v3074_v38  ;;  %5225 = vmatpush2.msra.mxu0 %v2945_v41  ;;  %v3054_v37 = vld [vmem:[%s8015_s0 + $0x5688] sm:$0xff]  ;;  %v2925_v38 = vld [vmem:[%s8015_s0 + $0x5280] sm:$0xff] }
 0x312   : > { %5296 = vmatpush2.msra.mxu1 %v3073_v44  ;;  %5226 = vmatprep.subr.mxu0 %v2942_v45  ;;  %v3053_v41 = vld [vmem:[%s8015_s0 + $0x5680] sm:$0xff]  ;;  %v2922_v44 = vld [vmem:[%s8015_s0 + $0x5268] sm:$0xff] }
 0x313   : > { %5297 = vmatprep.subr.mxu1 %v3070_v46  ;;  %5227 = vmatpush2.msra.mxu0 %v2941_v50  ;;  %v3050_v45 = vld [vmem:[%s8015_s0 + $0x5668] sm:$0xff]  ;;  %v3668_v46 = vcombine.high %v282_v31, %v282_v31  ;;  %v2921_v50 = vld [vmem:[%s8015_s0 + $0x5260] sm:$0xff] }
 0x314   : > { %5298 = vmatpush2.msra.mxu1 %v3069_v51  ;;  %5228 = vmatprep.subr.mxu0 %v2938_v53  ;;  %v3049_v51 = vld [vmem:[%s8015_s0 + $0x5660] sm:$0xff]  ;;  %v2918_v53 = vld [vmem:[%s8015_s0 + $0x5248] sm:$0xff] }
 0x315   : > { %5299 = vmatprep.subr.mxu1 %v3066_v55  ;;  %5229 = vmatpush2.msra.mxu0 %v2937_v59  ;;  %v3046_v55 = vld [vmem:[%s8015_s0 + $0x5648] sm:$0xff]  ;;  %v9649_v59 = vrot.slane %v282_v31, %v8168_v52 }
 0x316   : > { %5300 = vmatpush2.msra.mxu1 %v3065_v60  ;;  %5230 = vmatprep.subr.mxu0 %v2934_v4  ;;  %v2917_v60 = vld [vmem:[%s8015_s0 + $0x5240] sm:$0xff] }
 0x317   : > { %5301 = vmatprep.subr.mxu1 %v3062_v5  ;;  %5231 = vmatpush2.msra.mxu0 %v2933_v6  ;;  %v3045_v4 = vld [vmem:[%s8015_s0 + $0x5640] sm:$0xff]  ;;  %v2914_v5 = vld [vmem:[%s8015_s0 + $0x5228] sm:$0xff]  ;;  %v9664_v31 = vcombine.high %v9649_v59, %v9649_v59 }
 0x318   : > { %5302 = vmatpush2.msra.mxu1 %v3061_v11  ;;  %5232 = vmatprep.subr.mxu0 %v2930_v13  ;;  %v3042_v6 = vld [vmem:[%s8015_s0 + $0x5628] sm:$0xff]  ;;  %v9656_v11 = vrot.slane %v3668_v46, %v8168_v52  ;;  %v2913_v13 = vld [vmem:[%s8015_s0 + $0x5220] sm:$0xff] }
 0x319   : > { %5303 = vmatprep.subr.mxu1 %v3058_v14  ;;  %5233 = vmatpush2.msra.mxu0 %v2929_v20  ;;  %v3041_v14 = vld [vmem:[%s8015_s0 + $0x5620] sm:$0xff]  ;;  %v2910_v20 = vld [vmem:[%s8015_s0 + $0x5208] sm:$0xff] }
 0x31a   : > { %5304 = vmatpush2.msra.mxu1 %v3057_v22  ;;  %5234 = vmatprep.subr.mxu0 %v2926_v33  ;;  %v3038_v22 = vld [vmem:[%s8015_s0 + $0x5608] sm:$0xff]  ;;  %v2909_v33 = vld [vmem:[%s8015_s0 + $0x5200] sm:$0xff] }
 0x31b   : > { %5305 = vmatprep.subr.mxu1 %v3054_v37  ;;  %5235 = vmatpush2.msra.mxu0 %v2925_v38  ;;  %v3037_v37 = vld [vmem:[%s8015_s0 + $0x5600] sm:$0xff]  ;;  %v9670_v38 = vcombine.high %v9656_v11, %v9656_v11 }
 0x31c   : > { %5306 = vmatpush2.msra.mxu1 %v3053_v41  ;;  %5236 = vmatprep.subr.mxu0 %v2922_v44  ;;  %v3162_v41 = vld [vmem:[%s8015_s0 + $0x59e8] sm:$0xff]  ;;  %v3289_v46 = vld [vmem:[%s8015_s0 + $0x5de0] sm:$0xff] }
 0x31d   : > { %5307 = vmatprep.subr.mxu1 %v3050_v45  ;;  %5237 = vmatpush2.msra.mxu0 %v2921_v50  ;;  %v3290_v44 = vld [vmem:[%s8015_s0 + $0x5de8] sm:$0xff]  ;;  %v3161_v45 = vld [vmem:[%s8015_s0 + $0x59e0] sm:$0xff] }
 0x31e   : > { %5308 = vmatpush2.msra.mxu1 %v3049_v51  ;;  %5238 = vmatprep.subr.mxu0 %v2918_v53  ;;  %v3158_v50 = vld [vmem:[%s8015_s0 + $0x59c8] sm:$0xff]  ;;  %v3157_v53 = vld [vmem:[%s8015_s0 + $0x59c0] sm:$0xff] }
 0x31f   : > { %5309 = vmatprep.subr.mxu1 %v3046_v55  ;;  %5239 = vmatpush2.msra.mxu0 %v2917_v60  ;;  %v3286_v51 = vld [vmem:[%s8015_s0 + $0x5dc8] sm:$0xff]  ;;  %v3285_v55 = vld [vmem:[%s8015_s0 + $0x5dc0] sm:$0xff] }
 0x320   : > { %5310 = vmatpush2.msra.mxu1 %v3045_v4  ;;  %5240 = vmatprep.subr.mxu0 %v2914_v5  ;;  %v3154_v60 = vld [vmem:[%s8015_s0 + $0x59a8] sm:$0xff]  ;;  %v3153_v5 = vld [vmem:[%s8015_s0 + $0x59a0] sm:$0xff] }
 0x321   : > { %5311 = vmatprep.subr.mxu1 %v3042_v6  ;;  %5241 = vmatpush2.msra.mxu0 %v2913_v13  ;;  %v3282_v4 = vld [vmem:[%s8015_s0 + $0x5da8] sm:$0xff]  ;;  %v3281_v6 = vld [vmem:[%s8015_s0 + $0x5da0] sm:$0xff] }
 0x322   : > { %5312 = vmatpush2.msra.mxu1 %v3041_v14  ;;  %5242 = vmatprep.subr.mxu0 %v2910_v20  ;;  %v3150_v13 = vld [vmem:[%s8015_s0 + $0x5988] sm:$0xff]  ;;  %v3149_v20 = vld [vmem:[%s8015_s0 + $0x5980] sm:$0xff] }
 0x323   : > { %5313 = vmatprep.subr.mxu1 %v3038_v22  ;;  %5243 = vmatpush2.msra.mxu0 %v2909_v33  ;;  %v3278_v14 = vld [vmem:[%s8015_s0 + $0x5d88] sm:$0xff]  ;;  %v3277_v22 = vld [vmem:[%s8015_s0 + $0x5d80] sm:$0xff] }
 0x324   : > { %5244 = vmatprep.mubr.f32.mxu0 %v9664_v31  ;;  %5314 = vmatpush2.msra.mxu1 %v3037_v37  ;;  %v3146_v33 = vld [vmem:[%s8015_s0 + $0x5968] sm:$0xff] }
 0x325   : > { %5245 = vmatmul.mubr.f32.vlgmr.msra.gmra.mxu0 %v9649_v59  ;;  %5315 = vmatprep.mubr.f32.mxu1 %v9670_v38  ;;  %v3274_v37 = vld [vmem:[%s8015_s0 + $0x5d68] sm:$0xff] }
 0x326   : > { %5322 = vmatprep.subr.mxu0 %v3162_v41  ;;  %5393 = vmatprep.subr.mxu1 %v3290_v44  ;;  %v3145_v41 = vld [vmem:[%s8015_s0 + $0x5960] sm:$0xff] }
 0x327   : > { %5316 = vmatmul.mubr.f32.vlgmr.msra.gmra.mxu1 %v9656_v11  ;;  %5323 = vmatpush1.msra.mxu0 %v3161_v45  ;;  %v3273_v44 = vld [vmem:[%s8015_s0 + $0x5d60] sm:$0xff]  ;;  %v3142_v45 = vld [vmem:[%s8015_s0 + $0x5948] sm:$0xff] }
 0x328   : > { %5394 = vmatpush1.msra.mxu1 %v3289_v46  ;;  %5324 = vmatprep.subr.mxu0 %v3158_v50  ;;  %v3270_v46 = vld [vmem:[%s8015_s0 + $0x5d48] sm:$0xff]  ;;  %v3141_v50 = vld [vmem:[%s8015_s0 + $0x5940] sm:$0xff] }
 0x329   : > { %5395 = vmatprep.subr.mxu1 %v3286_v51  ;;  %5325 = vmatpush1.msra.mxu0 %v3157_v53  ;;  %v3269_v51 = vld [vmem:[%s8015_s0 + $0x5d40] sm:$0xff]  ;;  %v3138_v53 = vld [vmem:[%s8015_s0 + $0x5928] sm:$0xff] }
 0x32a   : > { %5396 = vmatpush1.msra.mxu1 %v3285_v55  ;;  %5326 = vmatprep.subr.mxu0 %v3154_v60  ;;  %v3266_v55 = vld [vmem:[%s8015_s0 + $0x5d28] sm:$0xff]  ;;  %v3137_v60 = vld [vmem:[%s8015_s0 + $0x5920] sm:$0xff] }
 0x32b   : > { %5397 = vmatprep.subr.mxu1 %v3282_v4  ;;  %5327 = vmatpush1.msra.mxu0 %v3153_v5  ;;  %v3265_v4 = vld [vmem:[%s8015_s0 + $0x5d20] sm:$0xff]  ;;  %v3134_v5 = vld [vmem:[%s8015_s0 + $0x5908] sm:$0xff] }
 0x32c   : > { %5398 = vmatpush1.msra.mxu1 %v3281_v6  ;;  %5328 = vmatprep.subr.mxu0 %v3150_v13  ;;  %v3262_v6 = vld [vmem:[%s8015_s0 + $0x5d08] sm:$0xff]  ;;  %v3133_v13 = vld [vmem:[%s8015_s0 + $0x5900] sm:$0xff] }
 0x32d   : > { %5399 = vmatprep.subr.mxu1 %v3278_v14  ;;  %5329 = vmatpush1.msra.mxu0 %v3149_v20  ;;  %v3261_v14 = vld [vmem:[%s8015_s0 + $0x5d00] sm:$0xff]  ;;  %v3130_v20 = vld [vmem:[%s8015_s0 + $0x58e8] sm:$0xff] }
 0x32e   : > { %5400 = vmatpush1.msra.mxu1 %v3277_v22  ;;  %5330 = vmatprep.subr.mxu0 %v3146_v33  ;;  %v3258_v22 = vld [vmem:[%s8015_s0 + $0x5ce8] sm:$0xff]  ;;  %v3129_v33 = vld [vmem:[%s8015_s0 + $0x58e0] sm:$0xff] }
 0x32f   : > { %5401 = vmatprep.subr.mxu1 %v3274_v37  ;;  %5331 = vmatpush1.msra.mxu0 %v3145_v41  ;;  %v3257_v37 = vld [vmem:[%s8015_s0 + $0x5ce0] sm:$0xff]  ;;  %v3126_v41 = vld [vmem:[%s8015_s0 + $0x58c8] sm:$0xff] }
 0x330   : > { %5402 = vmatpush1.msra.mxu1 %v3273_v44  ;;  %5332 = vmatprep.subr.mxu0 %v3142_v45  ;;  %v3254_v44 = vld [vmem:[%s8015_s0 + $0x5cc8] sm:$0xff]  ;;  %v3125_v45 = vld [vmem:[%s8015_s0 + $0x58c0] sm:$0xff] }
 0x331   : > { %5403 = vmatprep.subr.mxu1 %v3270_v46  ;;  %5333 = vmatpush1.msra.mxu0 %v3141_v50  ;;  %v3253_v46 = vld [vmem:[%s8015_s0 + $0x5cc0] sm:$0xff]  ;;  %v3122_v50 = vld [vmem:[%s8015_s0 + $0x58a8] sm:$0xff] }
 0x332   : > { %5404 = vmatpush1.msra.mxu1 %v3269_v51  ;;  %5334 = vmatprep.subr.mxu0 %v3138_v53  ;;  %v3250_v51 = vld [vmem:[%s8015_s0 + $0x5ca8] sm:$0xff]  ;;  %v3121_v53 = vld [vmem:[%s8015_s0 + $0x58a0] sm:$0xff] }
 0x333   : > { %5405 = vmatprep.subr.mxu1 %v3266_v55  ;;  %5335 = vmatpush1.msra.mxu0 %v3137_v60  ;;  %v3249_v55 = vld [vmem:[%s8015_s0 + $0x5ca0] sm:$0xff]  ;;  %v3118_v60 = vld [vmem:[%s8015_s0 + $0x5888] sm:$0xff] }
 0x334   : > { %5406 = vmatpush1.msra.mxu1 %v3265_v4  ;;  %5336 = vmatprep.subr.mxu0 %v3134_v5  ;;  %v3246_v4 = vld [vmem:[%s8015_s0 + $0x5c88] sm:$0xff]  ;;  %v3117_v5 = vld [vmem:[%s8015_s0 + $0x5880] sm:$0xff] }
 0x335   : > { %5407 = vmatprep.subr.mxu1 %v3262_v6  ;;  %5337 = vmatpush1.msra.mxu0 %v3133_v13  ;;  %v3245_v6 = vld [vmem:[%s8015_s0 + $0x5c80] sm:$0xff]  ;;  %v3114_v13 = vld [vmem:[%s8015_s0 + $0x5868] sm:$0xff] }
 0x336   : > { %5408 = vmatpush1.msra.mxu1 %v3261_v14  ;;  %5338 = vmatprep.subr.mxu0 %v3130_v20  ;;  %v3242_v14 = vld [vmem:[%s8015_s0 + $0x5c68] sm:$0xff]  ;;  %v3113_v20 = vld [vmem:[%s8015_s0 + $0x5860] sm:$0xff] }
 0x337   : > { %5409 = vmatprep.subr.mxu1 %v3258_v22  ;;  %5339 = vmatpush1.msra.mxu0 %v3129_v33  ;;  %v3241_v22 = vld [vmem:[%s8015_s0 + $0x5c60] sm:$0xff]  ;;  %v3110_v33 = vld [vmem:[%s8015_s0 + $0x5848] sm:$0xff] }
 0x338   : > { %5410 = vmatpush1.msra.mxu1 %v3257_v37  ;;  %5340 = vmatprep.subr.mxu0 %v3126_v41  ;;  %v3238_v37 = vld [vmem:[%s8015_s0 + $0x5c48] sm:$0xff]  ;;  %v3109_v41 = vld [vmem:[%s8015_s0 + $0x5840] sm:$0xff] }
 0x339   : > { %5411 = vmatprep.subr.mxu1 %v3254_v44  ;;  %5341 = vmatpush1.msra.mxu0 %v3125_v45  ;;  %v3237_v44 = vld [vmem:[%s8015_s0 + $0x5c40] sm:$0xff]  ;;  %v3106_v45 = vld [vmem:[%s8015_s0 + $0x5828] sm:$0xff] }
 0x33a   : > { %5412 = vmatpush1.msra.mxu1 %v3253_v46  ;;  %5342 = vmatprep.subr.mxu0 %v3122_v50  ;;  %v3234_v46 = vld [vmem:[%s8015_s0 + $0x5c28] sm:$0xff]  ;;  %v3105_v50 = vld [vmem:[%s8015_s0 + $0x5820] sm:$0xff] }
 0x33b   : > { %5413 = vmatprep.subr.mxu1 %v3250_v51  ;;  %5343 = vmatpush1.msra.mxu0 %v3121_v53  ;;  %v3233_v51 = vld [vmem:[%s8015_s0 + $0x5c20] sm:$0xff]  ;;  %v3102_v53 = vld [vmem:[%s8015_s0 + $0x5808] sm:$0xff] }
 0x33c   : > { %5414 = vmatpush1.msra.mxu1 %v3249_v55  ;;  %5344 = vmatprep.subr.mxu0 %v3118_v60  ;;  %v3230_v55 = vld [vmem:[%s8015_s0 + $0x5c08] sm:$0xff]  ;;  %v3101_v60 = vld [vmem:[%s8015_s0 + $0x5800] sm:$0xff] }
 0x33d   : > { %5415 = vmatprep.subr.mxu1 %v3246_v4  ;;  %5345 = vmatpush1.msra.mxu0 %v3117_v5  ;;  %v3229_v4 = vld [vmem:[%s8015_s0 + $0x5c00] sm:$0xff]  ;;  %v3226_v5 = vld [vmem:[%s8015_s0 + $0x5be8] sm:$0xff] }
 0x33e   : > { %5416 = vmatpush1.msra.mxu1 %v3245_v6  ;;  %5346 = vmatprep.subr.mxu0 %v3114_v13  ;;  %v3354_v6 = vld [vmem:[%s8015_s0 + $0x5fe8] sm:$0xff]  ;;  %v3225_v13 = vld [vmem:[%s8015_s0 + $0x5be0] sm:$0xff] }
 0x33f   : > { %5417 = vmatprep.subr.mxu1 %v3242_v14  ;;  %5347 = vmatpush1.msra.mxu0 %v3113_v20  ;;  %v3353_v14 = vld [vmem:[%s8015_s0 + $0x5fe0] sm:$0xff]  ;;  %v3222_v20 = vld [vmem:[%s8015_s0 + $0x5bc8] sm:$0xff] }
 0x340   : > { %5418 = vmatpush1.msra.mxu1 %v3241_v22  ;;  %5348 = vmatprep.subr.mxu0 %v3110_v33  ;;  %v3350_v22 = vld [vmem:[%s8015_s0 + $0x5fc8] sm:$0xff]  ;;  %v3221_v33 = vld [vmem:[%s8015_s0 + $0x5bc0] sm:$0xff] }
 0x341   : > { %5419 = vmatprep.subr.mxu1 %v3238_v37  ;;  %5349 = vmatpush1.msra.mxu0 %v3109_v41  ;;  %v3349_v37 = vld [vmem:[%s8015_s0 + $0x5fc0] sm:$0xff]  ;;  %v3218_v41 = vld [vmem:[%s8015_s0 + $0x5ba8] sm:$0xff] }
 0x342   : > { %5420 = vmatpush1.msra.mxu1 %v3237_v44  ;;  %5350 = vmatprep.subr.mxu0 %v3106_v45  ;;  %v3346_v44 = vld [vmem:[%s8015_s0 + $0x5fa8] sm:$0xff]  ;;  %v3217_v45 = vld [vmem:[%s8015_s0 + $0x5ba0] sm:$0xff] }
 0x343   : > { %5421 = vmatprep.subr.mxu1 %v3234_v46  ;;  %5351 = vmatpush1.msra.mxu0 %v3105_v50  ;;  %v3345_v46 = vld [vmem:[%s8015_s0 + $0x5fa0] sm:$0xff]  ;;  %v3214_v50 = vld [vmem:[%s8015_s0 + $0x5b88] sm:$0xff] }
 0x344   : > { %5422 = vmatpush1.msra.mxu1 %v3233_v51  ;;  %5352 = vmatprep.subr.mxu0 %v3102_v53  ;;  %v3342_v51 = vld [vmem:[%s8015_s0 + $0x5f88] sm:$0xff]  ;;  %v3213_v53 = vld [vmem:[%s8015_s0 + $0x5b80] sm:$0xff] }
 0x345   : > { %5423 = vmatprep.subr.mxu1 %v3230_v55  ;;  %5353 = vmatpush1.msra.mxu0 %v3101_v60  ;;  %v3341_v55 = vld [vmem:[%s8015_s0 + $0x5f80] sm:$0xff]  ;;  %v3210_v60 = vld [vmem:[%s8015_s0 + $0x5b68] sm:$0xff] }
 0x346   : > { %5424 = vmatpush1.msra.mxu1 %v3229_v4  ;;  %5354 = vmatprep.subr.mxu0 %v3226_v5  ;;  %v3338_v4 = vld [vmem:[%s8015_s0 + $0x5f68] sm:$0xff]  ;;  %v3209_v5 = vld [vmem:[%s8015_s0 + $0x5b60] sm:$0xff] }
 0x347   : > { %5425 = vmatprep.subr.mxu1 %v3354_v6  ;;  %5355 = vmatpush2.msra.mxu0 %v3225_v13  ;;  %v3337_v6 = vld [vmem:[%s8015_s0 + $0x5f60] sm:$0xff]  ;;  %v3206_v13 = vld [vmem:[%s8015_s0 + $0x5b48] sm:$0xff] }
 0x348   : > { %5426 = vmatpush2.msra.mxu1 %v3353_v14  ;;  %5356 = vmatprep.subr.mxu0 %v3222_v20  ;;  %v3334_v14 = vld [vmem:[%s8015_s0 + $0x5f48] sm:$0xff]  ;;  %v3205_v20 = vld [vmem:[%s8015_s0 + $0x5b40] sm:$0xff] }
 0x349   : > { %5427 = vmatprep.subr.mxu1 %v3350_v22  ;;  %5357 = vmatpush2.msra.mxu0 %v3221_v33  ;;  %v3333_v22 = vld [vmem:[%s8015_s0 + $0x5f40] sm:$0xff]  ;;  %v3202_v33 = vld [vmem:[%s8015_s0 + $0x5b28] sm:$0xff] }
 0x34a   : > { %5428 = vmatpush2.msra.mxu1 %v3349_v37  ;;  %5358 = vmatprep.subr.mxu0 %v3218_v41  ;;  %v3330_v37 = vld [vmem:[%s8015_s0 + $0x5f28] sm:$0xff]  ;;  %v3201_v41 = vld [vmem:[%s8015_s0 + $0x5b20] sm:$0xff] }
 0x34b   : > { %5429 = vmatprep.subr.mxu1 %v3346_v44  ;;  %5359 = vmatpush2.msra.mxu0 %v3217_v45  ;;  %v3329_v44 = vld [vmem:[%s8015_s0 + $0x5f20] sm:$0xff]  ;;  %v3198_v45 = vld [vmem:[%s8015_s0 + $0x5b08] sm:$0xff] }
 0x34c   : > { %5430 = vmatpush2.msra.mxu1 %v3345_v46  ;;  %5360 = vmatprep.subr.mxu0 %v3214_v50  ;;  %v3326_v46 = vld [vmem:[%s8015_s0 + $0x5f08] sm:$0xff]  ;;  %v3197_v50 = vld [vmem:[%s8015_s0 + $0x5b00] sm:$0xff] }
 0x34d   : > { %5431 = vmatprep.subr.mxu1 %v3342_v51  ;;  %5361 = vmatpush2.msra.mxu0 %v3213_v53  ;;  %v3325_v51 = vld [vmem:[%s8015_s0 + $0x5f00] sm:$0xff]  ;;  %v3194_v53 = vld [vmem:[%s8015_s0 + $0x5ae8] sm:$0xff] }
 0x34e   : > { %5432 = vmatpush2.msra.mxu1 %v3341_v55  ;;  %5362 = vmatprep.subr.mxu0 %v3210_v60  ;;  %v3322_v55 = vld [vmem:[%s8015_s0 + $0x5ee8] sm:$0xff]  ;;  %v3193_v60 = vld [vmem:[%s8015_s0 + $0x5ae0] sm:$0xff] }
 0x34f   : > { %5433 = vmatprep.subr.mxu1 %v3338_v4  ;;  %5363 = vmatpush2.msra.mxu0 %v3209_v5  ;;  %v3321_v4 = vld [vmem:[%s8015_s0 + $0x5ee0] sm:$0xff]  ;;  %v3190_v5 = vld [vmem:[%s8015_s0 + $0x5ac8] sm:$0xff] }
 0x350   : > { %5434 = vmatpush2.msra.mxu1 %v3337_v6  ;;  %5364 = vmatprep.subr.mxu0 %v3206_v13  ;;  %v3318_v6 = vld [vmem:[%s8015_s0 + $0x5ec8] sm:$0xff]  ;;  %v3189_v13 = vld [vmem:[%s8015_s0 + $0x5ac0] sm:$0xff] }
 0x351   : > { %5435 = vmatprep.subr.mxu1 %v3334_v14  ;;  %5365 = vmatpush2.msra.mxu0 %v3205_v20  ;;  %v3317_v14 = vld [vmem:[%s8015_s0 + $0x5ec0] sm:$0xff]  ;;  %v3186_v20 = vld [vmem:[%s8015_s0 + $0x5aa8] sm:$0xff] }
 0x352   : > { %5436 = vmatpush2.msra.mxu1 %v3333_v22  ;;  %5366 = vmatprep.subr.mxu0 %v3202_v33  ;;  %v3314_v22 = vld [vmem:[%s8015_s0 + $0x5ea8] sm:$0xff]  ;;  %v3185_v33 = vld [vmem:[%s8015_s0 + $0x5aa0] sm:$0xff] }
 0x353   : > { %5437 = vmatprep.subr.mxu1 %v3330_v37  ;;  %5367 = vmatpush2.msra.mxu0 %v3201_v41  ;;  %v3313_v37 = vld [vmem:[%s8015_s0 + $0x5ea0] sm:$0xff]  ;;  %v283_v41 = vld [vmem:[%s8152_s6 + $0x58] sm:$0xff] }
 0x354   : > { %5438 = vmatpush2.msra.mxu1 %v3329_v44  ;;  %5368 = vmatprep.subr.mxu0 %v3198_v45  ;;  %v3182_v44 = vld [vmem:[%s8015_s0 + $0x5a88] sm:$0xff] }
 0x355   : > { %5439 = vmatprep.subr.mxu1 %v3326_v46  ;;  %5369 = vmatpush2.msra.mxu0 %v3197_v50  ;;  %v3310_v45 = vld [vmem:[%s8015_s0 + $0x5e88] sm:$0xff]  ;;  %v3181_v46 = vld [vmem:[%s8015_s0 + $0x5a80] sm:$0xff] }
 0x356   : > { %5440 = vmatpush2.msra.mxu1 %v3325_v51  ;;  %5370 = vmatprep.subr.mxu0 %v3194_v53  ;;  %v3309_v50 = vld [vmem:[%s8015_s0 + $0x5e80] sm:$0xff]  ;;  %v3178_v51 = vld [vmem:[%s8015_s0 + $0x5a68] sm:$0xff] }
 0x357   : > { %5441 = vmatprep.subr.mxu1 %v3322_v55  ;;  %5371 = vmatpush2.msra.mxu0 %v3193_v60  ;;  %v3306_v53 = vld [vmem:[%s8015_s0 + $0x5e68] sm:$0xff]  ;;  %v3685_v55 = vcombine.high %v283_v41, %v283_v41  ;;  %v3177_v60 = vld [vmem:[%s8015_s0 + $0x5a60] sm:$0xff] }
 0x358   : > { %5442 = vmatpush2.msra.mxu1 %v3321_v4  ;;  %5372 = vmatprep.subr.mxu0 %v3190_v5  ;;  %v3305_v4 = vld [vmem:[%s8015_s0 + $0x5e60] sm:$0xff]  ;;  %v3174_v5 = vld [vmem:[%s8015_s0 + $0x5a48] sm:$0xff] }
 0x359   : > { %5443 = vmatprep.subr.mxu1 %v3318_v6  ;;  %5373 = vmatpush2.msra.mxu0 %v3189_v13  ;;  %v3302_v6 = vld [vmem:[%s8015_s0 + $0x5e48] sm:$0xff]  ;;  %v9796_v13 = vrot.slane %v283_v41, %v8168_v52  ;;  %v3297_v41 = vld [vmem:[%s8015_s0 + $0x5e20] sm:$0xff] }
 0x35a   : > { %5444 = vmatpush2.msra.mxu1 %v3317_v14  ;;  %5374 = vmatprep.subr.mxu0 %v3186_v20  ;;  %v3173_v14 = vld [vmem:[%s8015_s0 + $0x5a40] sm:$0xff] }
 0x35b   : > { %5445 = vmatprep.subr.mxu1 %v3314_v22  ;;  %5375 = vmatpush2.msra.mxu0 %v3185_v33  ;;  %v3301_v20 = vld [vmem:[%s8015_s0 + $0x5e40] sm:$0xff]  ;;  %v3170_v22 = vld [vmem:[%s8015_s0 + $0x5a28] sm:$0xff] }
 0x35c   : > { %5446 = vmatpush2.msra.mxu1 %v3313_v37  ;;  %5376 = vmatprep.subr.mxu0 %v3182_v44  ;;  %v3298_v33 = vld [vmem:[%s8015_s0 + $0x5e28] sm:$0xff]  ;;  %v9803_v37 = vrot.slane %v3685_v55, %v8168_v52  ;;  %v3169_v44 = vld [vmem:[%s8015_s0 + $0x5a20] sm:$0xff] }
 0x35d   : > { %5447 = vmatprep.subr.mxu1 %v3310_v45  ;;  %5377 = vmatpush2.msra.mxu0 %v3181_v46  ;;  %v3166_v45 = vld [vmem:[%s8015_s0 + $0x5a08] sm:$0xff] }
 0x35e   : > { %5448 = vmatpush2.msra.mxu1 %v3309_v50  ;;  %5378 = vmatprep.subr.mxu0 %v3178_v51  ;;  %v3294_v46 = vld [vmem:[%s8015_s0 + $0x5e08] sm:$0xff]  ;;  %v9811_v50 = vcombine.high %v9796_v13, %v9796_v13  ;;  %v3165_v51 = vld [vmem:[%s8015_s0 + $0x5a00] sm:$0xff]  ;;  %v9817_v55 = vcombine.high %v9803_v37, %v9803_v37 }
 0x35f   : > { %5449 = vmatprep.subr.mxu1 %v3306_v53  ;;  %5379 = vmatpush2.msra.mxu0 %v3177_v60  ;;  %v3293_v53 = vld [vmem:[%s8015_s0 + $0x5e00] sm:$0xff]  ;;  %v3418_v60 = vld [vmem:[%s8015_s0 + $0x61e8] sm:$0xff] }
 0x360   : > { %5450 = vmatpush2.msra.mxu1 %v3305_v4  ;;  %5380 = vmatprep.subr.mxu0 %v3174_v5  ;;  %v348_v4 = vld [vmem:[%s8015_s0 + $0x1f8] sm:$0xff]  ;;  %v3417_v5 = vld [vmem:[%s8015_s0 + $0x61e0] sm:$0xff] }
 0x361   : > { %5451 = vmatprep.subr.mxu1 %v3302_v6  ;;  %5381 = vmatpush2.msra.mxu0 %v3173_v14  ;;  %v347_v6 = vld [vmem:[%s8015_s0 + $0x1f0] sm:$0xff]  ;;  %v3414_v14 = vld [vmem:[%s8015_s0 + $0x61c8] sm:$0xff] }
 0x362   : > { %5452 = vmatpush2.msra.mxu1 %v3301_v20  ;;  %5382 = vmatprep.subr.mxu0 %v3170_v22  ;;  %v344_v20 = vld [vmem:[%s8015_s0 + $0x1d8] sm:$0xff]  ;;  %v3413_v22 = vld [vmem:[%s8015_s0 + $0x61c0] sm:$0xff] }
 0x363   : > { %5453 = vmatprep.subr.mxu1 %v3298_v33  ;;  %5383 = vmatpush2.msra.mxu0 %v3169_v44  ;;  %v343_v33 = vld [vmem:[%s8015_s0 + $0x1d0] sm:$0xff]  ;;  %v3410_v44 = vld [vmem:[%s8015_s0 + $0x61a8] sm:$0xff] }
 0x364   : > { %5454 = vmatpush2.msra.mxu1 %v3297_v41  ;;  %5384 = vmatprep.subr.mxu0 %v3166_v45  ;;  %v340_v41 = vld [vmem:[%s8015_s0 + $0x1b8] sm:$0xff]  ;;  %v3409_v45 = vld [vmem:[%s8015_s0 + $0x61a0] sm:$0xff] }
 0x365   : > { %5455 = vmatprep.subr.mxu1 %v3294_v46  ;;  %5385 = vmatpush2.msra.mxu0 %v3165_v51  ;;  %v339_v46 = vld [vmem:[%s8015_s0 + $0x1b0] sm:$0xff]  ;;  %v3406_v51 = vld [vmem:[%s8015_s0 + $0x6188] sm:$0xff] }
 0x366   : > { %5386 = vmatprep.mubr.f32.mxu0 %v9811_v50  ;;  %5456 = vmatpush2.msra.mxu1 %v3293_v53  ;;  %v336_v53 = vld [vmem:[%s8015_s0 + $0x198] sm:$0xff] }
 0x367   : > { %5387 = vmatmul.mubr.f32.vlgmr.msra.gmra.mxu0 %v9796_v13  ;;  %5457 = vmatprep.mubr.f32.mxu1 %v9817_v55 }
 0x368   : > { %5464 = vmatprep.subr.mxu0 %v3418_v60  ;;  %5535 = vmatprep.subr.mxu1 %v348_v4  ;;  %v3405_v60 = vld [vmem:[%s8015_s0 + $0x6180] sm:$0xff]  ;;  %v335_v4 = vld [vmem:[%s8015_s0 + $0x190] sm:$0xff] }
 0x369   : > { %5458 = vmatmul.mubr.f32.vlgmr.msra.gmra.mxu1 %v9803_v37  ;;  %5465 = vmatpush1.msra.mxu0 %v3417_v5  ;;  %v3402_v5 = vld [vmem:[%s8015_s0 + $0x6168] sm:$0xff] }
 0x36a   : > { %5536 = vmatpush1.msra.mxu1 %v347_v6  ;;  %5466 = vmatprep.subr.mxu0 %v3414_v14  ;;  %v332_v6 = vld [vmem:[%s8015_s0 + $0x178] sm:$0xff]  ;;  %v3401_v14 = vld [vmem:[%s8015_s0 + $0x6160] sm:$0xff] }
 0x36b   : > { %5537 = vmatprep.subr.mxu1 %v344_v20  ;;  %5467 = vmatpush1.msra.mxu0 %v3413_v22  ;;  %v331_v20 = vld [vmem:[%s8015_s0 + $0x170] sm:$0xff]  ;;  %v3398_v22 = vld [vmem:[%s8015_s0 + $0x6148] sm:$0xff] }
 0x36c   : > { %5538 = vmatpush1.msra.mxu1 %v343_v33  ;;  %5468 = vmatprep.subr.mxu0 %v3410_v44  ;;  %v328_v33 = vld [vmem:[%s8015_s0 + $0x158] sm:$0xff]  ;;  %v3397_v44 = vld [vmem:[%s8015_s0 + $0x6140] sm:$0xff] }
 0x36d   : > { %5539 = vmatprep.subr.mxu1 %v340_v41  ;;  %5469 = vmatpush1.msra.mxu0 %v3409_v45  ;;  %v327_v41 = vld [vmem:[%s8015_s0 + $0x150] sm:$0xff]  ;;  %v3394_v45 = vld [vmem:[%s8015_s0 + $0x6128] sm:$0xff] }
 0x36e   : > { %5540 = vmatpush1.msra.mxu1 %v339_v46  ;;  %5470 = vmatprep.subr.mxu0 %v3406_v51  ;;  %v324_v46 = vld [vmem:[%s8015_s0 + $0x138] sm:$0xff]  ;;  %v3393_v51 = vld [vmem:[%s8015_s0 + $0x6120] sm:$0xff] }
 0x36f   : > { %5541 = vmatprep.subr.mxu1 %v336_v53  ;;  %5471 = vmatpush1.msra.mxu0 %v3405_v60  ;;  %v323_v53 = vld [vmem:[%s8015_s0 + $0x130] sm:$0xff]  ;;  %v3390_v60 = vld [vmem:[%s8015_s0 + $0x6108] sm:$0xff] }
 0x370   : > { %5542 = vmatpush1.msra.mxu1 %v335_v4  ;;  %5472 = vmatprep.subr.mxu0 %v3402_v5  ;;  %v320_v4 = vld [vmem:[%s8015_s0 + $0x118] sm:$0xff]  ;;  %v3389_v5 = vld [vmem:[%s8015_s0 + $0x6100] sm:$0xff] }
 0x371   : > { %5543 = vmatprep.subr.mxu1 %v332_v6  ;;  %5473 = vmatpush1.msra.mxu0 %v3401_v14  ;;  %v319_v6 = vld [vmem:[%s8015_s0 + $0x110] sm:$0xff]  ;;  %v3386_v14 = vld [vmem:[%s8015_s0 + $0x60e8] sm:$0xff] }
 0x372   : > { %5544 = vmatpush1.msra.mxu1 %v331_v20  ;;  %5474 = vmatprep.subr.mxu0 %v3398_v22  ;;  %v316_v20 = vld [vmem:[%s8015_s0 + $0xf8] sm:$0xff]  ;;  %v3385_v22 = vld [vmem:[%s8015_s0 + $0x60e0] sm:$0xff] }
 0x373   : > { %5545 = vmatprep.subr.mxu1 %v328_v33  ;;  %5475 = vmatpush1.msra.mxu0 %v3397_v44  ;;  %v315_v33 = vld [vmem:[%s8015_s0 + $0xf0] sm:$0xff]  ;;  %v3382_v44 = vld [vmem:[%s8015_s0 + $0x60c8] sm:$0xff] }
 0x374   : > { %5546 = vmatpush1.msra.mxu1 %v327_v41  ;;  %5476 = vmatprep.subr.mxu0 %v3394_v45  ;;  %v312_v41 = vld [vmem:[%s8015_s0 + $0xd8] sm:$0xff]  ;;  %v3381_v45 = vld [vmem:[%s8015_s0 + $0x60c0] sm:$0xff] }
 0x375   : > { %5547 = vmatprep.subr.mxu1 %v324_v46  ;;  %5477 = vmatpush1.msra.mxu0 %v3393_v51  ;;  %v311_v46 = vld [vmem:[%s8015_s0 + $0xd0] sm:$0xff]  ;;  %v3378_v51 = vld [vmem:[%s8015_s0 + $0x60a8] sm:$0xff] }
 0x376   : > { %5548 = vmatpush1.msra.mxu1 %v323_v53  ;;  %5478 = vmatprep.subr.mxu0 %v3390_v60  ;;  %v308_v53 = vld [vmem:[%s8015_s0 + $0xb8] sm:$0xff]  ;;  %v3377_v60 = vld [vmem:[%s8015_s0 + $0x60a0] sm:$0xff] }
 0x377   : > { %5549 = vmatprep.subr.mxu1 %v320_v4  ;;  %5479 = vmatpush1.msra.mxu0 %v3389_v5  ;;  %v307_v4 = vld [vmem:[%s8015_s0 + $0xb0] sm:$0xff]  ;;  %v3374_v5 = vld [vmem:[%s8015_s0 + $0x6088] sm:$0xff] }
 0x378   : > { %5550 = vmatpush1.msra.mxu1 %v319_v6  ;;  %5480 = vmatprep.subr.mxu0 %v3386_v14  ;;  %v304_v6 = vld [vmem:[%s8015_s0 + $0x98] sm:$0xff]  ;;  %v3373_v14 = vld [vmem:[%s8015_s0 + $0x6080] sm:$0xff] }
 0x379   : > { %5551 = vmatprep.subr.mxu1 %v316_v20  ;;  %5481 = vmatpush1.msra.mxu0 %v3385_v22  ;;  %v303_v20 = vld [vmem:[%s8015_s0 + $0x90] sm:$0xff]  ;;  %v3370_v22 = vld [vmem:[%s8015_s0 + $0x6068] sm:$0xff] }
 0x37a   : > { %5552 = vmatpush1.msra.mxu1 %v315_v33  ;;  %5482 = vmatprep.subr.mxu0 %v3382_v44  ;;  %v300_v33 = vld [vmem:[%s8015_s0 + $0x78] sm:$0xff]  ;;  %v3369_v44 = vld [vmem:[%s8015_s0 + $0x6060] sm:$0xff] }
 0x37b   : > { %5553 = vmatprep.subr.mxu1 %v312_v41  ;;  %5483 = vmatpush1.msra.mxu0 %v3381_v45  ;;  %v299_v41 = vld [vmem:[%s8015_s0 + $0x70] sm:$0xff]  ;;  %v3366_v45 = vld [vmem:[%s8015_s0 + $0x6048] sm:$0xff] }
 0x37c   : > { %5554 = vmatpush1.msra.mxu1 %v311_v46  ;;  %5484 = vmatprep.subr.mxu0 %v3378_v51  ;;  %v296_v46 = vld [vmem:[%s8015_s0 + $0x58] sm:$0xff]  ;;  %v3365_v51 = vld [vmem:[%s8015_s0 + $0x6040] sm:$0xff] }
 0x37d   : > { %5555 = vmatprep.subr.mxu1 %v308_v53  ;;  %5485 = vmatpush1.msra.mxu0 %v3377_v60  ;;  %v295_v53 = vld [vmem:[%s8015_s0 + $0x50] sm:$0xff]  ;;  %v3362_v60 = vld [vmem:[%s8015_s0 + $0x6028] sm:$0xff] }
 0x37e   : > { %5556 = vmatpush1.msra.mxu1 %v307_v4  ;;  %5486 = vmatprep.subr.mxu0 %v3374_v5  ;;  %v292_v4 = vld [vmem:[%s8015_s0 + $0x38] sm:$0xff]  ;;  %v3361_v5 = vld [vmem:[%s8015_s0 + $0x6020] sm:$0xff] }
 0x37f   : > { %5557 = vmatprep.subr.mxu1 %v304_v6  ;;  %5487 = vmatpush1.msra.mxu0 %v3373_v14  ;;  %v291_v6 = vld [vmem:[%s8015_s0 + $0x30] sm:$0xff]  ;;  %v3358_v14 = vld [vmem:[%s8015_s0 + $0x6008] sm:$0xff] }
 0x380   : > { %5558 = vmatpush1.msra.mxu1 %v303_v20  ;;  %5488 = vmatprep.subr.mxu0 %v3370_v22  ;;  %v288_v20 = vld [vmem:[%s8015_s0 + $0x18] sm:$0xff]  ;;  %v3357_v22 = vld [vmem:[%s8015_s0 + $0x6000] sm:$0xff] }
 0x381   : > { %5559 = vmatprep.subr.mxu1 %v300_v33  ;;  %5489 = vmatpush1.msra.mxu0 %v3369_v44  ;;  %v287_v33 = vld [vmem:[%s8015_s0 + $0x10] sm:$0xff]  ;;  %v3482_v44 = vld [vmem:[%s8015_s0 + $0x63e8] sm:$0xff] }
 0x382   : > { %5560 = vmatpush1.msra.mxu1 %v299_v41  ;;  %5490 = vmatprep.subr.mxu0 %v3366_v45  ;;  %v412_v41 = vld [vmem:[%s8015_s0 + $0x3f8] sm:$0xff]  ;;  %v3481_v45 = vld [vmem:[%s8015_s0 + $0x63e0] sm:$0xff] }
 0x383   : > { %5561 = vmatprep.subr.mxu1 %v296_v46  ;;  %5491 = vmatpush1.msra.mxu0 %v3365_v51  ;;  %v411_v46 = vld [vmem:[%s8015_s0 + $0x3f0] sm:$0xff]  ;;  %v3478_v51 = vld [vmem:[%s8015_s0 + $0x63c8] sm:$0xff] }
 0x384   : > { %5562 = vmatpush1.msra.mxu1 %v295_v53  ;;  %5492 = vmatprep.subr.mxu0 %v3362_v60  ;;  %v408_v53 = vld [vmem:[%s8015_s0 + $0x3d8] sm:$0xff]  ;;  %v3477_v60 = vld [vmem:[%s8015_s0 + $0x63c0] sm:$0xff] }
 0x385   : > { %5563 = vmatprep.subr.mxu1 %v292_v4  ;;  %5493 = vmatpush1.msra.mxu0 %v3361_v5  ;;  %v407_v4 = vld [vmem:[%s8015_s0 + $0x3d0] sm:$0xff]  ;;  %v3474_v5 = vld [vmem:[%s8015_s0 + $0x63a8] sm:$0xff] }
 0x386   : > { %5564 = vmatpush1.msra.mxu1 %v291_v6  ;;  %5494 = vmatprep.subr.mxu0 %v3358_v14  ;;  %v404_v6 = vld [vmem:[%s8015_s0 + $0x3b8] sm:$0xff]  ;;  %v3473_v14 = vld [vmem:[%s8015_s0 + $0x63a0] sm:$0xff] }
 0x387   : > { %5565 = vmatprep.subr.mxu1 %v288_v20  ;;  %5495 = vmatpush1.msra.mxu0 %v3357_v22  ;;  %v403_v20 = vld [vmem:[%s8015_s0 + $0x3b0] sm:$0xff]  ;;  %v3470_v22 = vld [vmem:[%s8015_s0 + $0x6388] sm:$0xff] }
 0x388   : > { %5566 = vmatpush1.msra.mxu1 %v287_v33  ;;  %5496 = vmatprep.subr.mxu0 %v3482_v44  ;;  %v400_v33 = vld [vmem:[%s8015_s0 + $0x398] sm:$0xff]  ;;  %v3469_v44 = vld [vmem:[%s8015_s0 + $0x6380] sm:$0xff] }
 0x389   : > { %5567 = vmatprep.subr.mxu1 %v412_v41  ;;  %5497 = vmatpush2.msra.mxu0 %v3481_v45  ;;  %v399_v41 = vld [vmem:[%s8015_s0 + $0x390] sm:$0xff]  ;;  %v3466_v45 = vld [vmem:[%s8015_s0 + $0x6368] sm:$0xff] }
 0x38a   : > { %5568 = vmatpush2.msra.mxu1 %v411_v46  ;;  %5498 = vmatprep.subr.mxu0 %v3478_v51  ;;  %v396_v46 = vld [vmem:[%s8015_s0 + $0x378] sm:$0xff]  ;;  %v3465_v51 = vld [vmem:[%s8015_s0 + $0x6360] sm:$0xff] }
 0x38b   : > { %5569 = vmatprep.subr.mxu1 %v408_v53  ;;  %5499 = vmatpush2.msra.mxu0 %v3477_v60  ;;  %v395_v53 = vld [vmem:[%s8015_s0 + $0x370] sm:$0xff]  ;;  %v3462_v60 = vld [vmem:[%s8015_s0 + $0x6348] sm:$0xff] }
 0x38c   : > { %5570 = vmatpush2.msra.mxu1 %v407_v4  ;;  %5500 = vmatprep.subr.mxu0 %v3474_v5  ;;  %v392_v4 = vld [vmem:[%s8015_s0 + $0x358] sm:$0xff]  ;;  %v3461_v5 = vld [vmem:[%s8015_s0 + $0x6340] sm:$0xff] }
 0x38d   : > { %5571 = vmatprep.subr.mxu1 %v404_v6  ;;  %5501 = vmatpush2.msra.mxu0 %v3473_v14  ;;  %v391_v6 = vld [vmem:[%s8015_s0 + $0x350] sm:$0xff]  ;;  %v3458_v14 = vld [vmem:[%s8015_s0 + $0x6328] sm:$0xff] }
 0x38e   : > { %5572 = vmatpush2.msra.mxu1 %v403_v20  ;;  %5502 = vmatprep.subr.mxu0 %v3470_v22  ;;  %v388_v20 = vld [vmem:[%s8015_s0 + $0x338] sm:$0xff]  ;;  %v3457_v22 = vld [vmem:[%s8015_s0 + $0x6320] sm:$0xff] }
 0x38f   : > { %5573 = vmatprep.subr.mxu1 %v400_v33  ;;  %5503 = vmatpush2.msra.mxu0 %v3469_v44  ;;  %v387_v33 = vld [vmem:[%s8015_s0 + $0x330] sm:$0xff]  ;;  %v3454_v44 = vld [vmem:[%s8015_s0 + $0x6308] sm:$0xff] }
 0x390   : > { %5574 = vmatpush2.msra.mxu1 %v399_v41  ;;  %5504 = vmatprep.subr.mxu0 %v3466_v45  ;;  %v384_v41 = vld [vmem:[%s8015_s0 + $0x318] sm:$0xff]  ;;  %v3453_v45 = vld [vmem:[%s8015_s0 + $0x6300] sm:$0xff] }
 0x391   : > { %5575 = vmatprep.subr.mxu1 %v396_v46  ;;  %5505 = vmatpush2.msra.mxu0 %v3465_v51  ;;  %v383_v46 = vld [vmem:[%s8015_s0 + $0x310] sm:$0xff]  ;;  %v3450_v51 = vld [vmem:[%s8015_s0 + $0x62e8] sm:$0xff] }
 0x392   : > { %5576 = vmatpush2.msra.mxu1 %v395_v53  ;;  %5506 = vmatprep.subr.mxu0 %v3462_v60  ;;  %v380_v53 = vld [vmem:[%s8015_s0 + $0x2f8] sm:$0xff]  ;;  %v3449_v60 = vld [vmem:[%s8015_s0 + $0x62e0] sm:$0xff] }
 0x393   : > { %5577 = vmatprep.subr.mxu1 %v392_v4  ;;  %5507 = vmatpush2.msra.mxu0 %v3461_v5  ;;  %v379_v4 = vld [vmem:[%s8015_s0 + $0x2f0] sm:$0xff]  ;;  %v3446_v5 = vld [vmem:[%s8015_s0 + $0x62c8] sm:$0xff] }
 0x394   : > { %5578 = vmatpush2.msra.mxu1 %v391_v6  ;;  %5508 = vmatprep.subr.mxu0 %v3458_v14  ;;  %v376_v6 = vld [vmem:[%s8015_s0 + $0x2d8] sm:$0xff]  ;;  %v3445_v14 = vld [vmem:[%s8015_s0 + $0x62c0] sm:$0xff] }
 0x395   : > { %5579 = vmatprep.subr.mxu1 %v388_v20  ;;  %5509 = vmatpush2.msra.mxu0 %v3457_v22  ;;  %v375_v20 = vld [vmem:[%s8015_s0 + $0x2d0] sm:$0xff]  ;;  %v3442_v22 = vld [vmem:[%s8015_s0 + $0x62a8] sm:$0xff] }
 0x396   : > { %5580 = vmatpush2.msra.mxu1 %v387_v33  ;;  %5510 = vmatprep.subr.mxu0 %v3454_v44  ;;  %v372_v33 = vld [vmem:[%s8015_s0 + $0x2b8] sm:$0xff]  ;;  %v3441_v44 = vld [vmem:[%s8015_s0 + $0x62a0] sm:$0xff] }
 0x397   : > { %5581 = vmatprep.subr.mxu1 %v384_v41  ;;  %5511 = vmatpush2.msra.mxu0 %v3453_v45  ;;  %v371_v41 = vld [vmem:[%s8015_s0 + $0x2b0] sm:$0xff]  ;;  %v3438_v45 = vld [vmem:[%s8015_s0 + $0x6288] sm:$0xff] }
 0x398   : > { %5582 = vmatpush2.msra.mxu1 %v383_v46  ;;  %5512 = vmatprep.subr.mxu0 %v3450_v51  ;;  %v368_v46 = vld [vmem:[%s8015_s0 + $0x298] sm:$0xff]  ;;  %v3437_v51 = vld [vmem:[%s8015_s0 + $0x6280] sm:$0xff] }
 0x399   : > { %5583 = vmatprep.subr.mxu1 %v380_v53  ;;  %5513 = vmatpush2.msra.mxu0 %v3449_v60  ;;  %v367_v53 = vld [vmem:[%s8015_s0 + $0x290] sm:$0xff]  ;;  %v3434_v60 = vld [vmem:[%s8015_s0 + $0x6268] sm:$0xff] }
 0x39a   : > { %5584 = vmatpush2.msra.mxu1 %v379_v4  ;;  %5514 = vmatprep.subr.mxu0 %v3446_v5  ;;  %v364_v4 = vld [vmem:[%s8015_s0 + $0x278] sm:$0xff]  ;;  %v3433_v5 = vld [vmem:[%s8015_s0 + $0x6260] sm:$0xff] }
 0x39b   : > { %5585 = vmatprep.subr.mxu1 %v376_v6  ;;  %5515 = vmatpush2.msra.mxu0 %v3445_v14  ;;  %v363_v6 = vld [vmem:[%s8015_s0 + $0x270] sm:$0xff]  ;;  %v3430_v14 = vld [vmem:[%s8015_s0 + $0x6248] sm:$0xff] }
 0x39c   : > { %5586 = vmatpush2.msra.mxu1 %v375_v20  ;;  %5516 = vmatprep.subr.mxu0 %v3442_v22  ;;  %v360_v20 = vld [vmem:[%s8015_s0 + $0x258] sm:$0xff]  ;;  %v3429_v22 = vld [vmem:[%s8015_s0 + $0x6240] sm:$0xff] }
 0x39d   : > { %5587 = vmatprep.subr.mxu1 %v372_v33  ;;  %5517 = vmatpush2.msra.mxu0 %v3441_v44  ;;  %v359_v33 = vld [vmem:[%s8015_s0 + $0x250] sm:$0xff]  ;;  %v7544_v44 = vld.sshfl [vmem:[%s8152_s6 + $0x60] sm:$0x33 pattern:$0x76325410] }
 0x39e   : > { %5588 = vmatpush2.msra.mxu1 %v371_v41  ;;  %5518 = vmatprep.subr.mxu0 %v3438_v45  ;;  %v3426_v41 = vld [vmem:[%s8015_s0 + $0x6228] sm:$0xff]  ;;  %v356_v45 = vld [vmem:[%s8015_s0 + $0x238] sm:$0xff] }
 0x39f   : > { %5589 = vmatprep.subr.mxu1 %v368_v46  ;;  %5519 = vmatpush2.msra.mxu0 %v3437_v51  ;;  %v3425_v46 = vld [vmem:[%s8015_s0 + $0x6220] sm:$0xff]  ;;  %v355_v51 = vld [vmem:[%s8015_s0 + $0x230] sm:$0xff] }
 0x3a0   : > { %5590 = vmatpush2.msra.mxu1 %v367_v53  ;;  %5520 = vmatprep.subr.mxu0 %v3434_v60  ;;  %v3422_v53 = vld [vmem:[%s8015_s0 + $0x6208] sm:$0xff]  ;;  %v352_v60 = vld [vmem:[%s8015_s0 + $0x218] sm:$0xff] }
 0x3a1   : > { %5591 = vmatprep.subr.mxu1 %v364_v4  ;;  %5521 = vmatpush2.msra.mxu0 %v3433_v5  ;;  %v9950_v4 = vcombine.high %v7544_v44, %v7544_v44  ;;  %v3421_v5 = vld [vmem:[%s8015_s0 + $0x6200] sm:$0xff] }
 0x3a2   : > { %5592 = vmatpush2.msra.mxu1 %v363_v6  ;;  %5522 = vmatprep.subr.mxu0 %v3430_v14  ;;  %v351_v6 = vld [vmem:[%s8015_s0 + $0x210] sm:$0xff]  ;;  %v476_v14 = vld [vmem:[%s8015_s0 + $0x5f8] sm:$0xff] }
 0x3a3   : > { %5593 = vmatprep.subr.mxu1 %v360_v20  ;;  %5523 = vmatpush2.msra.mxu0 %v3429_v22  ;;  %v604_v20 = vld [vmem:[%s8015_s0 + $0x9f8] sm:$0xff]  ;;  %v475_v22 = vld [vmem:[%s8015_s0 + $0x5f0] sm:$0xff] }
 0x3a4   : > { %5594 = vmatpush2.msra.mxu1 %v359_v33  ;;  %5524 = vmatprep.subr.mxu0 %v3426_v41  ;;  %v603_v33 = vld [vmem:[%s8015_s0 + $0x9f0] sm:$0xff]  ;;  %v472_v41 = vld [vmem:[%s8015_s0 + $0x5d8] sm:$0xff] }
 0x3a5   : > { %5595 = vmatprep.subr.mxu1 %v356_v45  ;;  %5525 = vmatpush2.msra.mxu0 %v3425_v46  ;;  %v600_v45 = vld [vmem:[%s8015_s0 + $0x9d8] sm:$0xff]  ;;  %v471_v46 = vld [vmem:[%s8015_s0 + $0x5d0] sm:$0xff] }
 0x3a6   : > { %5596 = vmatpush2.msra.mxu1 %v355_v51  ;;  %5526 = vmatprep.subr.mxu0 %v3422_v53  ;;  %v599_v51 = vld [vmem:[%s8015_s0 + $0x9d0] sm:$0xff]  ;;  %v596_v53 = vld [vmem:[%s8015_s0 + $0x9b8] sm:$0xff] }
 0x3a7   : > { %5597 = vmatprep.subr.mxu1 %v352_v60  ;;  %5527 = vmatpush2.msra.mxu0 %v3421_v5  ;;  %v595_v60 = vld [vmem:[%s8015_s0 + $0x9b0] sm:$0xff]  ;;  %v464_v5 = vld [vmem:[%s8015_s0 + $0x598] sm:$0xff] }
 0x3a8   : > { %5528 = vmatprep.mubr.f32.mxu0 %v9950_v4  ;;  %5598 = vmatpush2.msra.mxu1 %v351_v6  ;;  %v463_v6 = vld [vmem:[%s8015_s0 + $0x590] sm:$0xff] }
 0x3a9   : > { %5529 = vmatmul.mubr.f32.vlgmr.msra.gmra.mxu0 %v7544_v44  ;;  %5599 = vmatprep.mubr.f32.mxu1 %v8194_v8  ;;  %v468_v44 = vld [vmem:[%s8015_s0 + $0x5b8] sm:$0xff]  ;;  %v467_v8 = vld [vmem:[%s8015_s0 + $0x5b0] sm:$0xff] }
 0x3aa   : > { %5606 = vmatprep.subr.mxu0 %v476_v14  ;;  %5677 = vmatprep.subr.mxu1 %v604_v20  ;;  %v591_v14 = vld [vmem:[%s8015_s0 + $0x990] sm:$0xff]  ;;  %v460_v20 = vld [vmem:[%s8015_s0 + $0x578] sm:$0xff] }
 0x3ab   : > { %5600 = vmatmul.mubr.f32.vlgmr.msra.gmra.mxu1 %v8179_v62  ;;  %5607 = vmatpush1.msra.mxu0 %v475_v22  ;;  %v592_v62 = vld [vmem:[%s8015_s0 + $0x998] sm:$0xff] }
 0x3ac   : > { %5678 = vmatpush1.msra.mxu1 %v603_v33  ;;  %5608 = vmatprep.subr.mxu0 %v472_v41  ;;  %v588_v22 = vld [vmem:[%s8015_s0 + $0x978] sm:$0xff]  ;;  %v459_v33 = vld [vmem:[%s8015_s0 + $0x570] sm:$0xff] }
 0x3ad   : > { %5679 = vmatprep.subr.mxu1 %v600_v45  ;;  %5609 = vmatpush1.msra.mxu0 %v471_v46  ;;  %v587_v41 = vld [vmem:[%s8015_s0 + $0x970] sm:$0xff]  ;;  %v456_v45 = vld [vmem:[%s8015_s0 + $0x558] sm:$0xff] }
 0x3ae   : > { %5680 = vmatpush1.msra.mxu1 %v599_v51  ;;  %5610 = vmatprep.subr.mxu0 %v468_v44  ;;  %v584_v46 = vld [vmem:[%s8015_s0 + $0x958] sm:$0xff]  ;;  %v455_v51 = vld [vmem:[%s8015_s0 + $0x550] sm:$0xff] }
 0x3af   : > { %5681 = vmatprep.subr.mxu1 %v596_v53  ;;  %5611 = vmatpush1.msra.mxu0 %v467_v8  ;;  %v583_v44 = vld [vmem:[%s8015_s0 + $0x950] sm:$0xff]  ;;  %v452_v53 = vld [vmem:[%s8015_s0 + $0x538] sm:$0xff] }
 0x3b0   : > { %5682 = vmatpush1.msra.mxu1 %v595_v60  ;;  %5612 = vmatprep.subr.mxu0 %v464_v5  ;;  %v580_v8 = vld [vmem:[%s8015_s0 + $0x938] sm:$0xff]  ;;  %v451_v60 = vld [vmem:[%s8015_s0 + $0x530] sm:$0xff] }
 0x3b1   : > { %5683 = vmatprep.subr.mxu1 %v592_v62  ;;  %5613 = vmatpush1.msra.mxu0 %v463_v6  ;;  %v579_v5 = vld [vmem:[%s8015_s0 + $0x930] sm:$0xff]  ;;  %v448_v62 = vld [vmem:[%s8015_s0 + $0x518] sm:$0xff] }
 0x3b2   : > { %5684 = vmatpush1.msra.mxu1 %v591_v14  ;;  %5614 = vmatprep.subr.mxu0 %v460_v20  ;;  %v576_v6 = vld [vmem:[%s8015_s0 + $0x918] sm:$0xff]  ;;  %v447_v14 = vld [vmem:[%s8015_s0 + $0x510] sm:$0xff] }
 0x3b3   : > { %5685 = vmatprep.subr.mxu1 %v588_v22  ;;  %5615 = vmatpush1.msra.mxu0 %v459_v33  ;;  %v575_v20 = vld [vmem:[%s8015_s0 + $0x910] sm:$0xff]  ;;  %v444_v22 = vld [vmem:[%s8015_s0 + $0x4f8] sm:$0xff] }
 0x3b4   : > { %5686 = vmatpush1.msra.mxu1 %v587_v41  ;;  %5616 = vmatprep.subr.mxu0 %v456_v45  ;;  %v572_v33 = vld [vmem:[%s8015_s0 + $0x8f8] sm:$0xff]  ;;  %v443_v41 = vld [vmem:[%s8015_s0 + $0x4f0] sm:$0xff] }
 0x3b5   : > { %5687 = vmatprep.subr.mxu1 %v584_v46  ;;  %5617 = vmatpush1.msra.mxu0 %v455_v51  ;;  %v571_v45 = vld [vmem:[%s8015_s0 + $0x8f0] sm:$0xff]  ;;  %v440_v46 = vld [vmem:[%s8015_s0 + $0x4d8] sm:$0xff] }
 0x3b6   : > { %5688 = vmatpush1.msra.mxu1 %v583_v44  ;;  %5618 = vmatprep.subr.mxu0 %v452_v53  ;;  %v568_v51 = vld [vmem:[%s8015_s0 + $0x8d8] sm:$0xff]  ;;  %v439_v44 = vld [vmem:[%s8015_s0 + $0x4d0] sm:$0xff] }
 0x3b7   : > { %5689 = vmatprep.subr.mxu1 %v580_v8  ;;  %5619 = vmatpush1.msra.mxu0 %v451_v60  ;;  %v567_v53 = vld [vmem:[%s8015_s0 + $0x8d0] sm:$0xff]  ;;  %v436_v8 = vld [vmem:[%s8015_s0 + $0x4b8] sm:$0xff] }
 0x3b8   : > { %5690 = vmatpush1.msra.mxu1 %v579_v5  ;;  %5620 = vmatprep.subr.mxu0 %v448_v62  ;;  %v564_v60 = vld [vmem:[%s8015_s0 + $0x8b8] sm:$0xff]  ;;  %v435_v5 = vld [vmem:[%s8015_s0 + $0x4b0] sm:$0xff] }
 0x3b9   : > { %5691 = vmatprep.subr.mxu1 %v576_v6  ;;  %5621 = vmatpush1.msra.mxu0 %v447_v14  ;;  %v563_v62 = vld [vmem:[%s8015_s0 + $0x8b0] sm:$0xff]  ;;  %v432_v6 = vld [vmem:[%s8015_s0 + $0x498] sm:$0xff] }
 0x3ba   : > { %5692 = vmatpush1.msra.mxu1 %v575_v20  ;;  %5622 = vmatprep.subr.mxu0 %v444_v22  ;;  %v560_v14 = vld [vmem:[%s8015_s0 + $0x898] sm:$0xff]  ;;  %v431_v20 = vld [vmem:[%s8015_s0 + $0x490] sm:$0xff] }
 0x3bb   : > { %5693 = vmatprep.subr.mxu1 %v572_v33  ;;  %5623 = vmatpush1.msra.mxu0 %v443_v41  ;;  %v559_v22 = vld [vmem:[%s8015_s0 + $0x890] sm:$0xff]  ;;  %v428_v33 = vld [vmem:[%s8015_s0 + $0x478] sm:$0xff] }
 0x3bc   : > { %5694 = vmatpush1.msra.mxu1 %v571_v45  ;;  %5624 = vmatprep.subr.mxu0 %v440_v46  ;;  %v556_v41 = vld [vmem:[%s8015_s0 + $0x878] sm:$0xff]  ;;  %v427_v45 = vld [vmem:[%s8015_s0 + $0x470] sm:$0xff] }
 0x3bd   : > { %5695 = vmatprep.subr.mxu1 %v568_v51  ;;  %5625 = vmatpush1.msra.mxu0 %v439_v44  ;;  %v555_v46 = vld [vmem:[%s8015_s0 + $0x870] sm:$0xff]  ;;  %v424_v51 = vld [vmem:[%s8015_s0 + $0x458] sm:$0xff] }
 0x3be   : > { %5696 = vmatpush1.msra.mxu1 %v567_v53  ;;  %5626 = vmatprep.subr.mxu0 %v436_v8  ;;  %v552_v44 = vld [vmem:[%s8015_s0 + $0x858] sm:$0xff]  ;;  %v423_v53 = vld [vmem:[%s8015_s0 + $0x450] sm:$0xff] }
 0x3bf   : > { %5697 = vmatprep.subr.mxu1 %v564_v60  ;;  %5627 = vmatpush1.msra.mxu0 %v435_v5  ;;  %v551_v8 = vld [vmem:[%s8015_s0 + $0x850] sm:$0xff]  ;;  %v420_v60 = vld [vmem:[%s8015_s0 + $0x438] sm:$0xff] }
 0x3c0   : > { %5698 = vmatpush1.msra.mxu1 %v563_v62  ;;  %5628 = vmatprep.subr.mxu0 %v432_v6  ;;  %v548_v5 = vld [vmem:[%s8015_s0 + $0x838] sm:$0xff]  ;;  %v419_v62 = vld [vmem:[%s8015_s0 + $0x430] sm:$0xff] }
 0x3c1   : > { %5699 = vmatprep.subr.mxu1 %v560_v14  ;;  %5629 = vmatpush1.msra.mxu0 %v431_v20  ;;  %v547_v6 = vld [vmem:[%s8015_s0 + $0x830] sm:$0xff]  ;;  %v416_v14 = vld [vmem:[%s8015_s0 + $0x418] sm:$0xff] }
 0x3c2   : > { %5700 = vmatpush1.msra.mxu1 %v559_v22  ;;  %5630 = vmatprep.subr.mxu0 %v428_v33  ;;  %v544_v20 = vld [vmem:[%s8015_s0 + $0x818] sm:$0xff]  ;;  %v415_v22 = vld [vmem:[%s8015_s0 + $0x410] sm:$0xff] }
 0x3c3   : > { %5701 = vmatprep.subr.mxu1 %v556_v41  ;;  %5631 = vmatpush1.msra.mxu0 %v427_v45  ;;  %v543_v33 = vld [vmem:[%s8015_s0 + $0x810] sm:$0xff]  ;;  %v540_v41 = vld [vmem:[%s8015_s0 + $0x7f8] sm:$0xff] }
 0x3c4   : > { %5702 = vmatpush1.msra.mxu1 %v555_v46  ;;  %5632 = vmatprep.subr.mxu0 %v424_v51  ;;  %v668_v45 = vld [vmem:[%s8015_s0 + $0xbf8] sm:$0xff]  ;;  %v539_v46 = vld [vmem:[%s8015_s0 + $0x7f0] sm:$0xff] }
 0x3c5   : > { %5703 = vmatprep.subr.mxu1 %v552_v44  ;;  %5633 = vmatpush1.msra.mxu0 %v423_v53  ;;  %v667_v51 = vld [vmem:[%s8015_s0 + $0xbf0] sm:$0xff]  ;;  %v536_v44 = vld [vmem:[%s8015_s0 + $0x7d8] sm:$0xff] }
 0x3c6   : > { %5704 = vmatpush1.msra.mxu1 %v551_v8  ;;  %5634 = vmatprep.subr.mxu0 %v420_v60  ;;  %v664_v53 = vld [vmem:[%s8015_s0 + $0xbd8] sm:$0xff]  ;;  %v535_v8 = vld [vmem:[%s8015_s0 + $0x7d0] sm:$0xff] }
 0x3c7   : > { %5705 = vmatprep.subr.mxu1 %v548_v5  ;;  %5635 = vmatpush1.msra.mxu0 %v419_v62  ;;  %v663_v60 = vld [vmem:[%s8015_s0 + $0xbd0] sm:$0xff]  ;;  %v532_v5 = vld [vmem:[%s8015_s0 + $0x7b8] sm:$0xff] }
 0x3c8   : > { %5706 = vmatpush1.msra.mxu1 %v547_v6  ;;  %5636 = vmatprep.subr.mxu0 %v416_v14  ;;  %v660_v62 = vld [vmem:[%s8015_s0 + $0xbb8] sm:$0xff]  ;;  %v531_v6 = vld [vmem:[%s8015_s0 + $0x7b0] sm:$0xff] }
 0x3c9   : > { %5707 = vmatprep.subr.mxu1 %v544_v20  ;;  %5637 = vmatpush1.msra.mxu0 %v415_v22  ;;  %v659_v14 = vld [vmem:[%s8015_s0 + $0xbb0] sm:$0xff]  ;;  %v528_v20 = vld [vmem:[%s8015_s0 + $0x798] sm:$0xff] }
 0x3ca   : > { %5708 = vmatpush1.msra.mxu1 %v543_v33  ;;  %5638 = vmatprep.subr.mxu0 %v540_v41  ;;  %v656_v22 = vld [vmem:[%s8015_s0 + $0xb98] sm:$0xff]  ;;  %v527_v33 = vld [vmem:[%s8015_s0 + $0x790] sm:$0xff] }
 0x3cb   : > { %5709 = vmatprep.subr.mxu1 %v668_v45  ;;  %5639 = vmatpush2.msra.mxu0 %v539_v46  ;;  %v655_v41 = vld [vmem:[%s8015_s0 + $0xb90] sm:$0xff]  ;;  %v524_v45 = vld [vmem:[%s8015_s0 + $0x778] sm:$0xff] }
 0x3cc   : > { %5710 = vmatpush2.msra.mxu1 %v667_v51  ;;  %5640 = vmatprep.subr.mxu0 %v536_v44  ;;  %v652_v46 = vld [vmem:[%s8015_s0 + $0xb78] sm:$0xff]  ;;  %v523_v51 = vld [vmem:[%s8015_s0 + $0x770] sm:$0xff] }
 0x3cd   : > { %5711 = vmatprep.subr.mxu1 %v664_v53  ;;  %5641 = vmatpush2.msra.mxu0 %v535_v8  ;;  %v651_v44 = vld [vmem:[%s8015_s0 + $0xb70] sm:$0xff]  ;;  %v520_v53 = vld [vmem:[%s8015_s0 + $0x758] sm:$0xff] }
 0x3ce   : > { %5712 = vmatpush2.msra.mxu1 %v663_v60  ;;  %5642 = vmatprep.subr.mxu0 %v532_v5  ;;  %v648_v8 = vld [vmem:[%s8015_s0 + $0xb58] sm:$0xff]  ;;  %v519_v60 = vld [vmem:[%s8015_s0 + $0x750] sm:$0xff] }
 0x3cf   : > { %5713 = vmatprep.subr.mxu1 %v660_v62  ;;  %5643 = vmatpush2.msra.mxu0 %v531_v6  ;;  %v647_v5 = vld [vmem:[%s8015_s0 + $0xb50] sm:$0xff]  ;;  %v516_v62 = vld [vmem:[%s8015_s0 + $0x738] sm:$0xff] }
 0x3d0   : > { %5714 = vmatpush2.msra.mxu1 %v659_v14  ;;  %5644 = vmatprep.subr.mxu0 %v528_v20  ;;  %v644_v6 = vld [vmem:[%s8015_s0 + $0xb38] sm:$0xff]  ;;  %v515_v14 = vld [vmem:[%s8015_s0 + $0x730] sm:$0xff] }
 0x3d1   : > { %5715 = vmatprep.subr.mxu1 %v656_v22  ;;  %5645 = vmatpush2.msra.mxu0 %v527_v33  ;;  %v643_v20 = vld [vmem:[%s8015_s0 + $0xb30] sm:$0xff]  ;;  %v512_v22 = vld [vmem:[%s8015_s0 + $0x718] sm:$0xff] }
 0x3d2   : > { %5716 = vmatpush2.msra.mxu1 %v655_v41  ;;  %5646 = vmatprep.subr.mxu0 %v524_v45  ;;  %v640_v33 = vld [vmem:[%s8015_s0 + $0xb18] sm:$0xff]  ;;  %v511_v41 = vld [vmem:[%s8015_s0 + $0x710] sm:$0xff] }
 0x3d3   : > { %5717 = vmatprep.subr.mxu1 %v652_v46  ;;  %5647 = vmatpush2.msra.mxu0 %v523_v51  ;;  %v639_v45 = vld [vmem:[%s8015_s0 + $0xb10] sm:$0xff]  ;;  %v508_v46 = vld [vmem:[%s8015_s0 + $0x6f8] sm:$0xff] }
 0x3d4   : > { %5718 = vmatpush2.msra.mxu1 %v651_v44  ;;  %5648 = vmatprep.subr.mxu0 %v520_v53  ;;  %v636_v51 = vld [vmem:[%s8015_s0 + $0xaf8] sm:$0xff]  ;;  %v507_v44 = vld [vmem:[%s8015_s0 + $0x6f0] sm:$0xff] }
 0x3d5   : > { %5719 = vmatprep.subr.mxu1 %v648_v8  ;;  %5649 = vmatpush2.msra.mxu0 %v519_v60  ;;  %v635_v53 = vld [vmem:[%s8015_s0 + $0xaf0] sm:$0xff]  ;;  %v504_v8 = vld [vmem:[%s8015_s0 + $0x6d8] sm:$0xff] }
 0x3d6   : > { %5720 = vmatpush2.msra.mxu1 %v647_v5  ;;  %5650 = vmatprep.subr.mxu0 %v516_v62  ;;  %v632_v60 = vld [vmem:[%s8015_s0 + $0xad8] sm:$0xff]  ;;  %v503_v5 = vld [vmem:[%s8015_s0 + $0x6d0] sm:$0xff] }
 0x3d7   : > { %5721 = vmatprep.subr.mxu1 %v644_v6  ;;  %5651 = vmatpush2.msra.mxu0 %v515_v14  ;;  %v631_v62 = vld [vmem:[%s8015_s0 + $0xad0] sm:$0xff]  ;;  %v500_v6 = vld [vmem:[%s8015_s0 + $0x6b8] sm:$0xff] }
 0x3d8   : > { %5722 = vmatpush2.msra.mxu1 %v643_v20  ;;  %5652 = vmatprep.subr.mxu0 %v512_v22  ;;  %v628_v14 = vld [vmem:[%s8015_s0 + $0xab8] sm:$0xff]  ;;  %v499_v20 = vld [vmem:[%s8015_s0 + $0x6b0] sm:$0xff] }
 0x3d9   : > { %5723 = vmatprep.subr.mxu1 %v640_v33  ;;  %5653 = vmatpush2.msra.mxu0 %v511_v41  ;;  %v627_v22 = vld [vmem:[%s8015_s0 + $0xab0] sm:$0xff]  ;;  %v496_v33 = vld [vmem:[%s8015_s0 + $0x698] sm:$0xff] }
 0x3da   : > { %5724 = vmatpush2.msra.mxu1 %v639_v45  ;;  %5654 = vmatprep.subr.mxu0 %v508_v46  ;;  %v624_v41 = vld [vmem:[%s8015_s0 + $0xa98] sm:$0xff]  ;;  %v495_v45 = vld [vmem:[%s8015_s0 + $0x690] sm:$0xff] }
 0x3db   : > { %5725 = vmatprep.subr.mxu1 %v636_v51  ;;  %5655 = vmatpush2.msra.mxu0 %v507_v44  ;;  %v623_v46 = vld [vmem:[%s8015_s0 + $0xa90] sm:$0xff]  ;;  %v492_v51 = vld [vmem:[%s8015_s0 + $0x678] sm:$0xff] }
 0x3dc   : > { %5726 = vmatpush2.msra.mxu1 %v635_v53  ;;  %5656 = vmatprep.subr.mxu0 %v504_v8  ;;  %v620_v44 = vld [vmem:[%s8015_s0 + $0xa78] sm:$0xff]  ;;  %v491_v53 = vld [vmem:[%s8015_s0 + $0x670] sm:$0xff] }
 0x3dd   : > { %5727 = vmatprep.subr.mxu1 %v632_v60  ;;  %5657 = vmatpush2.msra.mxu0 %v503_v5  ;;  %v619_v8 = vld [vmem:[%s8015_s0 + $0xa70] sm:$0xff]  ;;  %v488_v60 = vld [vmem:[%s8015_s0 + $0x658] sm:$0xff] }
 0x3de   : > { %5728 = vmatpush2.msra.mxu1 %v631_v62  ;;  %5658 = vmatprep.subr.mxu0 %v500_v6  ;;  %v616_v5 = vld [vmem:[%s8015_s0 + $0xa58] sm:$0xff]  ;;  %v487_v62 = vld [vmem:[%s8015_s0 + $0x650] sm:$0xff] }
 0x3df   : > { %5729 = vmatprep.subr.mxu1 %v628_v14  ;;  %5659 = vmatpush2.msra.mxu0 %v499_v20  ;;  %v615_v6 = vld [vmem:[%s8015_s0 + $0xa50] sm:$0xff]  ;;  %v484_v14 = vld [vmem:[%s8015_s0 + $0x638] sm:$0xff] }
 0x3e0   : > { %5730 = vmatpush2.msra.mxu1 %v627_v22  ;;  %5660 = vmatprep.subr.mxu0 %v496_v33  ;;  %v612_v20 = vld [vmem:[%s8015_s0 + $0xa38] sm:$0xff]  ;;  %v483_v22 = vld [vmem:[%s8015_s0 + $0x630] sm:$0xff] }
 0x3e1   : > { %5731 = vmatprep.subr.mxu1 %v624_v41  ;;  %5661 = vmatpush2.msra.mxu0 %v495_v45  ;;  %v611_v33 = vld [vmem:[%s8015_s0 + $0xa30] sm:$0xff]  ;;  %v480_v41 = vld [vmem:[%s8015_s0 + $0x618] sm:$0xff] }
 0x3e2   : > { %5732 = vmatpush2.msra.mxu1 %v623_v46  ;;  %5662 = vmatprep.subr.mxu0 %v492_v51  ;;  %v608_v45 = vld [vmem:[%s8015_s0 + $0xa18] sm:$0xff]  ;;  %v479_v46 = vld [vmem:[%s8015_s0 + $0x610] sm:$0xff] }
 0x3e3   : > { %5733 = vmatprep.subr.mxu1 %v620_v44  ;;  %5663 = vmatpush2.msra.mxu0 %v491_v53  ;;  %v607_v51 = vld [vmem:[%s8015_s0 + $0xa10] sm:$0xff]  ;;  %v732_v44 = vld [vmem:[%s8015_s0 + $0xdf8] sm:$0xff] }
 0x3e4   : > { %5734 = vmatpush2.msra.mxu1 %v619_v8  ;;  %5664 = vmatprep.subr.mxu0 %v488_v60  ;;  %v860_v53 = vld [vmem:[%s8015_s0 + $0x11f8] sm:$0xff]  ;;  %v731_v8 = vld [vmem:[%s8015_s0 + $0xdf0] sm:$0xff] }
 0x3e5   : > { %5735 = vmatprep.subr.mxu1 %v616_v5  ;;  %5665 = vmatpush2.msra.mxu0 %v487_v62  ;;  %v859_v60 = vld [vmem:[%s8015_s0 + $0x11f0] sm:$0xff]  ;;  %v728_v5 = vld [vmem:[%s8015_s0 + $0xdd8] sm:$0xff] }
 0x3e6   : > { %5736 = vmatpush2.msra.mxu1 %v615_v6  ;;  %5666 = vmatprep.subr.mxu0 %v484_v14  ;;  %v856_v62 = vld [vmem:[%s8015_s0 + $0x11d8] sm:$0xff]  ;;  %v855_v6 = vld [vmem:[%s8015_s0 + $0x11d0] sm:$0xff] }
 0x3e7   : > { %5737 = vmatprep.subr.mxu1 %v612_v20  ;;  %5667 = vmatpush2.msra.mxu0 %v483_v22  ;;  %v852_v14 = vld [vmem:[%s8015_s0 + $0x11b8] sm:$0xff]  ;;  %v851_v20 = vld [vmem:[%s8015_s0 + $0x11b0] sm:$0xff] }
 0x3e8   : > { %5738 = vmatpush2.msra.mxu1 %v611_v33  ;;  %5668 = vmatprep.subr.mxu0 %v480_v41  ;;  %v720_v22 = vld [vmem:[%s8015_s0 + $0xd98] sm:$0xff]  ;;  %v719_v33 = vld [vmem:[%s8015_s0 + $0xd90] sm:$0xff] }
 0x3e9   : > { %5739 = vmatprep.subr.mxu1 %v608_v45  ;;  %5669 = vmatpush2.msra.mxu0 %v479_v46  ;;  %v847_v41 = vld [vmem:[%s8015_s0 + $0x1190] sm:$0xff]  ;;  %v716_v45 = vld [vmem:[%s8015_s0 + $0xd78] sm:$0xff] }
 0x3ea   : > { %5670 = vmatprep.mubr.f32.mxu0 %v8199_v10  ;;  %5740 = vmatpush2.msra.mxu1 %v607_v51  ;;  %v727_v10 = vld [vmem:[%s8015_s0 + $0xdd0] sm:$0xff]  ;;  %v844_v46 = vld [vmem:[%s8015_s0 + $0x1178] sm:$0xff] }
 0x3eb   : > { %5671 = vmatmul.mubr.f32.vlgmr.msra.gmra.mxu0 %v8184_v1  ;;  %5741 = vmatprep.mubr.f32.mxu1 %v8341_v26  ;;  %v724_v1 = vld [vmem:[%s8015_s0 + $0xdb8] sm:$0xff]  ;;  %v723_v26 = vld [vmem:[%s8015_s0 + $0xdb0] sm:$0xff] }
 0x3ec   : > { %5748 = vmatprep.subr.mxu0 %v732_v44  ;;  %5819 = vmatprep.subr.mxu1 %v860_v53  ;;  %v715_v51 = vld [vmem:[%s8015_s0 + $0xd70] sm:$0xff]  ;;  %v712_v53 = vld [vmem:[%s8015_s0 + $0xd58] sm:$0xff] }
 0x3ed   : > { %5742 = vmatmul.mubr.f32.vlgmr.msra.gmra.mxu1 %v8326_v16  ;;  %5749 = vmatpush1.msra.mxu0 %v731_v8  ;;  %v848_v16 = vld [vmem:[%s8015_s0 + $0x1198] sm:$0xff]  ;;  %v843_v44 = vld [vmem:[%s8015_s0 + $0x1170] sm:$0xff] }
 0x3ee   : > { %5820 = vmatpush1.msra.mxu1 %v859_v60  ;;  %5750 = vmatprep.subr.mxu0 %v728_v5  ;;  %v840_v8 = vld [vmem:[%s8015_s0 + $0x1158] sm:$0xff]  ;;  %v711_v60 = vld [vmem:[%s8015_s0 + $0xd50] sm:$0xff] }
 0x3ef   : > { %5821 = vmatprep.subr.mxu1 %v856_v62  ;;  %5751 = vmatpush1.msra.mxu0 %v727_v10  ;;  %v839_v5 = vld [vmem:[%s8015_s0 + $0x1150] sm:$0xff]  ;;  %v708_v62 = vld [vmem:[%s8015_s0 + $0xd38] sm:$0xff] }
 0x3f0   : > { %5822 = vmatpush1.msra.mxu1 %v855_v6  ;;  %5752 = vmatprep.subr.mxu0 %v724_v1  ;;  %v836_v10 = vld [vmem:[%s8015_s0 + $0x1138] sm:$0xff]  ;;  %v707_v6 = vld [vmem:[%s8015_s0 + $0xd30] sm:$0xff] }
 0x3f1   : > { %5823 = vmatprep.subr.mxu1 %v852_v14  ;;  %5753 = vmatpush1.msra.mxu0 %v723_v26  ;;  %v835_v1 = vld [vmem:[%s8015_s0 + $0x1130] sm:$0xff]  ;;  %v704_v14 = vld [vmem:[%s8015_s0 + $0xd18] sm:$0xff] }
 0x3f2   : > { %5824 = vmatpush1.msra.mxu1 %v851_v20  ;;  %5754 = vmatprep.subr.mxu0 %v720_v22  ;;  %v832_v26 = vld [vmem:[%s8015_s0 + $0x1118] sm:$0xff]  ;;  %v703_v20 = vld [vmem:[%s8015_s0 + $0xd10] sm:$0xff] }
 0x3f3   : > { %5825 = vmatprep.subr.mxu1 %v848_v16  ;;  %5755 = vmatpush1.msra.mxu0 %v719_v33  ;;  %v831_v22 = vld [vmem:[%s8015_s0 + $0x1110] sm:$0xff]  ;;  %v700_v16 = vld [vmem:[%s8015_s0 + $0xcf8] sm:$0xff] }
 0x3f4   : > { %5826 = vmatpush1.msra.mxu1 %v847_v41  ;;  %5756 = vmatprep.subr.mxu0 %v716_v45  ;;  %v828_v33 = vld [vmem:[%s8015_s0 + $0x10f8] sm:$0xff]  ;;  %v699_v41 = vld [vmem:[%s8015_s0 + $0xcf0] sm:$0xff] }
 0x3f5   : > { %5827 = vmatprep.subr.mxu1 %v844_v46  ;;  %5757 = vmatpush1.msra.mxu0 %v715_v51  ;;  %v827_v45 = vld [vmem:[%s8015_s0 + $0x10f0] sm:$0xff]  ;;  %v696_v46 = vld [vmem:[%s8015_s0 + $0xcd8] sm:$0xff] }
 0x3f6   : > { %5828 = vmatpush1.msra.mxu1 %v843_v44  ;;  %5758 = vmatprep.subr.mxu0 %v712_v53  ;;  %v824_v51 = vld [vmem:[%s8015_s0 + $0x10d8] sm:$0xff]  ;;  %v695_v44 = vld [vmem:[%s8015_s0 + $0xcd0] sm:$0xff] }
 0x3f7   : > { %5829 = vmatprep.subr.mxu1 %v840_v8  ;;  %5759 = vmatpush1.msra.mxu0 %v711_v60  ;;  %v823_v53 = vld [vmem:[%s8015_s0 + $0x10d0] sm:$0xff]  ;;  %v692_v8 = vld [vmem:[%s8015_s0 + $0xcb8] sm:$0xff] }
 0x3f8   : > { %5830 = vmatpush1.msra.mxu1 %v839_v5  ;;  %5760 = vmatprep.subr.mxu0 %v708_v62  ;;  %v820_v60 = vld [vmem:[%s8015_s0 + $0x10b8] sm:$0xff]  ;;  %v691_v5 = vld [vmem:[%s8015_s0 + $0xcb0] sm:$0xff] }
 0x3f9   : > { %5831 = vmatprep.subr.mxu1 %v836_v10  ;;  %5761 = vmatpush1.msra.mxu0 %v707_v6  ;;  %v819_v62 = vld [vmem:[%s8015_s0 + $0x10b0] sm:$0xff]  ;;  %v688_v10 = vld [vmem:[%s8015_s0 + $0xc98] sm:$0xff] }
 0x3fa   : > { %5832 = vmatpush1.msra.mxu1 %v835_v1  ;;  %5762 = vmatprep.subr.mxu0 %v704_v14  ;;  %v816_v6 = vld [vmem:[%s8015_s0 + $0x1098] sm:$0xff]  ;;  %v687_v1 = vld [vmem:[%s8015_s0 + $0xc90] sm:$0xff] }
 0x3fb   : > { %5833 = vmatprep.subr.mxu1 %v832_v26  ;;  %5763 = vmatpush1.msra.mxu0 %v703_v20  ;;  %v815_v14 = vld [vmem:[%s8015_s0 + $0x1090] sm:$0xff]  ;;  %v684_v26 = vld [vmem:[%s8015_s0 + $0xc78] sm:$0xff] }
 0x3fc   : > { %5834 = vmatpush1.msra.mxu1 %v831_v22  ;;  %5764 = vmatprep.subr.mxu0 %v700_v16  ;;  %v812_v20 = vld [vmem:[%s8015_s0 + $0x1078] sm:$0xff]  ;;  %v683_v22 = vld [vmem:[%s8015_s0 + $0xc70] sm:$0xff] }
 0x3fd   : > { %5835 = vmatprep.subr.mxu1 %v828_v33  ;;  %5765 = vmatpush1.msra.mxu0 %v699_v41  ;;  %v811_v16 = vld [vmem:[%s8015_s0 + $0x1070] sm:$0xff]  ;;  %v680_v33 = vld [vmem:[%s8015_s0 + $0xc58] sm:$0xff] }
 0x3fe   : > { %5836 = vmatpush1.msra.mxu1 %v827_v45  ;;  %5766 = vmatprep.subr.mxu0 %v696_v46  ;;  %v808_v41 = vld [vmem:[%s8015_s0 + $0x1058] sm:$0xff]  ;;  %v679_v45 = vld [vmem:[%s8015_s0 + $0xc50] sm:$0xff] }
 0x3ff   : > { %5837 = vmatprep.subr.mxu1 %v824_v51  ;;  %5767 = vmatpush1.msra.mxu0 %v695_v44  ;;  %v807_v46 = vld [vmem:[%s8015_s0 + $0x1050] sm:$0xff]  ;;  %v676_v51 = vld [vmem:[%s8015_s0 + $0xc38] sm:$0xff] }
 0x400   : > { %5838 = vmatpush1.msra.mxu1 %v823_v53  ;;  %5768 = vmatprep.subr.mxu0 %v692_v8  ;;  %v804_v44 = vld [vmem:[%s8015_s0 + $0x1038] sm:$0xff]  ;;  %v675_v53 = vld [vmem:[%s8015_s0 + $0xc30] sm:$0xff] }
 0x401   : > { %5839 = vmatprep.subr.mxu1 %v820_v60  ;;  %5769 = vmatpush1.msra.mxu0 %v691_v5  ;;  %v803_v8 = vld [vmem:[%s8015_s0 + $0x1030] sm:$0xff]  ;;  %v672_v60 = vld [vmem:[%s8015_s0 + $0xc18] sm:$0xff] }
 0x402   : > { %5840 = vmatpush1.msra.mxu1 %v819_v62  ;;  %5770 = vmatprep.subr.mxu0 %v688_v10  ;;  %v800_v5 = vld [vmem:[%s8015_s0 + $0x1018] sm:$0xff]  ;;  %v671_v62 = vld [vmem:[%s8015_s0 + $0xc10] sm:$0xff] }
 0x403   : > { %5841 = vmatprep.subr.mxu1 %v816_v6  ;;  %5771 = vmatpush1.msra.mxu0 %v687_v1  ;;  %v799_v10 = vld [vmem:[%s8015_s0 + $0x1010] sm:$0xff]  ;;  %v796_v6 = vld [vmem:[%s8015_s0 + $0xff8] sm:$0xff] }
 0x404   : > { %5842 = vmatpush1.msra.mxu1 %v815_v14  ;;  %5772 = vmatprep.subr.mxu0 %v684_v26  ;;  %v924_v1 = vld [vmem:[%s8015_s0 + $0x13f8] sm:$0xff]  ;;  %v795_v14 = vld [vmem:[%s8015_s0 + $0xff0] sm:$0xff] }
 0x405   : > { %5843 = vmatprep.subr.mxu1 %v812_v20  ;;  %5773 = vmatpush1.msra.mxu0 %v683_v22  ;;  %v923_v26 = vld [vmem:[%s8015_s0 + $0x13f0] sm:$0xff]  ;;  %v792_v20 = vld [vmem:[%s8015_s0 + $0xfd8] sm:$0xff] }
 0x406   : > { %5844 = vmatpush1.msra.mxu1 %v811_v16  ;;  %5774 = vmatprep.subr.mxu0 %v680_v33  ;;  %v920_v22 = vld [vmem:[%s8015_s0 + $0x13d8] sm:$0xff]  ;;  %v791_v16 = vld [vmem:[%s8015_s0 + $0xfd0] sm:$0xff] }
 0x407   : > { %5845 = vmatprep.subr.mxu1 %v808_v41  ;;  %5775 = vmatpush1.msra.mxu0 %v679_v45  ;;  %v919_v33 = vld [vmem:[%s8015_s0 + $0x13d0] sm:$0xff]  ;;  %v788_v41 = vld [vmem:[%s8015_s0 + $0xfb8] sm:$0xff] }
 0x408   : > { %5846 = vmatpush1.msra.mxu1 %v807_v46  ;;  %5776 = vmatprep.subr.mxu0 %v676_v51  ;;  %v916_v45 = vld [vmem:[%s8015_s0 + $0x13b8] sm:$0xff]  ;;  %v787_v46 = vld [vmem:[%s8015_s0 + $0xfb0] sm:$0xff] }
 0x409   : > { %5847 = vmatprep.subr.mxu1 %v804_v44  ;;  %5777 = vmatpush1.msra.mxu0 %v675_v53  ;;  %v915_v51 = vld [vmem:[%s8015_s0 + $0x13b0] sm:$0xff]  ;;  %v784_v44 = vld [vmem:[%s8015_s0 + $0xf98] sm:$0xff] }
 0x40a   : > { %5848 = vmatpush1.msra.mxu1 %v803_v8  ;;  %5778 = vmatprep.subr.mxu0 %v672_v60  ;;  %v912_v53 = vld [vmem:[%s8015_s0 + $0x1398] sm:$0xff]  ;;  %v783_v8 = vld [vmem:[%s8015_s0 + $0xf90] sm:$0xff] }
 0x40b   : > { %5849 = vmatprep.subr.mxu1 %v800_v5  ;;  %5779 = vmatpush1.msra.mxu0 %v671_v62  ;;  %v911_v60 = vld [vmem:[%s8015_s0 + $0x1390] sm:$0xff]  ;;  %v780_v5 = vld [vmem:[%s8015_s0 + $0xf78] sm:$0xff] }
 0x40c   : > { %5850 = vmatpush1.msra.mxu1 %v799_v10  ;;  %5780 = vmatprep.subr.mxu0 %v796_v6  ;;  %v908_v62 = vld [vmem:[%s8015_s0 + $0x1378] sm:$0xff]  ;;  %v779_v10 = vld [vmem:[%s8015_s0 + $0xf70] sm:$0xff] }
 0x40d   : > { %5851 = vmatprep.subr.mxu1 %v924_v1  ;;  %5781 = vmatpush2.msra.mxu0 %v795_v14  ;;  %v907_v6 = vld [vmem:[%s8015_s0 + $0x1370] sm:$0xff]  ;;  %v776_v1 = vld [vmem:[%s8015_s0 + $0xf58] sm:$0xff] }
 0x40e   : > { %5852 = vmatpush2.msra.mxu1 %v923_v26  ;;  %5782 = vmatprep.subr.mxu0 %v792_v20  ;;  %v904_v14 = vld [vmem:[%s8015_s0 + $0x1358] sm:$0xff]  ;;  %v775_v26 = vld [vmem:[%s8015_s0 + $0xf50] sm:$0xff] }
 0x40f   : > { %5853 = vmatprep.subr.mxu1 %v920_v22  ;;  %5783 = vmatpush2.msra.mxu0 %v791_v16  ;;  %v903_v20 = vld [vmem:[%s8015_s0 + $0x1350] sm:$0xff]  ;;  %v772_v22 = vld [vmem:[%s8015_s0 + $0xf38] sm:$0xff] }
 0x410   : > { %5854 = vmatpush2.msra.mxu1 %v919_v33  ;;  %5784 = vmatprep.subr.mxu0 %v788_v41  ;;  %v900_v16 = vld [vmem:[%s8015_s0 + $0x1338] sm:$0xff]  ;;  %v771_v33 = vld [vmem:[%s8015_s0 + $0xf30] sm:$0xff] }
 0x411   : > { %5855 = vmatprep.subr.mxu1 %v916_v45  ;;  %5785 = vmatpush2.msra.mxu0 %v787_v46  ;;  %v899_v41 = vld [vmem:[%s8015_s0 + $0x1330] sm:$0xff]  ;;  %v768_v45 = vld [vmem:[%s8015_s0 + $0xf18] sm:$0xff] }
 0x412   : > { %5856 = vmatpush2.msra.mxu1 %v915_v51  ;;  %5786 = vmatprep.subr.mxu0 %v784_v44  ;;  %v896_v46 = vld [vmem:[%s8015_s0 + $0x1318] sm:$0xff]  ;;  %v767_v51 = vld [vmem:[%s8015_s0 + $0xf10] sm:$0xff] }
 0x413   : > { %5857 = vmatprep.subr.mxu1 %v912_v53  ;;  %5787 = vmatpush2.msra.mxu0 %v783_v8  ;;  %v895_v44 = vld [vmem:[%s8015_s0 + $0x1310] sm:$0xff]  ;;  %v764_v53 = vld [vmem:[%s8015_s0 + $0xef8] sm:$0xff] }
 0x414   : > { %5858 = vmatpush2.msra.mxu1 %v911_v60  ;;  %5788 = vmatprep.subr.mxu0 %v780_v5  ;;  %v892_v8 = vld [vmem:[%s8015_s0 + $0x12f8] sm:$0xff]  ;;  %v763_v60 = vld [vmem:[%s8015_s0 + $0xef0] sm:$0xff] }
 0x415   : > { %5859 = vmatprep.subr.mxu1 %v908_v62  ;;  %5789 = vmatpush2.msra.mxu0 %v779_v10  ;;  %v891_v5 = vld [vmem:[%s8015_s0 + $0x12f0] sm:$0xff]  ;;  %v760_v62 = vld [vmem:[%s8015_s0 + $0xed8] sm:$0xff] }
 0x416   : > { %5860 = vmatpush2.msra.mxu1 %v907_v6  ;;  %5790 = vmatprep.subr.mxu0 %v776_v1  ;;  %v888_v10 = vld [vmem:[%s8015_s0 + $0x12d8] sm:$0xff]  ;;  %v3826_v6 = vpop.f32.mrf.mxu0  ;;  %v759_v1 = vld [vmem:[%s8015_s0 + $0xed0] sm:$0xff] }
 0x417   : > { %5861 = vmatprep.subr.mxu1 %v904_v14  ;;  %5791 = vmatpush2.msra.mxu0 %v775_v26  ;;  %v887_v14 = vld [vmem:[%s8015_s0 + $0x12d0] sm:$0xff]  ;;  %v756_v26 = vld [vmem:[%s8015_s0 + $0xeb8] sm:$0xff] }
 0x418   : > { %5862 = vmatpush2.msra.mxu1 %v903_v20  ;;  %5792 = vmatprep.subr.mxu0 %v772_v22  ;;  %v884_v20 = vld [vmem:[%s8015_s0 + $0x12b8] sm:$0xff]  ;;  %v755_v22 = vld [vmem:[%s8015_s0 + $0xeb0] sm:$0xff] }
 0x419   : > { %5863 = vmatprep.subr.mxu1 %v900_v16  ;;  %5793 = vmatpush2.msra.mxu0 %v771_v33  ;;  %v883_v16 = vld [vmem:[%s8015_s0 + $0x12b0] sm:$0xff]  ;;  %v752_v33 = vld [vmem:[%s8015_s0 + $0xe98] sm:$0xff] }
 0x41a   : > { %5864 = vmatpush2.msra.mxu1 %v899_v41  ;;  %5794 = vmatprep.subr.mxu0 %v768_v45  ;;  %v880_v41 = vld [vmem:[%s8015_s0 + $0x1298] sm:$0xff]  ;;  %v3897_v45 = vpop.f32.mrf.mxu1 }
 0x41b   : > { %5865 = vmatprep.subr.mxu1 %v896_v46  ;;  %5795 = vmatpush2.msra.mxu0 %v767_v51  ;;  %v3828_v46 = vpop.f32.mrf.mxu0  ;;  %v751_v51 = vld [vmem:[%s8015_s0 + $0xe90] sm:$0xff] }
 0x41c   : > { %5866 = vmatpush2.msra.mxu1 %v895_v44  ;;  %5796 = vmatprep.subr.mxu0 %v764_v53  ;;  %v879_v44 = vld [vmem:[%s8015_s0 + $0x1290] sm:$0xff]  ;;  %v748_v53 = vld [vmem:[%s8015_s0 + $0xe78] sm:$0xff] }
 0x41d   : > { %5867 = vmatprep.subr.mxu1 %v892_v8  ;;  %5797 = vmatpush2.msra.mxu0 %v763_v60  ;;  %v876_v8 = vld [vmem:[%s8015_s0 + $0x1278] sm:$0xff]  ;;  %v3968_v60 = vpop.f32.mrf.mxu0 }
 0x41e   : > { %5868 = vmatpush2.msra.mxu1 %v891_v5  ;;  %5798 = vmatprep.subr.mxu0 %v760_v62  ;;  %v747_v5 = vld [vmem:[%s8015_s0 + $0xe70] sm:$0xff] }
 0x41f   : > { %5869 = vmatprep.subr.mxu1 %v888_v10  ;;  %5799 = vmatpush2.msra.mxu0 %v759_v1  ;;  %v875_v62 = vld [vmem:[%s8015_s0 + $0x1270] sm:$0xff]  ;;  %v744_v10 = vld [vmem:[%s8015_s0 + $0xe58] sm:$0xff] }
 0x420   : > { %5870 = vmatpush2.msra.mxu1 %v887_v14  ;;  %5800 = vmatprep.subr.mxu0 %v756_v26  ;;  %v872_v1 = vld [vmem:[%s8015_s0 + $0x1258] sm:$0xff]  ;;  %v3899_v14 = vpop.f32.mrf.mxu1  ;;  %v743_v26 = vld [vmem:[%s8015_s0 + $0xe50] sm:$0xff] }
 0x421   : > { %5871 = vmatprep.subr.mxu1 %v884_v20  ;;  %5801 = vmatpush2.msra.mxu0 %v755_v22  ;;  %v871_v20 = vld [vmem:[%s8015_s0 + $0x1250] sm:$0xff]  ;;  %v3898_v22 = vadd.f32 %v3897_v45, %v3826_v6  ;;  %v3900_v52 = vadd.f32 %v3899_v14, %v3828_v46  ;;  %v864_v6 = vld [vmem:[%s8015_s0 + $0x1218] sm:$0xff] }
 0x422   : > { %5872 = vmatpush2.msra.mxu1 %v883_v16  ;;  %5802 = vmatprep.subr.mxu0 %v752_v33  ;;  %v740_v16 = vld [vmem:[%s8015_s0 + $0xe38] sm:$0xff] }
 0x423   : > { %5873 = vmatprep.subr.mxu1 %v880_v41  ;;  %5803 = vmatpush2.msra.mxu0 %v751_v51  ;;  %v868_v33 = vld [vmem:[%s8015_s0 + $0x1238] sm:$0xff]  ;;  %v4039_v41 = vpop.f32.mrf.mxu1  ;;  %v3970_v51 = vpop.f32.mrf.mxu0 }
 0x424   : > { %5874 = vmatpush2.msra.mxu1 %v879_v44  ;;  %5804 = vmatprep.subr.mxu0 %v748_v53  ;;  %v739_v44 = vld [vmem:[%s8015_s0 + $0xe30] sm:$0xff]  ;;  %v3969_v53 = vadd.f32 %v3968_v60, %v3898_v22  ;;  %v988_v46 = vld [vmem:[%s8015_s0 + $0x15f8] sm:$0xff] }
 0x425   : > { %5875 = vmatprep.subr.mxu1 %v876_v8  ;;  %5805 = vmatpush2.msra.mxu0 %v747_v5  ;;  %v736_v8 = vld [vmem:[%s8015_s0 + $0xe18] sm:$0xff]  ;;  %v4110_v45 = vpop.f32.mrf.mxu0  ;;  %v735_v5 = vld [vmem:[%s8015_s0 + $0xe10] sm:$0xff] }
 0x426   : > { %5876 = vmatpush2.msra.mxu1 %v875_v62  ;;  %5806 = vmatprep.subr.mxu0 %v744_v10  ;;  %v3971_v62 = vadd.f32 %v3970_v51, %v3900_v52  ;;  %v863_v10 = vld [vmem:[%s8015_s0 + $0x1210] sm:$0xff]  ;;  %v4040_v60 = vadd.f32 %v4039_v41, %v3969_v53  ;;  %v1116_v14 = vld [vmem:[%s8015_s0 + $0x19f8] sm:$0xff] }
 0x427   : > { %5877 = vmatprep.subr.mxu1 %v872_v1  ;;  %5807 = vmatpush2.msra.mxu0 %v743_v26  ;;  %v4041_v1 = vpop.f32.mrf.mxu1  ;;  %v4112_v52 = vpop.f32.mrf.mxu0  ;;  %v983_v51 = vld [vmem:[%s8015_s0 + $0x15d0] sm:$0xff]  ;;  %v980_v53 = vld [vmem:[%s8015_s0 + $0x15b8] sm:$0xff] }
 0x428   : > { %5878 = vmatpush2.msra.mxu1 %v871_v20  ;;  %5808 = vmatprep.subr.mxu0 %v740_v16  ;;  %v1115_v20 = vld [vmem:[%s8015_s0 + $0x19f0] sm:$0xff]  ;;  %v4042_v22 = vadd.f32 %v4041_v1, %v3971_v62  ;;  %v4111_v16 = vadd.f32 %v4110_v45, %v4040_v60  ;;  %v1104_v62 = vld [vmem:[%s8015_s0 + $0x1998] sm:$0xff] }
 0x429   : > { %5879 = vmatprep.subr.mxu1 %v868_v33  ;;  %5809 = vmatpush2.msra.mxu0 %v739_v44  ;;  %v4181_v26 = vpop.f32.mrf.mxu1  ;;  %v984_v33 = vld [vmem:[%s8015_s0 + $0x15d8] sm:$0xff]  ;;  %v4252_v41 = vpop.f32.mrf.mxu0  ;;  %v1107_v45 = vld [vmem:[%s8015_s0 + $0x19b0] sm:$0xff] }
 0x42a   : > { %5880 = vmatpush2.msra.mxu1 %v867_v42  ;;  %5810 = vmatprep.subr.mxu0 %v736_v8  ;;  %v987_v42 = vld [vmem:[%s8015_s0 + $0x15f0] sm:$0xff]  ;;  %v4113_v44 = vadd.f32 %v4112_v52, %v4042_v22  ;;  %v1108_v8 = vld [vmem:[%s8015_s0 + $0x19b8] sm:$0xff] }
 0x42b   : > { %5881 = vmatprep.subr.mxu1 %v864_v6  ;;  %5811 = vmatpush2.msra.mxu0 %v735_v5  ;;  %v979_v6 = vld [vmem:[%s8015_s0 + $0x15b0] sm:$0xff]  ;;  %v4182_v5 = vadd.f32 %v4181_v26, %v4111_v16  ;;  %v4254_v1 = vpop.f32.mrf.mxu0  ;;  %v972_v26 = vld [vmem:[%s8015_s0 + $0x1578] sm:$0xff] }
 0x42c   : > { %5812 = vmatprep.mubr.f32.mxu0 %v8347_v29  ;;  %5882 = vmatpush2.msra.mxu1 %v863_v10  ;;  %v1112_v29 = vld [vmem:[%s8015_s0 + $0x19d8] sm:$0xff]  ;;  %v1103_v60 = vld [vmem:[%s8015_s0 + $0x1990] sm:$0xff] }
 0x42d   : > { %5813 = vmatmul.mubr.f32.vlgmr.msra.gmra.mxu0 %v8333_v21  ;;  %5883 = vmatprep.mubr.f32.mxu1 %v8488_v54  ;;  %v1111_v21 = vld [vmem:[%s8015_s0 + $0x19d0] sm:$0xff]  ;;  %v4183_v54 = vpop.f32.mrf.mxu1  ;;  %v4253_v52 = vadd.f32 %v4252_v41, %v4182_v5 }
 0x42e   : > { %5890 = vmatprep.subr.mxu0 %v988_v46  ;;  %5961 = vmatprep.subr.mxu1 %v1116_v14  ;;  %v975_v46 = vld [vmem:[%s8015_s0 + $0x1590] sm:$0xff]  ;;  %v4184_v14 = vadd.f32 %v4183_v54, %v4113_v44  ;;  %v1092_v54 = vld [vmem:[%s8015_s0 + $0x1938] sm:$0xff] }
 0x42f   : > { %5884 = vmatmul.mubr.f32.vlgmr.msra.gmra.mxu1 %v8473_v43  ;;  %5891 = vmatpush1.msra.mxu0 %v987_v42  ;;  %v976_v43 = vld [vmem:[%s8015_s0 + $0x1598] sm:$0xff]  ;;  %v4323_v10 = vpop.f32.mrf.mxu1  ;;  %v971_v22 = vld [vmem:[%s8015_s0 + $0x1570] sm:$0xff] }
 0x430   : > { %5962 = vmatpush1.msra.mxu1 %v1115_v20  ;;  %5892 = vmatprep.subr.mxu0 %v984_v33  ;;  %v1100_v42 = vld [vmem:[%s8015_s0 + $0x1978] sm:$0xff]  ;;  %v4394_v20 = vpop.f32.mrf.mxu0  ;;  %v1099_v16 = vld [vmem:[%s8015_s0 + $0x1970] sm:$0xff]  ;;  %v4255_v33 = vadd.f32 %v4254_v1, %v4184_v14 }
 0x431   : > { %5963 = vmatprep.subr.mxu1 %v1112_v29  ;;  %5893 = vmatpush1.msra.mxu0 %v983_v51  ;;  %v968_v29 = vld [vmem:[%s8015_s0 + $0x1558] sm:$0xff]  ;;  %v4325_v41 = vpop.f32.mrf.mxu1  ;;  %v1095_v44 = vld [vmem:[%s8015_s0 + $0x1950] sm:$0xff] }
 0x432   : > { %5964 = vmatpush1.msra.mxu1 %v1111_v21  ;;  %5894 = vmatprep.subr.mxu0 %v980_v53  ;;  %v1096_v51 = vld [vmem:[%s8015_s0 + $0x1958] sm:$0xff]  ;;  %v967_v21 = vld [vmem:[%s8015_s0 + $0x1550] sm:$0xff]  ;;  %v4324_v53 = vadd.f32 %v4323_v10, %v4253_v52 }
 0x433   : > { %5965 = vmatprep.subr.mxu1 %v1108_v8  ;;  %5895 = vmatpush1.msra.mxu0 %v979_v6  ;;  %v964_v8 = vld [vmem:[%s8015_s0 + $0x1538] sm:$0xff]  ;;  %v4465_v6 = vpop.f32.mrf.mxu1  ;;  %v963_v5 = vld [vmem:[%s8015_s0 + $0x1530] sm:$0xff] }
 0x434   : > { %5966 = vmatpush1.msra.mxu1 %v1107_v45  ;;  %5896 = vmatprep.subr.mxu0 %v976_v43  ;;  %v4396_v45 = vpop.f32.mrf.mxu0  ;;  %v1091_v43 = vld [vmem:[%s8015_s0 + $0x1930] sm:$0xff]  ;;  %v4395_v1 = vadd.f32 %v4394_v20, %v4324_v53  ;;  %v960_v10 = vld [vmem:[%s8015_s0 + $0x1518] sm:$0xff] }
 0x435   : > { %5967 = vmatprep.subr.mxu1 %v1104_v62  ;;  %5897 = vmatpush1.msra.mxu0 %v975_v46  ;;  %v4326_v62 = vadd.f32 %v4325_v41, %v4255_v33  ;;  %v1088_v46 = vld [vmem:[%s8015_s0 + $0x1918] sm:$0xff]  ;;  %v959_v14 = vld [vmem:[%s8015_s0 + $0x1510] sm:$0xff]  ;;  %v4467_v20 = vpop.f32.mrf.mxu1 }
 0x436   : > { %5968 = vmatpush1.msra.mxu1 %v1103_v60  ;;  %5898 = vmatprep.subr.mxu0 %v972_v26  ;;  %v4536_v60 = vpop.f32.mrf.mxu0  ;;  %v1087_v52 = vld [vmem:[%s8015_s0 + $0x1910] sm:$0xff]  ;;  %v1080_v41 = vld [vmem:[%s8015_s0 + $0x18d8] sm:$0xff] }
 0x437   : > { %5969 = vmatprep.subr.mxu1 %v1100_v42  ;;  %5899 = vmatpush1.msra.mxu0 %v971_v22  ;;  %v4397_v26 = vadd.f32 %v4396_v45, %v4326_v62  ;;  %v956_v42 = vld [vmem:[%s8015_s0 + $0x14f8] sm:$0xff]  ;;  %v1083_v33 = vld [vmem:[%s8015_s0 + $0x18f0] sm:$0xff] }
 0x438   : > { %5970 = vmatpush1.msra.mxu1 %v1099_v16  ;;  %5900 = vmatprep.subr.mxu0 %v968_v29  ;;  %v1084_v22 = vld [vmem:[%s8015_s0 + $0x18f8] sm:$0xff]  ;;  %v955_v16 = vld [vmem:[%s8015_s0 + $0x14f0] sm:$0xff]  ;;  %v4466_v29 = vadd.f32 %v4465_v6, %v4395_v1 }
 0x439   : > { %5971 = vmatprep.subr.mxu1 %v1096_v51  ;;  %5901 = vmatpush1.msra.mxu0 %v967_v21  ;;  %v952_v51 = vld [vmem:[%s8015_s0 + $0x14d8] sm:$0xff]  ;;  %v4607_v21 = vpop.f32.mrf.mxu1  ;;  %v951_v53 = vld [vmem:[%s8015_s0 + $0x14d0] sm:$0xff] }
 0x43a   : > { %5972 = vmatpush1.msra.mxu1 %v1095_v44  ;;  %5902 = vmatprep.subr.mxu0 %v964_v8  ;;  %v4538_v44 = vpop.f32.mrf.mxu0  ;;  %v1079_v8 = vld [vmem:[%s8015_s0 + $0x18d0] sm:$0xff]  ;;  %v4537_v45 = vadd.f32 %v4536_v60, %v4466_v29  ;;  %v948_v6 = vld [vmem:[%s8015_s0 + $0x14b8] sm:$0xff] }
 0x43b   : > { %5973 = vmatprep.subr.mxu1 %v1092_v54  ;;  %5903 = vmatpush1.msra.mxu0 %v963_v5  ;;  %v4468_v54 = vadd.f32 %v4467_v20, %v4397_v26  ;;  %v1076_v5 = vld [vmem:[%s8015_s0 + $0x18b8] sm:$0xff]  ;;  %v947_v62 = vld [vmem:[%s8015_s0 + $0x14b0] sm:$0xff]  ;;  %v4609_v60 = vpop.f32.mrf.mxu1 }
 0x43c   : > { %5974 = vmatpush1.msra.mxu1 %v1091_v43  ;;  %5904 = vmatprep.subr.mxu0 %v960_v10  ;;  %v4678_v43 = vpop.f32.mrf.mxu0  ;;  %v1075_v1 = vld [vmem:[%s8015_s0 + $0x18b0] sm:$0xff]  ;;  %v1068_v20 = vld [vmem:[%s8015_s0 + $0x1878] sm:$0xff] }
 0x43d   : > { %5975 = vmatprep.subr.mxu1 %v1088_v46  ;;  %5905 = vmatpush1.msra.mxu0 %v959_v14  ;;  %v4539_v10 = vadd.f32 %v4538_v44, %v4468_v54  ;;  %v944_v46 = vld [vmem:[%s8015_s0 + $0x1498] sm:$0xff]  ;;  %v1071_v26 = vld [vmem:[%s8015_s0 + $0x1890] sm:$0xff] }
 0x43e   : > { %5976 = vmatpush1.msra.mxu1 %v1087_v52  ;;  %5906 = vmatprep.subr.mxu0 %v956_v42  ;;  %v1072_v14 = vld [vmem:[%s8015_s0 + $0x1898] sm:$0xff]  ;;  %v943_v52 = vld [vmem:[%s8015_s0 + $0x1490] sm:$0xff]  ;;  %v4608_v42 = vadd.f32 %v4607_v21, %v4537_v45 }
 0x43f   : > { %5977 = vmatprep.subr.mxu1 %v1084_v22  ;;  %5907 = vmatpush1.msra.mxu0 %v955_v16  ;;  %v940_v22 = vld [vmem:[%s8015_s0 + $0x1478] sm:$0xff]  ;;  %v4749_v16 = vpop.f32.mrf.mxu1  ;;  %v939_v29 = vld [vmem:[%s8015_s0 + $0x1470] sm:$0xff] }
 0x440   : > { %5978 = vmatpush1.msra.mxu1 %v1083_v33  ;;  %5908 = vmatprep.subr.mxu0 %v952_v51  ;;  %v4680_v33 = vpop.f32.mrf.mxu0  ;;  %v1067_v51 = vld [vmem:[%s8015_s0 + $0x1870] sm:$0xff]  ;;  %v4679_v44 = vadd.f32 %v4678_v43, %v4608_v42  ;;  %v936_v21 = vld [vmem:[%s8015_s0 + $0x1458] sm:$0xff] }
 0x441   : > { %5979 = vmatprep.subr.mxu1 %v1080_v41  ;;  %5909 = vmatpush1.msra.mxu0 %v951_v53  ;;  %v4610_v41 = vadd.f32 %v4609_v60, %v4539_v10  ;;  %v1064_v53 = vld [vmem:[%s8015_s0 + $0x1858] sm:$0xff]  ;;  %v935_v54 = vld [vmem:[%s8015_s0 + $0x1450] sm:$0xff]  ;;  %v4751_v43 = vpop.f32.mrf.mxu1 }
 0x442   : > { %5980 = vmatpush1.msra.mxu1 %v1079_v8  ;;  %5910 = vmatprep.subr.mxu0 %v948_v6  ;;  %v4820_v8 = vpop.f32.mrf.mxu0  ;;  %v1063_v45 = vld [vmem:[%s8015_s0 + $0x1850] sm:$0xff]  ;;  %v1056_v60 = vld [vmem:[%s8015_s0 + $0x1818] sm:$0xff] }
 0x443   : > { %5981 = vmatprep.subr.mxu1 %v1076_v5  ;;  %5911 = vmatpush1.msra.mxu0 %v947_v62  ;;  %v4681_v6 = vadd.f32 %v4680_v33, %v4610_v41  ;;  %v932_v5 = vld [vmem:[%s8015_s0 + $0x1438] sm:$0xff]  ;;  %v1059_v10 = vld [vmem:[%s8015_s0 + $0x1830] sm:$0xff] }
 0x444   : > { %5982 = vmatpush1.msra.mxu1 %v1075_v1  ;;  %5912 = vmatprep.subr.mxu0 %v944_v46  ;;  %v1060_v62 = vld [vmem:[%s8015_s0 + $0x1838] sm:$0xff]  ;;  %v931_v1 = vld [vmem:[%s8015_s0 + $0x1430] sm:$0xff]  ;;  %v4750_v46 = vadd.f32 %v4749_v16, %v4679_v44 }
 0x445   : > { %5983 = vmatprep.subr.mxu1 %v1072_v14  ;;  %5913 = vmatpush1.msra.mxu0 %v943_v52  ;;  %v928_v14 = vld [vmem:[%s8015_s0 + $0x1418] sm:$0xff]  ;;  %v4891_v52 = vpop.f32.mrf.mxu1  ;;  %v927_v42 = vld [vmem:[%s8015_s0 + $0x1410] sm:$0xff] }
 0x446   : > { %5984 = vmatpush1.msra.mxu1 %v1071_v26  ;;  %5914 = vmatprep.subr.mxu0 %v940_v22  ;;  %v4822_v26 = vpop.f32.mrf.mxu0  ;;  %v1055_v22 = vld [vmem:[%s8015_s0 + $0x1810] sm:$0xff]  ;;  %v4821_v33 = vadd.f32 %v4820_v8, %v4750_v46  ;;  %v1052_v16 = vld [vmem:[%s8015_s0 + $0x17f8] sm:$0xff] }
 0x447   : > { %5985 = vmatprep.subr.mxu1 %v1068_v20  ;;  %5915 = vmatpush1.msra.mxu0 %v939_v29  ;;  %v4752_v20 = vadd.f32 %v4751_v43, %v4681_v6  ;;  %v1180_v29 = vld [vmem:[%s8015_s0 + $0x1bf8] sm:$0xff]  ;;  %v1051_v41 = vld [vmem:[%s8015_s0 + $0x17f0] sm:$0xff]  ;;  %v4893_v8 = vpop.f32.mrf.mxu1 }
 0x448   : > { %5986 = vmatpush1.msra.mxu1 %v1067_v51  ;;  %5916 = vmatprep.subr.mxu0 %v936_v21  ;;  %v4962_v51 = vpop.f32.mrf.mxu0  ;;  %v1179_v44 = vld [vmem:[%s8015_s0 + $0x1bf0] sm:$0xff]  ;;  %v1172_v43 = vld [vmem:[%s8015_s0 + $0x1bb8] sm:$0xff] }
 0x449   : > { %5987 = vmatprep.subr.mxu1 %v1064_v53  ;;  %5917 = vmatpush1.msra.mxu0 %v935_v54  ;;  %v4823_v21 = vadd.f32 %v4822_v26, %v4752_v20  ;;  %v1048_v53 = vld [vmem:[%s8015_s0 + $0x17d8] sm:$0xff]  ;;  %v1175_v6 = vld [vmem:[%s8015_s0 + $0x1bd0] sm:$0xff] }
 0x44a   : > { %5988 = vmatpush1.msra.mxu1 %v1063_v45  ;;  %5918 = vmatprep.subr.mxu0 %v932_v5  ;;  %v1176_v54 = vld [vmem:[%s8015_s0 + $0x1bd8] sm:$0xff]  ;;  %v1047_v45 = vld [vmem:[%s8015_s0 + $0x17d0] sm:$0xff]  ;;  %v4892_v5 = vadd.f32 %v4891_v52, %v4821_v33 }
 0x44b   : > { %5989 = vmatprep.subr.mxu1 %v1060_v62  ;;  %5919 = vmatpush1.msra.mxu0 %v931_v1  ;;  %v1044_v62 = vld [vmem:[%s8015_s0 + $0x17b8] sm:$0xff]  ;;  %v5033_v1 = vpop.f32.mrf.mxu1  ;;  %v1043_v46 = vld [vmem:[%s8015_s0 + $0x17b0] sm:$0xff] }
 0x44c   : > { %5990 = vmatpush1.msra.mxu1 %v1059_v10  ;;  %5920 = vmatprep.subr.mxu0 %v928_v14  ;;  %v4964_v10 = vpop.f32.mrf.mxu0  ;;  %v1171_v14 = vld [vmem:[%s8015_s0 + $0x1bb0] sm:$0xff]  ;;  %v4963_v26 = vadd.f32 %v4962_v51, %v4892_v5  ;;  %v1040_v52 = vld [vmem:[%s8015_s0 + $0x1798] sm:$0xff] }
 0x44d   : > { %5991 = vmatprep.subr.mxu1 %v1056_v60  ;;  %5921 = vmatpush1.msra.mxu0 %v927_v42  ;;  %v4894_v60 = vadd.f32 %v4893_v8, %v4823_v21  ;;  %v1168_v42 = vld [vmem:[%s8015_s0 + $0x1b98] sm:$0xff]  ;;  %v1039_v20 = vld [vmem:[%s8015_s0 + $0x1790] sm:$0xff]  ;;  %v5035_v51 = vpop.f32.mrf.mxu1 }
 0x44e   : > { %5992 = vmatpush1.msra.mxu1 %v1055_v22  ;;  %5922 = vmatprep.subr.mxu0 %v1052_v16  ;;  %v5104_v22 = vpop.f32.mrf.mxu0  ;;  %v1167_v33 = vld [vmem:[%s8015_s0 + $0x1b90] sm:$0xff]  ;;  %v1160_v8 = vld [vmem:[%s8015_s0 + $0x1b58] sm:$0xff] }
 0x44f   : > { %5993 = vmatprep.subr.mxu1 %v1180_v29  ;;  %5923 = vmatpush2.msra.mxu0 %v1051_v41  ;;  %v4965_v16 = vadd.f32 %v4964_v10, %v4894_v60  ;;  %v1036_v29 = vld [vmem:[%s8015_s0 + $0x1778] sm:$0xff]  ;;  %v1163_v21 = vld [vmem:[%s8015_s0 + $0x1b70] sm:$0xff] }
 0x450   : > { %5994 = vmatpush2.msra.mxu1 %v1179_v44  ;;  %5924 = vmatprep.subr.mxu0 %v1048_v53  ;;  %v1164_v41 = vld [vmem:[%s8015_s0 + $0x1b78] sm:$0xff]  ;;  %v1035_v44 = vld [vmem:[%s8015_s0 + $0x1770] sm:$0xff]  ;;  %v5034_v53 = vadd.f32 %v5033_v1, %v4963_v26 }
 0x451   : > { %5995 = vmatprep.subr.mxu1 %v1176_v54  ;;  %5925 = vmatpush2.msra.mxu0 %v1047_v45  ;;  %v1032_v54 = vld [vmem:[%s8015_s0 + $0x1758] sm:$0xff]  ;;  %v5175_v45 = vpop.f32.mrf.mxu1  ;;  %v1031_v5 = vld [vmem:[%s8015_s0 + $0x1750] sm:$0xff] }
 0x452   : > { %5996 = vmatpush2.msra.mxu1 %v1175_v6  ;;  %5926 = vmatprep.subr.mxu0 %v1044_v62  ;;  %v5106_v6 = vpop.f32.mrf.mxu0  ;;  %v1159_v62 = vld [vmem:[%s8015_s0 + $0x1b50] sm:$0xff]  ;;  %v5105_v10 = vadd.f32 %v5104_v22, %v5034_v53  ;;  %v1028_v1 = vld [vmem:[%s8015_s0 + $0x1738] sm:$0xff] }
 0x453   : > { %5997 = vmatprep.subr.mxu1 %v1172_v43  ;;  %5927 = vmatpush2.msra.mxu0 %v1043_v46  ;;  %v5036_v43 = vadd.f32 %v5035_v51, %v4965_v16  ;;  %v1156_v46 = vld [vmem:[%s8015_s0 + $0x1b38] sm:$0xff]  ;;  %v1027_v60 = vld [vmem:[%s8015_s0 + $0x1730] sm:$0xff]  ;;  %v5177_v22 = vpop.f32.mrf.mxu1 }
 0x454   : > { %5998 = vmatpush2.msra.mxu1 %v1171_v14  ;;  %5928 = vmatprep.subr.mxu0 %v1040_v52  ;;  %v5246_v14 = vpop.f32.mrf.mxu0  ;;  %v1155_v26 = vld [vmem:[%s8015_s0 + $0x1b30] sm:$0xff]  ;;  %v1148_v51 = vld [vmem:[%s8015_s0 + $0x1af8] sm:$0xff] }
 0x455   : > { %5999 = vmatprep.subr.mxu1 %v1168_v42  ;;  %5929 = vmatpush2.msra.mxu0 %v1039_v20  ;;  %v5107_v52 = vadd.f32 %v5106_v6, %v5036_v43  ;;  %v1024_v42 = vld [vmem:[%s8015_s0 + $0x1718] sm:$0xff]  ;;  %v1151_v16 = vld [vmem:[%s8015_s0 + $0x1b10] sm:$0xff] }
 0x456   : > { %6000 = vmatpush2.msra.mxu1 %v1167_v33  ;;  %5930 = vmatprep.subr.mxu0 %v1036_v29  ;;  %v1152_v20 = vld [vmem:[%s8015_s0 + $0x1b18] sm:$0xff]  ;;  %v1023_v33 = vld [vmem:[%s8015_s0 + $0x1710] sm:$0xff]  ;;  %v5176_v29 = vadd.f32 %v5175_v45, %v5105_v10 }
 0x457   : > { %6001 = vmatprep.subr.mxu1 %v1164_v41  ;;  %5931 = vmatpush2.msra.mxu0 %v1035_v44  ;;  %v1020_v41 = vld [vmem:[%s8015_s0 + $0x16f8] sm:$0xff]  ;;  %v5317_v44 = vpop.f32.mrf.mxu1  ;;  %v1019_v53 = vld [vmem:[%s8015_s0 + $0x16f0] sm:$0xff] }
 0x458   : > { %6002 = vmatpush2.msra.mxu1 %v1163_v21  ;;  %5932 = vmatprep.subr.mxu0 %v1032_v54  ;;  %v5248_v21 = vpop.f32.mrf.mxu0  ;;  %v1147_v54 = vld [vmem:[%s8015_s0 + $0x1af0] sm:$0xff]  ;;  %v5247_v6 = vadd.f32 %v5246_v14, %v5176_v29  ;;  %v1016_v45 = vld [vmem:[%s8015_s0 + $0x16d8] sm:$0xff] }
 0x459   : > { %6003 = vmatprep.subr.mxu1 %v1160_v8  ;;  %5933 = vmatpush2.msra.mxu0 %v1031_v5  ;;  %v5178_v8 = vadd.f32 %v5177_v22, %v5107_v52  ;;  %v1144_v5 = vld [vmem:[%s8015_s0 + $0x1ad8] sm:$0xff]  ;;  %v1015_v43 = vld [vmem:[%s8015_s0 + $0x16d0] sm:$0xff]  ;;  %v5319_v14 = vpop.f32.mrf.mxu1 }
 0x45a   : > { %6004 = vmatpush2.msra.mxu1 %v1159_v62  ;;  %5934 = vmatprep.subr.mxu0 %v1028_v1  ;;  %v5388_v62 = vpop.f32.mrf.mxu0  ;;  %v1143_v10 = vld [vmem:[%s8015_s0 + $0x1ad0] sm:$0xff]  ;;  %v1136_v22 = vld [vmem:[%s8015_s0 + $0x1a98] sm:$0xff] }
 0x45b   : > { %6005 = vmatprep.subr.mxu1 %v1156_v46  ;;  %5935 = vmatpush2.msra.mxu0 %v1027_v60  ;;  %v5249_v1 = vadd.f32 %v5248_v21, %v5178_v8  ;;  %v1012_v46 = vld [vmem:[%s8015_s0 + $0x16b8] sm:$0xff]  ;;  %v1139_v52 = vld [vmem:[%s8015_s0 + $0x1ab0] sm:$0xff] }
 0x45c   : > { %6006 = vmatpush2.msra.mxu1 %v1155_v26  ;;  %5936 = vmatprep.subr.mxu0 %v1024_v42  ;;  %v1140_v60 = vld [vmem:[%s8015_s0 + $0x1ab8] sm:$0xff]  ;;  %v1011_v26 = vld [vmem:[%s8015_s0 + $0x16b0] sm:$0xff]  ;;  %v5318_v42 = vadd.f32 %v5317_v44, %v5247_v6 }
 0x45d   : > { %6007 = vmatprep.subr.mxu1 %v1152_v20  ;;  %5937 = vmatpush2.msra.mxu0 %v1023_v33  ;;  %v1008_v20 = vld [vmem:[%s8015_s0 + $0x1698] sm:$0xff]  ;;  %v5459_v33 = vpop.f32.mrf.mxu1  ;;  %v1007_v29 = vld [vmem:[%s8015_s0 + $0x1690] sm:$0xff] }
 0x45e   : > { %6008 = vmatpush2.msra.mxu1 %v1151_v16  ;;  %5938 = vmatprep.subr.mxu0 %v1020_v41  ;;  %v5390_v16 = vpop.f32.mrf.mxu0  ;;  %v1135_v41 = vld [vmem:[%s8015_s0 + $0x1a90] sm:$0xff]  ;;  %v5389_v21 = vadd.f32 %v5388_v62, %v5318_v42  ;;  %v1004_v44 = vld [vmem:[%s8015_s0 + $0x1678] sm:$0xff] }
 0x45f   : > { %6009 = vmatprep.subr.mxu1 %v1148_v51  ;;  %5939 = vmatpush2.msra.mxu0 %v1019_v53  ;;  %v5320_v51 = vadd.f32 %v5319_v14, %v5249_v1  ;;  %v1132_v53 = vld [vmem:[%s8015_s0 + $0x1a78] sm:$0xff]  ;;  %v1131_v8 = vld [vmem:[%s8015_s0 + $0x1a70] sm:$0xff]  ;;  %v5461_v62 = vpop.f32.mrf.mxu1 }
 0x460   : > { %6010 = vmatpush2.msra.mxu1 %v1147_v54  ;;  %5940 = vmatprep.subr.mxu0 %v1016_v45  ;;  %v1003_v54 = vld [vmem:[%s8015_s0 + $0x1670] sm:$0xff]  ;;  %v1000_v45 = vld [vmem:[%s8015_s0 + $0x1658] sm:$0xff]  ;;  %v5460_v1 = vadd.f32 %v5459_v33, %v5389_v21 }
 0x461   : > { %6011 = vmatprep.subr.mxu1 %v1144_v5  ;;  %5941 = vmatpush2.msra.mxu0 %v1015_v43  ;;  %v5391_v6 = vadd.f32 %v5390_v16, %v5320_v51  ;;  %v1128_v5 = vld [vmem:[%s8015_s0 + $0x1a58] sm:$0xff]  ;;  %v999_v43 = vld [vmem:[%s8015_s0 + $0x1650] sm:$0xff] }
 0x462   : > { %6012 = vmatpush2.msra.mxu1 %v1143_v10  ;;  %5942 = vmatprep.subr.mxu0 %v1012_v46  ;;  %v1127_v10 = vld [vmem:[%s8015_s0 + $0x1a50] sm:$0xff]  ;;  %v996_v46 = vld [vmem:[%s8015_s0 + $0x1638] sm:$0xff] }
 0x463   : > { %6013 = vmatprep.subr.mxu1 %v1140_v60  ;;  %5943 = vmatpush2.msra.mxu0 %v1011_v26  ;;  %v1124_v60 = vld [vmem:[%s8015_s0 + $0x1a38] sm:$0xff]  ;;  %v995_v14 = vld [vmem:[%s8015_s0 + $0x1630] sm:$0xff]  ;;  %v5462_v42 = vadd.f32 %v5461_v62, %v5391_v6 }
 0x464   : > { %6014 = vmatpush2.msra.mxu1 %v1139_v52  ;;  %5944 = vmatprep.subr.mxu0 %v1008_v20  ;;  %v1123_v26 = vld [vmem:[%s8015_s0 + $0x1a30] sm:$0xff]  ;;  %v992_v20 = vld [vmem:[%s8015_s0 + $0x1618] sm:$0xff] }
 0x465   : > { %6015 = vmatprep.subr.mxu1 %v1136_v22  ;;  %5945 = vmatpush2.msra.mxu0 %v1007_v29  ;;  %v1120_v22 = vld [vmem:[%s8015_s0 + $0x1a18] sm:$0xff]  ;;  %v991_v33 = vld [vmem:[%s8015_s0 + $0x1610] sm:$0xff] }
 0x466   : > { %6016 = vmatpush2.msra.mxu1 %v1135_v41  ;;  %5946 = vmatprep.subr.mxu0 %v1004_v44  ;;  %v1119_v41 = vld [vmem:[%s8015_s0 + $0x1a10] sm:$0xff]  ;;  %v1244_v21 = vld [vmem:[%s8015_s0 + $0x1df8] sm:$0xff] }
 0x467   : > { %6017 = vmatprep.subr.mxu1 %v1132_v53  ;;  %5947 = vmatpush2.msra.mxu0 %v1003_v54  ;;  %v1372_v44 = vld [vmem:[%s8015_s0 + $0x21f8] sm:$0xff]  ;;  %v1243_v53 = vld [vmem:[%s8015_s0 + $0x1df0] sm:$0xff] }
 0x468   : > { %6018 = vmatpush2.msra.mxu1 %v1131_v8  ;;  %5948 = vmatprep.subr.mxu0 %v1000_v45  ;;  %v1371_v54 = vld [vmem:[%s8015_s0 + $0x21f0] sm:$0xff]  ;;  %v1240_v8 = vld [vmem:[%s8015_s0 + $0x1dd8] sm:$0xff] }
 0x469   : > { %6019 = vmatprep.subr.mxu1 %v1128_v5  ;;  %v5530_v52 = vpop.f32.mrf.mxu0  ;;  %5949 = vmatpush2.msra.mxu0 %v999_v43  ;;  %v1368_v6 = vld [vmem:[%s8015_s0 + $0x21d8] sm:$0xff]  ;;  %v1367_v45 = vld [vmem:[%s8015_s0 + $0x21d0] sm:$0xff] }
 0x46a   : > { %6020 = vmatpush2.msra.mxu1 %v1127_v10  ;;  %v10347_v16 = vadd.f32 %v5530_v52, %v5460_v1  ;;  %5950 = vmatprep.subr.mxu0 %v996_v46  ;;  %v1364_v5 = vld [vmem:[%s8015_s0 + $0x21b8] sm:$0xff]  ;;  %v1363_v62 = vld [vmem:[%s8015_s0 + $0x21b0] sm:$0xff] }
 0x46b   : > { %6021 = vmatprep.subr.mxu1 %v1124_v60  ;;  %v5532_v29 = vpop.f32.mrf.mxu0  ;;  %5951 = vmatpush2.msra.mxu0 %v995_v14  ;;  %v1232_v43 = vld [vmem:[%s8015_s0 + $0x1d98] sm:$0xff]  ;;  %v1231_v10 = vld [vmem:[%s8015_s0 + $0x1d90] sm:$0xff] }
 0x46c   : > { %6022 = vmatpush2.msra.mxu1 %v1123_v26  ;;  %v10351_v51 = vadd.f32 %v5532_v29, %v5462_v42  ;;  %5952 = vmatprep.subr.mxu0 %v992_v20  ;;  %v1359_v1 = vld [vmem:[%s8015_s0 + $0x2190] sm:$0xff]  ;;  %v1228_v46 = vld [vmem:[%s8015_s0 + $0x1d78] sm:$0xff] }
 0x46d   : > { %6023 = vmatprep.subr.mxu1 %v1120_v22  ;;  %5953 = vmatpush2.msra.mxu0 %v991_v33  ;;  %v1356_v60 = vld [vmem:[%s8015_s0 + $0x2178] sm:$0xff]  ;;  %v1227_v14 = vld [vmem:[%s8015_s0 + $0x1d70] sm:$0xff] }
 0x46e   : > { %5954 = vmatprep.mubr.f32.mxu0 %v8494_v57  ;;  %6024 = vmatpush2.msra.mxu1 %v1119_v41  ;;  %v1239_v57 = vld [vmem:[%s8015_s0 + $0x1dd0] sm:$0xff]  ;;  %v1224_v52 = vld [vmem:[%s8015_s0 + $0x1d58] sm:$0xff] }
 0x46f   : > { %5955 = vmatmul.mubr.f32.vlgmr.msra.gmra.mxu0 %v8480_v48  ;;  %6025 = vmatprep.mubr.f32.mxu1 %v8635_v32  ;;  %v1236_v48 = vld [vmem:[%s8015_s0 + $0x1db8] sm:$0xff]  ;;  %v1235_v32 = vld [vmem:[%s8015_s0 + $0x1db0] sm:$0xff] }
 0x470   : > { %6032 = vmatprep.subr.mxu0 %v1244_v21  ;;  %6103 = vmatprep.subr.mxu1 %v1372_v44  ;;  %v1355_v26 = vld [vmem:[%s8015_s0 + $0x2170] sm:$0xff]  ;;  %v1352_v42 = vld [vmem:[%s8015_s0 + $0x2158] sm:$0xff] }
 0x471   : > { %6026 = vmatmul.mubr.f32.vlgmr.msra.gmra.mxu1 %v8620_v19  ;;  %6033 = vmatpush1.msra.mxu0 %v1243_v53  ;;  %v1360_v19 = vld [vmem:[%s8015_s0 + $0x2198] sm:$0xff]  ;;  %v1223_v20 = vld [vmem:[%s8015_s0 + $0x1d50] sm:$0xff] }
 0x472   : > { %6104 = vmatpush1.msra.mxu1 %v1371_v54  ;;  %6034 = vmatprep.subr.mxu0 %v1240_v8  ;;  %v1351_v22 = vld [vmem:[%s8015_s0 + $0x2150] sm:$0xff]  ;;  %v1220_v33 = vld [vmem:[%s8015_s0 + $0x1d38] sm:$0xff] }
 0x473   : > { %6105 = vmatprep.subr.mxu1 %v1368_v6  ;;  %6035 = vmatpush1.msra.mxu0 %v1239_v57  ;;  %v1348_v29 = vld [vmem:[%s8015_s0 + $0x2138] sm:$0xff]  ;;  %v1219_v41 = vld [vmem:[%s8015_s0 + $0x1d30] sm:$0xff] }
 0x474   : > { %6106 = vmatpush1.msra.mxu1 %v1367_v45  ;;  %6036 = vmatprep.subr.mxu0 %v1236_v48  ;;  %v1347_v21 = vld [vmem:[%s8015_s0 + $0x2130] sm:$0xff]  ;;  %v1216_v44 = vld [vmem:[%s8015_s0 + $0x1d18] sm:$0xff] }
 0x475   : > { %6107 = vmatprep.subr.mxu1 %v1364_v5  ;;  %6037 = vmatpush1.msra.mxu0 %v1235_v32  ;;  %v1344_v53 = vld [vmem:[%s8015_s0 + $0x2118] sm:$0xff]  ;;  %v1215_v54 = vld [vmem:[%s8015_s0 + $0x1d10] sm:$0xff] }
 0x476   : > { %6108 = vmatpush1.msra.mxu1 %v1363_v62  ;;  %6038 = vmatprep.subr.mxu0 %v1232_v43  ;;  %v1343_v8 = vld [vmem:[%s8015_s0 + $0x2110] sm:$0xff]  ;;  %v1212_v6 = vld [vmem:[%s8015_s0 + $0x1cf8] sm:$0xff] }
 0x477   : > { %6109 = vmatprep.subr.mxu1 %v1360_v19  ;;  %6039 = vmatpush1.msra.mxu0 %v1231_v10  ;;  %v1340_v57 = vld [vmem:[%s8015_s0 + $0x20f8] sm:$0xff]  ;;  %v1211_v45 = vld [vmem:[%s8015_s0 + $0x1cf0] sm:$0xff] }
 0x478   : > { %6110 = vmatpush1.msra.mxu1 %v1359_v1  ;;  %6040 = vmatprep.subr.mxu0 %v1228_v46  ;;  %v1339_v48 = vld [vmem:[%s8015_s0 + $0x20f0] sm:$0xff]  ;;  %v1208_v5 = vld [vmem:[%s8015_s0 + $0x1cd8] sm:$0xff] }
 0x479   : > { %6111 = vmatprep.subr.mxu1 %v1356_v60  ;;  %6041 = vmatpush1.msra.mxu0 %v1227_v14  ;;  %v1336_v32 = vld [vmem:[%s8015_s0 + $0x20d8] sm:$0xff]  ;;  %v1207_v62 = vld [vmem:[%s8015_s0 + $0x1cd0] sm:$0xff] }
 0x47a   : > { %6112 = vmatpush1.msra.mxu1 %v1355_v26  ;;  %6042 = vmatprep.subr.mxu0 %v1224_v52  ;;  %v1335_v43 = vld [vmem:[%s8015_s0 + $0x20d0] sm:$0xff]  ;;  %v1204_v19 = vld [vmem:[%s8015_s0 + $0x1cb8] sm:$0xff] }
 0x47b   : > { %6113 = vmatprep.subr.mxu1 %v1352_v42  ;;  %6043 = vmatpush1.msra.mxu0 %v1223_v20  ;;  %v1332_v10 = vld [vmem:[%s8015_s0 + $0x20b8] sm:$0xff]  ;;  %v1203_v1 = vld [vmem:[%s8015_s0 + $0x1cb0] sm:$0xff] }
 0x47c   : > { %6114 = vmatpush1.msra.mxu1 %v1351_v22  ;;  %6044 = vmatprep.subr.mxu0 %v1220_v33  ;;  %v1331_v46 = vld [vmem:[%s8015_s0 + $0x20b0] sm:$0xff]  ;;  %v1200_v60 = vld [vmem:[%s8015_s0 + $0x1c98] sm:$0xff] }
 0x47d   : > { %6115 = vmatprep.subr.mxu1 %v1348_v29  ;;  %6045 = vmatpush1.msra.mxu0 %v1219_v41  ;;  %v1328_v14 = vld [vmem:[%s8015_s0 + $0x2098] sm:$0xff]  ;;  %v1199_v26 = vld [vmem:[%s8015_s0 + $0x1c90] sm:$0xff] }
 0x47e   : > { %6116 = vmatpush1.msra.mxu1 %v1347_v21  ;;  %6046 = vmatprep.subr.mxu0 %v1216_v44  ;;  %v1327_v52 = vld [vmem:[%s8015_s0 + $0x2090] sm:$0xff]  ;;  %v1196_v42 = vld [vmem:[%s8015_s0 + $0x1c78] sm:$0xff] }
 0x47f   : > { %6117 = vmatprep.subr.mxu1 %v1344_v53  ;;  %6047 = vmatpush1.msra.mxu0 %v1215_v54  ;;  %v1324_v20 = vld [vmem:[%s8015_s0 + $0x2078] sm:$0xff]  ;;  %v1195_v22 = vld [vmem:[%s8015_s0 + $0x1c70] sm:$0xff] }
 0x480   : > { %6118 = vmatpush1.msra.mxu1 %v1343_v8  ;;  %6048 = vmatprep.subr.mxu0 %v1212_v6  ;;  %v1323_v33 = vld [vmem:[%s8015_s0 + $0x2070] sm:$0xff]  ;;  %v1192_v29 = vld [vmem:[%s8015_s0 + $0x1c58] sm:$0xff] }
 0x481   : > { %6119 = vmatprep.subr.mxu1 %v1340_v57  ;;  %6049 = vmatpush1.msra.mxu0 %v1211_v45  ;;  %v1320_v41 = vld [vmem:[%s8015_s0 + $0x2058] sm:$0xff]  ;;  %v1191_v21 = vld [vmem:[%s8015_s0 + $0x1c50] sm:$0xff] }
 0x482   : > { %6120 = vmatpush1.msra.mxu1 %v1339_v48  ;;  %6050 = vmatprep.subr.mxu0 %v1208_v5  ;;  %v1319_v44 = vld [vmem:[%s8015_s0 + $0x2050] sm:$0xff]  ;;  %v1188_v53 = vld [vmem:[%s8015_s0 + $0x1c38] sm:$0xff] }
 0x483   : > { %6121 = vmatprep.subr.mxu1 %v1336_v32  ;;  %6051 = vmatpush1.msra.mxu0 %v1207_v62  ;;  %v1316_v54 = vld [vmem:[%s8015_s0 + $0x2038] sm:$0xff]  ;;  %v1187_v8 = vld [vmem:[%s8015_s0 + $0x1c30] sm:$0xff] }
 0x484   : > { %6122 = vmatpush1.msra.mxu1 %v1335_v43  ;;  %6052 = vmatprep.subr.mxu0 %v1204_v19  ;;  %v1315_v6 = vld [vmem:[%s8015_s0 + $0x2030] sm:$0xff]  ;;  %v1184_v57 = vld [vmem:[%s8015_s0 + $0x1c18] sm:$0xff] }
 0x485   : > { %6123 = vmatprep.subr.mxu1 %v1332_v10  ;;  %6053 = vmatpush1.msra.mxu0 %v1203_v1  ;;  %v1312_v45 = vld [vmem:[%s8015_s0 + $0x2018] sm:$0xff]  ;;  %v1183_v48 = vld [vmem:[%s8015_s0 + $0x1c10] sm:$0xff] }
 0x486   : > { %6124 = vmatpush1.msra.mxu1 %v1331_v46  ;;  %6054 = vmatprep.subr.mxu0 %v1200_v60  ;;  %v1311_v5 = vld [vmem:[%s8015_s0 + $0x2010] sm:$0xff]  ;;  %v1308_v32 = vld [vmem:[%s8015_s0 + $0x1ff8] sm:$0xff] }
 0x487   : > { %6125 = vmatprep.subr.mxu1 %v1328_v14  ;;  %6055 = vmatpush1.msra.mxu0 %v1199_v26  ;;  %v1436_v62 = vld [vmem:[%s8015_s0 + $0x23f8] sm:$0xff]  ;;  %v1307_v43 = vld [vmem:[%s8015_s0 + $0x1ff0] sm:$0xff] }
 0x488   : > { %6126 = vmatpush1.msra.mxu1 %v1327_v52  ;;  %6056 = vmatprep.subr.mxu0 %v1196_v42  ;;  %v1435_v19 = vld [vmem:[%s8015_s0 + $0x23f0] sm:$0xff]  ;;  %v1304_v10 = vld [vmem:[%s8015_s0 + $0x1fd8] sm:$0xff] }
 0x489   : > { %6127 = vmatprep.subr.mxu1 %v1324_v20  ;;  %6057 = vmatpush1.msra.mxu0 %v1195_v22  ;;  %v1432_v1 = vld [vmem:[%s8015_s0 + $0x23d8] sm:$0xff]  ;;  %v1303_v46 = vld [vmem:[%s8015_s0 + $0x1fd0] sm:$0xff] }
 0x48a   : > { %6128 = vmatpush1.msra.mxu1 %v1323_v33  ;;  %6058 = vmatprep.subr.mxu0 %v1192_v29  ;;  %v1431_v60 = vld [vmem:[%s8015_s0 + $0x23d0] sm:$0xff]  ;;  %v1300_v14 = vld [vmem:[%s8015_s0 + $0x1fb8] sm:$0xff] }
 0x48b   : > { %6129 = vmatprep.subr.mxu1 %v1320_v41  ;;  %6059 = vmatpush1.msra.mxu0 %v1191_v21  ;;  %v1428_v26 = vld [vmem:[%s8015_s0 + $0x23b8] sm:$0xff]  ;;  %v1299_v52 = vld [vmem:[%s8015_s0 + $0x1fb0] sm:$0xff] }
 0x48c   : > { %6130 = vmatpush1.msra.mxu1 %v1319_v44  ;;  %6060 = vmatprep.subr.mxu0 %v1188_v53  ;;  %v1427_v42 = vld [vmem:[%s8015_s0 + $0x23b0] sm:$0xff]  ;;  %v1296_v20 = vld [vmem:[%s8015_s0 + $0x1f98] sm:$0xff] }
 0x48d   : > { %6131 = vmatprep.subr.mxu1 %v1316_v54  ;;  %6061 = vmatpush1.msra.mxu0 %v1187_v8  ;;  %v1424_v22 = vld [vmem:[%s8015_s0 + $0x2398] sm:$0xff]  ;;  %v1295_v33 = vld [vmem:[%s8015_s0 + $0x1f90] sm:$0xff] }
 0x48e   : > { %6132 = vmatpush1.msra.mxu1 %v1315_v6  ;;  %6062 = vmatprep.subr.mxu0 %v1184_v57  ;;  %v1423_v29 = vld [vmem:[%s8015_s0 + $0x2390] sm:$0xff]  ;;  %v1292_v41 = vld [vmem:[%s8015_s0 + $0x1f78] sm:$0xff] }
 0x48f   : > { %6133 = vmatprep.subr.mxu1 %v1312_v45  ;;  %6063 = vmatpush1.msra.mxu0 %v1183_v48  ;;  %v1420_v21 = vld [vmem:[%s8015_s0 + $0x2378] sm:$0xff]  ;;  %v1291_v44 = vld [vmem:[%s8015_s0 + $0x1f70] sm:$0xff] }
 0x490   : > { %6134 = vmatpush1.msra.mxu1 %v1311_v5  ;;  %6064 = vmatprep.subr.mxu0 %v1308_v32  ;;  %v1419_v53 = vld [vmem:[%s8015_s0 + $0x2370] sm:$0xff]  ;;  %v1288_v54 = vld [vmem:[%s8015_s0 + $0x1f58] sm:$0xff] }
 0x491   : > { %6135 = vmatprep.subr.mxu1 %v1436_v62  ;;  %6065 = vmatpush2.msra.mxu0 %v1307_v43  ;;  %v1416_v8 = vld [vmem:[%s8015_s0 + $0x2358] sm:$0xff]  ;;  %v1287_v6 = vld [vmem:[%s8015_s0 + $0x1f50] sm:$0xff] }
 0x492   : > { %6136 = vmatpush2.msra.mxu1 %v1435_v19  ;;  %6066 = vmatprep.subr.mxu0 %v1304_v10  ;;  %v1415_v57 = vld [vmem:[%s8015_s0 + $0x2350] sm:$0xff]  ;;  %v1284_v45 = vld [vmem:[%s8015_s0 + $0x1f38] sm:$0xff] }
 0x493   : > { %6137 = vmatprep.subr.mxu1 %v1432_v1  ;;  %6067 = vmatpush2.msra.mxu0 %v1303_v46  ;;  %v1412_v48 = vld [vmem:[%s8015_s0 + $0x2338] sm:$0xff]  ;;  %v1283_v5 = vld [vmem:[%s8015_s0 + $0x1f30] sm:$0xff] }
 0x494   : > { %6138 = vmatpush2.msra.mxu1 %v1431_v60  ;;  %6068 = vmatprep.subr.mxu0 %v1300_v14  ;;  %v1411_v32 = vld [vmem:[%s8015_s0 + $0x2330] sm:$0xff]  ;;  %v1280_v62 = vld [vmem:[%s8015_s0 + $0x1f18] sm:$0xff] }
 0x495   : > { %6139 = vmatprep.subr.mxu1 %v1428_v26  ;;  %6069 = vmatpush2.msra.mxu0 %v1299_v52  ;;  %v1408_v43 = vld [vmem:[%s8015_s0 + $0x2318] sm:$0xff]  ;;  %v1279_v19 = vld [vmem:[%s8015_s0 + $0x1f10] sm:$0xff] }
 0x496   : > { %6140 = vmatpush2.msra.mxu1 %v1427_v42  ;;  %6070 = vmatprep.subr.mxu0 %v1296_v20  ;;  %v1407_v10 = vld [vmem:[%s8015_s0 + $0x2310] sm:$0xff]  ;;  %v1276_v1 = vld [vmem:[%s8015_s0 + $0x1ef8] sm:$0xff] }
 0x497   : > { %6141 = vmatprep.subr.mxu1 %v1424_v22  ;;  %6071 = vmatpush2.msra.mxu0 %v1295_v33  ;;  %v1404_v46 = vld [vmem:[%s8015_s0 + $0x22f8] sm:$0xff]  ;;  %v1275_v60 = vld [vmem:[%s8015_s0 + $0x1ef0] sm:$0xff] }
 0x498   : > { %6142 = vmatpush2.msra.mxu1 %v1423_v29  ;;  %6072 = vmatprep.subr.mxu0 %v1292_v41  ;;  %v1403_v14 = vld [vmem:[%s8015_s0 + $0x22f0] sm:$0xff]  ;;  %v1272_v26 = vld [vmem:[%s8015_s0 + $0x1ed8] sm:$0xff] }
 0x499   : > { %6143 = vmatprep.subr.mxu1 %v1420_v21  ;;  %6073 = vmatpush2.msra.mxu0 %v1291_v44  ;;  %v1400_v52 = vld [vmem:[%s8015_s0 + $0x22d8] sm:$0xff]  ;;  %v1271_v42 = vld [vmem:[%s8015_s0 + $0x1ed0] sm:$0xff] }
 0x49a   : > { %6144 = vmatpush2.msra.mxu1 %v1419_v53  ;;  %6074 = vmatprep.subr.mxu0 %v1288_v54  ;;  %v1399_v20 = vld [vmem:[%s8015_s0 + $0x22d0] sm:$0xff]  ;;  %v1268_v22 = vld [vmem:[%s8015_s0 + $0x1eb8] sm:$0xff] }
 0x49b   : > { %6145 = vmatprep.subr.mxu1 %v1416_v8  ;;  %6075 = vmatpush2.msra.mxu0 %v1287_v6  ;;  %v1396_v33 = vld [vmem:[%s8015_s0 + $0x22b8] sm:$0xff]  ;;  %v1267_v29 = vld [vmem:[%s8015_s0 + $0x1eb0] sm:$0xff] }
 0x49c   : > { %6146 = vmatpush2.msra.mxu1 %v1415_v57  ;;  %6076 = vmatprep.subr.mxu0 %v1284_v45  ;;  %v1395_v41 = vld [vmem:[%s8015_s0 + $0x22b0] sm:$0xff]  ;;  %v1264_v21 = vld [vmem:[%s8015_s0 + $0x1e98] sm:$0xff] }
 0x49d   : > { %6147 = vmatprep.subr.mxu1 %v1412_v48  ;;  %6077 = vmatpush2.msra.mxu0 %v1283_v5  ;;  %v1392_v44 = vld [vmem:[%s8015_s0 + $0x2298] sm:$0xff]  ;;  %v1263_v53 = vld [vmem:[%s8015_s0 + $0x1e90] sm:$0xff] }
 0x49e   : > { %6148 = vmatpush2.msra.mxu1 %v1411_v32  ;;  %6078 = vmatprep.subr.mxu0 %v1280_v62  ;;  %v1391_v54 = vld [vmem:[%s8015_s0 + $0x2290] sm:$0xff]  ;;  %v1260_v8 = vld [vmem:[%s8015_s0 + $0x1e78] sm:$0xff] }
 0x49f   : > { %6149 = vmatprep.subr.mxu1 %v1408_v43  ;;  %6079 = vmatpush2.msra.mxu0 %v1279_v19  ;;  %v1388_v6 = vld [vmem:[%s8015_s0 + $0x2278] sm:$0xff]  ;;  %v1259_v57 = vld [vmem:[%s8015_s0 + $0x1e70] sm:$0xff] }
 0x4a0   : > { %6150 = vmatpush2.msra.mxu1 %v1407_v10  ;;  %6080 = vmatprep.subr.mxu0 %v1276_v1  ;;  %v1387_v45 = vld [vmem:[%s8015_s0 + $0x2270] sm:$0xff]  ;;  %v1256_v48 = vld [vmem:[%s8015_s0 + $0x1e58] sm:$0xff] }
 0x4a1   : > { %6151 = vmatprep.subr.mxu1 %v1404_v46  ;;  %6081 = vmatpush2.msra.mxu0 %v1275_v60  ;;  %v1384_v5 = vld [vmem:[%s8015_s0 + $0x2258] sm:$0xff]  ;;  %v1255_v32 = vld [vmem:[%s8015_s0 + $0x1e50] sm:$0xff] }
 0x4a2   : > { %6152 = vmatpush2.msra.mxu1 %v1403_v14  ;;  %6082 = vmatprep.subr.mxu0 %v1272_v26  ;;  %v1383_v62 = vld [vmem:[%s8015_s0 + $0x2250] sm:$0xff]  ;;  %v1252_v43 = vld [vmem:[%s8015_s0 + $0x1e38] sm:$0xff] }
 0x4a3   : > { %6153 = vmatprep.subr.mxu1 %v1400_v52  ;;  %6083 = vmatpush2.msra.mxu0 %v1271_v42  ;;  %v1380_v19 = vld [vmem:[%s8015_s0 + $0x2238] sm:$0xff]  ;;  %v1251_v10 = vld [vmem:[%s8015_s0 + $0x1e30] sm:$0xff] }
 0x4a4   : > { %6154 = vmatpush2.msra.mxu1 %v1399_v20  ;;  %6084 = vmatprep.subr.mxu0 %v1268_v22  ;;  %v1379_v1 = vld [vmem:[%s8015_s0 + $0x2230] sm:$0xff]  ;;  %v1248_v46 = vld [vmem:[%s8015_s0 + $0x1e18] sm:$0xff] }
 0x4a5   : > { %6155 = vmatprep.subr.mxu1 %v1396_v33  ;;  %6085 = vmatpush2.msra.mxu0 %v1267_v29  ;;  %v1376_v60 = vld [vmem:[%s8015_s0 + $0x2218] sm:$0xff]  ;;  %v1247_v14 = vld [vmem:[%s8015_s0 + $0x1e10] sm:$0xff] }
 0x4a6   : > { %6156 = vmatpush2.msra.mxu1 %v1395_v41  ;;  %6086 = vmatprep.subr.mxu0 %v1264_v21  ;;  %v1375_v26 = vld [vmem:[%s8015_s0 + $0x2210] sm:$0xff]  ;;  %v1500_v52 = vld [vmem:[%s8015_s0 + $0x25f8] sm:$0xff] }
 0x4a7   : > { %6157 = vmatprep.subr.mxu1 %v1392_v44  ;;  %6087 = vmatpush2.msra.mxu0 %v1263_v53  ;;  %v1628_v42 = vld [vmem:[%s8015_s0 + $0x29f8] sm:$0xff]  ;;  %v1499_v20 = vld [vmem:[%s8015_s0 + $0x25f0] sm:$0xff] }
 0x4a8   : > { %6158 = vmatpush2.msra.mxu1 %v1391_v54  ;;  %6088 = vmatprep.subr.mxu0 %v1260_v8  ;;  %v1627_v22 = vld [vmem:[%s8015_s0 + $0x29f0] sm:$0xff]  ;;  %v1496_v33 = vld [vmem:[%s8015_s0 + $0x25d8] sm:$0xff] }
 0x4a9   : > { %6159 = vmatprep.subr.mxu1 %v1388_v6  ;;  %6089 = vmatpush2.msra.mxu0 %v1259_v57  ;;  %v1624_v29 = vld [vmem:[%s8015_s0 + $0x29d8] sm:$0xff]  ;;  %v1623_v41 = vld [vmem:[%s8015_s0 + $0x29d0] sm:$0xff] }
 0x4aa   : > { %6160 = vmatpush2.msra.mxu1 %v1387_v45  ;;  %6090 = vmatprep.subr.mxu0 %v1256_v48  ;;  %v1620_v21 = vld [vmem:[%s8015_s0 + $0x29b8] sm:$0xff]  ;;  %v1619_v44 = vld [vmem:[%s8015_s0 + $0x29b0] sm:$0xff] }
 0x4ab   : > { %6161 = vmatprep.subr.mxu1 %v1384_v5  ;;  %6091 = vmatpush2.msra.mxu0 %v1255_v32  ;;  %v1488_v53 = vld [vmem:[%s8015_s0 + $0x2598] sm:$0xff]  ;;  %v1487_v54 = vld [vmem:[%s8015_s0 + $0x2590] sm:$0xff] }
 0x4ac   : > { %6162 = vmatpush2.msra.mxu1 %v1383_v62  ;;  %6092 = vmatprep.subr.mxu0 %v1252_v43  ;;  %v1615_v8 = vld [vmem:[%s8015_s0 + $0x2990] sm:$0xff]  ;;  %v1484_v6 = vld [vmem:[%s8015_s0 + $0x2578] sm:$0xff] }
 0x4ad   : > { %6163 = vmatprep.subr.mxu1 %v1380_v19  ;;  %6093 = vmatpush2.msra.mxu0 %v1251_v10  ;;  %v1612_v57 = vld [vmem:[%s8015_s0 + $0x2978] sm:$0xff]  ;;  %v1483_v45 = vld [vmem:[%s8015_s0 + $0x2570] sm:$0xff] }
 0x4ae   : > { %6164 = vmatpush2.msra.mxu1 %v1379_v1  ;;  %6094 = vmatprep.subr.mxu0 %v1248_v46  ;;  %v1611_v48 = vld [vmem:[%s8015_s0 + $0x2970] sm:$0xff]  ;;  %v1480_v5 = vld [vmem:[%s8015_s0 + $0x2558] sm:$0xff] }
 0x4af   : > { %6165 = vmatprep.subr.mxu1 %v1376_v60  ;;  %6095 = vmatpush2.msra.mxu0 %v1247_v14  ;;  %v1608_v32 = vld [vmem:[%s8015_s0 + $0x2958] sm:$0xff]  ;;  %v1479_v62 = vld [vmem:[%s8015_s0 + $0x2550] sm:$0xff] }
 0x4b0   : > { %6096 = vmatprep.mubr.f32.mxu0 %v8641_v35  ;;  %6166 = vmatpush2.msra.mxu1 %v1375_v26  ;;  %v1495_v35 = vld [vmem:[%s8015_s0 + $0x25d0] sm:$0xff]  ;;  %v1476_v19 = vld [vmem:[%s8015_s0 + $0x2538] sm:$0xff] }
 0x4b1   : > { %6097 = vmatmul.mubr.f32.vlgmr.msra.gmra.mxu0 %v8627_v25  ;;  %6167 = vmatprep.mubr.f32.mxu1 %v8782_v23  ;;  %v1492_v25 = vld [vmem:[%s8015_s0 + $0x25b8] sm:$0xff]  ;;  %v1491_v23 = vld [vmem:[%s8015_s0 + $0x25b0] sm:$0xff] }
 0x4b2   : > { %6174 = vmatprep.subr.mxu0 %v1500_v52  ;;  %6245 = vmatprep.subr.mxu1 %v1628_v42  ;;  %v1607_v43 = vld [vmem:[%s8015_s0 + $0x2950] sm:$0xff]  ;;  %v1604_v10 = vld [vmem:[%s8015_s0 + $0x2938] sm:$0xff] }
 0x4b3   : > { %6168 = vmatmul.mubr.f32.vlgmr.msra.gmra.mxu1 %v8767_v9  ;;  %6175 = vmatpush1.msra.mxu0 %v1499_v20  ;;  %v1616_v9 = vld [vmem:[%s8015_s0 + $0x2998] sm:$0xff]  ;;  %v1475_v1 = vld [vmem:[%s8015_s0 + $0x2530] sm:$0xff] }
 0x4b4   : > { %6246 = vmatpush1.msra.mxu1 %v1627_v22  ;;  %6176 = vmatprep.subr.mxu0 %v1496_v33  ;;  %v1603_v46 = vld [vmem:[%s8015_s0 + $0x2930] sm:$0xff]  ;;  %v1472_v60 = vld [vmem:[%s8015_s0 + $0x2518] sm:$0xff] }
 0x4b5   : > { %6247 = vmatprep.subr.mxu1 %v1624_v29  ;;  %6177 = vmatpush1.msra.mxu0 %v1495_v35  ;;  %v1600_v14 = vld [vmem:[%s8015_s0 + $0x2918] sm:$0xff]  ;;  %v1471_v26 = vld [vmem:[%s8015_s0 + $0x2510] sm:$0xff] }
 0x4b6   : > { %6248 = vmatpush1.msra.mxu1 %v1623_v41  ;;  %6178 = vmatprep.subr.mxu0 %v1492_v25  ;;  %v1599_v52 = vld [vmem:[%s8015_s0 + $0x2910] sm:$0xff]  ;;  %v1468_v42 = vld [vmem:[%s8015_s0 + $0x24f8] sm:$0xff] }
 0x4b7   : > { %6249 = vmatprep.subr.mxu1 %v1620_v21  ;;  %6179 = vmatpush1.msra.mxu0 %v1491_v23  ;;  %v1596_v20 = vld [vmem:[%s8015_s0 + $0x28f8] sm:$0xff]  ;;  %v1467_v22 = vld [vmem:[%s8015_s0 + $0x24f0] sm:$0xff] }
 0x4b8   : > { %6250 = vmatpush1.msra.mxu1 %v1619_v44  ;;  %6180 = vmatprep.subr.mxu0 %v1488_v53  ;;  %v1595_v33 = vld [vmem:[%s8015_s0 + $0x28f0] sm:$0xff]  ;;  %v1464_v29 = vld [vmem:[%s8015_s0 + $0x24d8] sm:$0xff] }
 0x4b9   : > { %6251 = vmatprep.subr.mxu1 %v1616_v9  ;;  %6181 = vmatpush1.msra.mxu0 %v1487_v54  ;;  %v1592_v35 = vld [vmem:[%s8015_s0 + $0x28d8] sm:$0xff]  ;;  %v1463_v41 = vld [vmem:[%s8015_s0 + $0x24d0] sm:$0xff] }
 0x4ba   : > { %6252 = vmatpush1.msra.mxu1 %v1615_v8  ;;  %6182 = vmatprep.subr.mxu0 %v1484_v6  ;;  %v1591_v25 = vld [vmem:[%s8015_s0 + $0x28d0] sm:$0xff]  ;;  %v1460_v21 = vld [vmem:[%s8015_s0 + $0x24b8] sm:$0xff] }
 0x4bb   : > { %6253 = vmatprep.subr.mxu1 %v1612_v57  ;;  %6183 = vmatpush1.msra.mxu0 %v1483_v45  ;;  %v1588_v23 = vld [vmem:[%s8015_s0 + $0x28b8] sm:$0xff]  ;;  %v1459_v44 = vld [vmem:[%s8015_s0 + $0x24b0] sm:$0xff] }
 0x4bc   : > { %6254 = vmatpush1.msra.mxu1 %v1611_v48  ;;  %6184 = vmatprep.subr.mxu0 %v1480_v5  ;;  %v1587_v53 = vld [vmem:[%s8015_s0 + $0x28b0] sm:$0xff]  ;;  %v1456_v9 = vld [vmem:[%s8015_s0 + $0x2498] sm:$0xff] }
 0x4bd   : > { %6255 = vmatprep.subr.mxu1 %v1608_v32  ;;  %6185 = vmatpush1.msra.mxu0 %v1479_v62  ;;  %v1584_v54 = vld [vmem:[%s8015_s0 + $0x2898] sm:$0xff]  ;;  %v1455_v8 = vld [vmem:[%s8015_s0 + $0x2490] sm:$0xff] }
 0x4be   : > { %6256 = vmatpush1.msra.mxu1 %v1607_v43  ;;  %6186 = vmatprep.subr.mxu0 %v1476_v19  ;;  %v1583_v6 = vld [vmem:[%s8015_s0 + $0x2890] sm:$0xff]  ;;  %v1452_v57 = vld [vmem:[%s8015_s0 + $0x2478] sm:$0xff] }
 0x4bf   : > { %6257 = vmatprep.subr.mxu1 %v1604_v10  ;;  %6187 = vmatpush1.msra.mxu0 %v1475_v1  ;;  %v1580_v45 = vld [vmem:[%s8015_s0 + $0x2878] sm:$0xff]  ;;  %v1451_v48 = vld [vmem:[%s8015_s0 + $0x2470] sm:$0xff] }
 0x4c0   : > { %6258 = vmatpush1.msra.mxu1 %v1603_v46  ;;  %6188 = vmatprep.subr.mxu0 %v1472_v60  ;;  %v1579_v5 = vld [vmem:[%s8015_s0 + $0x2870] sm:$0xff]  ;;  %v1448_v32 = vld [vmem:[%s8015_s0 + $0x2458] sm:$0xff] }
 0x4c1   : > { %6259 = vmatprep.subr.mxu1 %v1600_v14  ;;  %6189 = vmatpush1.msra.mxu0 %v1471_v26  ;;  %v1576_v62 = vld [vmem:[%s8015_s0 + $0x2858] sm:$0xff]  ;;  %v1447_v43 = vld [vmem:[%s8015_s0 + $0x2450] sm:$0xff] }
 0x4c2   : > { %6260 = vmatpush1.msra.mxu1 %v1599_v52  ;;  %6190 = vmatprep.subr.mxu0 %v1468_v42  ;;  %v1575_v19 = vld [vmem:[%s8015_s0 + $0x2850] sm:$0xff]  ;;  %v1444_v10 = vld [vmem:[%s8015_s0 + $0x2438] sm:$0xff] }
 0x4c3   : > { %6261 = vmatprep.subr.mxu1 %v1596_v20  ;;  %6191 = vmatpush1.msra.mxu0 %v1467_v22  ;;  %v1572_v1 = vld [vmem:[%s8015_s0 + $0x2838] sm:$0xff]  ;;  %v1443_v46 = vld [vmem:[%s8015_s0 + $0x2430] sm:$0xff] }
 0x4c4   : > { %6262 = vmatpush1.msra.mxu1 %v1595_v33  ;;  %6192 = vmatprep.subr.mxu0 %v1464_v29  ;;  %v1571_v60 = vld [vmem:[%s8015_s0 + $0x2830] sm:$0xff]  ;;  %v1440_v14 = vld [vmem:[%s8015_s0 + $0x2418] sm:$0xff] }
 0x4c5   : > { %6263 = vmatprep.subr.mxu1 %v1592_v35  ;;  %6193 = vmatpush1.msra.mxu0 %v1463_v41  ;;  %v1568_v26 = vld [vmem:[%s8015_s0 + $0x2818] sm:$0xff]  ;;  %v1439_v52 = vld [vmem:[%s8015_s0 + $0x2410] sm:$0xff] }
 0x4c6   : > { %6264 = vmatpush1.msra.mxu1 %v1591_v25  ;;  %6194 = vmatprep.subr.mxu0 %v1460_v21  ;;  %v1567_v42 = vld [vmem:[%s8015_s0 + $0x2810] sm:$0xff]  ;;  %v1564_v20 = vld [vmem:[%s8015_s0 + $0x27f8] sm:$0xff] }
 0x4c7   : > { %6265 = vmatprep.subr.mxu1 %v1588_v23  ;;  %6195 = vmatpush1.msra.mxu0 %v1459_v44  ;;  %v1692_v22 = vld [vmem:[%s8015_s0 + $0x2bf8] sm:$0xff]  ;;  %v1563_v33 = vld [vmem:[%s8015_s0 + $0x27f0] sm:$0xff] }
 0x4c8   : > { %6266 = vmatpush1.msra.mxu1 %v1587_v53  ;;  %6196 = vmatprep.subr.mxu0 %v1456_v9  ;;  %v1691_v29 = vld [vmem:[%s8015_s0 + $0x2bf0] sm:$0xff]  ;;  %v1560_v35 = vld [vmem:[%s8015_s0 + $0x27d8] sm:$0xff] }
 0x4c9   : > { %6267 = vmatprep.subr.mxu1 %v1584_v54  ;;  %6197 = vmatpush1.msra.mxu0 %v1455_v8  ;;  %v1688_v41 = vld [vmem:[%s8015_s0 + $0x2bd8] sm:$0xff]  ;;  %v1559_v25 = vld [vmem:[%s8015_s0 + $0x27d0] sm:$0xff] }
 0x4ca   : > { %6268 = vmatpush1.msra.mxu1 %v1583_v6  ;;  %6198 = vmatprep.subr.mxu0 %v1452_v57  ;;  %v1687_v21 = vld [vmem:[%s8015_s0 + $0x2bd0] sm:$0xff]  ;;  %v1556_v23 = vld [vmem:[%s8015_s0 + $0x27b8] sm:$0xff] }
 0x4cb   : > { %6269 = vmatprep.subr.mxu1 %v1580_v45  ;;  %6199 = vmatpush1.msra.mxu0 %v1451_v48  ;;  %v1684_v44 = vld [vmem:[%s8015_s0 + $0x2bb8] sm:$0xff]  ;;  %v1555_v53 = vld [vmem:[%s8015_s0 + $0x27b0] sm:$0xff] }
 0x4cc   : > { %6270 = vmatpush1.msra.mxu1 %v1579_v5  ;;  %6200 = vmatprep.subr.mxu0 %v1448_v32  ;;  %v1683_v9 = vld [vmem:[%s8015_s0 + $0x2bb0] sm:$0xff]  ;;  %v1552_v54 = vld [vmem:[%s8015_s0 + $0x2798] sm:$0xff] }
 0x4cd   : > { %6271 = vmatprep.subr.mxu1 %v1576_v62  ;;  %6201 = vmatpush1.msra.mxu0 %v1447_v43  ;;  %v1680_v8 = vld [vmem:[%s8015_s0 + $0x2b98] sm:$0xff]  ;;  %v1551_v6 = vld [vmem:[%s8015_s0 + $0x2790] sm:$0xff] }
 0x4ce   : > { %6272 = vmatpush1.msra.mxu1 %v1575_v19  ;;  %6202 = vmatprep.subr.mxu0 %v1444_v10  ;;  %v1679_v57 = vld [vmem:[%s8015_s0 + $0x2b90] sm:$0xff]  ;;  %v1548_v45 = vld [vmem:[%s8015_s0 + $0x2778] sm:$0xff] }
 0x4cf   : > { %6273 = vmatprep.subr.mxu1 %v1572_v1  ;;  %6203 = vmatpush1.msra.mxu0 %v1443_v46  ;;  %v1676_v48 = vld [vmem:[%s8015_s0 + $0x2b78] sm:$0xff]  ;;  %v1547_v5 = vld [vmem:[%s8015_s0 + $0x2770] sm:$0xff] }
 0x4d0   : > { %6274 = vmatpush1.msra.mxu1 %v1571_v60  ;;  %6204 = vmatprep.subr.mxu0 %v1440_v14  ;;  %v1675_v32 = vld [vmem:[%s8015_s0 + $0x2b70] sm:$0xff]  ;;  %v1544_v62 = vld [vmem:[%s8015_s0 + $0x2758] sm:$0xff] }
 0x4d1   : > { %6275 = vmatprep.subr.mxu1 %v1568_v26  ;;  %6205 = vmatpush1.msra.mxu0 %v1439_v52  ;;  %v1672_v43 = vld [vmem:[%s8015_s0 + $0x2b58] sm:$0xff]  ;;  %v1543_v19 = vld [vmem:[%s8015_s0 + $0x2750] sm:$0xff] }
 0x4d2   : > { %6276 = vmatpush1.msra.mxu1 %v1567_v42  ;;  %6206 = vmatprep.subr.mxu0 %v1564_v20  ;;  %v1671_v10 = vld [vmem:[%s8015_s0 + $0x2b50] sm:$0xff]  ;;  %v1540_v1 = vld [vmem:[%s8015_s0 + $0x2738] sm:$0xff] }
 0x4d3   : > { %6277 = vmatprep.subr.mxu1 %v1692_v22  ;;  %6207 = vmatpush2.msra.mxu0 %v1563_v33  ;;  %v1668_v46 = vld [vmem:[%s8015_s0 + $0x2b38] sm:$0xff]  ;;  %v1539_v60 = vld [vmem:[%s8015_s0 + $0x2730] sm:$0xff] }
 0x4d4   : > { %6278 = vmatpush2.msra.mxu1 %v1691_v29  ;;  %6208 = vmatprep.subr.mxu0 %v1560_v35  ;;  %v1667_v14 = vld [vmem:[%s8015_s0 + $0x2b30] sm:$0xff]  ;;  %v1536_v26 = vld [vmem:[%s8015_s0 + $0x2718] sm:$0xff] }
 0x4d5   : > { %6279 = vmatprep.subr.mxu1 %v1688_v41  ;;  %6209 = vmatpush2.msra.mxu0 %v1559_v25  ;;  %v1664_v52 = vld [vmem:[%s8015_s0 + $0x2b18] sm:$0xff]  ;;  %v1535_v42 = vld [vmem:[%s8015_s0 + $0x2710] sm:$0xff] }
 0x4d6   : > { %6280 = vmatpush2.msra.mxu1 %v1687_v21  ;;  %6210 = vmatprep.subr.mxu0 %v1556_v23  ;;  %v1663_v20 = vld [vmem:[%s8015_s0 + $0x2b10] sm:$0xff]  ;;  %v1532_v22 = vld [vmem:[%s8015_s0 + $0x26f8] sm:$0xff] }
 0x4d7   : > { %6281 = vmatprep.subr.mxu1 %v1684_v44  ;;  %6211 = vmatpush2.msra.mxu0 %v1555_v53  ;;  %v1660_v33 = vld [vmem:[%s8015_s0 + $0x2af8] sm:$0xff]  ;;  %v1531_v29 = vld [vmem:[%s8015_s0 + $0x26f0] sm:$0xff] }
 0x4d8   : > { %6282 = vmatpush2.msra.mxu1 %v1683_v9  ;;  %6212 = vmatprep.subr.mxu0 %v1552_v54  ;;  %v1659_v35 = vld [vmem:[%s8015_s0 + $0x2af0] sm:$0xff]  ;;  %v1528_v41 = vld [vmem:[%s8015_s0 + $0x26d8] sm:$0xff] }
 0x4d9   : > { %6283 = vmatprep.subr.mxu1 %v1680_v8  ;;  %6213 = vmatpush2.msra.mxu0 %v1551_v6  ;;  %v1656_v25 = vld [vmem:[%s8015_s0 + $0x2ad8] sm:$0xff]  ;;  %v1527_v21 = vld [vmem:[%s8015_s0 + $0x26d0] sm:$0xff] }
 0x4da   : > { %6284 = vmatpush2.msra.mxu1 %v1679_v57  ;;  %6214 = vmatprep.subr.mxu0 %v1548_v45  ;;  %v1655_v23 = vld [vmem:[%s8015_s0 + $0x2ad0] sm:$0xff]  ;;  %v1524_v44 = vld [vmem:[%s8015_s0 + $0x26b8] sm:$0xff] }
 0x4db   : > { %6285 = vmatprep.subr.mxu1 %v1676_v48  ;;  %6215 = vmatpush2.msra.mxu0 %v1547_v5  ;;  %v1652_v53 = vld [vmem:[%s8015_s0 + $0x2ab8] sm:$0xff]  ;;  %v1523_v9 = vld [vmem:[%s8015_s0 + $0x26b0] sm:$0xff] }
 0x4dc   : > { %6286 = vmatpush2.msra.mxu1 %v1675_v32  ;;  %6216 = vmatprep.subr.mxu0 %v1544_v62  ;;  %v1651_v54 = vld [vmem:[%s8015_s0 + $0x2ab0] sm:$0xff]  ;;  %v1520_v8 = vld [vmem:[%s8015_s0 + $0x2698] sm:$0xff] }
 0x4dd   : > { %6287 = vmatprep.subr.mxu1 %v1672_v43  ;;  %6217 = vmatpush2.msra.mxu0 %v1543_v19  ;;  %v1648_v6 = vld [vmem:[%s8015_s0 + $0x2a98] sm:$0xff]  ;;  %v1519_v57 = vld [vmem:[%s8015_s0 + $0x2690] sm:$0xff] }
 0x4de   : > { %6288 = vmatpush2.msra.mxu1 %v1671_v10  ;;  %6218 = vmatprep.subr.mxu0 %v1540_v1  ;;  %v1647_v45 = vld [vmem:[%s8015_s0 + $0x2a90] sm:$0xff]  ;;  %v1516_v48 = vld [vmem:[%s8015_s0 + $0x2678] sm:$0xff] }
 0x4df   : > { %6289 = vmatprep.subr.mxu1 %v1668_v46  ;;  %6219 = vmatpush2.msra.mxu0 %v1539_v60  ;;  %v1644_v5 = vld [vmem:[%s8015_s0 + $0x2a78] sm:$0xff]  ;;  %v1515_v32 = vld [vmem:[%s8015_s0 + $0x2670] sm:$0xff] }
 0x4e0   : > { %6290 = vmatpush2.msra.mxu1 %v1667_v14  ;;  %6220 = vmatprep.subr.mxu0 %v1536_v26  ;;  %v1643_v62 = vld [vmem:[%s8015_s0 + $0x2a70] sm:$0xff]  ;;  %v1512_v43 = vld [vmem:[%s8015_s0 + $0x2658] sm:$0xff] }
 0x4e1   : > { %6291 = vmatprep.subr.mxu1 %v1664_v52  ;;  %6221 = vmatpush2.msra.mxu0 %v1535_v42  ;;  %v1640_v19 = vld [vmem:[%s8015_s0 + $0x2a58] sm:$0xff]  ;;  %v1511_v10 = vld [vmem:[%s8015_s0 + $0x2650] sm:$0xff] }
 0x4e2   : > { %6292 = vmatpush2.msra.mxu1 %v1663_v20  ;;  %6222 = vmatprep.subr.mxu0 %v1532_v22  ;;  %v1639_v1 = vld [vmem:[%s8015_s0 + $0x2a50] sm:$0xff]  ;;  %v1508_v46 = vld [vmem:[%s8015_s0 + $0x2638] sm:$0xff] }
 0x4e3   : > { %6293 = vmatprep.subr.mxu1 %v1660_v33  ;;  %6223 = vmatpush2.msra.mxu0 %v1531_v29  ;;  %v1636_v60 = vld [vmem:[%s8015_s0 + $0x2a38] sm:$0xff]  ;;  %v1507_v14 = vld [vmem:[%s8015_s0 + $0x2630] sm:$0xff] }
 0x4e4   : > { %6294 = vmatpush2.msra.mxu1 %v1659_v35  ;;  %6224 = vmatprep.subr.mxu0 %v1528_v41  ;;  %v1635_v26 = vld [vmem:[%s8015_s0 + $0x2a30] sm:$0xff]  ;;  %v1504_v52 = vld [vmem:[%s8015_s0 + $0x2618] sm:$0xff] }
 0x4e5   : > { %6295 = vmatprep.subr.mxu1 %v1656_v25  ;;  %6225 = vmatpush2.msra.mxu0 %v1527_v21  ;;  %v1632_v42 = vld [vmem:[%s8015_s0 + $0x2a18] sm:$0xff]  ;;  %v1503_v20 = vld [vmem:[%s8015_s0 + $0x2610] sm:$0xff] }
 0x4e6   : > { %6296 = vmatpush2.msra.mxu1 %v1655_v23  ;;  %6226 = vmatprep.subr.mxu0 %v1524_v44  ;;  %v1631_v22 = vld [vmem:[%s8015_s0 + $0x2a10] sm:$0xff]  ;;  %v1756_v33 = vld [vmem:[%s8015_s0 + $0x2df8] sm:$0xff] }
 0x4e7   : > { %6297 = vmatprep.subr.mxu1 %v1652_v53  ;;  %6227 = vmatpush2.msra.mxu0 %v1523_v9  ;;  %v1884_v29 = vld [vmem:[%s8015_s0 + $0x31f8] sm:$0xff]  ;;  %v1755_v35 = vld [vmem:[%s8015_s0 + $0x2df0] sm:$0xff] }
 0x4e8   : > { %6298 = vmatpush2.msra.mxu1 %v1651_v54  ;;  %6228 = vmatprep.subr.mxu0 %v1520_v8  ;;  %v1883_v41 = vld [vmem:[%s8015_s0 + $0x31f0] sm:$0xff]  ;;  %v1752_v25 = vld [vmem:[%s8015_s0 + $0x2dd8] sm:$0xff] }
 0x4e9   : > { %6299 = vmatprep.subr.mxu1 %v1648_v6  ;;  %6229 = vmatpush2.msra.mxu0 %v1519_v57  ;;  %v1880_v21 = vld [vmem:[%s8015_s0 + $0x31d8] sm:$0xff]  ;;  %v1879_v23 = vld [vmem:[%s8015_s0 + $0x31d0] sm:$0xff] }
 0x4ea   : > { %6300 = vmatpush2.msra.mxu1 %v1647_v45  ;;  %6230 = vmatprep.subr.mxu0 %v1516_v48  ;;  %v1876_v44 = vld [vmem:[%s8015_s0 + $0x31b8] sm:$0xff]  ;;  %v1875_v53 = vld [vmem:[%s8015_s0 + $0x31b0] sm:$0xff] }
 0x4eb   : > { %6301 = vmatprep.subr.mxu1 %v1644_v5  ;;  %6231 = vmatpush2.msra.mxu0 %v1515_v32  ;;  %v1744_v9 = vld [vmem:[%s8015_s0 + $0x2d98] sm:$0xff]  ;;  %v1743_v54 = vld [vmem:[%s8015_s0 + $0x2d90] sm:$0xff] }
 0x4ec   : > { %6302 = vmatpush2.msra.mxu1 %v1643_v62  ;;  %6232 = vmatprep.subr.mxu0 %v1512_v43  ;;  %v1871_v8 = vld [vmem:[%s8015_s0 + $0x3190] sm:$0xff]  ;;  %v1740_v6 = vld [vmem:[%s8015_s0 + $0x2d78] sm:$0xff] }
 0x4ed   : > { %6303 = vmatprep.subr.mxu1 %v1640_v19  ;;  %6233 = vmatpush2.msra.mxu0 %v1511_v10  ;;  %v1868_v57 = vld [vmem:[%s8015_s0 + $0x3178] sm:$0xff]  ;;  %v1739_v45 = vld [vmem:[%s8015_s0 + $0x2d70] sm:$0xff] }
 0x4ee   : > { %6304 = vmatpush2.msra.mxu1 %v1639_v1  ;;  %6234 = vmatprep.subr.mxu0 %v1508_v46  ;;  %v1867_v48 = vld [vmem:[%s8015_s0 + $0x3170] sm:$0xff]  ;;  %v1736_v5 = vld [vmem:[%s8015_s0 + $0x2d58] sm:$0xff] }
 0x4ef   : > { %6305 = vmatprep.subr.mxu1 %v1636_v60  ;;  %6235 = vmatpush2.msra.mxu0 %v1507_v14  ;;  %v1864_v32 = vld [vmem:[%s8015_s0 + $0x3158] sm:$0xff]  ;;  %v1735_v62 = vld [vmem:[%s8015_s0 + $0x2d50] sm:$0xff] }
 0x4f0   : > { %6306 = vmatpush2.msra.mxu1 %v1635_v26  ;;  %6236 = vmatprep.subr.mxu0 %v1504_v52  ;;  %v1863_v43 = vld [vmem:[%s8015_s0 + $0x3150] sm:$0xff]  ;;  %v1732_v19 = vld [vmem:[%s8015_s0 + $0x2d38] sm:$0xff] }
 0x4f1   : > { %6307 = vmatprep.subr.mxu1 %v1632_v42  ;;  %6237 = vmatpush2.msra.mxu0 %v1503_v20  ;;  %v1860_v10 = vld [vmem:[%s8015_s0 + $0x3138] sm:$0xff]  ;;  %v1731_v1 = vld [vmem:[%s8015_s0 + $0x2d30] sm:$0xff] }
 0x4f2   : > { %6238 = vmatprep.mubr.f32.mxu0 %v8788_v28  ;;  %6308 = vmatpush2.msra.mxu1 %v1631_v22  ;;  %v1751_v28 = vld [vmem:[%s8015_s0 + $0x2dd0] sm:$0xff]  ;;  %v1728_v60 = vld [vmem:[%s8015_s0 + $0x2d18] sm:$0xff] }
 0x4f3   : > { %6239 = vmatmul.mubr.f32.vlgmr.msra.gmra.mxu0 %v8774_v15  ;;  %6309 = vmatprep.mubr.f32.mxu1 %v8929_v36  ;;  %v1748_v15 = vld [vmem:[%s8015_s0 + $0x2db8] sm:$0xff]  ;;  %v1747_v36 = vld [vmem:[%s8015_s0 + $0x2db0] sm:$0xff] }
 0x4f4   : > { %6316 = vmatprep.subr.mxu0 %v1756_v33  ;;  %6387 = vmatprep.subr.mxu1 %v1884_v29  ;;  %v1859_v46 = vld [vmem:[%s8015_s0 + $0x3130] sm:$0xff]  ;;  %v1856_v14 = vld [vmem:[%s8015_s0 + $0x3118] sm:$0xff] }
 0x4f5   : > { %6310 = vmatmul.mubr.f32.vlgmr.msra.gmra.mxu1 %v8914_v17  ;;  %6317 = vmatpush1.msra.mxu0 %v1755_v35  ;;  %v1872_v17 = vld [vmem:[%s8015_s0 + $0x3198] sm:$0xff]  ;;  %v1727_v26 = vld [vmem:[%s8015_s0 + $0x2d10] sm:$0xff] }
 0x4f6   : > { %6388 = vmatpush1.msra.mxu1 %v1883_v41  ;;  %6318 = vmatprep.subr.mxu0 %v1752_v25  ;;  %v1855_v52 = vld [vmem:[%s8015_s0 + $0x3110] sm:$0xff]  ;;  %v1724_v42 = vld [vmem:[%s8015_s0 + $0x2cf8] sm:$0xff] }
 0x4f7   : > { %6389 = vmatprep.subr.mxu1 %v1880_v21  ;;  %6319 = vmatpush1.msra.mxu0 %v1751_v28  ;;  %v1852_v20 = vld [vmem:[%s8015_s0 + $0x30f8] sm:$0xff]  ;;  %v1723_v22 = vld [vmem:[%s8015_s0 + $0x2cf0] sm:$0xff] }
 0x4f8   : > { %6390 = vmatpush1.msra.mxu1 %v1879_v23  ;;  %6320 = vmatprep.subr.mxu0 %v1748_v15  ;;  %v1851_v33 = vld [vmem:[%s8015_s0 + $0x30f0] sm:$0xff]  ;;  %v1720_v29 = vld [vmem:[%s8015_s0 + $0x2cd8] sm:$0xff] }
 0x4f9   : > { %6391 = vmatprep.subr.mxu1 %v1876_v44  ;;  %6321 = vmatpush1.msra.mxu0 %v1747_v36  ;;  %v1848_v35 = vld [vmem:[%s8015_s0 + $0x30d8] sm:$0xff]  ;;  %v1719_v41 = vld [vmem:[%s8015_s0 + $0x2cd0] sm:$0xff] }
 0x4fa   : > { %6392 = vmatpush1.msra.mxu1 %v1875_v53  ;;  %6322 = vmatprep.subr.mxu0 %v1744_v9  ;;  %v1847_v25 = vld [vmem:[%s8015_s0 + $0x30d0] sm:$0xff]  ;;  %v1716_v21 = vld [vmem:[%s8015_s0 + $0x2cb8] sm:$0xff] }
 0x4fb   : > { %6393 = vmatprep.subr.mxu1 %v1872_v17  ;;  %6323 = vmatpush1.msra.mxu0 %v1743_v54  ;;  %v1844_v28 = vld [vmem:[%s8015_s0 + $0x30b8] sm:$0xff]  ;;  %v1715_v23 = vld [vmem:[%s8015_s0 + $0x2cb0] sm:$0xff] }
 0x4fc   : > { %6394 = vmatpush1.msra.mxu1 %v1871_v8  ;;  %6324 = vmatprep.subr.mxu0 %v1740_v6  ;;  %v1843_v15 = vld [vmem:[%s8015_s0 + $0x30b0] sm:$0xff]  ;;  %v1712_v44 = vld [vmem:[%s8015_s0 + $0x2c98] sm:$0xff] }
 0x4fd   : > { %6395 = vmatprep.subr.mxu1 %v1868_v57  ;;  %6325 = vmatpush1.msra.mxu0 %v1739_v45  ;;  %v1840_v36 = vld [vmem:[%s8015_s0 + $0x3098] sm:$0xff]  ;;  %v1711_v53 = vld [vmem:[%s8015_s0 + $0x2c90] sm:$0xff] }
 0x4fe   : > { %6396 = vmatpush1.msra.mxu1 %v1867_v48  ;;  %6326 = vmatprep.subr.mxu0 %v1736_v5  ;;  %v1839_v9 = vld [vmem:[%s8015_s0 + $0x3090] sm:$0xff]  ;;  %v1708_v17 = vld [vmem:[%s8015_s0 + $0x2c78] sm:$0xff] }
 0x4ff   : > { %6397 = vmatprep.subr.mxu1 %v1864_v32  ;;  %6327 = vmatpush1.msra.mxu0 %v1735_v62  ;;  %v1836_v54 = vld [vmem:[%s8015_s0 + $0x3078] sm:$0xff]  ;;  %v1707_v8 = vld [vmem:[%s8015_s0 + $0x2c70] sm:$0xff] }
 0x500   : > { %6398 = vmatpush1.msra.mxu1 %v1863_v43  ;;  %6328 = vmatprep.subr.mxu0 %v1732_v19  ;;  %v1835_v6 = vld [vmem:[%s8015_s0 + $0x3070] sm:$0xff]  ;;  %v1704_v57 = vld [vmem:[%s8015_s0 + $0x2c58] sm:$0xff] }
 0x501   : > { %6399 = vmatprep.subr.mxu1 %v1860_v10  ;;  %6329 = vmatpush1.msra.mxu0 %v1731_v1  ;;  %v1832_v45 = vld [vmem:[%s8015_s0 + $0x3058] sm:$0xff]  ;;  %v1703_v48 = vld [vmem:[%s8015_s0 + $0x2c50] sm:$0xff] }
 0x502   : > { %6400 = vmatpush1.msra.mxu1 %v1859_v46  ;;  %6330 = vmatprep.subr.mxu0 %v1728_v60  ;;  %v1831_v5 = vld [vmem:[%s8015_s0 + $0x3050] sm:$0xff]  ;;  %v1700_v32 = vld [vmem:[%s8015_s0 + $0x2c38] sm:$0xff] }
 0x503   : > { %6401 = vmatprep.subr.mxu1 %v1856_v14  ;;  %6331 = vmatpush1.msra.mxu0 %v1727_v26  ;;  %v1828_v62 = vld [vmem:[%s8015_s0 + $0x3038] sm:$0xff]  ;;  %v1699_v43 = vld [vmem:[%s8015_s0 + $0x2c30] sm:$0xff] }
 0x504   : > { %6402 = vmatpush1.msra.mxu1 %v1855_v52  ;;  %6332 = vmatprep.subr.mxu0 %v1724_v42  ;;  %v1827_v19 = vld [vmem:[%s8015_s0 + $0x3030] sm:$0xff]  ;;  %v1696_v10 = vld [vmem:[%s8015_s0 + $0x2c18] sm:$0xff] }
 0x505   : > { %6403 = vmatprep.subr.mxu1 %v1852_v20  ;;  %6333 = vmatpush1.msra.mxu0 %v1723_v22  ;;  %v1824_v1 = vld [vmem:[%s8015_s0 + $0x3018] sm:$0xff]  ;;  %v1695_v46 = vld [vmem:[%s8015_s0 + $0x2c10] sm:$0xff] }
 0x506   : > { %6404 = vmatpush1.msra.mxu1 %v1851_v33  ;;  %6334 = vmatprep.subr.mxu0 %v1720_v29  ;;  %v1823_v60 = vld [vmem:[%s8015_s0 + $0x3010] sm:$0xff]  ;;  %v1820_v14 = vld [vmem:[%s8015_s0 + $0x2ff8] sm:$0xff] }
 0x507   : > { %6405 = vmatprep.subr.mxu1 %v1848_v35  ;;  %6335 = vmatpush1.msra.mxu0 %v1719_v41  ;;  %v1948_v26 = vld [vmem:[%s8015_s0 + $0x33f8] sm:$0xff]  ;;  %v1819_v52 = vld [vmem:[%s8015_s0 + $0x2ff0] sm:$0xff] }
 0x508   : > { %6406 = vmatpush1.msra.mxu1 %v1847_v25  ;;  %6336 = vmatprep.subr.mxu0 %v1716_v21  ;;  %v1947_v42 = vld [vmem:[%s8015_s0 + $0x33f0] sm:$0xff]  ;;  %v1816_v20 = vld [vmem:[%s8015_s0 + $0x2fd8] sm:$0xff] }
 0x509   : > { %6407 = vmatprep.subr.mxu1 %v1844_v28  ;;  %6337 = vmatpush1.msra.mxu0 %v1715_v23  ;;  %v1944_v22 = vld [vmem:[%s8015_s0 + $0x33d8] sm:$0xff]  ;;  %v1815_v33 = vld [vmem:[%s8015_s0 + $0x2fd0] sm:$0xff] }
 0x50a   : > { %6408 = vmatpush1.msra.mxu1 %v1843_v15  ;;  %6338 = vmatprep.subr.mxu0 %v1712_v44  ;;  %v1943_v29 = vld [vmem:[%s8015_s0 + $0x33d0] sm:$0xff]  ;;  %v1812_v35 = vld [vmem:[%s8015_s0 + $0x2fb8] sm:$0xff] }
 0x50b   : > { %6409 = vmatprep.subr.mxu1 %v1840_v36  ;;  %6339 = vmatpush1.msra.mxu0 %v1711_v53  ;;  %v1940_v41 = vld [vmem:[%s8015_s0 + $0x33b8] sm:$0xff]  ;;  %v1811_v25 = vld [vmem:[%s8015_s0 + $0x2fb0] sm:$0xff] }
 0x50c   : > { %6410 = vmatpush1.msra.mxu1 %v1839_v9  ;;  %6340 = vmatprep.subr.mxu0 %v1708_v17  ;;  %v1939_v21 = vld [vmem:[%s8015_s0 + $0x33b0] sm:$0xff]  ;;  %v1808_v28 = vld [vmem:[%s8015_s0 + $0x2f98] sm:$0xff] }
 0x50d   : > { %6411 = vmatprep.subr.mxu1 %v1836_v54  ;;  %6341 = vmatpush1.msra.mxu0 %v1707_v8  ;;  %v1936_v23 = vld [vmem:[%s8015_s0 + $0x3398] sm:$0xff]  ;;  %v1807_v15 = vld [vmem:[%s8015_s0 + $0x2f90] sm:$0xff] }
 0x50e   : > { %6412 = vmatpush1.msra.mxu1 %v1835_v6  ;;  %6342 = vmatprep.subr.mxu0 %v1704_v57  ;;  %v1935_v44 = vld [vmem:[%s8015_s0 + $0x3390] sm:$0xff]  ;;  %v1804_v36 = vld [vmem:[%s8015_s0 + $0x2f78] sm:$0xff] }
 0x50f   : > { %6413 = vmatprep.subr.mxu1 %v1832_v45  ;;  %6343 = vmatpush1.msra.mxu0 %v1703_v48  ;;  %v1932_v53 = vld [vmem:[%s8015_s0 + $0x3378] sm:$0xff]  ;;  %v1803_v9 = vld [vmem:[%s8015_s0 + $0x2f70] sm:$0xff] }
 0x510   : > { %6414 = vmatpush1.msra.mxu1 %v1831_v5  ;;  %6344 = vmatprep.subr.mxu0 %v1700_v32  ;;  %v1931_v17 = vld [vmem:[%s8015_s0 + $0x3370] sm:$0xff]  ;;  %v1800_v54 = vld [vmem:[%s8015_s0 + $0x2f58] sm:$0xff] }
 0x511   : > { %6415 = vmatprep.subr.mxu1 %v1828_v62  ;;  %6345 = vmatpush1.msra.mxu0 %v1699_v43  ;;  %v1928_v8 = vld [vmem:[%s8015_s0 + $0x3358] sm:$0xff]  ;;  %v1799_v6 = vld [vmem:[%s8015_s0 + $0x2f50] sm:$0xff] }
 0x512   : > { %6416 = vmatpush1.msra.mxu1 %v1827_v19  ;;  %6346 = vmatprep.subr.mxu0 %v1696_v10  ;;  %v1927_v57 = vld [vmem:[%s8015_s0 + $0x3350] sm:$0xff]  ;;  %v1796_v45 = vld [vmem:[%s8015_s0 + $0x2f38] sm:$0xff] }
 0x513   : > { %6417 = vmatprep.subr.mxu1 %v1824_v1  ;;  %6347 = vmatpush1.msra.mxu0 %v1695_v46  ;;  %v1924_v48 = vld [vmem:[%s8015_s0 + $0x3338] sm:$0xff]  ;;  %v1795_v5 = vld [vmem:[%s8015_s0 + $0x2f30] sm:$0xff] }
 0x514   : > { %6418 = vmatpush1.msra.mxu1 %v1823_v60  ;;  %6348 = vmatprep.subr.mxu0 %v1820_v14  ;;  %v1923_v32 = vld [vmem:[%s8015_s0 + $0x3330] sm:$0xff]  ;;  %v1792_v62 = vld [vmem:[%s8015_s0 + $0x2f18] sm:$0xff] }
 0x515   : > { %6419 = vmatprep.subr.mxu1 %v1948_v26  ;;  %6349 = vmatpush2.msra.mxu0 %v1819_v52  ;;  %v1920_v43 = vld [vmem:[%s8015_s0 + $0x3318] sm:$0xff]  ;;  %v1791_v19 = vld [vmem:[%s8015_s0 + $0x2f10] sm:$0xff] }
 0x516   : > { %6420 = vmatpush2.msra.mxu1 %v1947_v42  ;;  %6350 = vmatprep.subr.mxu0 %v1816_v20  ;;  %v1919_v10 = vld [vmem:[%s8015_s0 + $0x3310] sm:$0xff]  ;;  %v1788_v1 = vld [vmem:[%s8015_s0 + $0x2ef8] sm:$0xff] }
 0x517   : > { %6421 = vmatprep.subr.mxu1 %v1944_v22  ;;  %6351 = vmatpush2.msra.mxu0 %v1815_v33  ;;  %v1916_v46 = vld [vmem:[%s8015_s0 + $0x32f8] sm:$0xff]  ;;  %v1787_v60 = vld [vmem:[%s8015_s0 + $0x2ef0] sm:$0xff] }
 0x518   : > { %6422 = vmatpush2.msra.mxu1 %v1943_v29  ;;  %6352 = vmatprep.subr.mxu0 %v1812_v35  ;;  %v1915_v14 = vld [vmem:[%s8015_s0 + $0x32f0] sm:$0xff]  ;;  %v1784_v26 = vld [vmem:[%s8015_s0 + $0x2ed8] sm:$0xff] }
 0x519   : > { %6423 = vmatprep.subr.mxu1 %v1940_v41  ;;  %6353 = vmatpush2.msra.mxu0 %v1811_v25  ;;  %v1912_v52 = vld [vmem:[%s8015_s0 + $0x32d8] sm:$0xff]  ;;  %v1783_v42 = vld [vmem:[%s8015_s0 + $0x2ed0] sm:$0xff] }
 0x51a   : > { %6424 = vmatpush2.msra.mxu1 %v1939_v21  ;;  %6354 = vmatprep.subr.mxu0 %v1808_v28  ;;  %v1911_v20 = vld [vmem:[%s8015_s0 + $0x32d0] sm:$0xff]  ;;  %v1780_v22 = vld [vmem:[%s8015_s0 + $0x2eb8] sm:$0xff] }
 0x51b   : > { %6425 = vmatprep.subr.mxu1 %v1936_v23  ;;  %6355 = vmatpush2.msra.mxu0 %v1807_v15  ;;  %v1908_v33 = vld [vmem:[%s8015_s0 + $0x32b8] sm:$0xff]  ;;  %v1779_v29 = vld [vmem:[%s8015_s0 + $0x2eb0] sm:$0xff] }
 0x51c   : > { %6426 = vmatpush2.msra.mxu1 %v1935_v44  ;;  %6356 = vmatprep.subr.mxu0 %v1804_v36  ;;  %v1907_v35 = vld [vmem:[%s8015_s0 + $0x32b0] sm:$0xff]  ;;  %v1776_v41 = vld [vmem:[%s8015_s0 + $0x2e98] sm:$0xff] }
 0x51d   : > { %6427 = vmatprep.subr.mxu1 %v1932_v53  ;;  %6357 = vmatpush2.msra.mxu0 %v1803_v9  ;;  %v1904_v25 = vld [vmem:[%s8015_s0 + $0x3298] sm:$0xff]  ;;  %v1775_v21 = vld [vmem:[%s8015_s0 + $0x2e90] sm:$0xff] }
 0x51e   : > { %6428 = vmatpush2.msra.mxu1 %v1931_v17  ;;  %6358 = vmatprep.subr.mxu0 %v1800_v54  ;;  %v1903_v28 = vld [vmem:[%s8015_s0 + $0x3290] sm:$0xff]  ;;  %v1772_v23 = vld [vmem:[%s8015_s0 + $0x2e78] sm:$0xff] }
 0x51f   : > { %6429 = vmatprep.subr.mxu1 %v1928_v8  ;;  %6359 = vmatpush2.msra.mxu0 %v1799_v6  ;;  %v1900_v15 = vld [vmem:[%s8015_s0 + $0x3278] sm:$0xff]  ;;  %v1771_v44 = vld [vmem:[%s8015_s0 + $0x2e70] sm:$0xff] }
 0x520   : > { %6430 = vmatpush2.msra.mxu1 %v1927_v57  ;;  %6360 = vmatprep.subr.mxu0 %v1796_v45  ;;  %v1899_v36 = vld [vmem:[%s8015_s0 + $0x3270] sm:$0xff]  ;;  %v1768_v53 = vld [vmem:[%s8015_s0 + $0x2e58] sm:$0xff] }
 0x521   : > { %6431 = vmatprep.subr.mxu1 %v1924_v48  ;;  %6361 = vmatpush2.msra.mxu0 %v1795_v5  ;;  %v1896_v9 = vld [vmem:[%s8015_s0 + $0x3258] sm:$0xff]  ;;  %v1767_v17 = vld [vmem:[%s8015_s0 + $0x2e50] sm:$0xff] }
 0x522   : > { %6432 = vmatpush2.msra.mxu1 %v1923_v32  ;;  %6362 = vmatprep.subr.mxu0 %v1792_v62  ;;  %v1895_v54 = vld [vmem:[%s8015_s0 + $0x3250] sm:$0xff]  ;;  %v1764_v8 = vld [vmem:[%s8015_s0 + $0x2e38] sm:$0xff] }
 0x523   : > { %6433 = vmatprep.subr.mxu1 %v1920_v43  ;;  %6363 = vmatpush2.msra.mxu0 %v1791_v19  ;;  %v1892_v6 = vld [vmem:[%s8015_s0 + $0x3238] sm:$0xff]  ;;  %v1763_v57 = vld [vmem:[%s8015_s0 + $0x2e30] sm:$0xff] }
 0x524   : > { %6434 = vmatpush2.msra.mxu1 %v1919_v10  ;;  %6364 = vmatprep.subr.mxu0 %v1788_v1  ;;  %v1891_v45 = vld [vmem:[%s8015_s0 + $0x3230] sm:$0xff]  ;;  %v1760_v48 = vld [vmem:[%s8015_s0 + $0x2e18] sm:$0xff] }
 0x525   : > { %6435 = vmatprep.subr.mxu1 %v1916_v46  ;;  %6365 = vmatpush2.msra.mxu0 %v1787_v60  ;;  %v1888_v5 = vld [vmem:[%s8015_s0 + $0x3218] sm:$0xff]  ;;  %v1759_v32 = vld [vmem:[%s8015_s0 + $0x2e10] sm:$0xff] }
 0x526   : > { %6436 = vmatpush2.msra.mxu1 %v1915_v14  ;;  %6366 = vmatprep.subr.mxu0 %v1784_v26  ;;  %v1887_v62 = vld [vmem:[%s8015_s0 + $0x3210] sm:$0xff]  ;;  %v2012_v43 = vld [vmem:[%s8015_s0 + $0x35f8] sm:$0xff] }
 0x527   : > { %6437 = vmatprep.subr.mxu1 %v1912_v52  ;;  %6367 = vmatpush2.msra.mxu0 %v1783_v42  ;;  %v2140_v19 = vld [vmem:[%s8015_s0 + $0x39f8] sm:$0xff]  ;;  %v2011_v10 = vld [vmem:[%s8015_s0 + $0x35f0] sm:$0xff] }
 0x528   : > { %6438 = vmatpush2.msra.mxu1 %v1911_v20  ;;  %6368 = vmatprep.subr.mxu0 %v1780_v22  ;;  %v2139_v1 = vld [vmem:[%s8015_s0 + $0x39f0] sm:$0xff]  ;;  %v2008_v46 = vld [vmem:[%s8015_s0 + $0x35d8] sm:$0xff] }
 0x529   : > { %6439 = vmatprep.subr.mxu1 %v1908_v33  ;;  %6369 = vmatpush2.msra.mxu0 %v1779_v29  ;;  %v2136_v60 = vld [vmem:[%s8015_s0 + $0x39d8] sm:$0xff]  ;;  %v2135_v14 = vld [vmem:[%s8015_s0 + $0x39d0] sm:$0xff] }
 0x52a   : > { %6440 = vmatpush2.msra.mxu1 %v1907_v35  ;;  %6370 = vmatprep.subr.mxu0 %v1776_v41  ;;  %v2132_v26 = vld [vmem:[%s8015_s0 + $0x39b8] sm:$0xff]  ;;  %v2131_v52 = vld [vmem:[%s8015_s0 + $0x39b0] sm:$0xff] }
 0x52b   : > { %6441 = vmatprep.subr.mxu1 %v1904_v25  ;;  %6371 = vmatpush2.msra.mxu0 %v1775_v21  ;;  %v2000_v42 = vld [vmem:[%s8015_s0 + $0x3598] sm:$0xff]  ;;  %v1999_v20 = vld [vmem:[%s8015_s0 + $0x3590] sm:$0xff] }
 0x52c   : > { %6442 = vmatpush2.msra.mxu1 %v1903_v28  ;;  %6372 = vmatprep.subr.mxu0 %v1772_v23  ;;  %v2127_v22 = vld [vmem:[%s8015_s0 + $0x3990] sm:$0xff]  ;;  %v1996_v33 = vld [vmem:[%s8015_s0 + $0x3578] sm:$0xff] }
 0x52d   : > { %6443 = vmatprep.subr.mxu1 %v1900_v15  ;;  %6373 = vmatpush2.msra.mxu0 %v1771_v44  ;;  %v2124_v29 = vld [vmem:[%s8015_s0 + $0x3978] sm:$0xff]  ;;  %v1995_v35 = vld [vmem:[%s8015_s0 + $0x3570] sm:$0xff] }
 0x52e   : > { %6444 = vmatpush2.msra.mxu1 %v1899_v36  ;;  %6374 = vmatprep.subr.mxu0 %v1768_v53  ;;  %v2123_v41 = vld [vmem:[%s8015_s0 + $0x3970] sm:$0xff]  ;;  %v1992_v25 = vld [vmem:[%s8015_s0 + $0x3558] sm:$0xff] }
 0x52f   : > { %6445 = vmatprep.subr.mxu1 %v1896_v9  ;;  %6375 = vmatpush2.msra.mxu0 %v1767_v17  ;;  %v2120_v21 = vld [vmem:[%s8015_s0 + $0x3958] sm:$0xff]  ;;  %v1991_v28 = vld [vmem:[%s8015_s0 + $0x3550] sm:$0xff] }
 0x530   : > { %6446 = vmatpush2.msra.mxu1 %v1895_v54  ;;  %6376 = vmatprep.subr.mxu0 %v1764_v8  ;;  %v2119_v23 = vld [vmem:[%s8015_s0 + $0x3950] sm:$0xff]  ;;  %v1988_v15 = vld [vmem:[%s8015_s0 + $0x3538] sm:$0xff] }
 0x531   : > { %6447 = vmatprep.subr.mxu1 %v1892_v6  ;;  %6377 = vmatpush2.msra.mxu0 %v1763_v57  ;;  %v2116_v44 = vld [vmem:[%s8015_s0 + $0x3938] sm:$0xff]  ;;  %v1987_v36 = vld [vmem:[%s8015_s0 + $0x3530] sm:$0xff] }
 0x532   : > { %6448 = vmatpush2.msra.mxu1 %v1891_v45  ;;  %6378 = vmatprep.subr.mxu0 %v1760_v48  ;;  %v2115_v53 = vld [vmem:[%s8015_s0 + $0x3930] sm:$0xff]  ;;  %v1984_v9 = vld [vmem:[%s8015_s0 + $0x3518] sm:$0xff] }
 0x533   : > { %6449 = vmatprep.subr.mxu1 %v1888_v5  ;;  %6379 = vmatpush2.msra.mxu0 %v1759_v32  ;;  %v2112_v17 = vld [vmem:[%s8015_s0 + $0x3918] sm:$0xff]  ;;  %v1983_v54 = vld [vmem:[%s8015_s0 + $0x3510] sm:$0xff] }
 0x534   : > { %6380 = vmatprep.mubr.f32.mxu0 %v8935_v39  ;;  %6450 = vmatpush2.msra.mxu1 %v1887_v62  ;;  %v2007_v39 = vld [vmem:[%s8015_s0 + $0x35d0] sm:$0xff]  ;;  %v1980_v6 = vld [vmem:[%s8015_s0 + $0x34f8] sm:$0xff] }
 0x535   : > { %6381 = vmatmul.mubr.f32.vlgmr.msra.gmra.mxu0 %v8921_v27  ;;  %6451 = vmatprep.mubr.f32.mxu1 %v9076_v63  ;;  %v2004_v27 = vld [vmem:[%s8015_s0 + $0x35b8] sm:$0xff]  ;;  %v2003_v63 = vld [vmem:[%s8015_s0 + $0x35b0] sm:$0xff] }
 0x536   : > { %6458 = vmatprep.subr.mxu0 %v2012_v43  ;;  %6529 = vmatprep.subr.mxu1 %v2140_v19  ;;  %v2111_v8 = vld [vmem:[%s8015_s0 + $0x3910] sm:$0xff]  ;;  %v2108_v57 = vld [vmem:[%s8015_s0 + $0x38f8] sm:$0xff] }
 0x537   : > { %6452 = vmatmul.mubr.f32.vlgmr.msra.gmra.mxu1 %v9061_v49  ;;  %6459 = vmatpush1.msra.mxu0 %v2011_v10  ;;  %v2128_v49 = vld [vmem:[%s8015_s0 + $0x3998] sm:$0xff]  ;;  %v1979_v45 = vld [vmem:[%s8015_s0 + $0x34f0] sm:$0xff] }
 0x538   : > { %6530 = vmatpush1.msra.mxu1 %v2139_v1  ;;  %6460 = vmatprep.subr.mxu0 %v2008_v46  ;;  %v2107_v48 = vld [vmem:[%s8015_s0 + $0x38f0] sm:$0xff]  ;;  %v1976_v5 = vld [vmem:[%s8015_s0 + $0x34d8] sm:$0xff] }
 0x539   : > { %6531 = vmatprep.subr.mxu1 %v2136_v60  ;;  %6461 = vmatpush1.msra.mxu0 %v2007_v39  ;;  %v2104_v32 = vld [vmem:[%s8015_s0 + $0x38d8] sm:$0xff]  ;;  %v1975_v62 = vld [vmem:[%s8015_s0 + $0x34d0] sm:$0xff] }
 0x53a   : > { %6532 = vmatpush1.msra.mxu1 %v2135_v14  ;;  %6462 = vmatprep.subr.mxu0 %v2004_v27  ;;  %v2103_v43 = vld [vmem:[%s8015_s0 + $0x38d0] sm:$0xff]  ;;  %v1972_v19 = vld [vmem:[%s8015_s0 + $0x34b8] sm:$0xff] }
 0x53b   : > { %6533 = vmatprep.subr.mxu1 %v2132_v26  ;;  %6463 = vmatpush1.msra.mxu0 %v2003_v63  ;;  %v2100_v10 = vld [vmem:[%s8015_s0 + $0x38b8] sm:$0xff]  ;;  %v1971_v1 = vld [vmem:[%s8015_s0 + $0x34b0] sm:$0xff] }
 0x53c   : > { %6534 = vmatpush1.msra.mxu1 %v2131_v52  ;;  %6464 = vmatprep.subr.mxu0 %v2000_v42  ;;  %v2099_v46 = vld [vmem:[%s8015_s0 + $0x38b0] sm:$0xff]  ;;  %v1968_v60 = vld [vmem:[%s8015_s0 + $0x3498] sm:$0xff] }
 0x53d   : > { %6535 = vmatprep.subr.mxu1 %v2128_v49  ;;  %6465 = vmatpush1.msra.mxu0 %v1999_v20  ;;  %v2096_v39 = vld [vmem:[%s8015_s0 + $0x3898] sm:$0xff]  ;;  %v1967_v14 = vld [vmem:[%s8015_s0 + $0x3490] sm:$0xff] }
 0x53e   : > { %6536 = vmatpush1.msra.mxu1 %v2127_v22  ;;  %6466 = vmatprep.subr.mxu0 %v1996_v33  ;;  %v2095_v27 = vld [vmem:[%s8015_s0 + $0x3890] sm:$0xff]  ;;  %v1964_v26 = vld [vmem:[%s8015_s0 + $0x3478] sm:$0xff] }
 0x53f   : > { %6537 = vmatprep.subr.mxu1 %v2124_v29  ;;  %6467 = vmatpush1.msra.mxu0 %v1995_v35  ;;  %v2092_v63 = vld [vmem:[%s8015_s0 + $0x3878] sm:$0xff]  ;;  %v1963_v52 = vld [vmem:[%s8015_s0 + $0x3470] sm:$0xff] }
 0x540   : > { %6538 = vmatpush1.msra.mxu1 %v2123_v41  ;;  %6468 = vmatprep.subr.mxu0 %v1992_v25  ;;  %v2091_v42 = vld [vmem:[%s8015_s0 + $0x3870] sm:$0xff]  ;;  %v1960_v49 = vld [vmem:[%s8015_s0 + $0x3458] sm:$0xff] }
 0x541   : > { %6539 = vmatprep.subr.mxu1 %v2120_v21  ;;  %6469 = vmatpush1.msra.mxu0 %v1991_v28  ;;  %v2088_v20 = vld [vmem:[%s8015_s0 + $0x3858] sm:$0xff]  ;;  %v1959_v22 = vld [vmem:[%s8015_s0 + $0x3450] sm:$0xff] }
 0x542   : > { %6540 = vmatpush1.msra.mxu1 %v2119_v23  ;;  %6470 = vmatprep.subr.mxu0 %v1988_v15  ;;  %v2087_v33 = vld [vmem:[%s8015_s0 + $0x3850] sm:$0xff]  ;;  %v1956_v29 = vld [vmem:[%s8015_s0 + $0x3438] sm:$0xff] }
 0x543   : > { %6541 = vmatprep.subr.mxu1 %v2116_v44  ;;  %6471 = vmatpush1.msra.mxu0 %v1987_v36  ;;  %v2084_v35 = vld [vmem:[%s8015_s0 + $0x3838] sm:$0xff]  ;;  %v1955_v41 = vld [vmem:[%s8015_s0 + $0x3430] sm:$0xff] }
 0x544   : > { %6542 = vmatpush1.msra.mxu1 %v2115_v53  ;;  %6472 = vmatprep.subr.mxu0 %v1984_v9  ;;  %v2083_v25 = vld [vmem:[%s8015_s0 + $0x3830] sm:$0xff]  ;;  %v1952_v21 = vld [vmem:[%s8015_s0 + $0x3418] sm:$0xff] }
 0x545   : > { %6543 = vmatprep.subr.mxu1 %v2112_v17  ;;  %6473 = vmatpush1.msra.mxu0 %v1983_v54  ;;  %v2080_v28 = vld [vmem:[%s8015_s0 + $0x3818] sm:$0xff]  ;;  %v1951_v23 = vld [vmem:[%s8015_s0 + $0x3410] sm:$0xff] }
 0x546   : > { %6544 = vmatpush1.msra.mxu1 %v2111_v8  ;;  %6474 = vmatprep.subr.mxu0 %v1980_v6  ;;  %v2079_v15 = vld [vmem:[%s8015_s0 + $0x3810] sm:$0xff]  ;;  %v2076_v44 = vld [vmem:[%s8015_s0 + $0x37f8] sm:$0xff] }
 0x547   : > { %6545 = vmatprep.subr.mxu1 %v2108_v57  ;;  %6475 = vmatpush1.msra.mxu0 %v1979_v45  ;;  %v2204_v36 = vld [vmem:[%s8015_s0 + $0x3bf8] sm:$0xff]  ;;  %v2075_v53 = vld [vmem:[%s8015_s0 + $0x37f0] sm:$0xff] }
 0x548   : > { %6546 = vmatpush1.msra.mxu1 %v2107_v48  ;;  %6476 = vmatprep.subr.mxu0 %v1976_v5  ;;  %v2203_v9 = vld [vmem:[%s8015_s0 + $0x3bf0] sm:$0xff]  ;;  %v2072_v17 = vld [vmem:[%s8015_s0 + $0x37d8] sm:$0xff] }
 0x549   : > { %6547 = vmatprep.subr.mxu1 %v2104_v32  ;;  %6477 = vmatpush1.msra.mxu0 %v1975_v62  ;;  %v2200_v54 = vld [vmem:[%s8015_s0 + $0x3bd8] sm:$0xff]  ;;  %v2071_v8 = vld [vmem:[%s8015_s0 + $0x37d0] sm:$0xff] }
 0x54a   : > { %6548 = vmatpush1.msra.mxu1 %v2103_v43  ;;  %6478 = vmatprep.subr.mxu0 %v1972_v19  ;;  %v2199_v6 = vld [vmem:[%s8015_s0 + $0x3bd0] sm:$0xff]  ;;  %v2068_v57 = vld [vmem:[%s8015_s0 + $0x37b8] sm:$0xff] }
 0x54b   : > { %6549 = vmatprep.subr.mxu1 %v2100_v10  ;;  %6479 = vmatpush1.msra.mxu0 %v1971_v1  ;;  %v2196_v45 = vld [vmem:[%s8015_s0 + $0x3bb8] sm:$0xff]  ;;  %v2067_v48 = vld [vmem:[%s8015_s0 + $0x37b0] sm:$0xff] }
 0x54c   : > { %6550 = vmatpush1.msra.mxu1 %v2099_v46  ;;  %6480 = vmatprep.subr.mxu0 %v1968_v60  ;;  %v2195_v5 = vld [vmem:[%s8015_s0 + $0x3bb0] sm:$0xff]  ;;  %v2064_v32 = vld [vmem:[%s8015_s0 + $0x3798] sm:$0xff] }
 0x54d   : > { %6551 = vmatprep.subr.mxu1 %v2096_v39  ;;  %6481 = vmatpush1.msra.mxu0 %v1967_v14  ;;  %v2192_v62 = vld [vmem:[%s8015_s0 + $0x3b98] sm:$0xff]  ;;  %v2063_v43 = vld [vmem:[%s8015_s0 + $0x3790] sm:$0xff] }
 0x54e   : > { %6552 = vmatpush1.msra.mxu1 %v2095_v27  ;;  %6482 = vmatprep.subr.mxu0 %v1964_v26  ;;  %v2191_v19 = vld [vmem:[%s8015_s0 + $0x3b90] sm:$0xff]  ;;  %v2060_v10 = vld [vmem:[%s8015_s0 + $0x3778] sm:$0xff] }
 0x54f   : > { %6553 = vmatprep.subr.mxu1 %v2092_v63  ;;  %6483 = vmatpush1.msra.mxu0 %v1963_v52  ;;  %v2188_v1 = vld [vmem:[%s8015_s0 + $0x3b78] sm:$0xff]  ;;  %v2059_v46 = vld [vmem:[%s8015_s0 + $0x3770] sm:$0xff] }
 0x550   : > { %6554 = vmatpush1.msra.mxu1 %v2091_v42  ;;  %6484 = vmatprep.subr.mxu0 %v1960_v49  ;;  %v2187_v60 = vld [vmem:[%s8015_s0 + $0x3b70] sm:$0xff]  ;;  %v2056_v39 = vld [vmem:[%s8015_s0 + $0x3758] sm:$0xff] }
 0x551   : > { %6555 = vmatprep.subr.mxu1 %v2088_v20  ;;  %6485 = vmatpush1.msra.mxu0 %v1959_v22  ;;  %v2184_v14 = vld [vmem:[%s8015_s0 + $0x3b58] sm:$0xff]  ;;  %v2055_v27 = vld [vmem:[%s8015_s0 + $0x3750] sm:$0xff] }
 0x552   : > { %6556 = vmatpush1.msra.mxu1 %v2087_v33  ;;  %6486 = vmatprep.subr.mxu0 %v1956_v29  ;;  %v2183_v26 = vld [vmem:[%s8015_s0 + $0x3b50] sm:$0xff]  ;;  %v2052_v63 = vld [vmem:[%s8015_s0 + $0x3738] sm:$0xff] }
 0x553   : > { %6557 = vmatprep.subr.mxu1 %v2084_v35  ;;  %6487 = vmatpush1.msra.mxu0 %v1955_v41  ;;  %v2180_v52 = vld [vmem:[%s8015_s0 + $0x3b38] sm:$0xff]  ;;  %v2051_v42 = vld [vmem:[%s8015_s0 + $0x3730] sm:$0xff] }
 0x554   : > { %6558 = vmatpush1.msra.mxu1 %v2083_v25  ;;  %6488 = vmatprep.subr.mxu0 %v1952_v21  ;;  %v2179_v49 = vld [vmem:[%s8015_s0 + $0x3b30] sm:$0xff]  ;;  %v2048_v20 = vld [vmem:[%s8015_s0 + $0x3718] sm:$0xff] }
 0x555   : > { %6559 = vmatprep.subr.mxu1 %v2080_v28  ;;  %6489 = vmatpush1.msra.mxu0 %v1951_v23  ;;  %v2176_v22 = vld [vmem:[%s8015_s0 + $0x3b18] sm:$0xff]  ;;  %v2047_v33 = vld [vmem:[%s8015_s0 + $0x3710] sm:$0xff] }
 0x556   : > { %6560 = vmatpush1.msra.mxu1 %v2079_v15  ;;  %6490 = vmatprep.subr.mxu0 %v2076_v44  ;;  %v2175_v29 = vld [vmem:[%s8015_s0 + $0x3b10] sm:$0xff]  ;;  %v2044_v35 = vld [vmem:[%s8015_s0 + $0x36f8] sm:$0xff] }
 0x557   : > { %6561 = vmatprep.subr.mxu1 %v2204_v36  ;;  %6491 = vmatpush2.msra.mxu0 %v2075_v53  ;;  %v2172_v41 = vld [vmem:[%s8015_s0 + $0x3af8] sm:$0xff]  ;;  %v2043_v25 = vld [vmem:[%s8015_s0 + $0x36f0] sm:$0xff] }
 0x558   : > { %6562 = vmatpush2.msra.mxu1 %v2203_v9  ;;  %6492 = vmatprep.subr.mxu0 %v2072_v17  ;;  %v2171_v21 = vld [vmem:[%s8015_s0 + $0x3af0] sm:$0xff]  ;;  %v2040_v28 = vld [vmem:[%s8015_s0 + $0x36d8] sm:$0xff] }
 0x559   : > { %6563 = vmatprep.subr.mxu1 %v2200_v54  ;;  %6493 = vmatpush2.msra.mxu0 %v2071_v8  ;;  %v2168_v23 = vld [vmem:[%s8015_s0 + $0x3ad8] sm:$0xff]  ;;  %v2039_v15 = vld [vmem:[%s8015_s0 + $0x36d0] sm:$0xff] }
 0x55a   : > { %6564 = vmatpush2.msra.mxu1 %v2199_v6  ;;  %6494 = vmatprep.subr.mxu0 %v2068_v57  ;;  %v2167_v44 = vld [vmem:[%s8015_s0 + $0x3ad0] sm:$0xff]  ;;  %v2036_v36 = vld [vmem:[%s8015_s0 + $0x36b8] sm:$0xff] }
 0x55b   : > { %6565 = vmatprep.subr.mxu1 %v2196_v45  ;;  %6495 = vmatpush2.msra.mxu0 %v2067_v48  ;;  %v2164_v53 = vld [vmem:[%s8015_s0 + $0x3ab8] sm:$0xff]  ;;  %v2035_v9 = vld [vmem:[%s8015_s0 + $0x36b0] sm:$0xff] }
 0x55c   : > { %6566 = vmatpush2.msra.mxu1 %v2195_v5  ;;  %6496 = vmatprep.subr.mxu0 %v2064_v32  ;;  %v2163_v17 = vld [vmem:[%s8015_s0 + $0x3ab0] sm:$0xff]  ;;  %v2032_v54 = vld [vmem:[%s8015_s0 + $0x3698] sm:$0xff] }
 0x55d   : > { %6567 = vmatprep.subr.mxu1 %v2192_v62  ;;  %6497 = vmatpush2.msra.mxu0 %v2063_v43  ;;  %v2160_v8 = vld [vmem:[%s8015_s0 + $0x3a98] sm:$0xff]  ;;  %v2031_v6 = vld [vmem:[%s8015_s0 + $0x3690] sm:$0xff] }
 0x55e   : > { %6568 = vmatpush2.msra.mxu1 %v2191_v19  ;;  %6498 = vmatprep.subr.mxu0 %v2060_v10  ;;  %v2159_v57 = vld [vmem:[%s8015_s0 + $0x3a90] sm:$0xff]  ;;  %v2028_v45 = vld [vmem:[%s8015_s0 + $0x3678] sm:$0xff] }
 0x55f   : > { %6569 = vmatprep.subr.mxu1 %v2188_v1  ;;  %6499 = vmatpush2.msra.mxu0 %v2059_v46  ;;  %v2156_v48 = vld [vmem:[%s8015_s0 + $0x3a78] sm:$0xff]  ;;  %v2027_v5 = vld [vmem:[%s8015_s0 + $0x3670] sm:$0xff] }
 0x560   : > { %6570 = vmatpush2.msra.mxu1 %v2187_v60  ;;  %6500 = vmatprep.subr.mxu0 %v2056_v39  ;;  %v2155_v32 = vld [vmem:[%s8015_s0 + $0x3a70] sm:$0xff]  ;;  %v2024_v62 = vld [vmem:[%s8015_s0 + $0x3658] sm:$0xff] }
 0x561   : > { %6571 = vmatprep.subr.mxu1 %v2184_v14  ;;  %6501 = vmatpush2.msra.mxu0 %v2055_v27  ;;  %v2152_v43 = vld [vmem:[%s8015_s0 + $0x3a58] sm:$0xff]  ;;  %v2023_v19 = vld [vmem:[%s8015_s0 + $0x3650] sm:$0xff] }
 0x562   : > { %6572 = vmatpush2.msra.mxu1 %v2183_v26  ;;  %6502 = vmatprep.subr.mxu0 %v2052_v63  ;;  %v2151_v10 = vld [vmem:[%s8015_s0 + $0x3a50] sm:$0xff]  ;;  %v2020_v1 = vld [vmem:[%s8015_s0 + $0x3638] sm:$0xff] }
 0x563   : > { %6573 = vmatprep.subr.mxu1 %v2180_v52  ;;  %6503 = vmatpush2.msra.mxu0 %v2051_v42  ;;  %v2148_v46 = vld [vmem:[%s8015_s0 + $0x3a38] sm:$0xff]  ;;  %v2019_v60 = vld [vmem:[%s8015_s0 + $0x3630] sm:$0xff] }
 0x564   : > { %6574 = vmatpush2.msra.mxu1 %v2179_v49  ;;  %6504 = vmatprep.subr.mxu0 %v2048_v20  ;;  %v2147_v39 = vld [vmem:[%s8015_s0 + $0x3a30] sm:$0xff]  ;;  %v2016_v14 = vld [vmem:[%s8015_s0 + $0x3618] sm:$0xff] }
 0x565   : > { %6575 = vmatprep.subr.mxu1 %v2176_v22  ;;  %6505 = vmatpush2.msra.mxu0 %v2047_v33  ;;  %v2144_v27 = vld [vmem:[%s8015_s0 + $0x3a18] sm:$0xff]  ;;  %v2015_v26 = vld [vmem:[%s8015_s0 + $0x3610] sm:$0xff] }
 0x566   : > { %6576 = vmatpush2.msra.mxu1 %v2175_v29  ;;  %6506 = vmatprep.subr.mxu0 %v2044_v35  ;;  %v2143_v63 = vld [vmem:[%s8015_s0 + $0x3a10] sm:$0xff]  ;;  %v2268_v52 = vld [vmem:[%s8015_s0 + $0x3df8] sm:$0xff] }
 0x567   : > { %6577 = vmatprep.subr.mxu1 %v2172_v41  ;;  %6507 = vmatpush2.msra.mxu0 %v2043_v25  ;;  %v2396_v42 = vld [vmem:[%s8015_s0 + $0x41f8] sm:$0xff]  ;;  %v2267_v49 = vld [vmem:[%s8015_s0 + $0x3df0] sm:$0xff] }
 0x568   : > { %6578 = vmatpush2.msra.mxu1 %v2171_v21  ;;  %6508 = vmatprep.subr.mxu0 %v2040_v28  ;;  %v2395_v20 = vld [vmem:[%s8015_s0 + $0x41f0] sm:$0xff]  ;;  %v2264_v22 = vld [vmem:[%s8015_s0 + $0x3dd8] sm:$0xff] }
 0x569   : > { %6579 = vmatprep.subr.mxu1 %v2168_v23  ;;  %6509 = vmatpush2.msra.mxu0 %v2039_v15  ;;  %v2392_v33 = vld [vmem:[%s8015_s0 + $0x41d8] sm:$0xff]  ;;  %v2391_v29 = vld [vmem:[%s8015_s0 + $0x41d0] sm:$0xff] }
 0x56a   : > { %6580 = vmatpush2.msra.mxu1 %v2167_v44  ;;  %6510 = vmatprep.subr.mxu0 %v2036_v36  ;;  %v2388_v35 = vld [vmem:[%s8015_s0 + $0x41b8] sm:$0xff]  ;;  %v2387_v41 = vld [vmem:[%s8015_s0 + $0x41b0] sm:$0xff] }
 0x56b   : > { %6581 = vmatprep.subr.mxu1 %v2164_v53  ;;  %6511 = vmatpush2.msra.mxu0 %v2035_v9  ;;  %v2256_v25 = vld [vmem:[%s8015_s0 + $0x3d98] sm:$0xff]  ;;  %v2255_v21 = vld [vmem:[%s8015_s0 + $0x3d90] sm:$0xff] }
 0x56c   : > { %6582 = vmatpush2.msra.mxu1 %v2163_v17  ;;  %6512 = vmatprep.subr.mxu0 %v2032_v54  ;;  %v2383_v28 = vld [vmem:[%s8015_s0 + $0x4190] sm:$0xff]  ;;  %v2252_v23 = vld [vmem:[%s8015_s0 + $0x3d78] sm:$0xff] }
 0x56d   : > { %6583 = vmatprep.subr.mxu1 %v2160_v8  ;;  %6513 = vmatpush2.msra.mxu0 %v2031_v6  ;;  %v2380_v15 = vld [vmem:[%s8015_s0 + $0x4178] sm:$0xff]  ;;  %v2251_v44 = vld [vmem:[%s8015_s0 + $0x3d70] sm:$0xff] }
 0x56e   : > { %6584 = vmatpush2.msra.mxu1 %v2159_v57  ;;  %6514 = vmatprep.subr.mxu0 %v2028_v45  ;;  %v2379_v36 = vld [vmem:[%s8015_s0 + $0x4170] sm:$0xff]  ;;  %v2248_v53 = vld [vmem:[%s8015_s0 + $0x3d58] sm:$0xff] }
 0x56f   : > { %6585 = vmatprep.subr.mxu1 %v2156_v48  ;;  %6515 = vmatpush2.msra.mxu0 %v2027_v5  ;;  %v2376_v9 = vld [vmem:[%s8015_s0 + $0x4158] sm:$0xff]  ;;  %v2247_v17 = vld [vmem:[%s8015_s0 + $0x3d50] sm:$0xff] }
 0x570   : > { %6586 = vmatpush2.msra.mxu1 %v2155_v32  ;;  %6516 = vmatprep.subr.mxu0 %v2024_v62  ;;  %v2375_v54 = vld [vmem:[%s8015_s0 + $0x4150] sm:$0xff]  ;;  %v2244_v8 = vld [vmem:[%s8015_s0 + $0x3d38] sm:$0xff] }
 0x571   : > { %6587 = vmatprep.subr.mxu1 %v2152_v43  ;;  %6517 = vmatpush2.msra.mxu0 %v2023_v19  ;;  %v2372_v6 = vld [vmem:[%s8015_s0 + $0x4138] sm:$0xff]  ;;  %v2243_v57 = vld [vmem:[%s8015_s0 + $0x3d30] sm:$0xff] }
 0x572   : > { %6588 = vmatpush2.msra.mxu1 %v2151_v10  ;;  %6518 = vmatprep.subr.mxu0 %v2020_v1  ;;  %v2371_v45 = vld [vmem:[%s8015_s0 + $0x4130] sm:$0xff]  ;;  %v2240_v48 = vld [vmem:[%s8015_s0 + $0x3d18] sm:$0xff] }
 0x573   : > { %6589 = vmatprep.subr.mxu1 %v2148_v46  ;;  %6519 = vmatpush2.msra.mxu0 %v2019_v60  ;;  %v2368_v5 = vld [vmem:[%s8015_s0 + $0x4118] sm:$0xff]  ;;  %v2239_v32 = vld [vmem:[%s8015_s0 + $0x3d10] sm:$0xff] }
 0x574   : > { %6590 = vmatpush2.msra.mxu1 %v2147_v39  ;;  %6520 = vmatprep.subr.mxu0 %v2016_v14  ;;  %v2367_v62 = vld [vmem:[%s8015_s0 + $0x4110] sm:$0xff]  ;;  %v2236_v43 = vld [vmem:[%s8015_s0 + $0x3cf8] sm:$0xff] }
 0x575   : > { %6591 = vmatprep.subr.mxu1 %v2144_v27  ;;  %6521 = vmatpush2.msra.mxu0 %v2015_v26  ;;  %v2364_v19 = vld [vmem:[%s8015_s0 + $0x40f8] sm:$0xff]  ;;  %v2235_v10 = vld [vmem:[%s8015_s0 + $0x3cf0] sm:$0xff] }
 0x576   : > { %6522 = vmatprep.mubr.f32.mxu0 %v9082_v3  ;;  %6592 = vmatpush2.msra.mxu1 %v2143_v63  ;;  %v2263_v3 = vld [vmem:[%s8015_s0 + $0x3dd0] sm:$0xff]  ;;  %v2232_v46 = vld [vmem:[%s8015_s0 + $0x3cd8] sm:$0xff] }
 0x577   : > { %6523 = vmatmul.mubr.f32.vlgmr.msra.gmra.mxu0 %v9068_v56  ;;  %6593 = vmatprep.mubr.f32.mxu1 %v9223_v58  ;;  %v2260_v56 = vld [vmem:[%s8015_s0 + $0x3db8] sm:$0xff]  ;;  %v2259_v58 = vld [vmem:[%s8015_s0 + $0x3db0] sm:$0xff] }
 0x578   : > { %6600 = vmatprep.subr.mxu0 %v2268_v52  ;;  %6671 = vmatprep.subr.mxu1 %v2396_v42  ;;  %v2363_v1 = vld [vmem:[%s8015_s0 + $0x40f0] sm:$0xff]  ;;  %v2360_v60 = vld [vmem:[%s8015_s0 + $0x40d8] sm:$0xff] }
 0x579   : > { %6594 = vmatmul.mubr.f32.vlgmr.msra.gmra.mxu1 %v9208_v40  ;;  %6601 = vmatpush1.msra.mxu0 %v2267_v49  ;;  %v2384_v40 = vld [vmem:[%s8015_s0 + $0x4198] sm:$0xff]  ;;  %v2231_v39 = vld [vmem:[%s8015_s0 + $0x3cd0] sm:$0xff] }
 0x57a   : > { %6672 = vmatpush1.msra.mxu1 %v2395_v20  ;;  %6602 = vmatprep.subr.mxu0 %v2264_v22  ;;  %v2359_v14 = vld [vmem:[%s8015_s0 + $0x40d0] sm:$0xff]  ;;  %v2228_v27 = vld [vmem:[%s8015_s0 + $0x3cb8] sm:$0xff] }
 0x57b   : > { %6673 = vmatprep.subr.mxu1 %v2392_v33  ;;  %6603 = vmatpush1.msra.mxu0 %v2263_v3  ;;  %v2356_v26 = vld [vmem:[%s8015_s0 + $0x40b8] sm:$0xff]  ;;  %v2227_v63 = vld [vmem:[%s8015_s0 + $0x3cb0] sm:$0xff] }
 0x57c   : > { %6674 = vmatpush1.msra.mxu1 %v2391_v29  ;;  %6604 = vmatprep.subr.mxu0 %v2260_v56  ;;  %v2355_v52 = vld [vmem:[%s8015_s0 + $0x40b0] sm:$0xff]  ;;  %v2224_v42 = vld [vmem:[%s8015_s0 + $0x3c98] sm:$0xff] }
 0x57d   : > { %6675 = vmatprep.subr.mxu1 %v2388_v35  ;;  %6605 = vmatpush1.msra.mxu0 %v2259_v58  ;;  %v2352_v49 = vld [vmem:[%s8015_s0 + $0x4098] sm:$0xff]  ;;  %v2223_v20 = vld [vmem:[%s8015_s0 + $0x3c90] sm:$0xff] }
 0x57e   : > { %6676 = vmatpush1.msra.mxu1 %v2387_v41  ;;  %6606 = vmatprep.subr.mxu0 %v2256_v25  ;;  %v2351_v22 = vld [vmem:[%s8015_s0 + $0x4090] sm:$0xff]  ;;  %v2220_v33 = vld [vmem:[%s8015_s0 + $0x3c78] sm:$0xff] }
 0x57f   : > { %6677 = vmatprep.subr.mxu1 %v2384_v40  ;;  %6607 = vmatpush1.msra.mxu0 %v2255_v21  ;;  %v2348_v3 = vld [vmem:[%s8015_s0 + $0x4078] sm:$0xff]  ;;  %v2219_v29 = vld [vmem:[%s8015_s0 + $0x3c70] sm:$0xff] }
 0x580   : > { %6678 = vmatpush1.msra.mxu1 %v2383_v28  ;;  %6608 = vmatprep.subr.mxu0 %v2252_v23  ;;  %v2347_v56 = vld [vmem:[%s8015_s0 + $0x4070] sm:$0xff]  ;;  %v2216_v35 = vld [vmem:[%s8015_s0 + $0x3c58] sm:$0xff] }
 0x581   : > { %6679 = vmatprep.subr.mxu1 %v2380_v15  ;;  %6609 = vmatpush1.msra.mxu0 %v2251_v44  ;;  %v2344_v58 = vld [vmem:[%s8015_s0 + $0x4058] sm:$0xff]  ;;  %v2215_v41 = vld [vmem:[%s8015_s0 + $0x3c50] sm:$0xff] }
 0x582   : > { %6680 = vmatpush1.msra.mxu1 %v2379_v36  ;;  %6610 = vmatprep.subr.mxu0 %v2248_v53  ;;  %v2343_v25 = vld [vmem:[%s8015_s0 + $0x4050] sm:$0xff]  ;;  %v2212_v40 = vld [vmem:[%s8015_s0 + $0x3c38] sm:$0xff] }
 0x583   : > { %6681 = vmatprep.subr.mxu1 %v2376_v9  ;;  %6611 = vmatpush1.msra.mxu0 %v2247_v17  ;;  %v2340_v21 = vld [vmem:[%s8015_s0 + $0x4038] sm:$0xff]  ;;  %v2211_v28 = vld [vmem:[%s8015_s0 + $0x3c30] sm:$0xff] }
 0x584   : > { %6682 = vmatpush1.msra.mxu1 %v2375_v54  ;;  %6612 = vmatprep.subr.mxu0 %v2244_v8  ;;  %v2339_v23 = vld [vmem:[%s8015_s0 + $0x4030] sm:$0xff]  ;;  %v2208_v15 = vld [vmem:[%s8015_s0 + $0x3c18] sm:$0xff] }
 0x585   : > { %6683 = vmatprep.subr.mxu1 %v2372_v6  ;;  %6613 = vmatpush1.msra.mxu0 %v2243_v57  ;;  %v2336_v44 = vld [vmem:[%s8015_s0 + $0x4018] sm:$0xff]  ;;  %v2207_v36 = vld [vmem:[%s8015_s0 + $0x3c10] sm:$0xff] }
 0x586   : > { %6684 = vmatpush1.msra.mxu1 %v2371_v45  ;;  %6614 = vmatprep.subr.mxu0 %v2240_v48  ;;  %v2335_v53 = vld [vmem:[%s8015_s0 + $0x4010] sm:$0xff]  ;;  %v2332_v9 = vld [vmem:[%s8015_s0 + $0x3ff8] sm:$0xff] }
 0x587   : > { %6685 = vmatprep.subr.mxu1 %v2368_v5  ;;  %6615 = vmatpush1.msra.mxu0 %v2239_v32  ;;  %v2460_v17 = vld [vmem:[%s8015_s0 + $0x43f8] sm:$0xff]  ;;  %v2331_v54 = vld [vmem:[%s8015_s0 + $0x3ff0] sm:$0xff] }
 0x588   : > { %6686 = vmatpush1.msra.mxu1 %v2367_v62  ;;  %6616 = vmatprep.subr.mxu0 %v2236_v43  ;;  %v2459_v8 = vld [vmem:[%s8015_s0 + $0x43f0] sm:$0xff]  ;;  %v2328_v6 = vld [vmem:[%s8015_s0 + $0x3fd8] sm:$0xff] }
 0x589   : > { %6687 = vmatprep.subr.mxu1 %v2364_v19  ;;  %6617 = vmatpush1.msra.mxu0 %v2235_v10  ;;  %v2456_v57 = vld [vmem:[%s8015_s0 + $0x43d8] sm:$0xff]  ;;  %v2327_v45 = vld [vmem:[%s8015_s0 + $0x3fd0] sm:$0xff] }
 0x58a   : > { %6688 = vmatpush1.msra.mxu1 %v2363_v1  ;;  %6618 = vmatprep.subr.mxu0 %v2232_v46  ;;  %v2455_v48 = vld [vmem:[%s8015_s0 + $0x43d0] sm:$0xff]  ;;  %v2324_v5 = vld [vmem:[%s8015_s0 + $0x3fb8] sm:$0xff] }
 0x58b   : > { %6689 = vmatprep.subr.mxu1 %v2360_v60  ;;  %6619 = vmatpush1.msra.mxu0 %v2231_v39  ;;  %v2452_v32 = vld [vmem:[%s8015_s0 + $0x43b8] sm:$0xff]  ;;  %v2323_v62 = vld [vmem:[%s8015_s0 + $0x3fb0] sm:$0xff] }
 0x58c   : > { %6690 = vmatpush1.msra.mxu1 %v2359_v14  ;;  %6620 = vmatprep.subr.mxu0 %v2228_v27  ;;  %v2451_v43 = vld [vmem:[%s8015_s0 + $0x43b0] sm:$0xff]  ;;  %v2320_v19 = vld [vmem:[%s8015_s0 + $0x3f98] sm:$0xff] }
 0x58d   : > { %6691 = vmatprep.subr.mxu1 %v2356_v26  ;;  %6621 = vmatpush1.msra.mxu0 %v2227_v63  ;;  %v2448_v10 = vld [vmem:[%s8015_s0 + $0x4398] sm:$0xff]  ;;  %v2319_v1 = vld [vmem:[%s8015_s0 + $0x3f90] sm:$0xff] }
 0x58e   : > { %6692 = vmatpush1.msra.mxu1 %v2355_v52  ;;  %6622 = vmatprep.subr.mxu0 %v2224_v42  ;;  %v2447_v46 = vld [vmem:[%s8015_s0 + $0x4390] sm:$0xff]  ;;  %v2316_v60 = vld [vmem:[%s8015_s0 + $0x3f78] sm:$0xff] }
 0x58f   : > { %6693 = vmatprep.subr.mxu1 %v2352_v49  ;;  %6623 = vmatpush1.msra.mxu0 %v2223_v20  ;;  %v2444_v39 = vld [vmem:[%s8015_s0 + $0x4378] sm:$0xff]  ;;  %v2315_v14 = vld [vmem:[%s8015_s0 + $0x3f70] sm:$0xff] }
 0x590   : > { %6694 = vmatpush1.msra.mxu1 %v2351_v22  ;;  %6624 = vmatprep.subr.mxu0 %v2220_v33  ;;  %v2443_v27 = vld [vmem:[%s8015_s0 + $0x4370] sm:$0xff]  ;;  %v2312_v26 = vld [vmem:[%s8015_s0 + $0x3f58] sm:$0xff] }
 0x591   : > { %6695 = vmatprep.subr.mxu1 %v2348_v3  ;;  %6625 = vmatpush1.msra.mxu0 %v2219_v29  ;;  %v2440_v63 = vld [vmem:[%s8015_s0 + $0x4358] sm:$0xff]  ;;  %v2311_v52 = vld [vmem:[%s8015_s0 + $0x3f50] sm:$0xff] }
 0x592   : > { %6696 = vmatpush1.msra.mxu1 %v2347_v56  ;;  %6626 = vmatprep.subr.mxu0 %v2216_v35  ;;  %v2439_v42 = vld [vmem:[%s8015_s0 + $0x4350] sm:$0xff]  ;;  %v2308_v49 = vld [vmem:[%s8015_s0 + $0x3f38] sm:$0xff] }
 0x593   : > { %6697 = vmatprep.subr.mxu1 %v2344_v58  ;;  %6627 = vmatpush1.msra.mxu0 %v2215_v41  ;;  %v2436_v20 = vld [vmem:[%s8015_s0 + $0x4338] sm:$0xff]  ;;  %v2307_v22 = vld [vmem:[%s8015_s0 + $0x3f30] sm:$0xff] }
 0x594   : > { %6698 = vmatpush1.msra.mxu1 %v2343_v25  ;;  %6628 = vmatprep.subr.mxu0 %v2212_v40  ;;  %v2435_v33 = vld [vmem:[%s8015_s0 + $0x4330] sm:$0xff]  ;;  %v2304_v3 = vld [vmem:[%s8015_s0 + $0x3f18] sm:$0xff] }
 0x595   : > { %6699 = vmatprep.subr.mxu1 %v2340_v21  ;;  %6629 = vmatpush1.msra.mxu0 %v2211_v28  ;;  %v2432_v29 = vld [vmem:[%s8015_s0 + $0x4318] sm:$0xff]  ;;  %v2303_v56 = vld [vmem:[%s8015_s0 + $0x3f10] sm:$0xff] }
 0x596   : > { %6700 = vmatpush1.msra.mxu1 %v2339_v23  ;;  %6630 = vmatprep.subr.mxu0 %v2208_v15  ;;  %v2431_v35 = vld [vmem:[%s8015_s0 + $0x4310] sm:$0xff]  ;;  %v2300_v58 = vld [vmem:[%s8015_s0 + $0x3ef8] sm:$0xff] }
 0x597   : > { %6701 = vmatprep.subr.mxu1 %v2336_v44  ;;  %6631 = vmatpush1.msra.mxu0 %v2207_v36  ;;  %v2428_v41 = vld [vmem:[%s8015_s0 + $0x42f8] sm:$0xff]  ;;  %v2299_v25 = vld [vmem:[%s8015_s0 + $0x3ef0] sm:$0xff] }
 0x598   : > { %6702 = vmatpush1.msra.mxu1 %v2335_v53  ;;  %6632 = vmatprep.subr.mxu0 %v2332_v9  ;;  %v2427_v40 = vld [vmem:[%s8015_s0 + $0x42f0] sm:$0xff]  ;;  %v2296_v21 = vld [vmem:[%s8015_s0 + $0x3ed8] sm:$0xff] }
 0x599   : > { %6703 = vmatprep.subr.mxu1 %v2460_v17  ;;  %6633 = vmatpush2.msra.mxu0 %v2331_v54  ;;  %v2424_v28 = vld [vmem:[%s8015_s0 + $0x42d8] sm:$0xff]  ;;  %v2295_v23 = vld [vmem:[%s8015_s0 + $0x3ed0] sm:$0xff] }
 0x59a   : > { %6704 = vmatpush2.msra.mxu1 %v2459_v8  ;;  %6634 = vmatprep.subr.mxu0 %v2328_v6  ;;  %v2423_v15 = vld [vmem:[%s8015_s0 + $0x42d0] sm:$0xff]  ;;  %v2292_v44 = vld [vmem:[%s8015_s0 + $0x3eb8] sm:$0xff] }
 0x59b   : > { %6705 = vmatprep.subr.mxu1 %v2456_v57  ;;  %6635 = vmatpush2.msra.mxu0 %v2327_v45  ;;  %v2420_v36 = vld [vmem:[%s8015_s0 + $0x42b8] sm:$0xff]  ;;  %v2291_v53 = vld [vmem:[%s8015_s0 + $0x3eb0] sm:$0xff] }
 0x59c   : > { %6706 = vmatpush2.msra.mxu1 %v2455_v48  ;;  %6636 = vmatprep.subr.mxu0 %v2324_v5  ;;  %v2419_v9 = vld [vmem:[%s8015_s0 + $0x42b0] sm:$0xff]  ;;  %v2288_v17 = vld [vmem:[%s8015_s0 + $0x3e98] sm:$0xff] }
 0x59d   : > { %6707 = vmatprep.subr.mxu1 %v2452_v32  ;;  %6637 = vmatpush2.msra.mxu0 %v2323_v62  ;;  %v2416_v54 = vld [vmem:[%s8015_s0 + $0x4298] sm:$0xff]  ;;  %v2287_v8 = vld [vmem:[%s8015_s0 + $0x3e90] sm:$0xff] }
 0x59e   : > { %6708 = vmatpush2.msra.mxu1 %v2451_v43  ;;  %6638 = vmatprep.subr.mxu0 %v2320_v19  ;;  %v2415_v6 = vld [vmem:[%s8015_s0 + $0x4290] sm:$0xff]  ;;  %v2284_v57 = vld [vmem:[%s8015_s0 + $0x3e78] sm:$0xff] }
 0x59f   : > { %6709 = vmatprep.subr.mxu1 %v2448_v10  ;;  %6639 = vmatpush2.msra.mxu0 %v2319_v1  ;;  %v2412_v45 = vld [vmem:[%s8015_s0 + $0x4278] sm:$0xff]  ;;  %v2283_v48 = vld [vmem:[%s8015_s0 + $0x3e70] sm:$0xff] }
 0x5a0   : > { %6710 = vmatpush2.msra.mxu1 %v2447_v46  ;;  %6640 = vmatprep.subr.mxu0 %v2316_v60  ;;  %v2411_v5 = vld [vmem:[%s8015_s0 + $0x4270] sm:$0xff]  ;;  %v2280_v32 = vld [vmem:[%s8015_s0 + $0x3e58] sm:$0xff] }
 0x5a1   : > { %6711 = vmatprep.subr.mxu1 %v2444_v39  ;;  %6641 = vmatpush2.msra.mxu0 %v2315_v14  ;;  %v2408_v62 = vld [vmem:[%s8015_s0 + $0x4258] sm:$0xff]  ;;  %v2279_v43 = vld [vmem:[%s8015_s0 + $0x3e50] sm:$0xff] }
 0x5a2   : > { %6712 = vmatpush2.msra.mxu1 %v2443_v27  ;;  %6642 = vmatprep.subr.mxu0 %v2312_v26  ;;  %v2407_v19 = vld [vmem:[%s8015_s0 + $0x4250] sm:$0xff]  ;;  %v2276_v10 = vld [vmem:[%s8015_s0 + $0x3e38] sm:$0xff] }
 0x5a3   : > { %6713 = vmatprep.subr.mxu1 %v2440_v63  ;;  %6643 = vmatpush2.msra.mxu0 %v2311_v52  ;;  %v2404_v1 = vld [vmem:[%s8015_s0 + $0x4238] sm:$0xff]  ;;  %v2275_v46 = vld [vmem:[%s8015_s0 + $0x3e30] sm:$0xff] }
 0x5a4   : > { %6714 = vmatpush2.msra.mxu1 %v2439_v42  ;;  %6644 = vmatprep.subr.mxu0 %v2308_v49  ;;  %v2403_v60 = vld [vmem:[%s8015_s0 + $0x4230] sm:$0xff]  ;;  %v2272_v39 = vld [vmem:[%s8015_s0 + $0x3e18] sm:$0xff] }
 0x5a5   : > { %6715 = vmatprep.subr.mxu1 %v2436_v20  ;;  %6645 = vmatpush2.msra.mxu0 %v2307_v22  ;;  %v2400_v14 = vld [vmem:[%s8015_s0 + $0x4218] sm:$0xff]  ;;  %v2271_v27 = vld [vmem:[%s8015_s0 + $0x3e10] sm:$0xff] }
 0x5a6   : > { %6716 = vmatpush2.msra.mxu1 %v2435_v33  ;;  %6646 = vmatprep.subr.mxu0 %v2304_v3  ;;  %v2399_v26 = vld [vmem:[%s8015_s0 + $0x4210] sm:$0xff]  ;;  %v2524_v63 = vld [vmem:[%s8015_s0 + $0x45f8] sm:$0xff] }
 0x5a7   : > { %6717 = vmatprep.subr.mxu1 %v2432_v29  ;;  %6647 = vmatpush2.msra.mxu0 %v2303_v56  ;;  %v2652_v52 = vld [vmem:[%s8015_s0 + $0x49f8] sm:$0xff]  ;;  %v2523_v42 = vld [vmem:[%s8015_s0 + $0x45f0] sm:$0xff] }
 0x5a8   : > { %6718 = vmatpush2.msra.mxu1 %v2431_v35  ;;  %6648 = vmatprep.subr.mxu0 %v2300_v58  ;;  %v2651_v49 = vld [vmem:[%s8015_s0 + $0x49f0] sm:$0xff]  ;;  %v2520_v20 = vld [vmem:[%s8015_s0 + $0x45d8] sm:$0xff] }
 0x5a9   : > { %6719 = vmatprep.subr.mxu1 %v2428_v41  ;;  %6649 = vmatpush2.msra.mxu0 %v2299_v25  ;;  %v2648_v22 = vld [vmem:[%s8015_s0 + $0x49d8] sm:$0xff]  ;;  %v2647_v33 = vld [vmem:[%s8015_s0 + $0x49d0] sm:$0xff] }
 0x5aa   : > { %6720 = vmatpush2.msra.mxu1 %v2427_v40  ;;  %6650 = vmatprep.subr.mxu0 %v2296_v21  ;;  %v2644_v3 = vld [vmem:[%s8015_s0 + $0x49b8] sm:$0xff]  ;;  %v2643_v29 = vld [vmem:[%s8015_s0 + $0x49b0] sm:$0xff] }
 0x5ab   : > { %6721 = vmatprep.subr.mxu1 %v2424_v28  ;;  %6651 = vmatpush2.msra.mxu0 %v2295_v23  ;;  %v2512_v56 = vld [vmem:[%s8015_s0 + $0x4598] sm:$0xff]  ;;  %v2511_v35 = vld [vmem:[%s8015_s0 + $0x4590] sm:$0xff] }
 0x5ac   : > { %6722 = vmatpush2.msra.mxu1 %v2423_v15  ;;  %6652 = vmatprep.subr.mxu0 %v2292_v44  ;;  %v2639_v58 = vld [vmem:[%s8015_s0 + $0x4990] sm:$0xff]  ;;  %v2508_v41 = vld [vmem:[%s8015_s0 + $0x4578] sm:$0xff] }
 0x5ad   : > { %6723 = vmatprep.subr.mxu1 %v2420_v36  ;;  %6653 = vmatpush2.msra.mxu0 %v2291_v53  ;;  %v2636_v25 = vld [vmem:[%s8015_s0 + $0x4978] sm:$0xff]  ;;  %v2507_v40 = vld [vmem:[%s8015_s0 + $0x4570] sm:$0xff] }
 0x5ae   : > { %6724 = vmatpush2.msra.mxu1 %v2419_v9  ;;  %6654 = vmatprep.subr.mxu0 %v2288_v17  ;;  %v2635_v21 = vld [vmem:[%s8015_s0 + $0x4970] sm:$0xff]  ;;  %v2504_v28 = vld [vmem:[%s8015_s0 + $0x4558] sm:$0xff] }
 0x5af   : > { %6725 = vmatprep.subr.mxu1 %v2416_v54  ;;  %6655 = vmatpush2.msra.mxu0 %v2287_v8  ;;  %v2632_v23 = vld [vmem:[%s8015_s0 + $0x4958] sm:$0xff]  ;;  %v2503_v15 = vld [vmem:[%s8015_s0 + $0x4550] sm:$0xff] }
 0x5b0   : > { %6726 = vmatpush2.msra.mxu1 %v2415_v6  ;;  %6656 = vmatprep.subr.mxu0 %v2284_v57  ;;  %v2631_v44 = vld [vmem:[%s8015_s0 + $0x4950] sm:$0xff]  ;;  %v2500_v36 = vld [vmem:[%s8015_s0 + $0x4538] sm:$0xff] }
 0x5b1   : > { %6727 = vmatprep.subr.mxu1 %v2412_v45  ;;  %6657 = vmatpush2.msra.mxu0 %v2283_v48  ;;  %v2628_v53 = vld [vmem:[%s8015_s0 + $0x4938] sm:$0xff]  ;;  %v2499_v9 = vld [vmem:[%s8015_s0 + $0x4530] sm:$0xff] }
 0x5b2   : > { %6728 = vmatpush2.msra.mxu1 %v2411_v5  ;;  %6658 = vmatprep.subr.mxu0 %v2280_v32  ;;  %v2627_v17 = vld [vmem:[%s8015_s0 + $0x4930] sm:$0xff]  ;;  %v2496_v54 = vld [vmem:[%s8015_s0 + $0x4518] sm:$0xff] }
 0x5b3   : > { %6729 = vmatprep.subr.mxu1 %v2408_v62  ;;  %6659 = vmatpush2.msra.mxu0 %v2279_v43  ;;  %v2624_v8 = vld [vmem:[%s8015_s0 + $0x4918] sm:$0xff]  ;;  %v2495_v6 = vld [vmem:[%s8015_s0 + $0x4510] sm:$0xff] }
 0x5b4   : > { %6730 = vmatpush2.msra.mxu1 %v2407_v19  ;;  %6660 = vmatprep.subr.mxu0 %v2276_v10  ;;  %v2623_v57 = vld [vmem:[%s8015_s0 + $0x4910] sm:$0xff]  ;;  %v2492_v45 = vld [vmem:[%s8015_s0 + $0x44f8] sm:$0xff] }
 0x5b5   : > { %6731 = vmatprep.subr.mxu1 %v2404_v1  ;;  %6661 = vmatpush2.msra.mxu0 %v2275_v46  ;;  %v2620_v48 = vld [vmem:[%s8015_s0 + $0x48f8] sm:$0xff]  ;;  %v2491_v5 = vld [vmem:[%s8015_s0 + $0x44f0] sm:$0xff] }
 0x5b6   : > { %6732 = vmatpush2.msra.mxu1 %v2403_v60  ;;  %6662 = vmatprep.subr.mxu0 %v2272_v39  ;;  %v2619_v32 = vld [vmem:[%s8015_s0 + $0x48f0] sm:$0xff]  ;;  %v2488_v62 = vld [vmem:[%s8015_s0 + $0x44d8] sm:$0xff] }
 0x5b7   : > { %6733 = vmatprep.subr.mxu1 %v2400_v14  ;;  %6663 = vmatpush2.msra.mxu0 %v2271_v27  ;;  %v2616_v43 = vld [vmem:[%s8015_s0 + $0x48d8] sm:$0xff]  ;;  %v2487_v19 = vld [vmem:[%s8015_s0 + $0x44d0] sm:$0xff] }
 0x5b8   : > { %6664 = vmatprep.mubr.f32.mxu0 %v9229_v61  ;;  %6734 = vmatpush2.msra.mxu1 %v2399_v26  ;;  %v2519_v61 = vld [vmem:[%s8015_s0 + $0x45d0] sm:$0xff]  ;;  %v2484_v1 = vld [vmem:[%s8015_s0 + $0x44b8] sm:$0xff] }
 0x5b9   : > { %6665 = vmatmul.mubr.f32.vlgmr.msra.gmra.mxu0 %v9215_v47  ;;  %6735 = vmatprep.mubr.f32.mxu1 %v9370_v18  ;;  %v2516_v47 = vld [vmem:[%s8015_s0 + $0x45b8] sm:$0xff]  ;;  %v2515_v18 = vld [vmem:[%s8015_s0 + $0x45b0] sm:$0xff] }
 0x5ba   : > { %6742 = vmatprep.subr.mxu0 %v2524_v63  ;;  %6813 = vmatprep.subr.mxu1 %v2652_v52  ;;  %v2615_v10 = vld [vmem:[%s8015_s0 + $0x48d0] sm:$0xff]  ;;  %v2612_v46 = vld [vmem:[%s8015_s0 + $0x48b8] sm:$0xff] }
 0x5bb   : > { %6736 = vmatmul.mubr.f32.vlgmr.msra.gmra.mxu1 %v9355_v0  ;;  %6743 = vmatpush1.msra.mxu0 %v2523_v42  ;;  %v2640_v0 = vld [vmem:[%s8015_s0 + $0x4998] sm:$0xff]  ;;  %v2483_v60 = vld [vmem:[%s8015_s0 + $0x44b0] sm:$0xff] }
 0x5bc   : > { %6814 = vmatpush1.msra.mxu1 %v2651_v49  ;;  %6744 = vmatprep.subr.mxu0 %v2520_v20  ;;  %v2611_v39 = vld [vmem:[%s8015_s0 + $0x48b0] sm:$0xff]  ;;  %v2480_v14 = vld [vmem:[%s8015_s0 + $0x4498] sm:$0xff] }
 0x5bd   : > { %6815 = vmatprep.subr.mxu1 %v2648_v22  ;;  %6745 = vmatpush1.msra.mxu0 %v2519_v61  ;;  %v2608_v27 = vld [vmem:[%s8015_s0 + $0x4898] sm:$0xff]  ;;  %v2479_v26 = vld [vmem:[%s8015_s0 + $0x4490] sm:$0xff] }
 0x5be   : > { %6816 = vmatpush1.msra.mxu1 %v2647_v33  ;;  %6746 = vmatprep.subr.mxu0 %v2516_v47  ;;  %v2607_v63 = vld [vmem:[%s8015_s0 + $0x4890] sm:$0xff]  ;;  %v2476_v52 = vld [vmem:[%s8015_s0 + $0x4478] sm:$0xff] }
 0x5bf   : > { %6817 = vmatprep.subr.mxu1 %v2644_v3  ;;  %6747 = vmatpush1.msra.mxu0 %v2515_v18  ;;  %v2604_v42 = vld [vmem:[%s8015_s0 + $0x4878] sm:$0xff]  ;;  %v2475_v49 = vld [vmem:[%s8015_s0 + $0x4470] sm:$0xff] }
 0x5c0   : > { %6818 = vmatpush1.msra.mxu1 %v2643_v29  ;;  %6748 = vmatprep.subr.mxu0 %v2512_v56  ;;  %v2603_v20 = vld [vmem:[%s8015_s0 + $0x4870] sm:$0xff]  ;;  %v2472_v22 = vld [vmem:[%s8015_s0 + $0x4458] sm:$0xff] }
 0x5c1   : > { %6819 = vmatprep.subr.mxu1 %v2640_v0  ;;  %6749 = vmatpush1.msra.mxu0 %v2511_v35  ;;  %v2600_v61 = vld [vmem:[%s8015_s0 + $0x4858] sm:$0xff]  ;;  %v2471_v33 = vld [vmem:[%s8015_s0 + $0x4450] sm:$0xff] }
 0x5c2   : > { %6820 = vmatpush1.msra.mxu1 %v2639_v58  ;;  %6750 = vmatprep.subr.mxu0 %v2508_v41  ;;  %v2599_v47 = vld [vmem:[%s8015_s0 + $0x4850] sm:$0xff]  ;;  %v2468_v3 = vld [vmem:[%s8015_s0 + $0x4438] sm:$0xff] }
 0x5c3   : > { %6821 = vmatprep.subr.mxu1 %v2636_v25  ;;  %6751 = vmatpush1.msra.mxu0 %v2507_v40  ;;  %v2596_v18 = vld [vmem:[%s8015_s0 + $0x4838] sm:$0xff]  ;;  %v2467_v29 = vld [vmem:[%s8015_s0 + $0x4430] sm:$0xff] }
 0x5c4   : > { %6822 = vmatpush1.msra.mxu1 %v2635_v21  ;;  %6752 = vmatprep.subr.mxu0 %v2504_v28  ;;  %v2595_v56 = vld [vmem:[%s8015_s0 + $0x4830] sm:$0xff]  ;;  %v2464_v0 = vld [vmem:[%s8015_s0 + $0x4418] sm:$0xff] }
 0x5c5   : > { %6823 = vmatprep.subr.mxu1 %v2632_v23  ;;  %6753 = vmatpush1.msra.mxu0 %v2503_v15  ;;  %v2592_v35 = vld [vmem:[%s8015_s0 + $0x4818] sm:$0xff]  ;;  %v2463_v58 = vld [vmem:[%s8015_s0 + $0x4410] sm:$0xff] }
 0x5c6   : > { %6824 = vmatpush1.msra.mxu1 %v2631_v44  ;;  %6754 = vmatprep.subr.mxu0 %v2500_v36  ;;  %v2591_v41 = vld [vmem:[%s8015_s0 + $0x4810] sm:$0xff]  ;;  %v2588_v25 = vld [vmem:[%s8015_s0 + $0x47f8] sm:$0xff] }
 0x5c7   : > { %6825 = vmatprep.subr.mxu1 %v2628_v53  ;;  %6755 = vmatpush1.msra.mxu0 %v2499_v9  ;;  %v2716_v40 = vld [vmem:[%s8015_s0 + $0x4bf8] sm:$0xff]  ;;  %v2587_v21 = vld [vmem:[%s8015_s0 + $0x47f0] sm:$0xff] }
 0x5c8   : > { %6826 = vmatpush1.msra.mxu1 %v2627_v17  ;;  %6756 = vmatprep.subr.mxu0 %v2496_v54  ;;  %v2715_v28 = vld [vmem:[%s8015_s0 + $0x4bf0] sm:$0xff]  ;;  %v2584_v23 = vld [vmem:[%s8015_s0 + $0x47d8] sm:$0xff] }
 0x5c9   : > { %6827 = vmatprep.subr.mxu1 %v2624_v8  ;;  %6757 = vmatpush1.msra.mxu0 %v2495_v6  ;;  %v2712_v15 = vld [vmem:[%s8015_s0 + $0x4bd8] sm:$0xff]  ;;  %v2583_v44 = vld [vmem:[%s8015_s0 + $0x47d0] sm:$0xff] }
 0x5ca   : > { %6828 = vmatpush1.msra.mxu1 %v2623_v57  ;;  %6758 = vmatprep.subr.mxu0 %v2492_v45  ;;  %v2711_v36 = vld [vmem:[%s8015_s0 + $0x4bd0] sm:$0xff]  ;;  %v2580_v53 = vld [vmem:[%s8015_s0 + $0x47b8] sm:$0xff] }
 0x5cb   : > { %6829 = vmatprep.subr.mxu1 %v2620_v48  ;;  %6759 = vmatpush1.msra.mxu0 %v2491_v5  ;;  %v2708_v9 = vld [vmem:[%s8015_s0 + $0x4bb8] sm:$0xff]  ;;  %v2579_v17 = vld [vmem:[%s8015_s0 + $0x47b0] sm:$0xff] }
 0x5cc   : > { %6830 = vmatpush1.msra.mxu1 %v2619_v32  ;;  %6760 = vmatprep.subr.mxu0 %v2488_v62  ;;  %v2707_v54 = vld [vmem:[%s8015_s0 + $0x4bb0] sm:$0xff]  ;;  %v2576_v8 = vld [vmem:[%s8015_s0 + $0x4798] sm:$0xff] }
 0x5cd   : > { %6831 = vmatprep.subr.mxu1 %v2616_v43  ;;  %6761 = vmatpush1.msra.mxu0 %v2487_v19  ;;  %v2704_v6 = vld [vmem:[%s8015_s0 + $0x4b98] sm:$0xff]  ;;  %v2575_v57 = vld [vmem:[%s8015_s0 + $0x4790] sm:$0xff] }
 0x5ce   : > { %6832 = vmatpush1.msra.mxu1 %v2615_v10  ;;  %6762 = vmatprep.subr.mxu0 %v2484_v1  ;;  %v2703_v45 = vld [vmem:[%s8015_s0 + $0x4b90] sm:$0xff]  ;;  %v2572_v48 = vld [vmem:[%s8015_s0 + $0x4778] sm:$0xff] }
 0x5cf   : > { %6833 = vmatprep.subr.mxu1 %v2612_v46  ;;  %6763 = vmatpush1.msra.mxu0 %v2483_v60  ;;  %v2700_v5 = vld [vmem:[%s8015_s0 + $0x4b78] sm:$0xff]  ;;  %v2571_v32 = vld [vmem:[%s8015_s0 + $0x4770] sm:$0xff] }
 0x5d0   : > { %6834 = vmatpush1.msra.mxu1 %v2611_v39  ;;  %6764 = vmatprep.subr.mxu0 %v2480_v14  ;;  %v2699_v62 = vld [vmem:[%s8015_s0 + $0x4b70] sm:$0xff]  ;;  %v2568_v43 = vld [vmem:[%s8015_s0 + $0x4758] sm:$0xff] }
 0x5d1   : > { %6835 = vmatprep.subr.mxu1 %v2608_v27  ;;  %6765 = vmatpush1.msra.mxu0 %v2479_v26  ;;  %v2696_v19 = vld [vmem:[%s8015_s0 + $0x4b58] sm:$0xff]  ;;  %v2567_v10 = vld [vmem:[%s8015_s0 + $0x4750] sm:$0xff] }
 0x5d2   : > { %6836 = vmatpush1.msra.mxu1 %v2607_v63  ;;  %6766 = vmatprep.subr.mxu0 %v2476_v52  ;;  %v2695_v1 = vld [vmem:[%s8015_s0 + $0x4b50] sm:$0xff]  ;;  %v2564_v46 = vld [vmem:[%s8015_s0 + $0x4738] sm:$0xff] }
 0x5d3   : > { %6837 = vmatprep.subr.mxu1 %v2604_v42  ;;  %6767 = vmatpush1.msra.mxu0 %v2475_v49  ;;  %v2692_v60 = vld [vmem:[%s8015_s0 + $0x4b38] sm:$0xff]  ;;  %v2563_v39 = vld [vmem:[%s8015_s0 + $0x4730] sm:$0xff] }
 0x5d4   : > { %6838 = vmatpush1.msra.mxu1 %v2603_v20  ;;  %6768 = vmatprep.subr.mxu0 %v2472_v22  ;;  %v2691_v14 = vld [vmem:[%s8015_s0 + $0x4b30] sm:$0xff]  ;;  %v2560_v27 = vld [vmem:[%s8015_s0 + $0x4718] sm:$0xff] }
 0x5d5   : > { %6839 = vmatprep.subr.mxu1 %v2600_v61  ;;  %6769 = vmatpush1.msra.mxu0 %v2471_v33  ;;  %v2688_v26 = vld [vmem:[%s8015_s0 + $0x4b18] sm:$0xff]  ;;  %v2559_v63 = vld [vmem:[%s8015_s0 + $0x4710] sm:$0xff] }
 0x5d6   : > { %6840 = vmatpush1.msra.mxu1 %v2599_v47  ;;  %6770 = vmatprep.subr.mxu0 %v2468_v3  ;;  %v2687_v52 = vld [vmem:[%s8015_s0 + $0x4b10] sm:$0xff]  ;;  %v2556_v42 = vld [vmem:[%s8015_s0 + $0x46f8] sm:$0xff] }
 0x5d7   : > { %6841 = vmatprep.subr.mxu1 %v2596_v18  ;;  %6771 = vmatpush1.msra.mxu0 %v2467_v29  ;;  %v2684_v49 = vld [vmem:[%s8015_s0 + $0x4af8] sm:$0xff]  ;;  %v2555_v20 = vld [vmem:[%s8015_s0 + $0x46f0] sm:$0xff] }
 0x5d8   : > { %6842 = vmatpush1.msra.mxu1 %v2595_v56  ;;  %6772 = vmatprep.subr.mxu0 %v2464_v0  ;;  %v2683_v22 = vld [vmem:[%s8015_s0 + $0x4af0] sm:$0xff]  ;;  %v2552_v61 = vld [vmem:[%s8015_s0 + $0x46d8] sm:$0xff] }
 0x5d9   : > { %6843 = vmatprep.subr.mxu1 %v2592_v35  ;;  %6773 = vmatpush1.msra.mxu0 %v2463_v58  ;;  %v2680_v33 = vld [vmem:[%s8015_s0 + $0x4ad8] sm:$0xff]  ;;  %v2551_v47 = vld [vmem:[%s8015_s0 + $0x46d0] sm:$0xff] }
 0x5da   : > { %6844 = vmatpush1.msra.mxu1 %v2591_v41  ;;  %6774 = vmatprep.subr.mxu0 %v2588_v25  ;;  %v2679_v3 = vld [vmem:[%s8015_s0 + $0x4ad0] sm:$0xff]  ;;  %v2548_v18 = vld [vmem:[%s8015_s0 + $0x46b8] sm:$0xff] }
 0x5db   : > { %6845 = vmatprep.subr.mxu1 %v2716_v40  ;;  %6775 = vmatpush2.msra.mxu0 %v2587_v21  ;;  %v2676_v29 = vld [vmem:[%s8015_s0 + $0x4ab8] sm:$0xff]  ;;  %v2547_v56 = vld [vmem:[%s8015_s0 + $0x46b0] sm:$0xff] }
 0x5dc   : > { %6846 = vmatpush2.msra.mxu1 %v2715_v28  ;;  %6776 = vmatprep.subr.mxu0 %v2584_v23  ;;  %v2675_v0 = vld [vmem:[%s8015_s0 + $0x4ab0] sm:$0xff]  ;;  %v2544_v35 = vld [vmem:[%s8015_s0 + $0x4698] sm:$0xff] }
 0x5dd   : > { %6847 = vmatprep.subr.mxu1 %v2712_v15  ;;  %6777 = vmatpush2.msra.mxu0 %v2583_v44  ;;  %v2672_v58 = vld [vmem:[%s8015_s0 + $0x4a98] sm:$0xff]  ;;  %v2543_v41 = vld [vmem:[%s8015_s0 + $0x4690] sm:$0xff] }
 0x5de   : > { %6848 = vmatpush2.msra.mxu1 %v2711_v36  ;;  %6778 = vmatprep.subr.mxu0 %v2580_v53  ;;  %v2671_v25 = vld [vmem:[%s8015_s0 + $0x4a90] sm:$0xff]  ;;  %v2540_v40 = vld [vmem:[%s8015_s0 + $0x4678] sm:$0xff] }
 0x5df   : > { %6849 = vmatprep.subr.mxu1 %v2708_v9  ;;  %6779 = vmatpush2.msra.mxu0 %v2579_v17  ;;  %v2668_v21 = vld [vmem:[%s8015_s0 + $0x4a78] sm:$0xff]  ;;  %v2539_v28 = vld [vmem:[%s8015_s0 + $0x4670] sm:$0xff] }
 0x5e0   : > { %6850 = vmatpush2.msra.mxu1 %v2707_v54  ;;  %6780 = vmatprep.subr.mxu0 %v2576_v8  ;;  %v2667_v23 = vld [vmem:[%s8015_s0 + $0x4a70] sm:$0xff]  ;;  %v2536_v15 = vld [vmem:[%s8015_s0 + $0x4658] sm:$0xff] }
 0x5e1   : > { %6851 = vmatprep.subr.mxu1 %v2704_v6  ;;  %6781 = vmatpush2.msra.mxu0 %v2575_v57  ;;  %v2664_v44 = vld [vmem:[%s8015_s0 + $0x4a58] sm:$0xff]  ;;  %v2535_v36 = vld [vmem:[%s8015_s0 + $0x4650] sm:$0xff] }
 0x5e2   : > { %6852 = vmatpush2.msra.mxu1 %v2703_v45  ;;  %6782 = vmatprep.subr.mxu0 %v2572_v48  ;;  %v2663_v53 = vld [vmem:[%s8015_s0 + $0x4a50] sm:$0xff]  ;;  %v2532_v9 = vld [vmem:[%s8015_s0 + $0x4638] sm:$0xff] }
 0x5e3   : > { %6853 = vmatprep.subr.mxu1 %v2700_v5  ;;  %6783 = vmatpush2.msra.mxu0 %v2571_v32  ;;  %v2660_v17 = vld [vmem:[%s8015_s0 + $0x4a38] sm:$0xff]  ;;  %v2531_v54 = vld [vmem:[%s8015_s0 + $0x4630] sm:$0xff] }
 0x5e4   : > { %6854 = vmatpush2.msra.mxu1 %v2699_v62  ;;  %6784 = vmatprep.subr.mxu0 %v2568_v43  ;;  %v2659_v8 = vld [vmem:[%s8015_s0 + $0x4a30] sm:$0xff]  ;;  %v2528_v6 = vld [vmem:[%s8015_s0 + $0x4618] sm:$0xff] }
 0x5e5   : > { %6855 = vmatprep.subr.mxu1 %v2696_v19  ;;  %6785 = vmatpush2.msra.mxu0 %v2567_v10  ;;  %v2656_v57 = vld [vmem:[%s8015_s0 + $0x4a18] sm:$0xff]  ;;  %v2527_v45 = vld [vmem:[%s8015_s0 + $0x4610] sm:$0xff] }
 0x5e6   : > { %6856 = vmatpush2.msra.mxu1 %v2695_v1  ;;  %6786 = vmatprep.subr.mxu0 %v2564_v46  ;;  %v2655_v48 = vld [vmem:[%s8015_s0 + $0x4a10] sm:$0xff]  ;;  %v2780_v5 = vld [vmem:[%s8015_s0 + $0x4df8] sm:$0xff] }
 0x5e7   : > { %6857 = vmatprep.subr.mxu1 %v2692_v60  ;;  %6787 = vmatpush2.msra.mxu0 %v2563_v39  ;;  %v2908_v32 = vld [vmem:[%s8015_s0 + $0x51f8] sm:$0xff]  ;;  %v2779_v62 = vld [vmem:[%s8015_s0 + $0x4df0] sm:$0xff] }
 0x5e8   : > { %6858 = vmatpush2.msra.mxu1 %v2691_v14  ;;  %6788 = vmatprep.subr.mxu0 %v2560_v27  ;;  %v2907_v43 = vld [vmem:[%s8015_s0 + $0x51f0] sm:$0xff]  ;;  %v2776_v19 = vld [vmem:[%s8015_s0 + $0x4dd8] sm:$0xff] }
 0x5e9   : > { %6859 = vmatprep.subr.mxu1 %v2688_v26  ;;  %6789 = vmatpush2.msra.mxu0 %v2559_v63  ;;  %v2904_v10 = vld [vmem:[%s8015_s0 + $0x51d8] sm:$0xff]  ;;  %v2903_v1 = vld [vmem:[%s8015_s0 + $0x51d0] sm:$0xff] }
 0x5ea   : > { %6860 = vmatpush2.msra.mxu1 %v2687_v52  ;;  %6790 = vmatprep.subr.mxu0 %v2556_v42  ;;  %v2900_v46 = vld [vmem:[%s8015_s0 + $0x51b8] sm:$0xff]  ;;  %v2899_v60 = vld [vmem:[%s8015_s0 + $0x51b0] sm:$0xff] }
 0x5eb   : > { %6861 = vmatprep.subr.mxu1 %v2684_v49  ;;  %6791 = vmatpush2.msra.mxu0 %v2555_v20  ;;  %v2768_v39 = vld [vmem:[%s8015_s0 + $0x4d98] sm:$0xff]  ;;  %v2767_v14 = vld [vmem:[%s8015_s0 + $0x4d90] sm:$0xff] }
 0x5ec   : > { %6862 = vmatpush2.msra.mxu1 %v2683_v22  ;;  %6792 = vmatprep.subr.mxu0 %v2552_v61  ;;  %v2895_v27 = vld [vmem:[%s8015_s0 + $0x5190] sm:$0xff]  ;;  %v2764_v26 = vld [vmem:[%s8015_s0 + $0x4d78] sm:$0xff] }
 0x5ed   : > { %6863 = vmatprep.subr.mxu1 %v2680_v33  ;;  %6793 = vmatpush2.msra.mxu0 %v2551_v47  ;;  %v2892_v63 = vld [vmem:[%s8015_s0 + $0x5178] sm:$0xff]  ;;  %v2763_v52 = vld [vmem:[%s8015_s0 + $0x4d70] sm:$0xff] }
 0x5ee   : > { %6864 = vmatpush2.msra.mxu1 %v2679_v3  ;;  %6794 = vmatprep.subr.mxu0 %v2548_v18  ;;  %v2891_v42 = vld [vmem:[%s8015_s0 + $0x5170] sm:$0xff]  ;;  %v2760_v49 = vld [vmem:[%s8015_s0 + $0x4d58] sm:$0xff] }
 0x5ef   : > { %6865 = vmatprep.subr.mxu1 %v2676_v29  ;;  %6795 = vmatpush2.msra.mxu0 %v2547_v56  ;;  %v2888_v20 = vld [vmem:[%s8015_s0 + $0x5158] sm:$0xff]  ;;  %v2759_v22 = vld [vmem:[%s8015_s0 + $0x4d50] sm:$0xff] }
 0x5f0   : > { %6866 = vmatpush2.msra.mxu1 %v2675_v0  ;;  %6796 = vmatprep.subr.mxu0 %v2544_v35  ;;  %v2887_v61 = vld [vmem:[%s8015_s0 + $0x5150] sm:$0xff]  ;;  %v2756_v33 = vld [vmem:[%s8015_s0 + $0x4d38] sm:$0xff] }
 0x5f1   : > { %6867 = vmatprep.subr.mxu1 %v2672_v58  ;;  %6797 = vmatpush2.msra.mxu0 %v2543_v41  ;;  %v2884_v47 = vld [vmem:[%s8015_s0 + $0x5138] sm:$0xff]  ;;  %v2755_v3 = vld [vmem:[%s8015_s0 + $0x4d30] sm:$0xff] }
 0x5f2   : > { %6868 = vmatpush2.msra.mxu1 %v2671_v25  ;;  %6798 = vmatprep.subr.mxu0 %v2540_v40  ;;  %v2883_v18 = vld [vmem:[%s8015_s0 + $0x5130] sm:$0xff]  ;;  %v2752_v29 = vld [vmem:[%s8015_s0 + $0x4d18] sm:$0xff] }
 0x5f3   : > { %6869 = vmatprep.subr.mxu1 %v2668_v21  ;;  %6799 = vmatpush2.msra.mxu0 %v2539_v28  ;;  %v2880_v56 = vld [vmem:[%s8015_s0 + $0x5118] sm:$0xff]  ;;  %v2751_v0 = vld [vmem:[%s8015_s0 + $0x4d10] sm:$0xff] }
 0x5f4   : > { %6870 = vmatpush2.msra.mxu1 %v2667_v23  ;;  %6800 = vmatprep.subr.mxu0 %v2536_v15  ;;  %v2879_v35 = vld [vmem:[%s8015_s0 + $0x5110] sm:$0xff]  ;;  %v2748_v58 = vld [vmem:[%s8015_s0 + $0x4cf8] sm:$0xff] }
 0x5f5   : > { %6871 = vmatprep.subr.mxu1 %v2664_v44  ;;  %6801 = vmatpush2.msra.mxu0 %v2535_v36  ;;  %v2876_v41 = vld [vmem:[%s8015_s0 + $0x50f8] sm:$0xff]  ;;  %v2747_v25 = vld [vmem:[%s8015_s0 + $0x4cf0] sm:$0xff] }
 0x5f6   : > { %6872 = vmatpush2.msra.mxu1 %v2663_v53  ;;  %6802 = vmatprep.subr.mxu0 %v2532_v9  ;;  %v2875_v40 = vld [vmem:[%s8015_s0 + $0x50f0] sm:$0xff]  ;;  %v2744_v21 = vld [vmem:[%s8015_s0 + $0x4cd8] sm:$0xff] }
 0x5f7   : > { %6873 = vmatprep.subr.mxu1 %v2660_v17  ;;  %6803 = vmatpush2.msra.mxu0 %v2531_v54  ;;  %v2872_v28 = vld [vmem:[%s8015_s0 + $0x50d8] sm:$0xff]  ;;  %v2743_v23 = vld [vmem:[%s8015_s0 + $0x4cd0] sm:$0xff] }
 0x5f8   : > { %6874 = vmatpush2.msra.mxu1 %v2659_v8  ;;  %6804 = vmatprep.subr.mxu0 %v2528_v6  ;;  %v2871_v15 = vld [vmem:[%s8015_s0 + $0x50d0] sm:$0xff]  ;;  %v2740_v44 = vld [vmem:[%s8015_s0 + $0x4cb8] sm:$0xff] }
 0x5f9   : > { %6875 = vmatprep.subr.mxu1 %v2656_v57  ;;  %6805 = vmatpush2.msra.mxu0 %v2527_v45  ;;  %v2868_v36 = vld [vmem:[%s8015_s0 + $0x50b8] sm:$0xff]  ;;  %v2739_v53 = vld [vmem:[%s8015_s0 + $0x4cb0] sm:$0xff] }
 0x5fa   : > { %6806 = vmatprep.mubr.f32.mxu0 %v9376_v24  ;;  %6876 = vmatpush2.msra.mxu1 %v2655_v48  ;;  %v2775_v24 = vld [vmem:[%s8015_s0 + $0x4dd0] sm:$0xff]  ;;  %v2736_v17 = vld [vmem:[%s8015_s0 + $0x4c98] sm:$0xff] }
 0x5fb   : > { %6807 = vmatmul.mubr.f32.vlgmr.msra.gmra.mxu0 %v9362_v7  ;;  %6877 = vmatprep.mubr.f32.mxu1 %v9517_v30  ;;  %v2772_v7 = vld [vmem:[%s8015_s0 + $0x4db8] sm:$0xff]  ;;  %v2771_v30 = vld [vmem:[%s8015_s0 + $0x4db0] sm:$0xff] }
 0x5fc   : > { %6884 = vmatprep.subr.mxu0 %v2780_v5  ;;  %6955 = vmatprep.subr.mxu1 %v2908_v32  ;;  %v2867_v9 = vld [vmem:[%s8015_s0 + $0x50b0] sm:$0xff]  ;;  %v2864_v54 = vld [vmem:[%s8015_s0 + $0x5098] sm:$0xff] }
 0x5fd   : > { %6878 = vmatmul.mubr.f32.vlgmr.msra.gmra.mxu1 %v9502_v2  ;;  %6885 = vmatpush1.msra.mxu0 %v2779_v62  ;;  %v2896_v2 = vld [vmem:[%s8015_s0 + $0x5198] sm:$0xff]  ;;  %v2735_v8 = vld [vmem:[%s8015_s0 + $0x4c90] sm:$0xff] }
 0x5fe   : > { %6956 = vmatpush1.msra.mxu1 %v2907_v43  ;;  %6886 = vmatprep.subr.mxu0 %v2776_v19  ;;  %v2863_v6 = vld [vmem:[%s8015_s0 + $0x5090] sm:$0xff]  ;;  %v2732_v57 = vld [vmem:[%s8015_s0 + $0x4c78] sm:$0xff] }
 0x5ff   : > { %6957 = vmatprep.subr.mxu1 %v2904_v10  ;;  %6887 = vmatpush1.msra.mxu0 %v2775_v24  ;;  %v2860_v45 = vld [vmem:[%s8015_s0 + $0x5078] sm:$0xff]  ;;  %v2731_v48 = vld [vmem:[%s8015_s0 + $0x4c70] sm:$0xff] }
 0x600   : > { %6958 = vmatpush1.msra.mxu1 %v2903_v1  ;;  %6888 = vmatprep.subr.mxu0 %v2772_v7  ;;  %v2859_v5 = vld [vmem:[%s8015_s0 + $0x5070] sm:$0xff]  ;;  %v2728_v32 = vld [vmem:[%s8015_s0 + $0x4c58] sm:$0xff] }
 0x601   : > { %6959 = vmatprep.subr.mxu1 %v2900_v46  ;;  %6889 = vmatpush1.msra.mxu0 %v2771_v30  ;;  %v2856_v62 = vld [vmem:[%s8015_s0 + $0x5058] sm:$0xff]  ;;  %v2727_v43 = vld [vmem:[%s8015_s0 + $0x4c50] sm:$0xff] }
 0x602   : > { %6960 = vmatpush1.msra.mxu1 %v2899_v60  ;;  %6890 = vmatprep.subr.mxu0 %v2768_v39  ;;  %v2855_v19 = vld [vmem:[%s8015_s0 + $0x5050] sm:$0xff]  ;;  %v2724_v10 = vld [vmem:[%s8015_s0 + $0x4c38] sm:$0xff] }
 0x603   : > { %6961 = vmatprep.subr.mxu1 %v2896_v2  ;;  %6891 = vmatpush1.msra.mxu0 %v2767_v14  ;;  %v2852_v24 = vld [vmem:[%s8015_s0 + $0x5038] sm:$0xff]  ;;  %v2723_v1 = vld [vmem:[%s8015_s0 + $0x4c30] sm:$0xff] }
 0x604   : > { %6962 = vmatpush1.msra.mxu1 %v2895_v27  ;;  %6892 = vmatprep.subr.mxu0 %v2764_v26  ;;  %v2851_v7 = vld [vmem:[%s8015_s0 + $0x5030] sm:$0xff]  ;;  %v2720_v46 = vld [vmem:[%s8015_s0 + $0x4c18] sm:$0xff] }
 0x605   : > { %6963 = vmatprep.subr.mxu1 %v2892_v63  ;;  %6893 = vmatpush1.msra.mxu0 %v2763_v52  ;;  %v2848_v30 = vld [vmem:[%s8015_s0 + $0x5018] sm:$0xff]  ;;  %v2719_v60 = vld [vmem:[%s8015_s0 + $0x4c10] sm:$0xff] }
 0x606   : > { %6964 = vmatpush1.msra.mxu1 %v2891_v42  ;;  %6894 = vmatprep.subr.mxu0 %v2760_v49  ;;  %v2847_v39 = vld [vmem:[%s8015_s0 + $0x5010] sm:$0xff]  ;;  %v2844_v2 = vld [vmem:[%s8015_s0 + $0x4ff8] sm:$0xff] }
 0x607   : > { %6965 = vmatprep.subr.mxu1 %v2888_v20  ;;  %6895 = vmatpush1.msra.mxu0 %v2759_v22  ;;  %v2972_v14 = vld [vmem:[%s8015_s0 + $0x53f8] sm:$0xff]  ;;  %v2843_v27 = vld [vmem:[%s8015_s0 + $0x4ff0] sm:$0xff] }
 0x608   : > { %6966 = vmatpush1.msra.mxu1 %v2887_v61  ;;  %6896 = vmatprep.subr.mxu0 %v2756_v33  ;;  %v2971_v26 = vld [vmem:[%s8015_s0 + $0x53f0] sm:$0xff]  ;;  %v2840_v63 = vld [vmem:[%s8015_s0 + $0x4fd8] sm:$0xff] }
 0x609   : > { %6967 = vmatprep.subr.mxu1 %v2884_v47  ;;  %6897 = vmatpush1.msra.mxu0 %v2755_v3  ;;  %v2968_v52 = vld [vmem:[%s8015_s0 + $0x53d8] sm:$0xff]  ;;  %v2839_v42 = vld [vmem:[%s8015_s0 + $0x4fd0] sm:$0xff] }
 0x60a   : > { %6968 = vmatpush1.msra.mxu1 %v2883_v18  ;;  %6898 = vmatprep.subr.mxu0 %v2752_v29  ;;  %v2967_v49 = vld [vmem:[%s8015_s0 + $0x53d0] sm:$0xff]  ;;  %v2836_v20 = vld [vmem:[%s8015_s0 + $0x4fb8] sm:$0xff] }
 0x60b   : > { %6969 = vmatprep.subr.mxu1 %v2880_v56  ;;  %6899 = vmatpush1.msra.mxu0 %v2751_v0  ;;  %v2964_v22 = vld [vmem:[%s8015_s0 + $0x53b8] sm:$0xff]  ;;  %v2835_v61 = vld [vmem:[%s8015_s0 + $0x4fb0] sm:$0xff] }
 0x60c   : > { %6970 = vmatpush1.msra.mxu1 %v2879_v35  ;;  %6900 = vmatprep.subr.mxu0 %v2748_v58  ;;  %v2963_v33 = vld [vmem:[%s8015_s0 + $0x53b0] sm:$0xff]  ;;  %v2832_v47 = vld [vmem:[%s8015_s0 + $0x4f98] sm:$0xff] }
 0x60d   : > { %6971 = vmatprep.subr.mxu1 %v2876_v41  ;;  %6901 = vmatpush1.msra.mxu0 %v2747_v25  ;;  %v2960_v3 = vld [vmem:[%s8015_s0 + $0x5398] sm:$0xff]  ;;  %v2831_v18 = vld [vmem:[%s8015_s0 + $0x4f90] sm:$0xff] }
 0x60e   : > { %6972 = vmatpush1.msra.mxu1 %v2875_v40  ;;  %6902 = vmatprep.subr.mxu0 %v2744_v21  ;;  %v2959_v29 = vld [vmem:[%s8015_s0 + $0x5390] sm:$0xff]  ;;  %v2828_v56 = vld [vmem:[%s8015_s0 + $0x4f78] sm:$0xff] }
 0x60f   : > { %6973 = vmatprep.subr.mxu1 %v2872_v28  ;;  %6903 = vmatpush1.msra.mxu0 %v2743_v23  ;;  %v2956_v0 = vld [vmem:[%s8015_s0 + $0x5378] sm:$0xff]  ;;  %v2827_v35 = vld [vmem:[%s8015_s0 + $0x4f70] sm:$0xff] }
 0x610   : > { %6974 = vmatpush1.msra.mxu1 %v2871_v15  ;;  %6904 = vmatprep.subr.mxu0 %v2740_v44  ;;  %v2955_v58 = vld [vmem:[%s8015_s0 + $0x5370] sm:$0xff]  ;;  %v2824_v41 = vld [vmem:[%s8015_s0 + $0x4f58] sm:$0xff] }
 0x611   : > { %6975 = vmatprep.subr.mxu1 %v2868_v36  ;;  %6905 = vmatpush1.msra.mxu0 %v2739_v53  ;;  %v2952_v25 = vld [vmem:[%s8015_s0 + $0x5358] sm:$0xff]  ;;  %v2823_v40 = vld [vmem:[%s8015_s0 + $0x4f50] sm:$0xff] }
 0x612   : > { %6976 = vmatpush1.msra.mxu1 %v2867_v9  ;;  %6906 = vmatprep.subr.mxu0 %v2736_v17  ;;  %v2951_v21 = vld [vmem:[%s8015_s0 + $0x5350] sm:$0xff]  ;;  %v2820_v28 = vld [vmem:[%s8015_s0 + $0x4f38] sm:$0xff] }
 0x613   : > { %6977 = vmatprep.subr.mxu1 %v2864_v54  ;;  %6907 = vmatpush1.msra.mxu0 %v2735_v8  ;;  %v2948_v23 = vld [vmem:[%s8015_s0 + $0x5338] sm:$0xff]  ;;  %v2819_v15 = vld [vmem:[%s8015_s0 + $0x4f30] sm:$0xff] }
 0x614   : > { %6978 = vmatpush1.msra.mxu1 %v2863_v6  ;;  %6908 = vmatprep.subr.mxu0 %v2732_v57  ;;  %v2947_v44 = vld [vmem:[%s8015_s0 + $0x5330] sm:$0xff]  ;;  %v2816_v36 = vld [vmem:[%s8015_s0 + $0x4f18] sm:$0xff] }
 0x615   : > { %6979 = vmatprep.subr.mxu1 %v2860_v45  ;;  %6909 = vmatpush1.msra.mxu0 %v2731_v48  ;;  %v2944_v53 = vld [vmem:[%s8015_s0 + $0x5318] sm:$0xff]  ;;  %v2815_v9 = vld [vmem:[%s8015_s0 + $0x4f10] sm:$0xff] }
 0x616   : > { %6980 = vmatpush1.msra.mxu1 %v2859_v5  ;;  %6910 = vmatprep.subr.mxu0 %v2728_v32  ;;  %v2943_v17 = vld [vmem:[%s8015_s0 + $0x5310] sm:$0xff]  ;;  %v2812_v54 = vld [vmem:[%s8015_s0 + $0x4ef8] sm:$0xff] }
 0x617   : > { %6981 = vmatprep.subr.mxu1 %v2856_v62  ;;  %6911 = vmatpush1.msra.mxu0 %v2727_v43  ;;  %v2940_v8 = vld [vmem:[%s8015_s0 + $0x52f8] sm:$0xff]  ;;  %v2811_v6 = vld [vmem:[%s8015_s0 + $0x4ef0] sm:$0xff] }
 0x618   : > { %6982 = vmatpush1.msra.mxu1 %v2855_v19  ;;  %6912 = vmatprep.subr.mxu0 %v2724_v10  ;;  %v2939_v57 = vld [vmem:[%s8015_s0 + $0x52f0] sm:$0xff]  ;;  %v2808_v45 = vld [vmem:[%s8015_s0 + $0x4ed8] sm:$0xff] }
 0x619   : > { %6983 = vmatprep.subr.mxu1 %v2852_v24  ;;  %6913 = vmatpush1.msra.mxu0 %v2723_v1  ;;  %v2936_v48 = vld [vmem:[%s8015_s0 + $0x52d8] sm:$0xff]  ;;  %v2807_v5 = vld [vmem:[%s8015_s0 + $0x4ed0] sm:$0xff] }
 0x61a   : > { %6984 = vmatpush1.msra.mxu1 %v2851_v7  ;;  %6914 = vmatprep.subr.mxu0 %v2720_v46  ;;  %v2935_v32 = vld [vmem:[%s8015_s0 + $0x52d0] sm:$0xff]  ;;  %v2804_v62 = vld [vmem:[%s8015_s0 + $0x4eb8] sm:$0xff] }
 0x61b   : > { %6985 = vmatprep.subr.mxu1 %v2848_v30  ;;  %6915 = vmatpush1.msra.mxu0 %v2719_v60  ;;  %v2932_v43 = vld [vmem:[%s8015_s0 + $0x52b8] sm:$0xff]  ;;  %v2803_v19 = vld [vmem:[%s8015_s0 + $0x4eb0] sm:$0xff] }
 0x61c   : > { %6986 = vmatpush1.msra.mxu1 %v2847_v39  ;;  %6916 = vmatprep.subr.mxu0 %v2844_v2  ;;  %v2931_v10 = vld [vmem:[%s8015_s0 + $0x52b0] sm:$0xff]  ;;  %v2800_v24 = vld [vmem:[%s8015_s0 + $0x4e98] sm:$0xff] }
 0x61d   : > { %6987 = vmatprep.subr.mxu1 %v2972_v14  ;;  %6917 = vmatpush2.msra.mxu0 %v2843_v27  ;;  %v2928_v1 = vld [vmem:[%s8015_s0 + $0x5298] sm:$0xff]  ;;  %v2799_v7 = vld [vmem:[%s8015_s0 + $0x4e90] sm:$0xff] }
 0x61e   : > { %6988 = vmatpush2.msra.mxu1 %v2971_v26  ;;  %6918 = vmatprep.subr.mxu0 %v2840_v63  ;;  %v2927_v46 = vld [vmem:[%s8015_s0 + $0x5290] sm:$0xff]  ;;  %v2796_v30 = vld [vmem:[%s8015_s0 + $0x4e78] sm:$0xff] }
 0x61f   : > { %6989 = vmatprep.subr.mxu1 %v2968_v52  ;;  %6919 = vmatpush2.msra.mxu0 %v2839_v42  ;;  %v2924_v60 = vld [vmem:[%s8015_s0 + $0x5278] sm:$0xff]  ;;  %v2795_v39 = vld [vmem:[%s8015_s0 + $0x4e70] sm:$0xff] }
 0x620   : > { %6990 = vmatpush2.msra.mxu1 %v2967_v49  ;;  %6920 = vmatprep.subr.mxu0 %v2836_v20  ;;  %v2923_v2 = vld [vmem:[%s8015_s0 + $0x5270] sm:$0xff]  ;;  %v2792_v14 = vld [vmem:[%s8015_s0 + $0x4e58] sm:$0xff] }
 0x621   : > { %6991 = vmatprep.subr.mxu1 %v2964_v22  ;;  %6921 = vmatpush2.msra.mxu0 %v2835_v61  ;;  %v2920_v27 = vld [vmem:[%s8015_s0 + $0x5258] sm:$0xff]  ;;  %v2791_v26 = vld [vmem:[%s8015_s0 + $0x4e50] sm:$0xff] }
 0x622   : > { %6992 = vmatpush2.msra.mxu1 %v2963_v33  ;;  %6922 = vmatprep.subr.mxu0 %v2832_v47  ;;  %v2919_v63 = vld [vmem:[%s8015_s0 + $0x5250] sm:$0xff]  ;;  %v2788_v52 = vld [vmem:[%s8015_s0 + $0x4e38] sm:$0xff] }
 0x623   : > { %6993 = vmatprep.subr.mxu1 %v2960_v3  ;;  %6923 = vmatpush2.msra.mxu0 %v2831_v18  ;;  %v2916_v42 = vld [vmem:[%s8015_s0 + $0x5238] sm:$0xff]  ;;  %v2787_v49 = vld [vmem:[%s8015_s0 + $0x4e30] sm:$0xff] }
 0x624   : > { %6994 = vmatpush2.msra.mxu1 %v2959_v29  ;;  %6924 = vmatprep.subr.mxu0 %v2828_v56  ;;  %v2915_v20 = vld [vmem:[%s8015_s0 + $0x5230] sm:$0xff]  ;;  %v2784_v22 = vld [vmem:[%s8015_s0 + $0x4e18] sm:$0xff] }
 0x625   : > { %6995 = vmatprep.subr.mxu1 %v2956_v0  ;;  %6925 = vmatpush2.msra.mxu0 %v2827_v35  ;;  %v2912_v61 = vld [vmem:[%s8015_s0 + $0x5218] sm:$0xff]  ;;  %v2783_v33 = vld [vmem:[%s8015_s0 + $0x4e10] sm:$0xff] }
 0x626   : > { %6996 = vmatpush2.msra.mxu1 %v2955_v58  ;;  %6926 = vmatprep.subr.mxu0 %v2824_v41  ;;  %v2911_v47 = vld [vmem:[%s8015_s0 + $0x5210] sm:$0xff]  ;;  %v3036_v3 = vld [vmem:[%s8015_s0 + $0x55f8] sm:$0xff] }
 0x627   : > { %6997 = vmatprep.subr.mxu1 %v2952_v25  ;;  %6927 = vmatpush2.msra.mxu0 %v2823_v40  ;;  %v3164_v18 = vld [vmem:[%s8015_s0 + $0x59f8] sm:$0xff]  ;;  %v3035_v29 = vld [vmem:[%s8015_s0 + $0x55f0] sm:$0xff] }
 0x628   : > { %6998 = vmatpush2.msra.mxu1 %v2951_v21  ;;  %6928 = vmatprep.subr.mxu0 %v2820_v28  ;;  %v3163_v56 = vld [vmem:[%s8015_s0 + $0x59f0] sm:$0xff]  ;;  %v3032_v0 = vld [vmem:[%s8015_s0 + $0x55d8] sm:$0xff] }
 0x629   : > { %6999 = vmatprep.subr.mxu1 %v2948_v23  ;;  %6929 = vmatpush2.msra.mxu0 %v2819_v15  ;;  %v3160_v35 = vld [vmem:[%s8015_s0 + $0x59d8] sm:$0xff]  ;;  %v3159_v58 = vld [vmem:[%s8015_s0 + $0x59d0] sm:$0xff] }
 0x62a   : > { %7000 = vmatpush2.msra.mxu1 %v2947_v44  ;;  %6930 = vmatprep.subr.mxu0 %v2816_v36  ;;  %v3156_v41 = vld [vmem:[%s8015_s0 + $0x59b8] sm:$0xff]  ;;  %v3155_v25 = vld [vmem:[%s8015_s0 + $0x59b0] sm:$0xff] }
 0x62b   : > { %7001 = vmatprep.subr.mxu1 %v2944_v53  ;;  %6931 = vmatpush2.msra.mxu0 %v2815_v9  ;;  %v3024_v40 = vld [vmem:[%s8015_s0 + $0x5598] sm:$0xff]  ;;  %v3023_v21 = vld [vmem:[%s8015_s0 + $0x5590] sm:$0xff] }
 0x62c   : > { %7002 = vmatpush2.msra.mxu1 %v2943_v17  ;;  %6932 = vmatprep.subr.mxu0 %v2812_v54  ;;  %v3151_v28 = vld [vmem:[%s8015_s0 + $0x5990] sm:$0xff]  ;;  %v3020_v23 = vld [vmem:[%s8015_s0 + $0x5578] sm:$0xff] }
 0x62d   : > { %7003 = vmatprep.subr.mxu1 %v2940_v8  ;;  %6933 = vmatpush2.msra.mxu0 %v2811_v6  ;;  %v3148_v15 = vld [vmem:[%s8015_s0 + $0x5978] sm:$0xff]  ;;  %v3019_v44 = vld [vmem:[%s8015_s0 + $0x5570] sm:$0xff] }
 0x62e   : > { %7004 = vmatpush2.msra.mxu1 %v2939_v57  ;;  %6934 = vmatprep.subr.mxu0 %v2808_v45  ;;  %v3147_v36 = vld [vmem:[%s8015_s0 + $0x5970] sm:$0xff]  ;;  %v3016_v53 = vld [vmem:[%s8015_s0 + $0x5558] sm:$0xff] }
 0x62f   : > { %7005 = vmatprep.subr.mxu1 %v2936_v48  ;;  %6935 = vmatpush2.msra.mxu0 %v2807_v5  ;;  %v3144_v9 = vld [vmem:[%s8015_s0 + $0x5958] sm:$0xff]  ;;  %v3015_v17 = vld [vmem:[%s8015_s0 + $0x5550] sm:$0xff] }
 0x630   : > { %7006 = vmatpush2.msra.mxu1 %v2935_v32  ;;  %6936 = vmatprep.subr.mxu0 %v2804_v62  ;;  %v3143_v54 = vld [vmem:[%s8015_s0 + $0x5950] sm:$0xff]  ;;  %v3012_v8 = vld [vmem:[%s8015_s0 + $0x5538] sm:$0xff] }
 0x631   : > { %7007 = vmatprep.subr.mxu1 %v2932_v43  ;;  %6937 = vmatpush2.msra.mxu0 %v2803_v19  ;;  %v3140_v6 = vld [vmem:[%s8015_s0 + $0x5938] sm:$0xff]  ;;  %v3011_v57 = vld [vmem:[%s8015_s0 + $0x5530] sm:$0xff] }
 0x632   : > { %7008 = vmatpush2.msra.mxu1 %v2931_v10  ;;  %6938 = vmatprep.subr.mxu0 %v2800_v24  ;;  %v3139_v45 = vld [vmem:[%s8015_s0 + $0x5930] sm:$0xff]  ;;  %v3008_v48 = vld [vmem:[%s8015_s0 + $0x5518] sm:$0xff] }
 0x633   : > { %7009 = vmatprep.subr.mxu1 %v2928_v1  ;;  %6939 = vmatpush2.msra.mxu0 %v2799_v7  ;;  %v3136_v5 = vld [vmem:[%s8015_s0 + $0x5918] sm:$0xff]  ;;  %v3007_v32 = vld [vmem:[%s8015_s0 + $0x5510] sm:$0xff] }
 0x634   : > { %7010 = vmatpush2.msra.mxu1 %v2927_v46  ;;  %6940 = vmatprep.subr.mxu0 %v2796_v30  ;;  %v3135_v62 = vld [vmem:[%s8015_s0 + $0x5910] sm:$0xff]  ;;  %v3004_v43 = vld [vmem:[%s8015_s0 + $0x54f8] sm:$0xff] }
 0x635   : > { %7011 = vmatprep.subr.mxu1 %v2924_v60  ;;  %6941 = vmatpush2.msra.mxu0 %v2795_v39  ;;  %v3132_v19 = vld [vmem:[%s8015_s0 + $0x58f8] sm:$0xff]  ;;  %v3003_v10 = vld [vmem:[%s8015_s0 + $0x54f0] sm:$0xff] }
 0x636   : > { %7012 = vmatpush2.msra.mxu1 %v2923_v2  ;;  %6942 = vmatprep.subr.mxu0 %v2792_v14  ;;  %v3131_v24 = vld [vmem:[%s8015_s0 + $0x58f0] sm:$0xff]  ;;  %v3000_v1 = vld [vmem:[%s8015_s0 + $0x54d8] sm:$0xff] }
 0x637   : > { %7013 = vmatprep.subr.mxu1 %v2920_v27  ;;  %6943 = vmatpush2.msra.mxu0 %v2791_v26  ;;  %v3128_v7 = vld [vmem:[%s8015_s0 + $0x58d8] sm:$0xff]  ;;  %v2999_v46 = vld [vmem:[%s8015_s0 + $0x54d0] sm:$0xff] }
 0x638   : > { %7014 = vmatpush2.msra.mxu1 %v2919_v63  ;;  %6944 = vmatprep.subr.mxu0 %v2788_v52  ;;  %v3127_v30 = vld [vmem:[%s8015_s0 + $0x58d0] sm:$0xff]  ;;  %v2996_v60 = vld [vmem:[%s8015_s0 + $0x54b8] sm:$0xff] }
 0x639   : > { %7015 = vmatprep.subr.mxu1 %v2916_v42  ;;  %6945 = vmatpush2.msra.mxu0 %v2787_v49  ;;  %v3124_v39 = vld [vmem:[%s8015_s0 + $0x58b8] sm:$0xff]  ;;  %v2995_v2 = vld [vmem:[%s8015_s0 + $0x54b0] sm:$0xff] }
 0x63a   : > { %7016 = vmatpush2.msra.mxu1 %v2915_v20  ;;  %6946 = vmatprep.subr.mxu0 %v2784_v22  ;;  %v3123_v14 = vld [vmem:[%s8015_s0 + $0x58b0] sm:$0xff]  ;;  %v2992_v27 = vld [vmem:[%s8015_s0 + $0x5498] sm:$0xff] }
 0x63b   : > { %7017 = vmatprep.subr.mxu1 %v2912_v61  ;;  %6947 = vmatpush2.msra.mxu0 %v2783_v33  ;;  %v3120_v26 = vld [vmem:[%s8015_s0 + $0x5898] sm:$0xff]  ;;  %v2991_v63 = vld [vmem:[%s8015_s0 + $0x5490] sm:$0xff] }
 0x63c   : > { %6948 = vmatprep.mubr.f32.mxu0 %v9523_v34  ;;  %7018 = vmatpush2.msra.mxu1 %v2911_v47  ;;  %v3031_v34 = vld [vmem:[%s8015_s0 + $0x55d0] sm:$0xff]  ;;  %v2988_v42 = vld [vmem:[%s8015_s0 + $0x5478] sm:$0xff] }
 0x63d   : > { %6949 = vmatmul.mubr.f32.vlgmr.msra.gmra.mxu0 %v9509_v12  ;;  %7019 = vmatprep.mubr.f32.mxu1 %v9664_v31  ;;  %v3028_v12 = vld [vmem:[%s8015_s0 + $0x55b8] sm:$0xff]  ;;  %v3027_v31 = vld [vmem:[%s8015_s0 + $0x55b0] sm:$0xff] }
 0x63e   : > { %7026 = vmatprep.subr.mxu0 %v3036_v3  ;;  %7097 = vmatprep.subr.mxu1 %v3164_v18  ;;  %v3119_v52 = vld [vmem:[%s8015_s0 + $0x5890] sm:$0xff]  ;;  %v3116_v49 = vld [vmem:[%s8015_s0 + $0x5878] sm:$0xff] }
 0x63f   : > { %7020 = vmatmul.mubr.f32.vlgmr.msra.gmra.mxu1 %v9649_v59  ;;  %7027 = vmatpush1.msra.mxu0 %v3035_v29  ;;  %v3152_v59 = vld [vmem:[%s8015_s0 + $0x5998] sm:$0xff]  ;;  %v2987_v20 = vld [vmem:[%s8015_s0 + $0x5470] sm:$0xff] }
 0x640   : > { %7098 = vmatpush1.msra.mxu1 %v3163_v56  ;;  %7028 = vmatprep.subr.mxu0 %v3032_v0  ;;  %v3115_v22 = vld [vmem:[%s8015_s0 + $0x5870] sm:$0xff]  ;;  %v2984_v61 = vld [vmem:[%s8015_s0 + $0x5458] sm:$0xff] }
 0x641   : > { %7099 = vmatprep.subr.mxu1 %v3160_v35  ;;  %7029 = vmatpush1.msra.mxu0 %v3031_v34  ;;  %v3112_v33 = vld [vmem:[%s8015_s0 + $0x5858] sm:$0xff]  ;;  %v2983_v47 = vld [vmem:[%s8015_s0 + $0x5450] sm:$0xff] }
 0x642   : > { %7100 = vmatpush1.msra.mxu1 %v3159_v58  ;;  %7030 = vmatprep.subr.mxu0 %v3028_v12  ;;  %v3111_v3 = vld [vmem:[%s8015_s0 + $0x5850] sm:$0xff]  ;;  %v2980_v18 = vld [vmem:[%s8015_s0 + $0x5438] sm:$0xff] }
 0x643   : > { %7101 = vmatprep.subr.mxu1 %v3156_v41  ;;  %7031 = vmatpush1.msra.mxu0 %v3027_v31  ;;  %v3108_v29 = vld [vmem:[%s8015_s0 + $0x5838] sm:$0xff]  ;;  %v2979_v56 = vld [vmem:[%s8015_s0 + $0x5430] sm:$0xff] }
 0x644   : > { %7102 = vmatpush1.msra.mxu1 %v3155_v25  ;;  %7032 = vmatprep.subr.mxu0 %v3024_v40  ;;  %v3107_v0 = vld [vmem:[%s8015_s0 + $0x5830] sm:$0xff]  ;;  %v2976_v35 = vld [vmem:[%s8015_s0 + $0x5418] sm:$0xff] }
 0x645   : > { %7103 = vmatprep.subr.mxu1 %v3152_v59  ;;  %7033 = vmatpush1.msra.mxu0 %v3023_v21  ;;  %v3104_v34 = vld [vmem:[%s8015_s0 + $0x5818] sm:$0xff]  ;;  %v2975_v58 = vld [vmem:[%s8015_s0 + $0x5410] sm:$0xff] }
 0x646   : > { %7104 = vmatpush1.msra.mxu1 %v3151_v28  ;;  %7034 = vmatprep.subr.mxu0 %v3020_v23  ;;  %v3103_v12 = vld [vmem:[%s8015_s0 + $0x5810] sm:$0xff]  ;;  %v3100_v41 = vld [vmem:[%s8015_s0 + $0x57f8] sm:$0xff] }
 0x647   : > { %7105 = vmatprep.subr.mxu1 %v3148_v15  ;;  %7035 = vmatpush1.msra.mxu0 %v3019_v44  ;;  %v3228_v31 = vld [vmem:[%s8015_s0 + $0x5bf8] sm:$0xff]  ;;  %v3099_v25 = vld [vmem:[%s8015_s0 + $0x57f0] sm:$0xff] }
 0x648   : > { %7106 = vmatpush1.msra.mxu1 %v3147_v36  ;;  %7036 = vmatprep.subr.mxu0 %v3016_v53  ;;  %v3227_v40 = vld [vmem:[%s8015_s0 + $0x5bf0] sm:$0xff]  ;;  %v3096_v59 = vld [vmem:[%s8015_s0 + $0x57d8] sm:$0xff] }
 0x649   : > { %7107 = vmatprep.subr.mxu1 %v3144_v9  ;;  %7037 = vmatpush1.msra.mxu0 %v3015_v17  ;;  %v3224_v21 = vld [vmem:[%s8015_s0 + $0x5bd8] sm:$0xff]  ;;  %v3095_v28 = vld [vmem:[%s8015_s0 + $0x57d0] sm:$0xff] }
 0x64a   : > { %7108 = vmatpush1.msra.mxu1 %v3143_v54  ;;  %7038 = vmatprep.subr.mxu0 %v3012_v8  ;;  %v3223_v23 = vld [vmem:[%s8015_s0 + $0x5bd0] sm:$0xff]  ;;  %v3092_v15 = vld [vmem:[%s8015_s0 + $0x57b8] sm:$0xff] }
 0x64b   : > { %7109 = vmatprep.subr.mxu1 %v3140_v6  ;;  %7039 = vmatpush1.msra.mxu0 %v3011_v57  ;;  %v3220_v44 = vld [vmem:[%s8015_s0 + $0x5bb8] sm:$0xff]  ;;  %v3091_v36 = vld [vmem:[%s8015_s0 + $0x57b0] sm:$0xff] }
 0x64c   : > { %7110 = vmatpush1.msra.mxu1 %v3139_v45  ;;  %7040 = vmatprep.subr.mxu0 %v3008_v48  ;;  %v3219_v53 = vld [vmem:[%s8015_s0 + $0x5bb0] sm:$0xff]  ;;  %v3088_v9 = vld [vmem:[%s8015_s0 + $0x5798] sm:$0xff] }
 0x64d   : > { %7111 = vmatprep.subr.mxu1 %v3136_v5  ;;  %7041 = vmatpush1.msra.mxu0 %v3007_v32  ;;  %v3216_v17 = vld [vmem:[%s8015_s0 + $0x5b98] sm:$0xff]  ;;  %v3087_v54 = vld [vmem:[%s8015_s0 + $0x5790] sm:$0xff] }
 0x64e   : > { %7112 = vmatpush1.msra.mxu1 %v3135_v62  ;;  %7042 = vmatprep.subr.mxu0 %v3004_v43  ;;  %v3215_v8 = vld [vmem:[%s8015_s0 + $0x5b90] sm:$0xff]  ;;  %v3084_v6 = vld [vmem:[%s8015_s0 + $0x5778] sm:$0xff] }
 0x64f   : > { %7113 = vmatprep.subr.mxu1 %v3132_v19  ;;  %7043 = vmatpush1.msra.mxu0 %v3003_v10  ;;  %v3212_v57 = vld [vmem:[%s8015_s0 + $0x5b78] sm:$0xff]  ;;  %v3083_v45 = vld [vmem:[%s8015_s0 + $0x5770] sm:$0xff] }
 0x650   : > { %7114 = vmatpush1.msra.mxu1 %v3131_v24  ;;  %7044 = vmatprep.subr.mxu0 %v3000_v1  ;;  %v3211_v48 = vld [vmem:[%s8015_s0 + $0x5b70] sm:$0xff]  ;;  %v3080_v5 = vld [vmem:[%s8015_s0 + $0x5758] sm:$0xff] }
 0x651   : > { %7115 = vmatprep.subr.mxu1 %v3128_v7  ;;  %7045 = vmatpush1.msra.mxu0 %v2999_v46  ;;  %v3208_v32 = vld [vmem:[%s8015_s0 + $0x5b58] sm:$0xff]  ;;  %v3079_v62 = vld [vmem:[%s8015_s0 + $0x5750] sm:$0xff] }
 0x652   : > { %7116 = vmatpush1.msra.mxu1 %v3127_v30  ;;  %7046 = vmatprep.subr.mxu0 %v2996_v60  ;;  %v3207_v43 = vld [vmem:[%s8015_s0 + $0x5b50] sm:$0xff]  ;;  %v3076_v19 = vld [vmem:[%s8015_s0 + $0x5738] sm:$0xff] }
 0x653   : > { %7117 = vmatprep.subr.mxu1 %v3124_v39  ;;  %7047 = vmatpush1.msra.mxu0 %v2995_v2  ;;  %v3204_v10 = vld [vmem:[%s8015_s0 + $0x5b38] sm:$0xff]  ;;  %v3075_v24 = vld [vmem:[%s8015_s0 + $0x5730] sm:$0xff] }
 0x654   : > { %7118 = vmatpush1.msra.mxu1 %v3123_v14  ;;  %7048 = vmatprep.subr.mxu0 %v2992_v27  ;;  %v3203_v1 = vld [vmem:[%s8015_s0 + $0x5b30] sm:$0xff]  ;;  %v3072_v7 = vld [vmem:[%s8015_s0 + $0x5718] sm:$0xff] }
 0x655   : > { %7119 = vmatprep.subr.mxu1 %v3120_v26  ;;  %7049 = vmatpush1.msra.mxu0 %v2991_v63  ;;  %v3200_v46 = vld [vmem:[%s8015_s0 + $0x5b18] sm:$0xff]  ;;  %v3071_v30 = vld [vmem:[%s8015_s0 + $0x5710] sm:$0xff] }
 0x656   : > { %7120 = vmatpush1.msra.mxu1 %v3119_v52  ;;  %7050 = vmatprep.subr.mxu0 %v2988_v42  ;;  %v3199_v60 = vld [vmem:[%s8015_s0 + $0x5b10] sm:$0xff]  ;;  %v3068_v39 = vld [vmem:[%s8015_s0 + $0x56f8] sm:$0xff] }
 0x657   : > { %7121 = vmatprep.subr.mxu1 %v3116_v49  ;;  %7051 = vmatpush1.msra.mxu0 %v2987_v20  ;;  %v3196_v2 = vld [vmem:[%s8015_s0 + $0x5af8] sm:$0xff]  ;;  %v3067_v14 = vld [vmem:[%s8015_s0 + $0x56f0] sm:$0xff] }
 0x658   : > { %7122 = vmatpush1.msra.mxu1 %v3115_v22  ;;  %7052 = vmatprep.subr.mxu0 %v2984_v61  ;;  %v3195_v27 = vld [vmem:[%s8015_s0 + $0x5af0] sm:$0xff]  ;;  %v3064_v26 = vld [vmem:[%s8015_s0 + $0x56d8] sm:$0xff] }
 0x659   : > { %7123 = vmatprep.subr.mxu1 %v3112_v33  ;;  %7053 = vmatpush1.msra.mxu0 %v2983_v47  ;;  %v3192_v63 = vld [vmem:[%s8015_s0 + $0x5ad8] sm:$0xff]  ;;  %v3063_v52 = vld [vmem:[%s8015_s0 + $0x56d0] sm:$0xff] }
 0x65a   : > { %7124 = vmatpush1.msra.mxu1 %v3111_v3  ;;  %7054 = vmatprep.subr.mxu0 %v2980_v18  ;;  %v3191_v42 = vld [vmem:[%s8015_s0 + $0x5ad0] sm:$0xff]  ;;  %v3060_v49 = vld [vmem:[%s8015_s0 + $0x56b8] sm:$0xff] }
 0x65b   : > { %7125 = vmatprep.subr.mxu1 %v3108_v29  ;;  %7055 = vmatpush1.msra.mxu0 %v2979_v56  ;;  %v3188_v20 = vld [vmem:[%s8015_s0 + $0x5ab8] sm:$0xff]  ;;  %v3059_v22 = vld [vmem:[%s8015_s0 + $0x56b0] sm:$0xff] }
 0x65c   : > { %7126 = vmatpush1.msra.mxu1 %v3107_v0  ;;  %7056 = vmatprep.subr.mxu0 %v2976_v35  ;;  %v3187_v61 = vld [vmem:[%s8015_s0 + $0x5ab0] sm:$0xff]  ;;  %v3056_v33 = vld [vmem:[%s8015_s0 + $0x5698] sm:$0xff] }
 0x65d   : > { %7127 = vmatprep.subr.mxu1 %v3104_v34  ;;  %7057 = vmatpush1.msra.mxu0 %v2975_v58  ;;  %v3184_v47 = vld [vmem:[%s8015_s0 + $0x5a98] sm:$0xff]  ;;  %v3055_v3 = vld [vmem:[%s8015_s0 + $0x5690] sm:$0xff] }
 0x65e   : > { %7128 = vmatpush1.msra.mxu1 %v3103_v12  ;;  %7058 = vmatprep.subr.mxu0 %v3100_v41  ;;  %v3183_v18 = vld [vmem:[%s8015_s0 + $0x5a90] sm:$0xff]  ;;  %v3052_v29 = vld [vmem:[%s8015_s0 + $0x5678] sm:$0xff] }
 0x65f   : > { %7129 = vmatprep.subr.mxu1 %v3228_v31  ;;  %7059 = vmatpush2.msra.mxu0 %v3099_v25  ;;  %v3180_v56 = vld [vmem:[%s8015_s0 + $0x5a78] sm:$0xff]  ;;  %v3051_v0 = vld [vmem:[%s8015_s0 + $0x5670] sm:$0xff] }
 0x660   : > { %7130 = vmatpush2.msra.mxu1 %v3227_v40  ;;  %7060 = vmatprep.subr.mxu0 %v3096_v59  ;;  %v3179_v35 = vld [vmem:[%s8015_s0 + $0x5a70] sm:$0xff]  ;;  %v3048_v34 = vld [vmem:[%s8015_s0 + $0x5658] sm:$0xff] }
 0x661   : > { %7131 = vmatprep.subr.mxu1 %v3224_v21  ;;  %7061 = vmatpush2.msra.mxu0 %v3095_v28  ;;  %v3176_v58 = vld [vmem:[%s8015_s0 + $0x5a58] sm:$0xff]  ;;  %v3047_v12 = vld [vmem:[%s8015_s0 + $0x5650] sm:$0xff] }
 0x662   : > { %7132 = vmatpush2.msra.mxu1 %v3223_v23  ;;  %7062 = vmatprep.subr.mxu0 %v3092_v15  ;;  %v3175_v41 = vld [vmem:[%s8015_s0 + $0x5a50] sm:$0xff]  ;;  %v3044_v31 = vld [vmem:[%s8015_s0 + $0x5638] sm:$0xff] }
 0x663   : > { %7133 = vmatprep.subr.mxu1 %v3220_v44  ;;  %7063 = vmatpush2.msra.mxu0 %v3091_v36  ;;  %v3172_v25 = vld [vmem:[%s8015_s0 + $0x5a38] sm:$0xff]  ;;  %v3043_v40 = vld [vmem:[%s8015_s0 + $0x5630] sm:$0xff] }
 0x664   : > { %7134 = vmatpush2.msra.mxu1 %v3219_v53  ;;  %7064 = vmatprep.subr.mxu0 %v3088_v9  ;;  %v3171_v59 = vld [vmem:[%s8015_s0 + $0x5a30] sm:$0xff]  ;;  %v3040_v21 = vld [vmem:[%s8015_s0 + $0x5618] sm:$0xff] }
 0x665   : > { %7135 = vmatprep.subr.mxu1 %v3216_v17  ;;  %7065 = vmatpush2.msra.mxu0 %v3087_v54  ;;  %v3168_v28 = vld [vmem:[%s8015_s0 + $0x5a18] sm:$0xff]  ;;  %v3039_v23 = vld [vmem:[%s8015_s0 + $0x5610] sm:$0xff] }
 0x666   : > { %7136 = vmatpush2.msra.mxu1 %v3215_v8  ;;  %7066 = vmatprep.subr.mxu0 %v3084_v6  ;;  %v3167_v15 = vld [vmem:[%s8015_s0 + $0x5a10] sm:$0xff]  ;;  %v3292_v44 = vld [vmem:[%s8015_s0 + $0x5df8] sm:$0xff] }
 0x667   : > { %7137 = vmatprep.subr.mxu1 %v3212_v57  ;;  %7067 = vmatpush2.msra.mxu0 %v3083_v45  ;;  %v3420_v36 = vld [vmem:[%s8015_s0 + $0x61f8] sm:$0xff]  ;;  %v3291_v53 = vld [vmem:[%s8015_s0 + $0x5df0] sm:$0xff] }
 0x668   : > { %7138 = vmatpush2.msra.mxu1 %v3211_v48  ;;  %7068 = vmatprep.subr.mxu0 %v3080_v5  ;;  %v3419_v9 = vld [vmem:[%s8015_s0 + $0x61f0] sm:$0xff]  ;;  %v3288_v17 = vld [vmem:[%s8015_s0 + $0x5dd8] sm:$0xff] }
 0x669   : > { %7139 = vmatprep.subr.mxu1 %v3208_v32  ;;  %7069 = vmatpush2.msra.mxu0 %v3079_v62  ;;  %v3416_v54 = vld [vmem:[%s8015_s0 + $0x61d8] sm:$0xff]  ;;  %v3415_v8 = vld [vmem:[%s8015_s0 + $0x61d0] sm:$0xff] }
 0x66a   : > { %7140 = vmatpush2.msra.mxu1 %v3207_v43  ;;  %7070 = vmatprep.subr.mxu0 %v3076_v19  ;;  %v3412_v6 = vld [vmem:[%s8015_s0 + $0x61b8] sm:$0xff]  ;;  %v3411_v57 = vld [vmem:[%s8015_s0 + $0x61b0] sm:$0xff] }
 0x66b   : > { %7141 = vmatprep.subr.mxu1 %v3204_v10  ;;  %7071 = vmatpush2.msra.mxu0 %v3075_v24  ;;  %v3280_v45 = vld [vmem:[%s8015_s0 + $0x5d98] sm:$0xff]  ;;  %v3279_v48 = vld [vmem:[%s8015_s0 + $0x5d90] sm:$0xff] }
 0x66c   : > { %7142 = vmatpush2.msra.mxu1 %v3203_v1  ;;  %7072 = vmatprep.subr.mxu0 %v3072_v7  ;;  %v3407_v5 = vld [vmem:[%s8015_s0 + $0x6190] sm:$0xff]  ;;  %v3276_v32 = vld [vmem:[%s8015_s0 + $0x5d78] sm:$0xff] }
 0x66d   : > { %7143 = vmatprep.subr.mxu1 %v3200_v46  ;;  %7073 = vmatpush2.msra.mxu0 %v3071_v30  ;;  %v3404_v62 = vld [vmem:[%s8015_s0 + $0x6178] sm:$0xff]  ;;  %v3275_v43 = vld [vmem:[%s8015_s0 + $0x5d70] sm:$0xff] }
 0x66e   : > { %7144 = vmatpush2.msra.mxu1 %v3199_v60  ;;  %7074 = vmatprep.subr.mxu0 %v3068_v39  ;;  %v3403_v19 = vld [vmem:[%s8015_s0 + $0x6170] sm:$0xff]  ;;  %v3272_v10 = vld [vmem:[%s8015_s0 + $0x5d58] sm:$0xff] }
 0x66f   : > { %7145 = vmatprep.subr.mxu1 %v3196_v2  ;;  %7075 = vmatpush2.msra.mxu0 %v3067_v14  ;;  %v3400_v24 = vld [vmem:[%s8015_s0 + $0x6158] sm:$0xff]  ;;  %v3271_v1 = vld [vmem:[%s8015_s0 + $0x5d50] sm:$0xff] }
 0x670   : > { %7146 = vmatpush2.msra.mxu1 %v3195_v27  ;;  %7076 = vmatprep.subr.mxu0 %v3064_v26  ;;  %v3399_v7 = vld [vmem:[%s8015_s0 + $0x6150] sm:$0xff]  ;;  %v3268_v46 = vld [vmem:[%s8015_s0 + $0x5d38] sm:$0xff] }
 0x671   : > { %7147 = vmatprep.subr.mxu1 %v3192_v63  ;;  %7077 = vmatpush2.msra.mxu0 %v3063_v52  ;;  %v3396_v30 = vld [vmem:[%s8015_s0 + $0x6138] sm:$0xff]  ;;  %v3267_v60 = vld [vmem:[%s8015_s0 + $0x5d30] sm:$0xff] }
 0x672   : > { %7148 = vmatpush2.msra.mxu1 %v3191_v42  ;;  %7078 = vmatprep.subr.mxu0 %v3060_v49  ;;  %v3395_v39 = vld [vmem:[%s8015_s0 + $0x6130] sm:$0xff]  ;;  %v3264_v2 = vld [vmem:[%s8015_s0 + $0x5d18] sm:$0xff] }
 0x673   : > { %7149 = vmatprep.subr.mxu1 %v3188_v20  ;;  %7079 = vmatpush2.msra.mxu0 %v3059_v22  ;;  %v3392_v14 = vld [vmem:[%s8015_s0 + $0x6118] sm:$0xff]  ;;  %v3263_v27 = vld [vmem:[%s8015_s0 + $0x5d10] sm:$0xff] }
 0x674   : > { %7150 = vmatpush2.msra.mxu1 %v3187_v61  ;;  %7080 = vmatprep.subr.mxu0 %v3056_v33  ;;  %v3391_v26 = vld [vmem:[%s8015_s0 + $0x6110] sm:$0xff]  ;;  %v3260_v63 = vld [vmem:[%s8015_s0 + $0x5cf8] sm:$0xff] }
 0x675   : > { %7151 = vmatprep.subr.mxu1 %v3184_v47  ;;  %7081 = vmatpush2.msra.mxu0 %v3055_v3  ;;  %v3388_v52 = vld [vmem:[%s8015_s0 + $0x60f8] sm:$0xff]  ;;  %v3259_v42 = vld [vmem:[%s8015_s0 + $0x5cf0] sm:$0xff] }
 0x676   : > { %7152 = vmatpush2.msra.mxu1 %v3183_v18  ;;  %7082 = vmatprep.subr.mxu0 %v3052_v29  ;;  %v3387_v49 = vld [vmem:[%s8015_s0 + $0x60f0] sm:$0xff]  ;;  %v3256_v20 = vld [vmem:[%s8015_s0 + $0x5cd8] sm:$0xff] }
 0x677   : > { %7153 = vmatprep.subr.mxu1 %v3180_v56  ;;  %7083 = vmatpush2.msra.mxu0 %v3051_v0  ;;  %v3384_v22 = vld [vmem:[%s8015_s0 + $0x60d8] sm:$0xff]  ;;  %v3255_v61 = vld [vmem:[%s8015_s0 + $0x5cd0] sm:$0xff] }
 0x678   : > { %7154 = vmatpush2.msra.mxu1 %v3179_v35  ;;  %7084 = vmatprep.subr.mxu0 %v3048_v34  ;;  %v3383_v33 = vld [vmem:[%s8015_s0 + $0x60d0] sm:$0xff]  ;;  %v3252_v47 = vld [vmem:[%s8015_s0 + $0x5cb8] sm:$0xff] }
 0x679   : > { %7155 = vmatprep.subr.mxu1 %v3176_v58  ;;  %7085 = vmatpush2.msra.mxu0 %v3047_v12  ;;  %v3380_v3 = vld [vmem:[%s8015_s0 + $0x60b8] sm:$0xff]  ;;  %v3251_v18 = vld [vmem:[%s8015_s0 + $0x5cb0] sm:$0xff] }
 0x67a   : > { %7156 = vmatpush2.msra.mxu1 %v3175_v41  ;;  %7086 = vmatprep.subr.mxu0 %v3044_v31  ;;  %v3379_v29 = vld [vmem:[%s8015_s0 + $0x60b0] sm:$0xff]  ;;  %v3248_v56 = vld [vmem:[%s8015_s0 + $0x5c98] sm:$0xff] }
 0x67b   : > { %7157 = vmatprep.subr.mxu1 %v3172_v25  ;;  %7087 = vmatpush2.msra.mxu0 %v3043_v40  ;;  %v3376_v0 = vld [vmem:[%s8015_s0 + $0x6098] sm:$0xff]  ;;  %v3247_v35 = vld [vmem:[%s8015_s0 + $0x5c90] sm:$0xff] }
 0x67c   : > { %7158 = vmatpush2.msra.mxu1 %v3171_v59  ;;  %7088 = vmatprep.subr.mxu0 %v3040_v21  ;;  %v3375_v34 = vld [vmem:[%s8015_s0 + $0x6090] sm:$0xff]  ;;  %v3244_v58 = vld [vmem:[%s8015_s0 + $0x5c78] sm:$0xff] }
 0x67d   : > { %7159 = vmatprep.subr.mxu1 %v3168_v28  ;;  %7089 = vmatpush2.msra.mxu0 %v3039_v23  ;;  %v3372_v12 = vld [vmem:[%s8015_s0 + $0x6078] sm:$0xff]  ;;  %v3243_v41 = vld [vmem:[%s8015_s0 + $0x5c70] sm:$0xff] }
 0x67e   : > { %7090 = vmatprep.mubr.f32.mxu0 %v9670_v38  ;;  %7160 = vmatpush2.msra.mxu1 %v3167_v15  ;;  %v3287_v38 = vld [vmem:[%s8015_s0 + $0x5dd0] sm:$0xff]  ;;  %v3240_v25 = vld [vmem:[%s8015_s0 + $0x5c58] sm:$0xff] }
 0x67f   : > { %7091 = vmatmul.mubr.f32.vlgmr.msra.gmra.mxu0 %v9656_v11  ;;  %7161 = vmatprep.mubr.f32.mxu1 %v9811_v50  ;;  %v3284_v11 = vld [vmem:[%s8015_s0 + $0x5db8] sm:$0xff]  ;;  %v3283_v50 = vld [vmem:[%s8015_s0 + $0x5db0] sm:$0xff] }
 0x680   : > { %7168 = vmatprep.subr.mxu0 %v3292_v44  ;;  %7239 = vmatprep.subr.mxu1 %v3420_v36  ;;  %v3371_v31 = vld [vmem:[%s8015_s0 + $0x6070] sm:$0xff]  ;;  %v3368_v40 = vld [vmem:[%s8015_s0 + $0x6058] sm:$0xff] }
 0x681   : > { %7162 = vmatmul.mubr.f32.vlgmr.msra.gmra.mxu1 %v9796_v13  ;;  %7169 = vmatpush1.msra.mxu0 %v3291_v53  ;;  %v3408_v13 = vld [vmem:[%s8015_s0 + $0x6198] sm:$0xff]  ;;  %v3239_v59 = vld [vmem:[%s8015_s0 + $0x5c50] sm:$0xff] }
 0x682   : > { %7240 = vmatpush1.msra.mxu1 %v3419_v9  ;;  %7170 = vmatprep.subr.mxu0 %v3288_v17  ;;  %v3367_v21 = vld [vmem:[%s8015_s0 + $0x6050] sm:$0xff]  ;;  %v3236_v28 = vld [vmem:[%s8015_s0 + $0x5c38] sm:$0xff] }
 0x683   : > { %7241 = vmatprep.subr.mxu1 %v3416_v54  ;;  %7171 = vmatpush1.msra.mxu0 %v3287_v38  ;;  %v3364_v23 = vld [vmem:[%s8015_s0 + $0x6038] sm:$0xff]  ;;  %v3235_v15 = vld [vmem:[%s8015_s0 + $0x5c30] sm:$0xff] }
 0x684   : > { %7242 = vmatpush1.msra.mxu1 %v3415_v8  ;;  %7172 = vmatprep.subr.mxu0 %v3284_v11  ;;  %v3363_v44 = vld [vmem:[%s8015_s0 + $0x6030] sm:$0xff]  ;;  %v3232_v36 = vld [vmem:[%s8015_s0 + $0x5c18] sm:$0xff] }
 0x685   : > { %7243 = vmatprep.subr.mxu1 %v3412_v6  ;;  %7173 = vmatpush1.msra.mxu0 %v3283_v50  ;;  %v3360_v53 = vld [vmem:[%s8015_s0 + $0x6018] sm:$0xff]  ;;  %v3231_v9 = vld [vmem:[%s8015_s0 + $0x5c10] sm:$0xff] }
 0x686   : > { %7244 = vmatpush1.msra.mxu1 %v3411_v57  ;;  %7174 = vmatprep.subr.mxu0 %v3280_v45  ;;  %v3359_v17 = vld [vmem:[%s8015_s0 + $0x6010] sm:$0xff]  ;;  %v3356_v54 = vld [vmem:[%s8015_s0 + $0x5ff8] sm:$0xff] }
 0x687   : > { %7245 = vmatprep.subr.mxu1 %v3408_v13  ;;  %7175 = vmatpush1.msra.mxu0 %v3279_v48  ;;  %v3484_v38 = vld [vmem:[%s8015_s0 + $0x63f8] sm:$0xff]  ;;  %v3355_v8 = vld [vmem:[%s8015_s0 + $0x5ff0] sm:$0xff] }
 0x688   : > { %7246 = vmatpush1.msra.mxu1 %v3407_v5  ;;  %7176 = vmatprep.subr.mxu0 %v3276_v32  ;;  %v3483_v11 = vld [vmem:[%s8015_s0 + $0x63f0] sm:$0xff]  ;;  %v3352_v6 = vld [vmem:[%s8015_s0 + $0x5fd8] sm:$0xff] }
 0x689   : > { %7247 = vmatprep.subr.mxu1 %v3404_v62  ;;  %7177 = vmatpush1.msra.mxu0 %v3275_v43  ;;  %v3480_v50 = vld [vmem:[%s8015_s0 + $0x63d8] sm:$0xff]  ;;  %v3351_v57 = vld [vmem:[%s8015_s0 + $0x5fd0] sm:$0xff] }
 0x68a   : > { %7248 = vmatpush1.msra.mxu1 %v3403_v19  ;;  %7178 = vmatprep.subr.mxu0 %v3272_v10  ;;  %v3479_v45 = vld [vmem:[%s8015_s0 + $0x63d0] sm:$0xff]  ;;  %v3348_v13 = vld [vmem:[%s8015_s0 + $0x5fb8] sm:$0xff] }
 0x68b   : > { %7249 = vmatprep.subr.mxu1 %v3400_v24  ;;  %7179 = vmatpush1.msra.mxu0 %v3271_v1  ;;  %v3476_v48 = vld [vmem:[%s8015_s0 + $0x63b8] sm:$0xff]  ;;  %v3347_v5 = vld [vmem:[%s8015_s0 + $0x5fb0] sm:$0xff] }
 0x68c   : > { %7250 = vmatpush1.msra.mxu1 %v3399_v7  ;;  %7180 = vmatprep.subr.mxu0 %v3268_v46  ;;  %v3475_v32 = vld [vmem:[%s8015_s0 + $0x63b0] sm:$0xff]  ;;  %v3344_v62 = vld [vmem:[%s8015_s0 + $0x5f98] sm:$0xff] }
 0x68d   : > { %7251 = vmatprep.subr.mxu1 %v3396_v30  ;;  %7181 = vmatpush1.msra.mxu0 %v3267_v60  ;;  %v3472_v43 = vld [vmem:[%s8015_s0 + $0x6398] sm:$0xff]  ;;  %v3343_v19 = vld [vmem:[%s8015_s0 + $0x5f90] sm:$0xff] }
 0x68e   : > { %7252 = vmatpush1.msra.mxu1 %v3395_v39  ;;  %7182 = vmatprep.subr.mxu0 %v3264_v2  ;;  %v3471_v10 = vld [vmem:[%s8015_s0 + $0x6390] sm:$0xff]  ;;  %v3340_v24 = vld [vmem:[%s8015_s0 + $0x5f78] sm:$0xff] }
 0x68f   : > { %7253 = vmatprep.subr.mxu1 %v3392_v14  ;;  %7183 = vmatpush1.msra.mxu0 %v3263_v27  ;;  %v3468_v1 = vld [vmem:[%s8015_s0 + $0x6378] sm:$0xff]  ;;  %v3339_v7 = vld [vmem:[%s8015_s0 + $0x5f70] sm:$0xff] }
 0x690   : > { %7254 = vmatpush1.msra.mxu1 %v3391_v26  ;;  %7184 = vmatprep.subr.mxu0 %v3260_v63  ;;  %v3467_v46 = vld [vmem:[%s8015_s0 + $0x6370] sm:$0xff]  ;;  %v3336_v30 = vld [vmem:[%s8015_s0 + $0x5f58] sm:$0xff] }
 0x691   : > { %7255 = vmatprep.subr.mxu1 %v3388_v52  ;;  %7185 = vmatpush1.msra.mxu0 %v3259_v42  ;;  %v3464_v60 = vld [vmem:[%s8015_s0 + $0x6358] sm:$0xff]  ;;  %v3335_v39 = vld [vmem:[%s8015_s0 + $0x5f50] sm:$0xff] }
 0x692   : > { %7256 = vmatpush1.msra.mxu1 %v3387_v49  ;;  %7186 = vmatprep.subr.mxu0 %v3256_v20  ;;  %v3463_v2 = vld [vmem:[%s8015_s0 + $0x6350] sm:$0xff]  ;;  %v3332_v14 = vld [vmem:[%s8015_s0 + $0x5f38] sm:$0xff] }
 0x693   : > { %7257 = vmatprep.subr.mxu1 %v3384_v22  ;;  %7187 = vmatpush1.msra.mxu0 %v3255_v61  ;;  %v3460_v27 = vld [vmem:[%s8015_s0 + $0x6338] sm:$0xff]  ;;  %v3331_v26 = vld [vmem:[%s8015_s0 + $0x5f30] sm:$0xff] }
 0x694   : > { %7258 = vmatpush1.msra.mxu1 %v3383_v33  ;;  %7188 = vmatprep.subr.mxu0 %v3252_v47  ;;  %v3459_v63 = vld [vmem:[%s8015_s0 + $0x6330] sm:$0xff]  ;;  %v3328_v52 = vld [vmem:[%s8015_s0 + $0x5f18] sm:$0xff] }
 0x695   : > { %7259 = vmatprep.subr.mxu1 %v3380_v3  ;;  %7189 = vmatpush1.msra.mxu0 %v3251_v18  ;;  %v3456_v42 = vld [vmem:[%s8015_s0 + $0x6318] sm:$0xff]  ;;  %v3327_v49 = vld [vmem:[%s8015_s0 + $0x5f10] sm:$0xff] }
 0x696   : > { %7260 = vmatpush1.msra.mxu1 %v3379_v29  ;;  %7190 = vmatprep.subr.mxu0 %v3248_v56  ;;  %v3455_v20 = vld [vmem:[%s8015_s0 + $0x6310] sm:$0xff]  ;;  %v3324_v22 = vld [vmem:[%s8015_s0 + $0x5ef8] sm:$0xff] }
 0x697   : > { %7261 = vmatprep.subr.mxu1 %v3376_v0  ;;  %7191 = vmatpush1.msra.mxu0 %v3247_v35  ;;  %v3452_v61 = vld [vmem:[%s8015_s0 + $0x62f8] sm:$0xff]  ;;  %v3323_v33 = vld [vmem:[%s8015_s0 + $0x5ef0] sm:$0xff] }
 0x698   : > { %7262 = vmatpush1.msra.mxu1 %v3375_v34  ;;  %7192 = vmatprep.subr.mxu0 %v3244_v58  ;;  %v3451_v47 = vld [vmem:[%s8015_s0 + $0x62f0] sm:$0xff]  ;;  %v3320_v3 = vld [vmem:[%s8015_s0 + $0x5ed8] sm:$0xff] }
 0x699   : > { %7263 = vmatprep.subr.mxu1 %v3372_v12  ;;  %7193 = vmatpush1.msra.mxu0 %v3243_v41  ;;  %v3448_v18 = vld [vmem:[%s8015_s0 + $0x62d8] sm:$0xff]  ;;  %v3319_v29 = vld [vmem:[%s8015_s0 + $0x5ed0] sm:$0xff] }
 0x69a   : > { %7264 = vmatpush1.msra.mxu1 %v3371_v31  ;;  %7194 = vmatprep.subr.mxu0 %v3240_v25  ;;  %v3447_v56 = vld [vmem:[%s8015_s0 + $0x62d0] sm:$0xff]  ;;  %v3316_v0 = vld [vmem:[%s8015_s0 + $0x5eb8] sm:$0xff] }
 0x69b   : > { %7265 = vmatprep.subr.mxu1 %v3368_v40  ;;  %7195 = vmatpush1.msra.mxu0 %v3239_v59  ;;  %v3444_v35 = vld [vmem:[%s8015_s0 + $0x62b8] sm:$0xff]  ;;  %v3315_v34 = vld [vmem:[%s8015_s0 + $0x5eb0] sm:$0xff] }
 0x69c   : > { %7266 = vmatpush1.msra.mxu1 %v3367_v21  ;;  %7196 = vmatprep.subr.mxu0 %v3236_v28  ;;  %v3443_v58 = vld [vmem:[%s8015_s0 + $0x62b0] sm:$0xff]  ;;  %v3312_v12 = vld [vmem:[%s8015_s0 + $0x5e98] sm:$0xff] }
 0x69d   : > { %7267 = vmatprep.subr.mxu1 %v3364_v23  ;;  %7197 = vmatpush1.msra.mxu0 %v3235_v15  ;;  %v3440_v41 = vld [vmem:[%s8015_s0 + $0x6298] sm:$0xff]  ;;  %v3311_v31 = vld [vmem:[%s8015_s0 + $0x5e90] sm:$0xff] }
 0x69e   : > { %7268 = vmatpush1.msra.mxu1 %v3363_v44  ;;  %7198 = vmatprep.subr.mxu0 %v3232_v36  ;;  %v3439_v25 = vld [vmem:[%s8015_s0 + $0x6290] sm:$0xff]  ;;  %v3308_v40 = vld [vmem:[%s8015_s0 + $0x5e78] sm:$0xff] }
 0x69f   : > { %7269 = vmatprep.subr.mxu1 %v3360_v53  ;;  %7199 = vmatpush1.msra.mxu0 %v3231_v9  ;;  %v3436_v59 = vld [vmem:[%s8015_s0 + $0x6278] sm:$0xff]  ;;  %v3307_v21 = vld [vmem:[%s8015_s0 + $0x5e70] sm:$0xff] }
 0x6a0   : > { %7270 = vmatpush1.msra.mxu1 %v3359_v17  ;;  %7200 = vmatprep.subr.mxu0 %v3356_v54  ;;  %v3435_v28 = vld [vmem:[%s8015_s0 + $0x6270] sm:$0xff]  ;;  %v3304_v23 = vld [vmem:[%s8015_s0 + $0x5e58] sm:$0xff] }
 0x6a1   : > { %7271 = vmatprep.subr.mxu1 %v3484_v38  ;;  %7201 = vmatpush2.msra.mxu0 %v3355_v8  ;;  %v3432_v15 = vld [vmem:[%s8015_s0 + $0x6258] sm:$0xff]  ;;  %v3303_v44 = vld [vmem:[%s8015_s0 + $0x5e50] sm:$0xff] }
 0x6a2   : > { %7272 = vmatpush2.msra.mxu1 %v3483_v11  ;;  %7202 = vmatprep.subr.mxu0 %v3352_v6  ;;  %v3431_v36 = vld [vmem:[%s8015_s0 + $0x6250] sm:$0xff]  ;;  %v3300_v53 = vld [vmem:[%s8015_s0 + $0x5e38] sm:$0xff] }
 0x6a3   : > { %7273 = vmatprep.subr.mxu1 %v3480_v50  ;;  %7203 = vmatpush2.msra.mxu0 %v3351_v57  ;;  %v3428_v9 = vld [vmem:[%s8015_s0 + $0x6238] sm:$0xff]  ;;  %v3299_v17 = vld [vmem:[%s8015_s0 + $0x5e30] sm:$0xff]  ;;  %v7670_v50 = vld.sshfl [vmem:[%s8152_s6 + $0x60] sm:$0x33 pattern:$0x76325410]  ;;  %v5601_v57 = vpop.f32.mrf.mxu1 }
 0x6a4   : > { %7274 = vmatpush2.msra.mxu1 %v3479_v45  ;;  %7204 = vmatprep.subr.mxu0 %v3348_v13  ;;  %v3427_v54 = vld [vmem:[%s8015_s0 + $0x6230] sm:$0xff]  ;;  %v3296_v38 = vld [vmem:[%s8015_s0 + $0x5e18] sm:$0xff]  ;;  %v5672_v45 = vpop.f32.mrf.mxu0 }
 0x6a5   : > { %7275 = vmatprep.subr.mxu1 %v3476_v48  ;;  %7205 = vmatpush2.msra.mxu0 %v3347_v5  ;;  %v3424_v8 = vld [vmem:[%s8015_s0 + $0x6218] sm:$0xff]  ;;  %v3295_v11 = vld [vmem:[%s8015_s0 + $0x5e10] sm:$0xff]  ;;  %v5603_v13 = vpop.f32.mrf.mxu1 }
 0x6a6   : > { %7276 = vmatpush2.msra.mxu1 %v3475_v32  ;;  %7206 = vmatprep.subr.mxu0 %v3344_v62  ;;  %v3423_v6 = vld [vmem:[%s8015_s0 + $0x6210] sm:$0xff]  ;;  %v5674_v5 = vpop.f32.mrf.mxu0  ;;  %v5673_v32 = vadd.f32 %v5672_v45, %v5601_v57 }
 0x6a7   : > { %7277 = vmatprep.subr.mxu1 %v3472_v43  ;;  %7207 = vmatpush2.msra.mxu0 %v3343_v19  ;;  %v5743_v48 = vpop.f32.mrf.mxu1  ;;  %v5675_v43 = vadd.f32 %v5674_v5, %v5603_v13 }
 0x6a8   : > { %7278 = vmatpush2.msra.mxu1 %v3471_v10  ;;  %7208 = vmatprep.subr.mxu0 %v3340_v24  ;;  %v5814_v62 = vpop.f32.mrf.mxu0  ;;  %v5744_v10 = vadd.f32 %v5743_v48, %v5673_v32 }
 0x6a9   : > { %7279 = vmatprep.subr.mxu1 %v3468_v1  ;;  %7209 = vmatpush2.msra.mxu0 %v3339_v7  ;;  %v5745_v19 = vpop.f32.mrf.mxu1 }
 0x6aa   : > { %7280 = vmatpush2.msra.mxu1 %v3467_v46  ;;  %7210 = vmatprep.subr.mxu0 %v3336_v30  ;;  %v5816_v1 = vpop.f32.mrf.mxu0  ;;  %v5815_v7 = vadd.f32 %v5814_v62, %v5744_v10 }
 0x6ab   : > { %7281 = vmatprep.subr.mxu1 %v3464_v60  ;;  %7211 = vmatpush2.msra.mxu0 %v3335_v39  ;;  %v5885_v24 = vpop.f32.mrf.mxu1 }
 0x6ac   : > { %7282 = vmatpush2.msra.mxu1 %v3463_v2  ;;  %7212 = vmatprep.subr.mxu0 %v3332_v14  ;;  %v5956_v46 = vpop.f32.mrf.mxu0 }
 0x6ad   : > { %7283 = vmatprep.subr.mxu1 %v3460_v27  ;;  %7213 = vmatpush2.msra.mxu0 %v3331_v26  ;;  %v5887_v30 = vpop.f32.mrf.mxu1 }
 0x6ae   : > { %7284 = vmatpush2.msra.mxu1 %v3459_v63  ;;  %7214 = vmatprep.subr.mxu0 %v3328_v52  ;;  %v5958_v39 = vpop.f32.mrf.mxu0 }
 0x6af   : > { %7285 = vmatprep.subr.mxu1 %v3456_v42  ;;  %7215 = vmatpush2.msra.mxu0 %v3327_v49  ;;  %v6027_v60 = vpop.f32.mrf.mxu1 }
 0x6b0   : > { %7286 = vmatpush2.msra.mxu1 %v3455_v20  ;;  %7216 = vmatprep.subr.mxu0 %v3324_v22  ;;  %v6098_v27 = vpop.f32.mrf.mxu0 }
 0x6b1   : > { %7287 = vmatprep.subr.mxu1 %v3452_v61  ;;  %7217 = vmatpush2.msra.mxu0 %v3323_v33  ;;  %v6029_v63 = vpop.f32.mrf.mxu1 }
 0x6b2   : > { %7288 = vmatpush2.msra.mxu1 %v3451_v47  ;;  %7218 = vmatprep.subr.mxu0 %v3320_v3  ;;  %v6100_v49 = vpop.f32.mrf.mxu0 }
 0x6b3   : > { %7289 = vmatprep.subr.mxu1 %v3448_v18  ;;  %7219 = vmatpush2.msra.mxu0 %v3319_v29  ;;  %v6169_v42 = vpop.f32.mrf.mxu1 }
 0x6b4   : > { %7290 = vmatpush2.msra.mxu1 %v3447_v56  ;;  %7220 = vmatprep.subr.mxu0 %v3316_v0  ;;  %v6240_v61 = vpop.f32.mrf.mxu0 }
 0x6b5   : > { %7291 = vmatprep.subr.mxu1 %v3444_v35  ;;  %7221 = vmatpush2.msra.mxu0 %v3315_v34  ;;  %v6171_v47 = vpop.f32.mrf.mxu1 }
 0x6b6   : > { %7292 = vmatpush2.msra.mxu1 %v3443_v58  ;;  %7222 = vmatprep.subr.mxu0 %v3312_v12  ;;  %v6242_v29 = vpop.f32.mrf.mxu0 }
 0x6b7   : > { %7293 = vmatprep.subr.mxu1 %v3440_v41  ;;  %7223 = vmatpush2.msra.mxu0 %v3311_v31  ;;  %v6311_v18 = vpop.f32.mrf.mxu1 }
 0x6b8   : > { %7294 = vmatpush2.msra.mxu1 %v3439_v25  ;;  %7224 = vmatprep.subr.mxu0 %v3308_v40  ;;  %v6382_v35 = vpop.f32.mrf.mxu0 }
 0x6b9   : > { %7295 = vmatprep.subr.mxu1 %v3436_v59  ;;  %7225 = vmatpush2.msra.mxu0 %v3307_v21  ;;  %v6313_v58 = vpop.f32.mrf.mxu1 }
 0x6ba   : > { %7296 = vmatpush2.msra.mxu1 %v3435_v28  ;;  %7226 = vmatprep.subr.mxu0 %v3304_v23  ;;  %v6384_v31 = vpop.f32.mrf.mxu0 }
 0x6bb   : > { %7297 = vmatprep.subr.mxu1 %v3432_v15  ;;  %7227 = vmatpush2.msra.mxu0 %v3303_v44  ;;  %v6453_v41 = vpop.f32.mrf.mxu1 }
 0x6bc   : > { %7298 = vmatpush2.msra.mxu1 %v3431_v36  ;;  %7228 = vmatprep.subr.mxu0 %v3300_v53  ;;  %v6524_v59 = vpop.f32.mrf.mxu0 }
 0x6bd   : > { %7299 = vmatprep.subr.mxu1 %v3428_v9  ;;  %7229 = vmatpush2.msra.mxu0 %v3299_v17  ;;  %v6455_v28 = vpop.f32.mrf.mxu1 }
 0x6be   : > { %7300 = vmatpush2.msra.mxu1 %v3427_v54  ;;  %7230 = vmatprep.subr.mxu0 %v3296_v38  ;;  %v6526_v44 = vpop.f32.mrf.mxu0 }
 0x6bf   : > { %7301 = vmatprep.subr.mxu1 %v3424_v8  ;;  %7231 = vmatpush2.msra.mxu0 %v3295_v11  ;;  %v6595_v15 = vpop.f32.mrf.mxu1 }
 0x6c0   : > { %7232 = vmatprep.mubr.f32.mxu0 %v9817_v55  ;;  %7302 = vmatpush2.msra.mxu1 %v3423_v6  ;;  %v5746_v55 = vadd.f32 %v5745_v19, %v5675_v43  ;;  %v6666_v9 = vpop.f32.mrf.mxu0 }
 0x6c1   : > { %7303 = vmatprep.mubr.f32.mxu1 %v9950_v4  ;;  %7233 = vmatmul.mubr.f32.vlgmr.msra.gmra.mxu0 %v9803_v37  ;;  %v5886_v37 = vadd.f32 %v5885_v24, %v5815_v7  ;;  %v6597_v54 = vpop.f32.mrf.mxu1 }
 0x6c2   : > { %7304 = vmatmul.mubr.f32.vlgmr.msra.gmra.mxu1 %v7670_v50  ;;  %v5817_v4 = vadd.f32 %v5816_v1, %v5746_v55  ;;  %v6668_v11 = vpop.f32.mrf.mxu0 }
 0x6c3   : > { %v5957_v14 = vadd.f32 %v5956_v46, %v5886_v37  ;;  %v6737_v8 = vpop.f32.mrf.mxu1 }
 0x6c4   : > { %v5888_v2 = vadd.f32 %v5887_v30, %v5817_v4  ;;  %v6808_v57 = vpop.f32.mrf.mxu0 }
 0x6c5   : > { %v6028_v52 = vadd.f32 %v6027_v60, %v5957_v14  ;;  %v6739_v13 = vpop.f32.mrf.mxu1 }
 0x6c6   : > { %v5959_v26 = vadd.f32 %v5958_v39, %v5888_v2  ;;  %v6810_v32 = vpop.f32.mrf.mxu0 }
 0x6c7   : > { %v6099_v22 = vadd.f32 %v6098_v27, %v6028_v52  ;;  %v6879_v5 = vpop.f32.mrf.mxu1 }
 0x6c8   : > { %v6030_v20 = vadd.f32 %v6029_v63, %v5959_v26 }
 0x6c9   : > { %v6170_v3 = vadd.f32 %v6169_v42, %v6099_v22  ;;  %v6881_v24 = vpop.f32.mrf.mxu1 }
 0x6ca   : > { %v6101_v33 = vadd.f32 %v6100_v49, %v6030_v20 }
 0x6cb   : > { %v6241_v0 = vadd.f32 %v6240_v61, %v6170_v3 }
 0x6cc   : > { %v6172_v56 = vadd.f32 %v6171_v47, %v6101_v33 }
 0x6cd   : > { %v6312_v12 = vadd.f32 %v6311_v18, %v6241_v0 }
 0x6ce   : > { %v6243_v34 = vadd.f32 %v6242_v29, %v6172_v56 }
 0x6cf   : > { %v6383_v40 = vadd.f32 %v6382_v35, %v6312_v12 }
 0x6d0   : > { %v6314_v25 = vadd.f32 %v6313_v58, %v6243_v34 }
 0x6d1   : > { %v6454_v23 = vadd.f32 %v6453_v41, %v6383_v40 }
 0x6d2   : > { %v6385_v21 = vadd.f32 %v6384_v31, %v6314_v25 }
 0x6d3   : > { %v6525_v53 = vadd.f32 %v6524_v59, %v6454_v23 }
 0x6d4   : > { %v6456_v36 = vadd.f32 %v6455_v28, %v6385_v21 }
 0x6d5   : > { %v6596_v38 = vadd.f32 %v6595_v15, %v6525_v53 }
 0x6d6   : > { %v6527_v17 = vadd.f32 %v6526_v44, %v6456_v36 }
 0x6d7   : > { %v6667_v50 = vadd.f32 %v6666_v9, %v6596_v38 }
 0x6d8   : > { %v6598_v6 = vadd.f32 %v6597_v54, %v6527_v17 }
 0x6d9   : > { %v6738_v48 = vadd.f32 %v6737_v8, %v6667_v50 }
 0x6da   : > { %v6669_v45 = vadd.f32 %v6668_v11, %v6598_v6 }
 0x6db   : > { %v6809_v43 = vadd.f32 %v6808_v57, %v6738_v48 }
 0x6dc   : > { %v6740_v62 = vadd.f32 %v6739_v13, %v6669_v45 }
 0x6dd   : > { %v6880_v1 = vadd.f32 %v6879_v5, %v6809_v43 }
 0x6de   : > { %v6811_v10 = vadd.f32 %v6810_v32, %v6740_v62 }
 0x6e0   : > { %v6882_v46 = vadd.f32 %v6881_v24, %v6811_v10 }
 0x6fd   : > { %v6950_v19 = vpop.f32.mrf.mxu0 }
 0x6fe   : > { %v6951_v4 = vadd.f32 %v6950_v19, %v6880_v1 }
 0x6ff   : > { %v7021_v55 = vpop.f32.mrf.mxu1  ;;  %v6952_v7 = vpop.f32.mrf.mxu0 }
 0x700   : > { %v6953_v37 = vadd.f32 %v6952_v7, %v6882_v46  ;;  %v7022_v39 = vadd.f32 %v7021_v55, %v6951_v4 }
 0x701   : > { %v7023_v60 = vpop.f32.mrf.mxu1 }
 0x702   : > { %v7024_v27 = vadd.f32 %v7023_v60, %v6953_v37 }
 0x73f   : > { %v7092_v30 = vpop.f32.mrf.mxu0 }
 0x740   : > { %v7093_v26 = vadd.f32 %v7092_v30, %v7022_v39 }
 0x741   : > { %v7163_v2 = vpop.f32.mrf.mxu1  ;;  %v7094_v14 = vpop.f32.mrf.mxu0 }
 0x742   : > { %v7095_v63 = vadd.f32 %v7094_v14, %v7024_v27  ;;  %v7164_v42 = vadd.f32 %v7163_v2, %v7093_v26 }
 0x743   : > { %v7165_v52 = vpop.f32.mrf.mxu1 }
 0x744   : > { %v7166_v22 = vadd.f32 %v7165_v52, %v7095_v63 }
 0x781   : > { %v7234_v49 = vpop.f32.mrf.mxu0 }
 0x782   : > { %v7305_v20 = vpop.f32.mrf.mxu1  ;;  %v7235_v61 = vadd.f32 %v7234_v49, %v7164_v42  ;;  %7313 = sbr.rel (%p7545_p6) target bundleno = 1935 (0x78f), region = 44 }
 0x783   : > { %v7236_v33 = vpop.f32.mrf.mxu0 }
 0x784   : > { %v7306_v47 = vadd.f32 %v7305_v20, %v7235_v61  ;;  %v7237_v3 = vadd.f32 %v7236_v33, %v7166_v22  ;;  %v7307_v18 = vpop.f32.mrf.mxu1 }
 0x786   : > { %v7308_v29 = vadd.f32 %v7307_v18, %v7237_v3 }
 0x787   : > { %v7318_v56 = vcombine.low %v10347_v16, %v10351_v51  ;;  %v11632_v35 = vld [vmem:[#allocation10_spill] sm:$0xff] }
 0x788   : > { %v7319_v0 = vcombine.low %v7306_v47, %v7308_v29 }
 0x789   : > { %v7326_v34 = vrot.slane %v7318_v56, %v11632_v35 }
 0x78a   : > { %v7333_v58 = vrot.slane %v7319_v0, %v11632_v35 }
 0x78c   : > { %v7334_v12 = vcombine.low %v7326_v34, %v7333_v58 }
 0x78e   : > { %7336 = vst [vmem:[%s8033_s25] sm:$0xff] %v7334_v12 }
 0x78f PF: > { %s11633_s0 = sld [smem:[#allocation8_spill]] }
 0x795   : > { %p7546_p0 = scmp.le.s32.totalorder %s11633_s0, 0 }
 0x797   : > { %7340 = sbr.rel (%p7546_p0) target bundleno = 1957 (0x7a5), region = 48 }
 0x79c   : > { %v7346_v41 = vcombine.low %v10347_v16, %v10351_v51  ;;  %v7347_v31 = vcombine.low %v7306_v47, %v7308_v29  ;;  %v11634_v25 = vld [vmem:[#allocation10_spill] sm:$0xff]  ;;  %v7341_v21 = vld [vmem:[%s8033_s25] sm:$0xff] }
 0x79e   : > { %v7354_v40 = vrot.slane %v7346_v41, %v11634_v25  ;;  %v7361_v59 = vrot.slane %v7347_v31, %v11634_v25 }
 0x7a0   : > { %v7362_v28 = vcombine.low %v7354_v40, %v7361_v59 }
 0x7a2   : > { %v7364_v23 = vadd.f32 %v7362_v28, %v7341_v21 }
 0x7a4   : > { %7365 = vst [vmem:[%s8033_s25] sm:$0xff] %v7364_v23 }
 0x7a5 PF: > { %s11635_s18 = sld [smem:[#allocation8_spill]] }
 0x7ab   : > { %p7547_p1 = scmp.ne.s32.totalorder %s11635_s18, 7 }
 0x7ad   : > { %7369 = sbr.rel (%p7547_p1) target bundleno = 1987 (0x7c3), region = 52 }
 0x7b2   : > { %v7371_v15 = vld [vmem:[%s224_s27] sm:$0xf]  ;;  %v11636_v44 = vld [vmem:[#allocation9_spill] sm:$0xff]  ;;  %v11637_v6 = vld [vmem:[#allocation10_spill] sm:$0xff] }
 0x7b3   : > { %v7375_v36 = vsub.s32 0, %v11636_v44  ;;  %v7379_v16 = vsub.s32 1, %v11636_v44  ;;  %v7383_v51 = vsub.s32 2, %v11636_v44  ;;  %v7387_v53 = vsub.s32 3, %v11636_v44  ;;  %v7370_v45 = vld [vmem:[%s8033_s25] sm:$0xff] }
 0x7b5   : > { %v7376_v9 = vrot.slane %v7371_v15, %v7375_v36  ;;  %v7380_v17 = vrot.slane %v7371_v15, %v7379_v16  ;;  %v7384_v54 = vrot.slane %v7371_v15, %v7383_v51  ;;  %v7388_v38 = vrot.slane %v7371_v15, %v7387_v53 }
 0x7b7   : > { %v7389_v8 = vcombine.low %v7376_v9, %v7380_v17  ;;  %v7390_v11 = vcombine.low %v7384_v54, %v7388_v38 }
 0x7b9   : > { %v7397_v50 = vrot.slane %v7389_v8, %v11637_v6  ;;  %v7404_v57 = vrot.slane %v7390_v11, %v11637_v6 }
 0x7bb   : > { %v7405_v13 = vcombine.low %v7397_v50, %v7404_v57 }
 0x7bd   : > { %v7407_v48 = vadd.f32 %v7405_v13, %v7370_v45 }
 0x7bf   : > { %vm7408_vm0 = vcmp.gt.f32.partialorder %v7407_v48, 0.0  ;;  %v7409_v5 = vmul.f32 0.01, %v7407_v48 }
 0x7c1   : > { %v7410_v32 = vsel %vm7408_vm0, %v7407_v48, %v7409_v5 }
 0x7c2   : > { %7411 = vst [vmem:[%s8033_s25] sm:$0xff] %v7410_v32 }
 0x7c3 PF: > { %s19_s22 = sadd.s32 1, %s7821_s22   ;;  %s11638_s12 = smov %s7785_s13 }
 0x7c4   : > { %p16_p2 = scmp.ge.s32.totalorder %s19_s22, 18   ;;  %s11639_s13 = smov %s7789_s14 }
 0x7c5   : > { %s11640_s14 = smov %s7989_s10  ;;  %s11641_s15 = smov %s7797_s16 }
 0x7c6   : > { %s11642_s16 = smov %s7801_s17  ;;  %s11643_s17 = smov %s7994_s29 }
 0x7c7   : > { %s11644_s18 = smov %s7813_s20  ;;  %s11645_s19 = smov %s7817_s21 }
 0x7c8   : > { %s11646_s20 = smov %s11649_s23  ;;  %s11647_s21 = smov %s11653_s30 }
 0x7c9   :  { %18 = sbr.rel (!%p16_p2) target bundleno = 12 (0xc), region = 100 }
 0x7ce   :  { %7434 = vsyncpa [#allocation3], 1 }
 0x7cf   :  { %7436 = vsyncpa [#allocation3 + $0x1], 1 }
 0x7d0   :  { %7437 = vsyncpa [#allocation5], 1 }
 0x7d1   :  { %7439 = vsyncpa [#allocation5 + $0x1], 1 }

</bundles_post_ra>
